<compile_context>
chip_gen: v7x
topology: tpu7x:2x2x1
jax: 0.10.0
libtpu: 0.0.40
codegen_flags: <defaults>
</compile_context>

<pallas_src>
import math
import numpy as np

import jax
import jax.numpy as jnp
from jax.experimental import pallas as pl
from jax.experimental.pallas import tpu as pltpu

# ---------------- configuration (small demo shapes) ----------------
N_EVENTS = 16            # module-level constant in the reference code
SAMPLERATE = 22050

LATENT_DIM = 16
CHANNELS = 8
N_ATOMS = 16
N_PIECEWISE = 2
N_FRAMES = 16                        # ConvUpsample end size == number of STFT frames
RESONANCE_SIZE = N_FRAMES * 256      # 4096 -> windowed_audio(512, 256) yields N_FRAMES windows
COARSE_COEFFS = 257
WINDOW_SIZE = 512
STEP_SIZE = 256
BASE_RESONANCE = 0.02
RES_FACTOR = (1.0 - BASE_RESONANCE) * 0.99

BATCH = 2
IMPULSE_LEN = 256

# 2 lane tiles over the resonance axis -> 2 "parallel" grid steps (keeps both
# TensorCores busy on v7x; negligible extra overhead on single-TC v5e/v6e).
LANE_TILE = RESONANCE_SIZE // 2
assert RESONANCE_SIZE % LANE_TILE == 0 and LANE_TILE % 128 == 0


# ============================ Pallas kernels ============================

def resonance_decay_pallas(latent2, wd, bd, cum_mat, sel_w, sel_b,
                           atoms_bf16, interp_bf16):
    """Fused K1+K2.

    decay   = exp(cumsum(log(base + sigmoid(latent @ Wd + bd) * factor)))
    res[p]  = softmax(latent @ Wp + bp) @ atoms
    out[p]  = res[p] * interp(decay)          for every piecewise p.

    The small (BE,16) chains are recomputed per grid step (cheap, K=16); the
    lane-wide work is two (BE,16)@(16,TR) bf16 matmuls with f32 accumulation.
    """
    BE, L = latent2.shape
    F = wd.shape[1]
    P, _, A = sel_w.shape
    R = atoms_bf16.shape[1]
    TR = LANE_TILE

    def kernel(lat_ref, wd_ref, bd_ref, cum_ref, w_ref, b_ref,
               atoms_ref, m_ref, out_ref):
        lat = lat_ref[...]

        # --- decay envelope (BE, F), f32 throughout ---
        d = jnp.dot(lat, wd_ref[...], preferred_element_type=jnp.float32)
        d = d + bd_ref[...]
        d = 1.0 / (1.0 + jnp.exp(-d))                       # sigmoid
        d = BASE_RESONANCE + d * RES_FACTOR
        d = jnp.log(1e-12 + d)
        d = jnp.dot(d, cum_ref[...], preferred_element_type=jnp.float32)  # cumsum
        d = jnp.exp(d)

        # --- atom selection softmax for this piecewise ---
        logits = jnp.dot(lat, w_ref[...], preferred_element_type=jnp.float32)
        logits = logits + b_ref[...]
        logits = logits - jnp.max(logits, axis=-1, keepdims=True)
        e = jnp.exp(logits)
        sel = e * pl.reciprocal(jnp.sum(e, axis=-1, keepdims=True), approx=True)

        # --- lane tile: interp(decay) and selection @ atoms on the MXU ---
        decay_t = jnp.dot(d.astype(jnp.bfloat16), m_ref[...],
                          preferred_element_type=jnp.float32)
        res_t = jnp.dot(sel.astype(jnp.bfloat16), atoms_ref[...],
                        preferred_element_type=jnp.float32)
        out_ref[...] = res_t * decay_t

    return pl.pallas_call(
        kernel,
        out_shape=jax.ShapeDtypeStruct((P, BE, R), jnp.float32),
        grid=(P, R // TR),
        in_specs=[
            pl.BlockSpec((BE, L), lambda p, j: (0, 0)),
            pl.BlockSpec((L, F), lambda p, j: (0, 0)),
            pl.BlockSpec((1, F), lambda p, j: (0, 0)),
            pl.BlockSpec((F, F), lambda p, j: (0, 0)),
            pl.BlockSpec((None, L, A), lambda p, j: (p, 0, 0)),   # squeezed P dim
            pl.BlockSpec((None, 1, A), lambda p, j: (p, 0, 0)),   # squeezed P dim
            pl.BlockSpec((A, TR), lambda p, j: (0, j)),
            pl.BlockSpec((F, TR), lambda p, j: (0, j)),
        ],
        out_specs=pl.BlockSpec((None, BE, TR), lambda p, j: (p, 0, j)),
        compiler_params=pltpu.CompilerParams(
            dimension_semantics=("parallel", "parallel")),
    )(latent2, wd, bd, cum_mat, sel_w, sel_b, atoms_bf16, interp_bf16)


def mixture_window_pallas(mx_pbf, interp_bf16, convs, hann):
    """Fused K3+K4.

    Interpolates the mixture logits to the resonance length, softmaxes over the
    piecewise axis, reduces the per-piecewise convolutions, then frames the
    result (512/256 hop), applies the Hann window and unit-L2-normalizes each
    frame -- all without touching HBM in between.  Output: (BE, n_frames, 512).
    """
    P, BE, F = mx_pbf.shape
    R = convs.shape[-1]
    W = WINDOW_SIZE
    S = STEP_SIZE
    NF = R // S
    TB = BE // 2 if (BE % 16 == 0) else BE     # 2 parallel row blocks when possible

    def kernel(mx_ref, m_ref, convs_ref, w_ref, out_ref):
        m = m_ref[...]
        interps = [jnp.dot(mx_ref[p].astype(jnp.bfloat16), m,
                           preferred_element_type=jnp.float32) for p in range(P)]
        mmax = interps[0]
        for p in range(1, P):
            mmax = jnp.maximum(mmax, interps[p])
        exps = [jnp.exp(v - mmax) for v in interps]
        denom = exps[0]
        for p in range(1, P):
            denom = denom + exps[p]
        inv = pl.reciprocal(denom, approx=True)            # EUP, not VALU divide
        fc = (exps[0] * inv) * convs_ref[0]
        for p in range(1, P):
            fc = fc + (exps[p] * inv) * convs_ref[p]

        # pad by one hop, then window + unit-norm every frame
        fcp = jnp.concatenate(
            [fc, jnp.zeros((fc.shape[0], S), jnp.float32)], axis=-1)
        hw = w_ref[...]
        for f in range(NF):
            xf = fcp[:, f * S:f * S + W] * hw
            sumsq = jnp.sum(xf * xf, axis=-1, keepdims=True)
            out_ref[:, f, :] = xf * jax.lax.rsqrt(sumsq + 1e-12)

    return pl.pallas_call(
        kernel,
        out_shape=jax.ShapeDtypeStruct((BE, NF, W), jnp.float32),
        grid=(BE // TB,),
        in_specs=[
            pl.BlockSpec((P, TB, F), lambda i: (0, i, 0)),
            pl.BlockSpec((F, R), lambda i: (0, 0)),
            pl.BlockSpec((P, TB, R), lambda i: (0, i, 0)),
            pl.BlockSpec((1, W), lambda i: (0, 0)),
        ],
        out_specs=pl.BlockSpec((TB, NF, W), lambda i: (i, 0, 0)),
        compiler_params=pltpu.CompilerParams(dimension_semantics=("parallel",)),
    )(mx_pbf, interp_bf16, convs, hann)


def final_blend_pallas(latent2, wf, bf, filtered, imp2):
    """K5: 2-way softmax(latent @ Wf + bf) blend of filtered signal and impulse.

    The 2-way softmax is computed as a single sigmoid of the logit difference
    (EUP op on a (BE,1) column) -- no cross-lane reductions for 2 elements.
    """
    BE, L = latent2.shape
    R = filtered.shape[-1]
    TR = LANE_TILE

    def kernel(lat_ref, wf_ref, bf_ref, fc_ref, imp_ref, out_ref):
        logits = jnp.dot(lat_ref[...], wf_ref[...], preferred_element_type=jnp.float32)
        logits = logits + bf_ref[...]
        # softmax over 2 logits: w0 = sigmoid(l0 - l1), w1 = 1 - w0
        w0 = 1.0 / (1.0 + jnp.exp(logits[:, 1:2] - logits[:, 0:1]))   # (BE, 1)
        out_ref[...] = fc_ref[...] * w0 + imp_ref[...] * (1.0 - w0)

    return pl.pallas_call(
        kernel,
        out_shape=jax.ShapeDtypeStruct((BE, R), jnp.float32),
        grid=(R // TR,),
        in_specs=[
            pl.BlockSpec((BE, L), lambda j: (0, 0)),
            pl.BlockSpec((L, 2), lambda j: (0, 0)),
            pl.BlockSpec((1, 2), lambda j: (0, 0)),
            pl.BlockSpec((BE, TR), lambda j: (0, j)),
            pl.BlockSpec((BE, TR), lambda j: (0, j)),
        ],
        out_specs=pl.BlockSpec((BE, TR), lambda j: (0, j)),
        compiler_params=pltpu.CompilerParams(dimension_semantics=("parallel",)),
    )(latent2, wf, bf, filtered, imp2)


# ============================ JAX glue pieces ============================

def fft_convolve(a, b):
    # TODO(synk): FFT has no Pallas TPU primitive; done with jnp.fft (XLA FFT).
    n = a.shape[-1]
    a_p = jnp.pad(a, [(0, 0)] * (a.ndim - 1) + [(0, n)])
    b_p = jnp.pad(b, [(0, 0)] * (b.ndim - 1) + [(0, n)])
    spec = jnp.fft.rfft(a_p, axis=-1) * jnp.fft.rfft(b_p, axis=-1)
    return jnp.fft.irfft(spec, axis=-1)[..., :n]


def conv1d_same(x, w, b):
    # x: (N, C_in, L), w: (C_out, C_in, K)
    y = jax.lax.conv_general_dilated(
        x, w, window_strides=(1,), padding="SAME",
        dimension_numbers=("NCH", "OIH", "NCH"))
    return y + b[None, :, None]


def conv_upsample_apply(p, latent_flat, channels, start_size):
    # TODO(synk): ConvUpsample definition is external to the given module; this
    # is a standard Linear -> [nearest x2 upsample, Conv1d(k=3), BatchNorm(eval,
    # identity stats), LeakyReLU(0.2)]* -> Conv1d(k=3) stack (glue, plain JAX).
    x = latent_flat @ p["begin_w"] + p["begin_b"]
    x = x.reshape(-1, channels, start_size)
    for (w, b) in p["layers"]:
        x = jnp.repeat(x, 2, axis=-1)                 # nearest upsample x2
        x = conv1d_same(x, w, b)
        x = x / jnp.sqrt(1.0 + 1e-5)                  # BatchNorm1d eval, default stats
        x = jnp.where(x >= 0, x, 0.2 * x)             # LeakyReLU(0.2)
    x = conv1d_same(x, p["final_w"], p["final_b"])
    return x


# ============================ forward ============================

def forward(params, latent, impulse):
    B, E, L = latent.shape
    BE = B * E
    R = RESONANCE_SIZE
    F = N_FRAMES
    latent2 = latent.reshape(BE, L)

    imp = jnp.pad(impulse, ((0, 0), (0, 0), (0, R - impulse.shape[-1])))
    imp2 = imp.reshape(BE, R)

    # K1+K2 fused: decay envelope * softmax-selected atoms per piecewise.
    res = resonance_decay_pallas(latent2, params["decay_w"], params["decay_b"],
                                 params["cumsum_mat"], params["sel_w"],
                                 params["sel_b"], params["atoms_bf16"],
                                 params["interp_bf16"])                     # (P, BE, R)

    # fft_convolve with the (padded) impulse.
    convs = fft_convolve(res, imp2[None, :, :])                             # (P, BE, R)

    # Filter coefficients (ConvUpsample glue) -> sigmoid; interpolate(257)->identity.
    tf = conv_upsample_apply(params["to_filter"], latent2, CHANNELS, 8)     # (BE, 257, F)
    filt = 1.0 / (1.0 + jnp.exp(-jnp.transpose(tf, (0, 2, 1))))             # (BE, F, 257)

    # Mixture logits (ConvUpsample glue).
    mx = conv_upsample_apply(params["to_mixture"], latent2, CHANNELS, 8)    # (BE, P, F)
    mx_pbf = jnp.transpose(mx, (1, 0, 2))                                   # (P, BE, F)

    # K3+K4 fused: mixture + framing + Hann + unit L2 norm -> windowed frames.
    hann = (0.5 - 0.5 * jnp.cos(
        2.0 * jnp.pi * jnp.arange(WINDOW_SIZE, dtype=jnp.float32) / WINDOW_SIZE)
            ).reshape(1, WINDOW_SIZE)
    windowed = mixture_window_pallas(mx_pbf, params["interp_bf16"],
                                     convs, hann)                           # (BE, F, 512)

    # Spectral filtering (JAX FFT; no Pallas equivalent).
    spec = jnp.fft.rfft(windowed, axis=-1) * filt                           # (BE, F, 257)
    filtered = jnp.fft.irfft(spec, axis=-1)                                 # (BE, F, 512)

    # overlap_add (apply_window=False) and trim to resonance_size.
    first = jnp.pad(filtered[..., :STEP_SIZE].reshape(BE, F * STEP_SIZE),
                    ((0, 0), (0, STEP_SIZE)))
    second = jnp.pad(filtered[..., STEP_SIZE:].reshape(BE, F * STEP_SIZE),
                     ((0, 0), (STEP_SIZE, 0)))
    ola = (first + second)[:, :R]                                           # (BE, R)

    # K5: final blend between the filtered resonance and the raw impulse.
    final = final_blend_pallas(latent2, params["final_mix_w"],
                               params["final_mix_b"], ola, imp2)            # (BE, R)
    return final.reshape(B, E, R)


# ============================ parameter setup ============================

def init_linear(key, in_dim, out_dim, scale=0.02):
    kw, kb = jax.random.split(key)
    w = jax.random.normal(kw, (in_dim, out_dim), jnp.float32) * scale
    b = jax.random.normal(kb, (out_dim,), jnp.float32) * scale
    return w, b


def init_conv_upsample(key, latent_dim, channels, start_size, end_size, out_channels):
    n_layers = int(math.log2(end_size) - math.log2(start_size))
    keys = jax.random.split(key, n_layers + 2)
    p = {}
    p["begin_w"], p["begin_b"] = init_linear(keys[0], latent_dim, channels * start_size)
    p["layers"] = []
    for i in range(n_layers):
        w = jax.random.normal(keys[1 + i], (channels, channels, 3), jnp.float32) * 0.05
        b = jnp.zeros((channels,), jnp.float32)
        p["layers"].append((w, b))
    p["final_w"] = jax.random.normal(keys[-1], (out_channels, channels, 3),
                                     jnp.float32) * 0.05
    p["final_b"] = jnp.zeros((out_channels,), jnp.float32)
    return p


def build_atoms(n_atoms, resonance_size):
    low_hz, high_hz = 40, 4000
    low_samples = SAMPLERATE // low_hz
    high_samples = SAMPLERATE // high_hz
    spacings = np.linspace(low_samples, high_samples, n_atoms)
    oversample = 8
    atoms = np.zeros((n_atoms, resonance_size * oversample), np.float32)
    for i, spacing in enumerate(spacings):
        sp = int(spacing * oversample)
        atoms[i, ::sp + 1] = 1.0
    atoms = atoms.reshape(n_atoms, resonance_size, oversample).mean(-1)
    return jnp.asarray(atoms, jnp.float32)


def build_interp_matrix(in_size, out_size):
    # F.interpolate(mode='linear', align_corners=False) as a (in, out) matrix.
    m = np.zeros((in_size, out_size), np.float32)
    scale = in_size / out_size
    for i in range(out_size):
        src = max((i + 0.5) * scale - 0.5, 0.0)
        i0 = int(np.floor(src))
        lam = src - i0
        i1 = i0 + 1 if i0 + 1 < in_size else i0
        m[i0, i] += 1.0 - lam
        m[i1, i] += lam
    return jnp.asarray(m)


def init_params(key):
    keys = jax.random.split(key, N_PIECEWISE + 4)
    params = {}
    sel_w, sel_b = [], []
    for i in range(N_PIECEWISE):
        w, b = init_linear(keys[i], LATENT_DIM, N_ATOMS)
        sel_w.append(w)
        sel_b.append(b[None, :])
    params["sel_w"] = jnp.stack(sel_w)                      # (P, L, A)
    params["sel_b"] = jnp.stack(sel_b)                      # (P, 1, A)
    dw, db = init_linear(keys[N_PIECEWISE], LATENT_DIM, N_FRAMES)
    params["decay_w"], params["decay_b"] = dw, db[None, :]
    fw, fb = init_linear(keys[N_PIECEWISE + 1], LATENT_DIM, 2)
    params["final_mix_w"], params["final_mix_b"] = fw, fb[None, :]
    params["to_filter"] = init_conv_upsample(keys[N_PIECEWISE + 2], LATENT_DIM,
                                             CHANNELS, 8, N_FRAMES, COARSE_COEFFS)
    params["to_mixture"] = init_conv_upsample(keys[N_PIECEWISE + 3], LATENT_DIM,
                                              CHANNELS, 8, N_FRAMES, N_PIECEWISE)
    # Large stationary MXU operands stored in bf16 (f32 accumulation in-kernel).
    params["atoms_bf16"] = build_atoms(N_ATOMS, RESONANCE_SIZE).astype(jnp.bfloat16)
    params["interp_bf16"] = build_interp_matrix(
        N_FRAMES, RESONANCE_SIZE).astype(jnp.bfloat16)
    params["cumsum_mat"] = jnp.triu(jnp.ones((N_FRAMES, N_FRAMES), jnp.float32))
    return params


if __name__ == "__main__":
    key = jax.random.PRNGKey(0)
    k_params, k_latent, k_imp = jax.random.split(key, 3)
    params = init_params(k_params)

    latent = jax.random.normal(k_latent, (BATCH, N_EVENTS, LATENT_DIM), jnp.float32)
    impulse = jax.random.normal(k_imp, (BATCH, N_EVENTS, IMPULSE_LEN), jnp.float32)

    out = jax.jit(forward)(params, latent, impulse)
    out = jax.block_until_ready(out)
    assert out.shape == (BATCH, N_EVENTS, RESONANCE_SIZE)
    assert bool(jnp.all(jnp.isfinite(out)))
    print("KERNEL_OK")
</pallas_src>

<mosaic_0001>
module attributes {stable_mosaic.version = 11 : i64} {
  func.func @kernel(%arg0: i32, %arg1: i32, %arg2: memref<32x16xf32, #tpu.memory_space<vmem>>, %arg3: memref<16x16xf32, #tpu.memory_space<vmem>>, %arg4: memref<1x16xf32, #tpu.memory_space<vmem>>, %arg5: memref<16x16xf32, #tpu.memory_space<vmem>>, %arg6: memref<1x16x16xf32, #tpu.memory_space<vmem>>, %arg7: memref<1x1x16xf32, #tpu.memory_space<vmem>>, %arg8: memref<16x2048xbf16, #tpu.memory_space<vmem>>, %arg9: memref<16x2048xbf16, #tpu.memory_space<vmem>>, %arg10: memref<1x32x2048xf32, #tpu.memory_space<vmem>>) attributes {dimension_semantics = [#tpu.dimension_semantics<parallel>, #tpu.dimension_semantics<parallel>], iteration_bounds = array<i64: 2, 2>, scalar_prefetch = 0 : i64, scratch_operands = 0 : i64, tpu.core_type = #tpu.core_type<tc>, window_params = [{pipeline_mode = #tpu.pipeline_mode<synchronous>, transform_indices = @transform_0, window_bounds = array<i64: 32, 16>}, {pipeline_mode = #tpu.pipeline_mode<synchronous>, transform_indices = @transform_1, window_bounds = array<i64: 16, 16>}, {pipeline_mode = #tpu.pipeline_mode<synchronous>, transform_indices = @transform_2, window_bounds = array<i64: 1, 16>}, {pipeline_mode = #tpu.pipeline_mode<synchronous>, transform_indices = @transform_3, window_bounds = array<i64: 16, 16>}, {transform_indices = @transform_4, window_bounds = array<i64: 1, 16, 16>}, {transform_indices = @transform_5, window_bounds = array<i64: 1, 1, 16>}, {transform_indices = @transform_6, window_bounds = array<i64: 16, 2048>}, {transform_indices = @transform_7, window_bounds = array<i64: 16, 2048>}, {transform_indices = @transform_8, window_bounds = array<i64: 1, 32, 2048>}]} {
    %c0 = arith.constant 0 : index
    %c0_0 = arith.constant 0 : index
    %0 = vector.load %arg2[%c0, %c0_0] : memref<32x16xf32, #tpu.memory_space<vmem>>, vector<32x16xf32>
    %c0_1 = arith.constant 0 : index
    %c0_2 = arith.constant 0 : index
    %1 = vector.load %arg3[%c0_1, %c0_2] : memref<16x16xf32, #tpu.memory_space<vmem>>, vector<16x16xf32>
    %cst = arith.constant dense<0.000000e+00> : vector<32x16xf32>
    %2 = tpu.matmul %0, %1, %cst {dimension_numbers = #tpu.dot_dimension_numbers<[1], [0], [0], [1], [0, 0, 1, 1], [], []>} : vector<32x16xf32>, vector<16x16xf32>, vector<32x16xf32> -> vector<32x16xf32>
    %c0_3 = arith.constant 0 : index
    %c0_4 = arith.constant 0 : index
    %3 = vector.load %arg4[%c0_3, %c0_4] : memref<1x16xf32, #tpu.memory_space<vmem>>, vector<1x16xf32>
    %4 = vector.broadcast %3 : vector<1x16xf32> to vector<32x16xf32>
    %5 = arith.addf %2, %4 : vector<32x16xf32>
    %cst_5 = arith.constant 0.000000e+00 : f32
    %6 = vector.broadcast %cst_5 : f32 to vector<32x16xf32>
    %7 = arith.subf %6, %5 : vector<32x16xf32>
    %8 = math.exp %7 : vector<32x16xf32>
    %cst_6 = arith.constant 1.000000e+00 : f32
    %9 = vector.broadcast %cst_6 : f32 to vector<32x16xf32>
    %10 = arith.addf %9, %8 : vector<32x16xf32>
    %cst_7 = arith.constant 1.000000e+00 : f32
    %11 = vector.broadcast %cst_7 : f32 to vector<32x16xf32>
    %12 = arith.divf %11, %10 : vector<32x16xf32>
    %cst_8 = arith.constant 9.702000e-01 : f32
    %13 = vector.broadcast %cst_8 : f32 to vector<32x16xf32>
    %14 = arith.mulf %12, %13 : vector<32x16xf32>
    %cst_9 = arith.constant 2.000000e-02 : f32
    %15 = vector.broadcast %cst_9 : f32 to vector<32x16xf32>
    %16 = arith.addf %15, %14 : vector<32x16xf32>
    %cst_10 = arith.constant 9.99999996E-13 : f32
    %17 = vector.broadcast %cst_10 : f32 to vector<32x16xf32>
    %18 = arith.addf %17, %16 : vector<32x16xf32>
    %19 = math.log %18 : vector<32x16xf32>
    %c0_11 = arith.constant 0 : index
    %c0_12 = arith.constant 0 : index
    %20 = vector.load %arg5[%c0_11, %c0_12] : memref<16x16xf32, #tpu.memory_space<vmem>>, vector<16x16xf32>
    %cst_13 = arith.constant dense<0.000000e+00> : vector<32x16xf32>
    %21 = tpu.matmul %19, %20, %cst_13 {dimension_numbers = #tpu.dot_dimension_numbers<[1], [0], [0], [1], [0, 0, 1, 1], [], []>} : vector<32x16xf32>, vector<16x16xf32>, vector<32x16xf32> -> vector<32x16xf32>
    %22 = math.exp %21 : vector<32x16xf32>
    %c0_14 = arith.constant 0 : index
    %c0_15 = arith.constant 0 : index
    %c0_16 = arith.constant 0 : index
    %23 = vector.load %arg6[%c0_14, %c0_15, %c0_16] : memref<1x16x16xf32, #tpu.memory_space<vmem>>, vector<1x16x16xf32>
    %24 = vector.shape_cast %23 : vector<1x16x16xf32> to vector<16x16xf32>
    %cst_17 = arith.constant dense<0.000000e+00> : vector<32x16xf32>
    %25 = tpu.matmul %0, %24, %cst_17 {dimension_numbers = #tpu.dot_dimension_numbers<[1], [0], [0], [1], [0, 0, 1, 1], [], []>} : vector<32x16xf32>, vector<16x16xf32>, vector<32x16xf32> -> vector<32x16xf32>
    %c0_18 = arith.constant 0 : index
    %c0_19 = arith.constant 0 : index
    %c0_20 = arith.constant 0 : index
    %26 = vector.load %arg7[%c0_18, %c0_19, %c0_20] : memref<1x1x16xf32, #tpu.memory_space<vmem>>, vector<1x1x16xf32>
    %27 = vector.shape_cast %26 : vector<1x1x16xf32> to vector<1x16xf32>
    %28 = vector.broadcast %27 : vector<1x16xf32> to vector<32x16xf32>
    %29 = arith.addf %25, %28 : vector<32x16xf32>
    %cst_21 = arith.constant dense<0xFF800000> : vector<32xf32>
    %30 = vector.multi_reduction <maximumf>, %29, %cst_21 [1] : vector<32x16xf32> to vector<32xf32>
    %31 = vector.shape_cast %30 : vector<32xf32> to vector<32x1xf32>
    %32 = vector.broadcast %31 : vector<32x1xf32> to vector<32x16xf32>
    %33 = arith.subf %29, %32 : vector<32x16xf32>
    %34 = math.exp %33 : vector<32x16xf32>
    %cst_22 = arith.constant dense<0.000000e+00> : vector<32xf32>
    %35 = vector.multi_reduction <add>, %34, %cst_22 [1] : vector<32x16xf32> to vector<32xf32>
    %36 = vector.shape_cast %35 : vector<32xf32> to vector<32x1xf32>
    %37 = tpu.reciprocal %36 {approx = true} : vector<32x1xf32> -> vector<32x1xf32>
    %38 = vector.broadcast %37 : vector<32x1xf32> to vector<32x16xf32>
    %39 = arith.mulf %34, %38 : vector<32x16xf32>
    %40 = arith.truncf %22 : vector<32x16xf32> to vector<32x16xbf16>
    %c0_23 = arith.constant 0 : index
    %c0_24 = arith.constant 0 : index
    %41 = vector.load %arg9[%c0_23, %c0_24] : memref<16x2048xbf16, #tpu.memory_space<vmem>>, vector<16x2048xbf16>
    %cst_25 = arith.constant dense<0.000000e+00> : vector<32x2048xf32>
    %42 = tpu.matmul %40, %41, %cst_25 {dimension_numbers = #tpu.dot_dimension_numbers<[1], [0], [0], [1], [0, 0, 1, 1], [], []>} : vector<32x16xbf16>, vector<16x2048xbf16>, vector<32x2048xf32> -> vector<32x2048xf32>
    %43 = arith.truncf %39 : vector<32x16xf32> to vector<32x16xbf16>
    %c0_26 = arith.constant 0 : index
    %c0_27 = arith.constant 0 : index
    %44 = vector.load %arg8[%c0_26, %c0_27] : memref<16x2048xbf16, #tpu.memory_space<vmem>>, vector<16x2048xbf16>
    %cst_28 = arith.constant dense<0.000000e+00> : vector<32x2048xf32>
    %45 = tpu.matmul %43, %44, %cst_28 {dimension_numbers = #tpu.dot_dimension_numbers<[1], [0], [0], [1], [0, 0, 1, 1], [], []>} : vector<32x16xbf16>, vector<16x2048xbf16>, vector<32x2048xf32> -> vector<32x2048xf32>
    %46 = arith.mulf %45, %42 : vector<32x2048xf32>
    %c0_29 = arith.constant 0 : index
    %c0_30 = arith.constant 0 : index
    %c0_31 = arith.constant 0 : index
    %47 = vector.load %arg10[%c0_29, %c0_30, %c0_31] : memref<1x32x2048xf32, #tpu.memory_space<vmem>>, vector<1x32x2048xf32>
    %48 = vector.shape_cast %47 : vector<1x32x2048xf32> to vector<32x2048xf32>
    %49 = vector.shape_cast %46 : vector<32x2048xf32> to vector<1x32x2048xf32>
    tpu.vector_store %arg10[%c0_29, %c0_30, %c0_31], %49 {strides = array<i32>} : memref<1x32x2048xf32, #tpu.memory_space<vmem>>, vector<1x32x2048xf32>,
    return
  }
  func.func @transform_0(%arg0: i32, %arg1: i32) -> (i32, i32) {
    %c0_i32 = arith.constant 0 : i32
    %c0_i32_0 = arith.constant 0 : i32
    %c0_i32_1 = arith.constant 0 : i32
    return %c0_i32, %c0_i32_0 : i32, i32
  }
  func.func @transform_1(%arg0: i32, %arg1: i32) -> (i32, i32) {
    %c0_i32 = arith.constant 0 : i32
    %c0_i32_0 = arith.constant 0 : i32
    %c0_i32_1 = arith.constant 0 : i32
    return %c0_i32, %c0_i32_0 : i32, i32
  }
  func.func @transform_2(%arg0: i32, %arg1: i32) -> (i32, i32) {
    %c0_i32 = arith.constant 0 : i32
    %c0_i32_0 = arith.constant 0 : i32
    %c0_i32_1 = arith.constant 0 : i32
    return %c0_i32, %c0_i32_0 : i32, i32
  }
  func.func @transform_3(%arg0: i32, %arg1: i32) -> (i32, i32) {
    %c0_i32 = arith.constant 0 : i32
    %c0_i32_0 = arith.constant 0 : i32
    %c0_i32_1 = arith.constant 0 : i32
    return %c0_i32, %c0_i32_0 : i32, i32
  }
  func.func @transform_4(%arg0: i32, %arg1: i32) -> (i32, i32, i32) {
    %c0_i32 = arith.constant 0 : i32
    %c0_i32_0 = arith.constant 0 : i32
    %c0_i32_1 = arith.constant 0 : i32
    return %arg0, %c0_i32, %c0_i32_0 : i32, i32, i32
  }
  func.func @transform_5(%arg0: i32, %arg1: i32) -> (i32, i32, i32) {
    %c0_i32 = arith.constant 0 : i32
    %c0_i32_0 = arith.constant 0 : i32
    %c0_i32_1 = arith.constant 0 : i32
    return %arg0, %c0_i32, %c0_i32_0 : i32, i32, i32
  }
  func.func @transform_6(%arg0: i32, %arg1: i32) -> (i32, i32) {
    %c0_i32 = arith.constant 0 : i32
    %c0_i32_0 = arith.constant 0 : i32
    return %c0_i32, %arg1 : i32, i32
  }
  func.func @transform_7(%arg0: i32, %arg1: i32) -> (i32, i32) {
    %c0_i32 = arith.constant 0 : i32
    %c0_i32_0 = arith.constant 0 : i32
    return %c0_i32, %arg1 : i32, i32
  }
  func.func @transform_8(%arg0: i32, %arg1: i32) -> (i32, i32, i32) {
    %c0_i32 = arith.constant 0 : i32
    %c0_i32_0 = arith.constant 0 : i32
    return %arg0, %c0_i32, %arg1 : i32, i32, i32
  }
}

module attributes {stable_mosaic.version = 11 : i64} {
  func.func @kernel(%arg0: i32, %arg1: memref<2x16x16xf32, #tpu.memory_space<vmem>>, %arg2: memref<16x4096xbf16, #tpu.memory_space<vmem>>, %arg3: memref<2x16x4096xf32, #tpu.memory_space<vmem>>, %arg4: memref<1x512xf32, #tpu.memory_space<vmem>>, %arg5: memref<16x16x512xf32, #tpu.memory_space<vmem>>) attributes {dimension_semantics = [#tpu.dimension_semantics<parallel>], iteration_bounds = array<i64: 2>, scalar_prefetch = 0 : i64, scratch_operands = 0 : i64, tpu.core_type = #tpu.core_type<tc>, window_params = [{transform_indices = @transform_0, window_bounds = array<i64: 2, 16, 16>}, {pipeline_mode = #tpu.pipeline_mode<synchronous>, transform_indices = @transform_1, window_bounds = array<i64: 16, 4096>}, {transform_indices = @transform_2, window_bounds = array<i64: 2, 16, 4096>}, {pipeline_mode = #tpu.pipeline_mode<synchronous>, transform_indices = @transform_3, window_bounds = array<i64: 1, 512>}, {transform_indices = @transform_4, window_bounds = array<i64: 16, 16, 512>}]} {
    %c0 = arith.constant 0 : index
    %c0_0 = arith.constant 0 : index
    %0 = vector.load %arg2[%c0, %c0_0] : memref<16x4096xbf16, #tpu.memory_space<vmem>>, vector<16x4096xbf16>
    %c0_1 = arith.constant 0 : index
    %c0_2 = arith.constant 0 : index
    %c0_3 = arith.constant 0 : index
    %1 = vector.load %arg1[%c0_1, %c0_2, %c0_3] : memref<2x16x16xf32, #tpu.memory_space<vmem>>, vector<1x16x16xf32>
    %2 = vector.shape_cast %1 : vector<1x16x16xf32> to vector<16x16xf32>
    %3 = arith.truncf %2 : vector<16x16xf32> to vector<16x16xbf16>
    %cst = arith.constant dense<0.000000e+00> : vector<16x4096xf32>
    %4 = tpu.matmul %3, %0, %cst {dimension_numbers = #tpu.dot_dimension_numbers<[1], [0], [0], [1], [0, 0, 1, 1], [], []>} : vector<16x16xbf16>, vector<16x4096xbf16>, vector<16x4096xf32> -> vector<16x4096xf32>
    %c1 = arith.constant 1 : index
    %c0_4 = arith.constant 0 : index
    %c0_5 = arith.constant 0 : index
    %5 = vector.load %arg1[%c1, %c0_4, %c0_5] : memref<2x16x16xf32, #tpu.memory_space<vmem>>, vector<1x16x16xf32>
    %6 = vector.shape_cast %5 : vector<1x16x16xf32> to vector<16x16xf32>
    %7 = arith.truncf %6 : vector<16x16xf32> to vector<16x16xbf16>
    %cst_6 = arith.constant dense<0.000000e+00> : vector<16x4096xf32>
    %8 = tpu.matmul %7, %0, %cst_6 {dimension_numbers = #tpu.dot_dimension_numbers<[1], [0], [0], [1], [0, 0, 1, 1], [], []>} : vector<16x16xbf16>, vector<16x4096xbf16>, vector<16x4096xf32> -> vector<16x4096xf32>
    %9 = arith.maximumf %4, %8 : vector<16x4096xf32>
    %10 = arith.subf %4, %9 : vector<16x4096xf32>
    %11 = math.exp %10 : vector<16x4096xf32>
    %12 = arith.subf %8, %9 : vector<16x4096xf32>
    %13 = math.exp %12 : vector<16x4096xf32>
    %14 = arith.addf %11, %13 : vector<16x4096xf32>
    %15 = tpu.reciprocal %14 {approx = true} : vector<16x4096xf32> -> vector<16x4096xf32>
    %16 = arith.mulf %11, %15 : vector<16x4096xf32>
    %c0_7 = arith.constant 0 : index
    %c0_8 = arith.constant 0 : index
    %c0_9 = arith.constant 0 : index
    %17 = vector.load %arg3[%c0_7, %c0_8, %c0_9] : memref<2x16x4096xf32, #tpu.memory_space<vmem>>, vector<1x16x4096xf32>
    %18 = vector.shape_cast %17 : vector<1x16x4096xf32> to vector<16x4096xf32>
    %19 = arith.mulf %16, %18 : vector<16x4096xf32>
    %20 = arith.mulf %13, %15 : vector<16x4096xf32>
    %c1_10 = arith.constant 1 : index
    %c0_11 = arith.constant 0 : index
    %c0_12 = arith.constant 0 : index
    %21 = vector.load %arg3[%c1_10, %c0_11, %c0_12] : memref<2x16x4096xf32, #tpu.memory_space<vmem>>, vector<1x16x4096xf32>
    %22 = vector.shape_cast %21 : vector<1x16x4096xf32> to vector<16x4096xf32>
    %23 = arith.mulf %20, %22 : vector<16x4096xf32>
    %24 = arith.addf %19, %23 : vector<16x4096xf32>
    %cst_13 = arith.constant 0.000000e+00 : f32
    %25 = vector.broadcast %cst_13 : f32 to vector<16x256xf32>
    %26 = tpu.concatenate %24, %25 in 1 : vector<16x4096xf32>, vector<16x256xf32> -> vector<16x4352xf32>
    %c0_14 = arith.constant 0 : index
    %c0_15 = arith.constant 0 : index
    %27 = vector.load %arg4[%c0_14, %c0_15] : memref<1x512xf32, #tpu.memory_space<vmem>>, vector<1x512xf32>
    %28 = vector.extract_strided_slice %26 {offsets = [0, 0], sizes = [16, 512], strides = [1, 1]} : vector<16x4352xf32> to vector<16x512xf32>
    %29 = vector.broadcast %27 : vector<1x512xf32> to vector<16x512xf32>
    %30 = arith.mulf %28, %29 : vector<16x512xf32>
    %31 = arith.mulf %30, %30 : vector<16x512xf32>
    %cst_16 = arith.constant dense<0.000000e+00> : vector<16xf32>
    %32 = vector.multi_reduction <add>, %31, %cst_16 [1] : vector<16x512xf32> to vector<16xf32>
    %33 = vector.shape_cast %32 : vector<16xf32> to vector<16x1xf32>
    %cst_17 = arith.constant 9.99999996E-13 : f32
    %34 = vector.broadcast %cst_17 : f32 to vector<16x1xf32>
    %35 = arith.addf %33, %34 : vector<16x1xf32>
    %36 = math.rsqrt %35 : vector<16x1xf32>
    %37 = vector.broadcast %36 : vector<16x1xf32> to vector<16x512xf32>
    %38 = arith.mulf %30, %37 : vector<16x512xf32>
    %c0_18 = arith.constant 0 : index
    %c0_19 = arith.constant 0 : index
    %c0_20 = arith.constant 0 : index
    %39 = vector.load %arg5[%c0_18, %c0_19, %c0_20] : memref<16x16x512xf32, #tpu.memory_space<vmem>>, vector<16x1x512xf32>
    %40 = vector.shape_cast %39 : vector<16x1x512xf32> to vector<16x512xf32>
    %41 = vector.shape_cast %38 : vector<16x512xf32> to vector<16x1x512xf32>
    tpu.vector_store %arg5[%c0_18, %c0_19, %c0_20], %41 {strides = array<i32>} : memref<16x16x512xf32, #tpu.memory_space<vmem>>, vector<16x1x512xf32>,
    %42 = vector.extract_strided_slice %26 {offsets = [0, 256], sizes = [16, 512], strides = [1, 1]} : vector<16x4352xf32> to vector<16x512xf32>
    %43 = vector.broadcast %27 : vector<1x512xf32> to vector<16x512xf32>
    %44 = arith.mulf %42, %43 : vector<16x512xf32>
    %45 = arith.mulf %44, %44 : vector<16x512xf32>
    %cst_21 = arith.constant dense<0.000000e+00> : vector<16xf32>
    %46 = vector.multi_reduction <add>, %45, %cst_21 [1] : vector<16x512xf32> to vector<16xf32>
    %47 = vector.shape_cast %46 : vector<16xf32> to vector<16x1xf32>
    %cst_22 = arith.constant 9.99999996E-13 : f32
    %48 = vector.broadcast %cst_22 : f32 to vector<16x1xf32>
    %49 = arith.addf %47, %48 : vector<16x1xf32>
    %50 = math.rsqrt %49 : vector<16x1xf32>
    %51 = vector.broadcast %50 : vector<16x1xf32> to vector<16x512xf32>
    %52 = arith.mulf %44, %51 : vector<16x512xf32>
    %c0_23 = arith.constant 0 : index
    %c1_24 = arith.constant 1 : index
    %c0_25 = arith.constant 0 : index
    %53 = vector.load %arg5[%c0_23, %c1_24, %c0_25] : memref<16x16x512xf32, #tpu.memory_space<vmem>>, vector<16x1x512xf32>
    %54 = vector.shape_cast %53 : vector<16x1x512xf32> to vector<16x512xf32>
    %55 = vector.shape_cast %52 : vector<16x512xf32> to vector<16x1x512xf32>
    tpu.vector_store %arg5[%c0_23, %c1_24, %c0_25], %55 {strides = array<i32>} : memref<16x16x512xf32, #tpu.memory_space<vmem>>, vector<16x1x512xf32>,
    %56 = vector.extract_strided_slice %26 {offsets = [0, 512], sizes = [16, 512], strides = [1, 1]} : vector<16x4352xf32> to vector<16x512xf32>
    %57 = vector.broadcast %27 : vector<1x512xf32> to vector<16x512xf32>
    %58 = arith.mulf %56, %57 : vector<16x512xf32>
    %59 = arith.mulf %58, %58 : vector<16x512xf32>
    %cst_26 = arith.constant dense<0.000000e+00> : vector<16xf32>
    %60 = vector.multi_reduction <add>, %59, %cst_26 [1] : vector<16x512xf32> to vector<16xf32>
    %61 = vector.shape_cast %60 : vector<16xf32> to vector<16x1xf32>
    %cst_27 = arith.constant 9.99999996E-13 : f32
    %62 = vector.broadcast %cst_27 : f32 to vector<16x1xf32>
    %63 = arith.addf %61, %62 : vector<16x1xf32>
    %64 = math.rsqrt %63 : vector<16x1xf32>
    %65 = vector.broadcast %64 : vector<16x1xf32> to vector<16x512xf32>
    %66 = arith.mulf %58, %65 : vector<16x512xf32>
    %c0_28 = arith.constant 0 : index
    %c2 = arith.constant 2 : index
    %c0_29 = arith.constant 0 : index
    %67 = vector.load %arg5[%c0_28, %c2, %c0_29] : memref<16x16x512xf32, #tpu.memory_space<vmem>>, vector<16x1x512xf32>
    %68 = vector.shape_cast %67 : vector<16x1x512xf32> to vector<16x512xf32>
    %69 = vector.shape_cast %66 : vector<16x512xf32> to vector<16x1x512xf32>
    tpu.vector_store %arg5[%c0_28, %c2, %c0_29], %69 {strides = array<i32>} : memref<16x16x512xf32, #tpu.memory_space<vmem>>, vector<16x1x512xf32>,
    %70 = vector.extract_strided_slice %26 {offsets = [0, 768], sizes = [16, 512], strides = [1, 1]} : vector<16x4352xf32> to vector<16x512xf32>
    %71 = vector.broadcast %27 : vector<1x512xf32> to vector<16x512xf32>
    %72 = arith.mulf %70, %71 : vector<16x512xf32>
    %73 = arith.mulf %72, %72 : vector<16x512xf32>
    %cst_30 = arith.constant dense<0.000000e+00> : vector<16xf32>
    %74 = vector.multi_reduction <add>, %73, %cst_30 [1] : vector<16x512xf32> to vector<16xf32>
    %75 = vector.shape_cast %74 : vector<16xf32> to vector<16x1xf32>
    %cst_31 = arith.constant 9.99999996E-13 : f32
    %76 = vector.broadcast %cst_31 : f32 to vector<16x1xf32>
    %77 = arith.addf %75, %76 : vector<16x1xf32>
    %78 = math.rsqrt %77 : vector<16x1xf32>
    %79 = vector.broadcast %78 : vector<16x1xf32> to vector<16x512xf32>
    %80 = arith.mulf %72, %79 : vector<16x512xf32>
    %c0_32 = arith.constant 0 : index
    %c3 = arith.constant 3 : index
    %c0_33 = arith.constant 0 : index
    %81 = vector.load %arg5[%c0_32, %c3, %c0_33] : memref<16x16x512xf32, #tpu.memory_space<vmem>>, vector<16x1x512xf32>
    %82 = vector.shape_cast %81 : vector<16x1x512xf32> to vector<16x512xf32>
    %83 = vector.shape_cast %80 : vector<16x512xf32> to vector<16x1x512xf32>
    tpu.vector_store %arg5[%c0_32, %c3, %c0_33], %83 {strides = array<i32>} : memref<16x16x512xf32, #tpu.memory_space<vmem>>, vector<16x1x512xf32>,
    %84 = vector.extract_strided_slice %26 {offsets = [0, 1024], sizes = [16, 512], strides = [1, 1]} : vector<16x4352xf32> to vector<16x512xf32>
    %85 = vector.broadcast %27 : vector<1x512xf32> to vector<16x512xf32>
    %86 = arith.mulf %84, %85 : vector<16x512xf32>
    %87 = arith.mulf %86, %86 : vector<16x512xf32>
    %cst_34 = arith.constant dense<0.000000e+00> : vector<16xf32>
    %88 = vector.multi_reduction <add>, %87, %cst_34 [1] : vector<16x512xf32> to vector<16xf32>
    %89 = vector.shape_cast %88 : vector<16xf32> to vector<16x1xf32>
    %cst_35 = arith.constant 9.99999996E-13 : f32
    %90 = vector.broadcast %cst_35 : f32 to vector<16x1xf32>
    %91 = arith.addf %89, %90 : vector<16x1xf32>
    %92 = math.rsqrt %91 : vector<16x1xf32>
    %93 = vector.broadcast %92 : vector<16x1xf32> to vector<16x512xf32>
    %94 = arith.mulf %86, %93 : vector<16x512xf32>
    %c0_36 = arith.constant 0 : index
    %c4 = arith.constant 4 : index
    %c0_37 = arith.constant 0 : index
    %95 = vector.load %arg5[%c0_36, %c4, %c0_37] : memref<16x16x512xf32, #tpu.memory_space<vmem>>, vector<16x1x512xf32>
    %96 = vector.shape_cast %95 : vector<16x1x512xf32> to vector<16x512xf32>
    %97 = vector.shape_cast %94 : vector<16x512xf32> to vector<16x1x512xf32>
    tpu.vector_store %arg5[%c0_36, %c4, %c0_37], %97 {strides = array<i32>} : memref<16x16x512xf32, #tpu.memory_space<vmem>>, vector<16x1x512xf32>,
    %98 = vector.extract_strided_slice %26 {offsets = [0, 1280], sizes = [16, 512], strides = [1, 1]} : vector<16x4352xf32> to vector<16x512xf32>
    %99 = vector.broadcast %27 : vector<1x512xf32> to vector<16x512xf32>
    %100 = arith.mulf %98, %99 : vector<16x512xf32>
    %101 = arith.mulf %100, %100 : vector<16x512xf32>
    %cst_38 = arith.constant dense<0.000000e+00> : vector<16xf32>
    %102 = vector.multi_reduction <add>, %101, %cst_38 [1] : vector<16x512xf32> to vector<16xf32>
    %103 = vector.shape_cast %102 : vector<16xf32> to vector<16x1xf32>
    %cst_39 = arith.constant 9.99999996E-13 : f32
    %104 = vector.broadcast %cst_39 : f32 to vector<16x1xf32>
    %105 = arith.addf %103, %104 : vector<16x1xf32>
    %106 = math.rsqrt %105 : vector<16x1xf32>
    %107 = vector.broadcast %106 : vector<16x1xf32> to vector<16x512xf32>
    %108 = arith.mulf %100, %107 : vector<16x512xf32>
    %c0_40 = arith.constant 0 : index
    %c5 = arith.constant 5 : index
    %c0_41 = arith.constant 0 : index
    %109 = vector.load %arg5[%c0_40, %c5, %c0_41] : memref<16x16x512xf32, #tpu.memory_space<vmem>>, vector<16x1x512xf32>
    %110 = vector.shape_cast %109 : vector<16x1x512xf32> to vector<16x512xf32>
    %111 = vector.shape_cast %108 : vector<16x512xf32> to vector<16x1x512xf32>
    tpu.vector_store %arg5[%c0_40, %c5, %c0_41], %111 {strides = array<i32>} : memref<16x16x512xf32, #tpu.memory_space<vmem>>, vector<16x1x512xf32>,
    %112 = vector.extract_strided_slice %26 {offsets = [0, 1536], sizes = [16, 512], strides = [1, 1]} : vector<16x4352xf32> to vector<16x512xf32>
    %113 = vector.broadcast %27 : vector<1x512xf32> to vector<16x512xf32>
    %114 = arith.mulf %112, %113 : vector<16x512xf32>
    %115 = arith.mulf %114, %114 : vector<16x512xf32>
    %cst_42 = arith.constant dense<0.000000e+00> : vector<16xf32>
    %116 = vector.multi_reduction <add>, %115, %cst_42 [1] : vector<16x512xf32> to vector<16xf32>
    %117 = vector.shape_cast %116 : vector<16xf32> to vector<16x1xf32>
    %cst_43 = arith.constant 9.99999996E-13 : f32
    %118 = vector.broadcast %cst_43 : f32 to vector<16x1xf32>
    %119 = arith.addf %117, %118 : vector<16x1xf32>
    %120 = math.rsqrt %119 : vector<16x1xf32>
    %121 = vector.broadcast %120 : vector<16x1xf32> to vector<16x512xf32>
    %122 = arith.mulf %114, %121 : vector<16x512xf32>
    %c0_44 = arith.constant 0 : index
    %c6 = arith.constant 6 : index
    %c0_45 = arith.constant 0 : index
    %123 = vector.load %arg5[%c0_44, %c6, %c0_45] : memref<16x16x512xf32, #tpu.memory_space<vmem>>, vector<16x1x512xf32>
    %124 = vector.shape_cast %123 : vector<16x1x512xf32> to vector<16x512xf32>
    %125 = vector.shape_cast %122 : vector<16x512xf32> to vector<16x1x512xf32>
    tpu.vector_store %arg5[%c0_44, %c6, %c0_45], %125 {strides = array<i32>} : memref<16x16x512xf32, #tpu.memory_space<vmem>>, vector<16x1x512xf32>,
    %126 = vector.extract_strided_slice %26 {offsets = [0, 1792], sizes = [16, 512], strides = [1, 1]} : vector<16x4352xf32> to vector<16x512xf32>
    %127 = vector.broadcast %27 : vector<1x512xf32> to vector<16x512xf32>
    %128 = arith.mulf %126, %127 : vector<16x512xf32>
    %129 = arith.mulf %128, %128 : vector<16x512xf32>
    %cst_46 = arith.constant dense<0.000000e+00> : vector<16xf32>
    %130 = vector.multi_reduction <add>, %129, %cst_46 [1] : vector<16x512xf32> to vector<16xf32>
    %131 = vector.shape_cast %130 : vector<16xf32> to vector<16x1xf32>
    %cst_47 = arith.constant 9.99999996E-13 : f32
    %132 = vector.broadcast %cst_47 : f32 to vector<16x1xf32>
    %133 = arith.addf %131, %132 : vector<16x1xf32>
    %134 = math.rsqrt %133 : vector<16x1xf32>
    %135 = vector.broadcast %134 : vector<16x1xf32> to vector<16x512xf32>
    %136 = arith.mulf %128, %135 : vector<16x512xf32>
    %c0_48 = arith.constant 0 : index
    %c7 = arith.constant 7 : index
    %c0_49 = arith.constant 0 : index
    %137 = vector.load %arg5[%c0_48, %c7, %c0_49] : memref<16x16x512xf32, #tpu.memory_space<vmem>>, vector<16x1x512xf32>
    %138 = vector.shape_cast %137 : vector<16x1x512xf32> to vector<16x512xf32>
    %139 = vector.shape_cast %136 : vector<16x512xf32> to vector<16x1x512xf32>
    tpu.vector_store %arg5[%c0_48, %c7, %c0_49], %139 {strides = array<i32>} : memref<16x16x512xf32, #tpu.memory_space<vmem>>, vector<16x1x512xf32>,
    %140 = vector.extract_strided_slice %26 {offsets = [0, 2048], sizes = [16, 512], strides = [1, 1]} : vector<16x4352xf32> to vector<16x512xf32>
    %141 = vector.broadcast %27 : vector<1x512xf32> to vector<16x512xf32>
    %142 = arith.mulf %140, %141 : vector<16x512xf32>
    %143 = arith.mulf %142, %142 : vector<16x512xf32>
    %cst_50 = arith.constant dense<0.000000e+00> : vector<16xf32>
    %144 = vector.multi_reduction <add>, %143, %cst_50 [1] : vector<16x512xf32> to vector<16xf32>
    %145 = vector.shape_cast %144 : vector<16xf32> to vector<16x1xf32>
    %cst_51 = arith.constant 9.99999996E-13 : f32
    %146 = vector.broadcast %cst_51 : f32 to vector<16x1xf32>
    %147 = arith.addf %145, %146 : vector<16x1xf32>
    %148 = math.rsqrt %147 : vector<16x1xf32>
    %149 = vector.broadcast %148 : vector<16x1xf32> to vector<16x512xf32>
    %150 = arith.mulf %142, %149 : vector<16x512xf32>
    %c0_52 = arith.constant 0 : index
    %c8 = arith.constant 8 : index
    %c0_53 = arith.constant 0 : index
    %151 = vector.load %arg5[%c0_52, %c8, %c0_53] : memref<16x16x512xf32, #tpu.memory_space<vmem>>, vector<16x1x512xf32>
    %152 = vector.shape_cast %151 : vector<16x1x512xf32> to vector<16x512xf32>
    %153 = vector.shape_cast %150 : vector<16x512xf32> to vector<16x1x512xf32>
    tpu.vector_store %arg5[%c0_52, %c8, %c0_53], %153 {strides = array<i32>} : memref<16x16x512xf32, #tpu.memory_space<vmem>>, vector<16x1x512xf32>,
    %154 = vector.extract_strided_slice %26 {offsets = [0, 2304], sizes = [16, 512], strides = [1, 1]} : vector<16x4352xf32> to vector<16x512xf32>
    %155 = vector.broadcast %27 : vector<1x512xf32> to vector<16x512xf32>
    %156 = arith.mulf %154, %155 : vector<16x512xf32>
    %157 = arith.mulf %156, %156 : vector<16x512xf32>
    %cst_54 = arith.constant dense<0.000000e+00> : vector<16xf32>
    %158 = vector.multi_reduction <add>, %157, %cst_54 [1] : vector<16x512xf32> to vector<16xf32>
    %159 = vector.shape_cast %158 : vector<16xf32> to vector<16x1xf32>
    %cst_55 = arith.constant 9.99999996E-13 : f32
    %160 = vector.broadcast %cst_55 : f32 to vector<16x1xf32>
    %161 = arith.addf %159, %160 : vector<16x1xf32>
    %162 = math.rsqrt %161 : vector<16x1xf32>
    %163 = vector.broadcast %162 : vector<16x1xf32> to vector<16x512xf32>
    %164 = arith.mulf %156, %163 : vector<16x512xf32>
    %c0_56 = arith.constant 0 : index
    %c9 = arith.constant 9 : index
    %c0_57 = arith.constant 0 : index
    %165 = vector.load %arg5[%c0_56, %c9, %c0_57] : memref<16x16x512xf32, #tpu.memory_space<vmem>>, vector<16x1x512xf32>
    %166 = vector.shape_cast %165 : vector<16x1x512xf32> to vector<16x512xf32>
    %167 = vector.shape_cast %164 : vector<16x512xf32> to vector<16x1x512xf32>
    tpu.vector_store %arg5[%c0_56, %c9, %c0_57], %167 {strides = array<i32>} : memref<16x16x512xf32, #tpu.memory_space<vmem>>, vector<16x1x512xf32>,
    %168 = vector.extract_strided_slice %26 {offsets = [0, 2560], sizes = [16, 512], strides = [1, 1]} : vector<16x4352xf32> to vector<16x512xf32>
    %169 = vector.broadcast %27 : vector<1x512xf32> to vector<16x512xf32>
    %170 = arith.mulf %168, %169 : vector<16x512xf32>
    %171 = arith.mulf %170, %170 : vector<16x512xf32>
    %cst_58 = arith.constant dense<0.000000e+00> : vector<16xf32>
    %172 = vector.multi_reduction <add>, %171, %cst_58 [1] : vector<16x512xf32> to vector<16xf32>
    %173 = vector.shape_cast %172 : vector<16xf32> to vector<16x1xf32>
    %cst_59 = arith.constant 9.99999996E-13 : f32
    %174 = vector.broadcast %cst_59 : f32 to vector<16x1xf32>
    %175 = arith.addf %173, %174 : vector<16x1xf32>
    %176 = math.rsqrt %175 : vector<16x1xf32>
    %177 = vector.broadcast %176 : vector<16x1xf32> to vector<16x512xf32>
    %178 = arith.mulf %170, %177 : vector<16x512xf32>
    %c0_60 = arith.constant 0 : index
    %c10 = arith.constant 10 : index
    %c0_61 = arith.constant 0 : index
    %179 = vector.load %arg5[%c0_60, %c10, %c0_61] : memref<16x16x512xf32, #tpu.memory_space<vmem>>, vector<16x1x512xf32>
    %180 = vector.shape_cast %179 : vector<16x1x512xf32> to vector<16x512xf32>
    %181 = vector.shape_cast %178 : vector<16x512xf32> to vector<16x1x512xf32>
    tpu.vector_store %arg5[%c0_60, %c10, %c0_61], %181 {strides = array<i32>} : memref<16x16x512xf32, #tpu.memory_space<vmem>>, vector<16x1x512xf32>,
    %182 = vector.extract_strided_slice %26 {offsets = [0, 2816], sizes = [16, 512], strides = [1, 1]} : vector<16x4352xf32> to vector<16x512xf32>
    %183 = vector.broadcast %27 : vector<1x512xf32> to vector<16x512xf32>
    %184 = arith.mulf %182, %183 : vector<16x512xf32>
    %185 = arith.mulf %184, %184 : vector<16x512xf32>
    %cst_62 = arith.constant dense<0.000000e+00> : vector<16xf32>
    %186 = vector.multi_reduction <add>, %185, %cst_62 [1] : vector<16x512xf32> to vector<16xf32>
    %187 = vector.shape_cast %186 : vector<16xf32> to vector<16x1xf32>
    %cst_63 = arith.constant 9.99999996E-13 : f32
    %188 = vector.broadcast %cst_63 : f32 to vector<16x1xf32>
    %189 = arith.addf %187, %188 : vector<16x1xf32>
    %190 = math.rsqrt %189 : vector<16x1xf32>
    %191 = vector.broadcast %190 : vector<16x1xf32> to vector<16x512xf32>
    %192 = arith.mulf %184, %191 : vector<16x512xf32>
    %c0_64 = arith.constant 0 : index
    %c11 = arith.constant 11 : index
    %c0_65 = arith.constant 0 : index
    %193 = vector.load %arg5[%c0_64, %c11, %c0_65] : memref<16x16x512xf32, #tpu.memory_space<vmem>>, vector<16x1x512xf32>
    %194 = vector.shape_cast %193 : vector<16x1x512xf32> to vector<16x512xf32>
    %195 = vector.shape_cast %192 : vector<16x512xf32> to vector<16x1x512xf32>
    tpu.vector_store %arg5[%c0_64, %c11, %c0_65], %195 {strides = array<i32>} : memref<16x16x512xf32, #tpu.memory_space<vmem>>, vector<16x1x512xf32>,
    %196 = vector.extract_strided_slice %26 {offsets = [0, 3072], sizes = [16, 512], strides = [1, 1]} : vector<16x4352xf32> to vector<16x512xf32>
    %197 = vector.broadcast %27 : vector<1x512xf32> to vector<16x512xf32>
    %198 = arith.mulf %196, %197 : vector<16x512xf32>
    %199 = arith.mulf %198, %198 : vector<16x512xf32>
    %cst_66 = arith.constant dense<0.000000e+00> : vector<16xf32>
    %200 = vector.multi_reduction <add>, %199, %cst_66 [1] : vector<16x512xf32> to vector<16xf32>
    %201 = vector.shape_cast %200 : vector<16xf32> to vector<16x1xf32>
    %cst_67 = arith.constant 9.99999996E-13 : f32
    %202 = vector.broadcast %cst_67 : f32 to vector<16x1xf32>
    %203 = arith.addf %201, %202 : vector<16x1xf32>
    %204 = math.rsqrt %203 : vector<16x1xf32>
    %205 = vector.broadcast %204 : vector<16x1xf32> to vector<16x512xf32>
    %206 = arith.mulf %198, %205 : vector<16x512xf32>
    %c0_68 = arith.constant 0 : index
    %c12 = arith.constant 12 : index
    %c0_69 = arith.constant 0 : index
    %207 = vector.load %arg5[%c0_68, %c12, %c0_69] : memref<16x16x512xf32, #tpu.memory_space<vmem>>, vector<16x1x512xf32>
    %208 = vector.shape_cast %207 : vector<16x1x512xf32> to vector<16x512xf32>
    %209 = vector.shape_cast %206 : vector<16x512xf32> to vector<16x1x512xf32>
    tpu.vector_store %arg5[%c0_68, %c12, %c0_69], %209 {strides = array<i32>} : memref<16x16x512xf32, #tpu.memory_space<vmem>>, vector<16x1x512xf32>,
    %210 = vector.extract_strided_slice %26 {offsets = [0, 3328], sizes = [16, 512], strides = [1, 1]} : vector<16x4352xf32> to vector<16x512xf32>
    %211 = vector.broadcast %27 : vector<1x512xf32> to vector<16x512xf32>
    %212 = arith.mulf %210, %211 : vector<16x512xf32>
    %213 = arith.mulf %212, %212 : vector<16x512xf32>
    %cst_70 = arith.constant dense<0.000000e+00> : vector<16xf32>
    %214 = vector.multi_reduction <add>, %213, %cst_70 [1] : vector<16x512xf32> to vector<16xf32>
    %215 = vector.shape_cast %214 : vector<16xf32> to vector<16x1xf32>
    %cst_71 = arith.constant 9.99999996E-13 : f32
    %216 = vector.broadcast %cst_71 : f32 to vector<16x1xf32>
    %217 = arith.addf %215, %216 : vector<16x1xf32>
    %218 = math.rsqrt %217 : vector<16x1xf32>
    %219 = vector.broadcast %218 : vector<16x1xf32> to vector<16x512xf32>
    %220 = arith.mulf %212, %219 : vector<16x512xf32>
    %c0_72 = arith.constant 0 : index
    %c13 = arith.constant 13 : index
    %c0_73 = arith.constant 0 : index
    %221 = vector.load %arg5[%c0_72, %c13, %c0_73] : memref<16x16x512xf32, #tpu.memory_space<vmem>>, vector<16x1x512xf32>
    %222 = vector.shape_cast %221 : vector<16x1x512xf32> to vector<16x512xf32>
    %223 = vector.shape_cast %220 : vector<16x512xf32> to vector<16x1x512xf32>
    tpu.vector_store %arg5[%c0_72, %c13, %c0_73], %223 {strides = array<i32>} : memref<16x16x512xf32, #tpu.memory_space<vmem>>, vector<16x1x512xf32>,
    %224 = vector.extract_strided_slice %26 {offsets = [0, 3584], sizes = [16, 512], strides = [1, 1]} : vector<16x4352xf32> to vector<16x512xf32>
    %225 = vector.broadcast %27 : vector<1x512xf32> to vector<16x512xf32>
    %226 = arith.mulf %224, %225 : vector<16x512xf32>
    %227 = arith.mulf %226, %226 : vector<16x512xf32>
    %cst_74 = arith.constant dense<0.000000e+00> : vector<16xf32>
    %228 = vector.multi_reduction <add>, %227, %cst_74 [1] : vector<16x512xf32> to vector<16xf32>
    %229 = vector.shape_cast %228 : vector<16xf32> to vector<16x1xf32>
    %cst_75 = arith.constant 9.99999996E-13 : f32
    %230 = vector.broadcast %cst_75 : f32 to vector<16x1xf32>
    %231 = arith.addf %229, %230 : vector<16x1xf32>
    %232 = math.rsqrt %231 : vector<16x1xf32>
    %233 = vector.broadcast %232 : vector<16x1xf32> to vector<16x512xf32>
    %234 = arith.mulf %226, %233 : vector<16x512xf32>
    %c0_76 = arith.constant 0 : index
    %c14 = arith.constant 14 : index
    %c0_77 = arith.constant 0 : index
    %235 = vector.load %arg5[%c0_76, %c14, %c0_77] : memref<16x16x512xf32, #tpu.memory_space<vmem>>, vector<16x1x512xf32>
    %236 = vector.shape_cast %235 : vector<16x1x512xf32> to vector<16x512xf32>
    %237 = vector.shape_cast %234 : vector<16x512xf32> to vector<16x1x512xf32>
    tpu.vector_store %arg5[%c0_76, %c14, %c0_77], %237 {strides = array<i32>} : memref<16x16x512xf32, #tpu.memory_space<vmem>>, vector<16x1x512xf32>,
    %238 = vector.extract_strided_slice %26 {offsets = [0, 3840], sizes = [16, 512], strides = [1, 1]} : vector<16x4352xf32> to vector<16x512xf32>
    %239 = vector.broadcast %27 : vector<1x512xf32> to vector<16x512xf32>
    %240 = arith.mulf %238, %239 : vector<16x512xf32>
    %241 = arith.mulf %240, %240 : vector<16x512xf32>
    %cst_78 = arith.constant dense<0.000000e+00> : vector<16xf32>
    %242 = vector.multi_reduction <add>, %241, %cst_78 [1] : vector<16x512xf32> to vector<16xf32>
    %243 = vector.shape_cast %242 : vector<16xf32> to vector<16x1xf32>
    %cst_79 = arith.constant 9.99999996E-13 : f32
    %244 = vector.broadcast %cst_79 : f32 to vector<16x1xf32>
    %245 = arith.addf %243, %244 : vector<16x1xf32>
    %246 = math.rsqrt %245 : vector<16x1xf32>
    %247 = vector.broadcast %246 : vector<16x1xf32> to vector<16x512xf32>
    %248 = arith.mulf %240, %247 : vector<16x512xf32>
    %c0_80 = arith.constant 0 : index
    %c15 = arith.constant 15 : index
    %c0_81 = arith.constant 0 : index
    %249 = vector.load %arg5[%c0_80, %c15, %c0_81] : memref<16x16x512xf32, #tpu.memory_space<vmem>>, vector<16x1x512xf32>
    %250 = vector.shape_cast %249 : vector<16x1x512xf32> to vector<16x512xf32>
    %251 = vector.shape_cast %248 : vector<16x512xf32> to vector<16x1x512xf32>
    tpu.vector_store %arg5[%c0_80, %c15, %c0_81], %251 {strides = array<i32>} : memref<16x16x512xf32, #tpu.memory_space<vmem>>, vector<16x1x512xf32>,
    return
  }
  func.func @transform_0(%arg0: i32) -> (i32, i32, i32) {
    %c0_i32 = arith.constant 0 : i32
    %c0_i32_0 = arith.constant 0 : i32
    %c0_i32_1 = arith.constant 0 : i32
    return %c0_i32, %arg0, %c0_i32_0 : i32, i32, i32
  }
  func.func @transform_1(%arg0: i32) -> (i32, i32) {
    %c0_i32 = arith.constant 0 : i32
    %c0_i32_0 = arith.constant 0 : i32
    %c0_i32_1 = arith.constant 0 : i32
    return %c0_i32, %c0_i32_0 : i32, i32
  }
  func.func @transform_2(%arg0: i32) -> (i32, i32, i32) {
    %c0_i32 = arith.constant 0 : i32
    %c0_i32_0 = arith.constant 0 : i32
    %c0_i32_1 = arith.constant 0 : i32
    return %c0_i32, %arg0, %c0_i32_0 : i32, i32, i32
  }
  func.func @transform_3(%arg0: i32) -> (i32, i32) {
    %c0_i32 = arith.constant 0 : i32
    %c0_i32_0 = arith.constant 0 : i32
    %c0_i32_1 = arith.constant 0 : i32
    return %c0_i32, %c0_i32_0 : i32, i32
  }
  func.func @transform_4(%arg0: i32) -> (i32, i32, i32) {
    %c0_i32 = arith.constant 0 : i32
    %c0_i32_0 = arith.constant 0 : i32
    %c0_i32_1 = arith.constant 0 : i32
    return %arg0, %c0_i32, %c0_i32_0 : i32, i32, i32
  }
}

module attributes {stable_mosaic.version = 11 : i64} {
  func.func @kernel(%arg0: i32, %arg1: memref<32x16xf32, #tpu.memory_space<vmem>>, %arg2: memref<16x2xf32, #tpu.memory_space<vmem>>, %arg3: memref<1x2xf32, #tpu.memory_space<vmem>>, %arg4: memref<32x2048xf32, #tpu.memory_space<vmem>>, %arg5: memref<32x2048xf32, #tpu.memory_space<vmem>>, %arg6: memref<32x2048xf32, #tpu.memory_space<vmem>>) attributes {dimension_semantics = [#tpu.dimension_semantics<parallel>], iteration_bounds = array<i64: 2>, scalar_prefetch = 0 : i64, scratch_operands = 0 : i64, tpu.core_type = #tpu.core_type<tc>, window_params = [{pipeline_mode = #tpu.pipeline_mode<synchronous>, transform_indices = @transform_0, window_bounds = array<i64: 32, 16>}, {pipeline_mode = #tpu.pipeline_mode<synchronous>, transform_indices = @transform_1, window_bounds = array<i64: 16, 2>}, {pipeline_mode = #tpu.pipeline_mode<synchronous>, transform_indices = @transform_2, window_bounds = array<i64: 1, 2>}, {transform_indices = @transform_3, window_bounds = array<i64: 32, 2048>}, {transform_indices = @transform_4, window_bounds = array<i64: 32, 2048>}, {transform_indices = @transform_5, window_bounds = array<i64: 32, 2048>}]} {
    %c0 = arith.constant 0 : index
    %c0_0 = arith.constant 0 : index
    %0 = vector.load %arg1[%c0, %c0_0] : memref<32x16xf32, #tpu.memory_space<vmem>>, vector<32x16xf32>
    %c0_1 = arith.constant 0 : index
    %c0_2 = arith.constant 0 : index
    %1 = vector.load %arg2[%c0_1, %c0_2] : memref<16x2xf32, #tpu.memory_space<vmem>>, vector<16x2xf32>
    %cst = arith.constant dense<0.000000e+00> : vector<32x2xf32>
    %2 = tpu.matmul %0, %1, %cst {dimension_numbers = #tpu.dot_dimension_numbers<[1], [0], [0], [1], [0, 0, 1, 1], [], []>} : vector<32x16xf32>, vector<16x2xf32>, vector<32x2xf32> -> vector<32x2xf32>
    %c0_3 = arith.constant 0 : index
    %c0_4 = arith.constant 0 : index
    %3 = vector.load %arg3[%c0_3, %c0_4] : memref<1x2xf32, #tpu.memory_space<vmem>>, vector<1x2xf32>
    %4 = vector.broadcast %3 : vector<1x2xf32> to vector<32x2xf32>
    %5 = arith.addf %2, %4 : vector<32x2xf32>
    %6 = vector.extract_strided_slice %5 {offsets = [0, 1], sizes = [32, 1], strides = [1, 1]} : vector<32x2xf32> to vector<32x1xf32>
    %7 = vector.extract_strided_slice %5 {offsets = [0, 0], sizes = [32, 1], strides = [1, 1]} : vector<32x2xf32> to vector<32x1xf32>
    %8 = arith.subf %6, %7 : vector<32x1xf32>
    %9 = math.exp %8 : vector<32x1xf32>
    %cst_5 = arith.constant 1.000000e+00 : f32
    %10 = vector.broadcast %cst_5 : f32 to vector<32x1xf32>
    %11 = arith.addf %10, %9 : vector<32x1xf32>
    %cst_6 = arith.constant 1.000000e+00 : f32
    %12 = vector.broadcast %cst_6 : f32 to vector<32x1xf32>
    %13 = arith.divf %12, %11 : vector<32x1xf32>
    %c0_7 = arith.constant 0 : index
    %c0_8 = arith.constant 0 : index
    %14 = vector.load %arg4[%c0_7, %c0_8] : memref<32x2048xf32, #tpu.memory_space<vmem>>, vector<32x2048xf32>
    %15 = vector.broadcast %13 : vector<32x1xf32> to vector<32x2048xf32>
    %16 = arith.mulf %14, %15 : vector<32x2048xf32>
    %c0_9 = arith.constant 0 : index
    %c0_10 = arith.constant 0 : index
    %17 = vector.load %arg5[%c0_9, %c0_10] : memref<32x2048xf32, #tpu.memory_space<vmem>>, vector<32x2048xf32>
    %cst_11 = arith.constant 1.000000e+00 : f32
    %18 = vector.broadcast %cst_11 : f32 to vector<32x1xf32>
    %19 = arith.subf %18, %13 : vector<32x1xf32>
    %20 = vector.broadcast %19 : vector<32x1xf32> to vector<32x2048xf32>
    %21 = arith.mulf %17, %20 : vector<32x2048xf32>
    %22 = arith.addf %16, %21 : vector<32x2048xf32>
    %c0_12 = arith.constant 0 : index
    %c0_13 = arith.constant 0 : index
    %23 = vector.load %arg6[%c0_12, %c0_13] : memref<32x2048xf32, #tpu.memory_space<vmem>>, vector<32x2048xf32>
    tpu.vector_store %arg6[%c0_12, %c0_13], %22 {strides = array<i32>} : memref<32x2048xf32, #tpu.memory_space<vmem>>, vector<32x2048xf32>,
    return
  }
  func.func @transform_0(%arg0: i32) -> (i32, i32) {
    %c0_i32 = arith.constant 0 : i32
    %c0_i32_0 = arith.constant 0 : i32
    %c0_i32_1 = arith.constant 0 : i32
    return %c0_i32, %c0_i32_0 : i32, i32
  }
  func.func @transform_1(%arg0: i32) -> (i32, i32) {
    %c0_i32 = arith.constant 0 : i32
    %c0_i32_0 = arith.constant 0 : i32
    %c0_i32_1 = arith.constant 0 : i32
    return %c0_i32, %c0_i32_0 : i32, i32
  }
  func.func @transform_2(%arg0: i32) -> (i32, i32) {
    %c0_i32 = arith.constant 0 : i32
    %c0_i32_0 = arith.constant 0 : i32
    %c0_i32_1 = arith.constant 0 : i32
    return %c0_i32, %c0_i32_0 : i32, i32
  }
  func.func @transform_3(%arg0: i32) -> (i32, i32) {
    %c0_i32 = arith.constant 0 : i32
    %c0_i32_0 = arith.constant 0 : i32
    return %c0_i32, %arg0 : i32, i32
  }
  func.func @transform_4(%arg0: i32) -> (i32, i32) {
    %c0_i32 = arith.constant 0 : i32
    %c0_i32_0 = arith.constant 0 : i32
    return %c0_i32, %arg0 : i32, i32
  }
  func.func @transform_5(%arg0: i32) -> (i32, i32) {
    %c0_i32 = arith.constant 0 : i32
    %c0_i32_0 = arith.constant 0 : i32
    return %c0_i32, %arg0 : i32, i32
  }
}

</mosaic_0001>

<bundles_post_ra>
// kernel: forward.3
= control target key start
LH: loop header
LB: loop body
LE: loop exit
PB: predicated region body
PF: predicated region fallthrough
CT: control target
= control target key end

     0   :  { %s4257_s0 = inlined_call_operand.hbm [shape: f32[32,16], index: 0, kind: input, shape index: {}]   ;;  %s4258_s1 = inlined_call_operand.hbm [shape: f32[16,16], index: 1, kind: input, shape index: {}]   ;;  %s4259_s2 = inlined_call_operand.hbm [shape: f32[1,16], index: 2, kind: input, shape index: {}]   ;;  %s4260_s3 = inlined_call_operand.hbm [shape: f32[16,16], index: 3, kind: input, shape index: {}]   ;;  %s4261_s4 = inlined_call_operand.hbm [shape: f32[2,16,16], index: 4, kind: input, shape index: {}]   ;;  %s4262_s5 = inlined_call_operand.hbm [shape: f32[2,1,16], index: 5, kind: input, shape index: {}]   ;;  %s4263_s6 = inlined_call_operand.hbm [shape: bf16[16,4096], index: 6, kind: input, shape index: {}]   ;;  %s4264_s7 = inlined_call_operand.hbm [shape: bf16[16,4096], index: 7, kind: input, shape index: {}]   ;;  %s4265_s8 = inlined_call_operand.vmem [shape: f32[2,32,4096], index: 8, kind: output, shape index: {}]  }
   0x1   :  { %4298 = sst [smem:[#allocation43_spill]] %s4257_s0 }
   0x2   :  { %4299 = sst [smem:[#allocation44_spill]] %s4258_s1 }
   0x3   :  { %4300 = sst [smem:[#allocation45_spill]] %s4261_s4 }
   0x4   :  { %4301 = sst [smem:[#allocation46_spill]] %s4262_s5 }
   0x5   :  { %4302 = sst [smem:[#allocation47_spill]] %s4263_s6 }
   0x6   :  { %4303 = sst [smem:[#allocation48_spill]] %s4264_s7 }
   0x7   :  { %4304 = sst [smem:[#allocation49_spill]] %s4265_s8 }
   0x8   :  { %13 = vsyncpa [#allocation3], 0 }
   0x9   :  { %14 = vsyncpa [#allocation5], 0 }
   0xa   :  { %15 = vsyncpa [#allocation8], 0  ;;  %s3219_s27 = smov 0   ;;  %s3221_s28 = smov 0  }
   0xb   :  { %s3223_s29 = smov 0   ;;  %s3225_s30 = smov 0  }
   0xc   :  { %s3227_s9 = smov 0   ;;  %s3229_s10 = smov 0  }
   0xd   :  { %s3231_s11 = smov 0   ;;  %s3233_s12 = smov 0  }
   0xe   :  { %s3235_s13 = smov 0   ;;  %s3237_s14 = smov 0  }
   0xf   :  { %s3239_s15 = smov 0   ;;  %s3241_s16 = smov 0  }
  0x10   :  { %s3243_s17 = smov 0  }
  0x11 LB: > { %4305 = sst [smem:[#allocation19_spill]] %s3110_s27  ;;  %s3281_s18 = sadd.s32 4294967295, %s3158_s17   ;;  %s3158_s17 = sphi %s3243_s17, %s21_s17   ;;  %s3154_s16 = sphi %s3241_s16, %s4394_s16   ;;  %s3150_s15 = sphi %s3239_s15, %s4402_s15   ;;  %s3146_s14 = sphi %s3237_s14, %s4392_s14   ;;  %s3142_s13 = sphi %s3235_s13, %s4401_s13   ;;  %s3138_s12 = sphi %s3233_s12, %s4400_s12   ;;  %s3134_s11 = sphi %s3231_s11, %s4399_s11   ;;  %s3130_s10 = sphi %s3229_s10, %s4390_s10   ;;  %s3126_s9 = sphi %s3227_s9, %s4398_s9   ;;  %s3122_s30 = sphi %s3225_s30, %s4397_s30   ;;  %s3118_s29 = sphi %s3223_s29, %s4389_s29   ;;  %s3114_s28 = sphi %s3221_s28, %s4396_s28   ;;  %s3110_s27 = sphi %s3219_s27, %s4395_s27  }
  0x12   : > { %4306 = sst [smem:[#allocation20_spill]] %s3122_s30  ;;  %p137_p0 = scmp.ne.s32.totalorder %s3134_s11, %s3130_s10 }
  0x13   : > { %4307 = sst [smem:[#allocation21_spill]] %s3134_s11  ;;  %p4268_p1 = scmp.eq.s32.totalorder %s3281_s18, 0 }
  0x14   : > { %4308 = sst [smem:[#allocation22_spill]] %s3142_s13  ;;  %p189_p2 = scmp.ne.s32.totalorder %s3122_s30, %s3118_s29 }
  0x15   : > { %4309 = sst [smem:[#allocation23_spill]] %s3146_s14  ;;  %p240_p3 = scmp.ne.s32.totalorder %s3114_s28, %s3110_s27 }
  0x16   : > { %4310 = sst [smem:[#allocation24_spill]] %s3154_s16  ;;  %p241_p4 = scmp.eq.s32.totalorder %s3281_s18, 3 }
  0x17   : > { %4311 = sst [smem:[#allocation25_spill]] %s3281_s18  ;;  %p3291_p5 = por %p4268_p1, %p137_p0 }
  0x18   : > { %p3297_p6 = por %p189_p2, %p4268_p1  ;;  %p3301_p7 = por %p241_p4, %p240_p3 }
  0x19   : > { %s4312_s19 = scalar_select %p3291_p5, 1, 0 }
  0x1a   : > { %s4314_s20 = scalar_select %p3297_p6, 1, 0 }
  0x1b   : > { %4313 = sst [smem:[#allocation26_spill]] %s4312_s19  ;;  %p2409_p8 = scmp.ge.s32.totalorder %s3158_s17, 1 }
  0x1c   : > { %4315 = sst [smem:[#allocation27_spill]] %s4314_s20  ;;  %p254_p9 = scmp.lt.s32.totalorder %s3158_s17, 5 }
  0x1d   : > { %s4316_s21 = scalar_select %p3301_p7, 1, 0 }
  0x1e   : > { %p3307_p10 = pnand %p2409_p8, %p254_p9  ;;  %s3160_s23 = smov [#allocation2]  }
  0x1f   : > { %4317 = sst [smem:[#allocation28_spill]] %s4316_s21  ;;  %s266_s24 = sshll.u32 %s3160_s23, 4  ;;  %s267_s24 = int_to_ptr.vmem [resolvable:$true] %s266_s24 }
  0x20   : > { %s4318_s22 = scalar_select %p3307_p10, 1, 0 }
  0x21   : > { %p2607_p11 = pneg %p3307_p10  ;;  %s4321_s0 = sld [smem:[#allocation43_spill]] }
  0x22   : > { %4319 = sst [smem:[#allocation29_spill]] %s4318_s22 }
  0x23   : > { %p3315_p12 = pnand %p2607_p11, %p4268_p1 }
  0x25   : > { %s4320_s25 = scalar_select %p3315_p12, 1, 0 }
  0x26   : > { %p3329_p0 = pneg %p3315_p12 }
  0x27   : > { %s2804_s14 = scalar_lea.hbm %s4321_s0, 512 }
  0x28   : > { %p2805_p13 = scmp.ne.s32.totalorder %s4321_s0, %s2804_s14  ;;  %p2811_p4 = scmp.lt.u32.totalorder %s2804_s14, %s4321_s0 }
  0x29   : > { %s4322_s23 = scalar_select %p3329_p0, 1, 0 }
  0x2a   : > { %p2807_p2 = pnand %p3329_p0, %p2805_p13 }
  0x2c   : > { %p2808_p3 = pneg %p2807_p2 }
  0x2e   : > { %p2813_p8 = pnand %p2811_p4, %p2808_p3 }
  0x30   : > { %2816 = shalt.err (!%p2813_p8)
}
  0x31   : > { %s2817_s8 = scalar_lea.vmem %s267_s24, 512  ;;  %p2825_p7 = scmp.lt.s32.totalorder %s267_s24, %s267_s24 }
  0x32   : > { %p2818_p9 = scmp.ne.s32.totalorder %s267_s24, %s2817_s8  ;;  %p2826_p6 = scmp.lt.s32.totalorder %s2817_s8, %s2817_s8 }
  0x34   : > { %p2820_p11 = pnand %p2818_p9, %p3329_p0  ;;  %p2827_p5 = por %p2826_p6, %p2825_p7 }
  0x36   : > { %p2821_p1 = pneg %p2820_p11 }
  0x38   : > { %p2828_p10 = pnand %p2827_p5, %p2821_p1 }
  0x3a   : > { %2831 = shalt.err (!%p2828_p10)
}
  0x3b   : > { %s4279_s13 = smov 128   ;;  %s4281_s27 = smov 8  }
  0x3c   : > { %2610 = dma.hbm_to_vmem [thread:$0]  (!%p3315_p12), %s4321_s0, 512, %s267_s24, [#allocation3], %s4279_s13, %s4279_s13, %s4281_s27  }
  0x3d   : > { %p131_p1 = scmp.ne.s32.totalorder %s3138_s12, %s3134_s11  ;;  %p4284_p5 = scmp.eq.s32.totalorder %s3158_s17, 0 }
  0x3e   : > { %p4283_p6 = scmp.lt.s32.totalorder %s3158_s17, 4  ;;  %s317_s26 = sand.u32 1, %s3158_s17  }
  0x3f   : > { %p133_p7 = por %p4284_p5, %p131_p1  ;;  %s4278_s10 = sand.u32 1, %s3138_s12  }
  0x40   : > { %s2518_s8 = sshll.u32 %s3154_s16, 8  ;;  %s2415_s29 = sshll.u32 %s4278_s10, 4 }
  0x41   : > { %s4323_s4 = sld [smem:[#allocation45_spill]]  ;;  %p3366_p10 = pnand %p4283_p6, %p133_p7 }
  0x42   : > { %s321_s14 = scalar_lea.vmem [#allocation9], %s2415_s29  ;;  %s3372_s10 = scalar_lea.sflag [#allocation3], %s317_s26 }
  0x43   : > { %s328_s21 = sshll.u32 %s321_s14, 4  ;;  %p2834_p2 = pneg %p3366_p10  ;;  %s3370_s21 = int_to_ptr.vmem [resolvable:$true] %s328_s21 }
  0x47   : > { %s3362_s18 = scalar_lea.hbm %s4323_s4, %s2518_s8  ;;  %s2837_s13 = scalar_lea.hbm %s4323_s4, 512 }
  0x48   : > { %s2832_s19 = scalar_lea.hbm %s3362_s18, 256  ;;  %p2838_p8 = scmp.lt.u32.totalorder %s3362_s18, %s4323_s4 }
  0x49   : > { %p2833_p13 = scmp.ne.s32.totalorder %s3362_s18, %s2832_s19  ;;  %p2839_p9 = scmp.lt.u32.totalorder %s2837_s13, %s2832_s19 }
  0x4a   : > { %p2841_p1 = scmp.lt.u32.totalorder %s2832_s19, %s3362_s18 }
  0x4b   : > { %p2835_p3 = pnand %p2834_p2, %p2833_p13  ;;  %p2840_p11 = por %p2839_p9, %p2838_p8 }
  0x4d   : > { %p2836_p4 = pneg %p2835_p3  ;;  %p2842_p7 = por %p2841_p1, %p2840_p11 }
  0x4f   : > { %p2843_p6 = pnand %p2842_p7, %p2836_p4 }
  0x51   : > { %2846 = shalt.err (!%p2843_p6)
}
  0x52   : > { %s2847_s29 = scalar_lea.vmem %s3370_s21, 256  ;;  %s3163_s26 = smov [#allocation9]  }
  0x53   : > { %p2848_p13 = scmp.ne.s32.totalorder %s3370_s21, %s2847_s29  ;;  %s2852_s14 = sshll.u32 %s3163_s26, 4  ;;  %s2853_s14 = int_to_ptr.vmem [resolvable:$false] %s2852_s14 }
  0x54   : > { %s2854_s0 = scalar_lea.vmem %s2853_s14, 512  ;;  %p2855_p12 = scmp.lt.s32.totalorder %s3370_s21, %s2853_s14 }
  0x55   : > { %p2850_p3 = pnand %p2848_p13, %p2834_p2  ;;  %p2856_p8 = scmp.lt.s32.totalorder %s2854_s0, %s2847_s29 }
  0x57   : > { %p2851_p5 = pneg %p2850_p3  ;;  %p2857_p9 = por %p2856_p8, %p2855_p12 }
  0x59   : > { %p2858_p11 = pnand %p2857_p9, %p2851_p5 }
  0x5b   : > { %2861 = shalt.err (!%p2858_p11)
}
  0x5c   : > { %s4325_s13 = smov 8   ;;  %s4326_s27 = smov 128  }
  0x5d   : > { %2623 = dma.hbm_to_vmem [thread:$0]  (!%p3366_p10), %s3362_s18, 256, %s3370_s21, %s3372_s10, %s4326_s27, %s4326_s27, %s4325_s13  }
  0x5e   : > { %s2418_s19 = sshll.u32 %s3154_s16, 4  ;;  %s4327_s20 = sand.u32 1, %s3138_s12  }
  0x5f   : > { %s341_s8 = scalar_lea.vmem [#allocation10], %s4327_s20  ;;  %s4328_s5 = sld [smem:[#allocation46_spill]] }
  0x60   : > { %s348_s26 = sshll.u32 %s341_s8, 4  ;;  %s349_s26 = int_to_ptr.vmem [resolvable:$true] %s348_s26 }
  0x65   : > { %s346_s0 = scalar_lea.hbm %s4328_s5, %s2418_s19  ;;  %s2867_s7 = scalar_lea.hbm %s4328_s5, 32 }
  0x66   : > { %s2862_s4 = scalar_lea.hbm %s346_s0, 16  ;;  %p2868_p4 = scmp.lt.u32.totalorder %s346_s0, %s4328_s5 }
  0x67   : > { %p2863_p12 = scmp.ne.s32.totalorder %s346_s0, %s2862_s4  ;;  %p2869_p1 = scmp.lt.u32.totalorder %s2867_s7, %s2862_s4 }
  0x68   : > { %p2871_p13 = scmp.lt.u32.totalorder %s2862_s4, %s346_s0 }
  0x69   : > { %p2865_p5 = pnand %p2863_p12, %p2834_p2  ;;  %p2870_p7 = por %p2869_p1, %p2868_p4 }
  0x6b   : > { %p2866_p6 = pneg %p2865_p5  ;;  %p2872_p3 = por %p2871_p13, %p2870_p7 }
  0x6d   : > { %p2873_p8 = pnand %p2872_p3, %p2866_p6 }
  0x6f   : > { %2876 = shalt.err (!%p2873_p8)
}
  0x70   : > { %s2877_s19 = scalar_lea.vmem %s349_s26, 16  ;;  %s3164_s20 = smov [#allocation10]  }
  0x71   : > { %p2878_p9 = scmp.ne.s32.totalorder %s349_s26, %s2877_s19  ;;  %s2882_s11 = sshll.u32 %s3164_s20, 4  ;;  %s2883_s11 = int_to_ptr.vmem [resolvable:$false] %s2882_s11 }
  0x72   : > { %s2884_s22 = scalar_lea.vmem %s2883_s11, 32  ;;  %p2885_p5 = scmp.lt.s32.totalorder %s349_s26, %s2883_s11 }
  0x73   : > { %p2880_p11 = pnand %p2878_p9, %p2834_p2  ;;  %p2886_p0 = scmp.lt.s32.totalorder %s2884_s22, %s2877_s19 }
  0x75   : > { %p2881_p12 = pneg %p2880_p11  ;;  %p2887_p1 = por %p2886_p0, %p2885_p5 }
  0x77   : > { %p2888_p4 = pnand %p2887_p1, %p2881_p12 }
  0x79   : > { %2891 = shalt.err (!%p2888_p4)
}
  0x7a   : > { %2626 = dma.hbm_to_vmem [thread:$0]  (!%p3366_p10), %s346_s0, 16, %s349_s26, %s3372_s10  }
  0x7b   : > { %s3165_s4 = smov [#allocation4]   ;;  %s4329_s1 = sld [smem:[#allocation44_spill]] }
  0x7c   : > { %s279_s7 = sshll.u32 %s3165_s4, 4  ;;  %p4330_p6 = scmp.ne.s32.totalorder %s4322_s23, 0  ;;  %s280_s7 = int_to_ptr.vmem [resolvable:$true] %s279_s7 }
  0x81   : > { %s2892_s14 = scalar_lea.hbm %s4329_s1, 256 }
  0x82   : > { %p2893_p2 = scmp.ne.s32.totalorder %s4329_s1, %s2892_s14  ;;  %p2899_p13 = scmp.lt.u32.totalorder %s2892_s14, %s4329_s1 }
  0x84   : > { %p2895_p0 = pnand %p2893_p2, %p4330_p6 }
  0x86   : > { %p2896_p7 = pneg %p2895_p0 }
  0x88   : > { %p2901_p3 = pnand %p2899_p13, %p2896_p7 }
  0x8a   : > { %2904 = shalt.err (!%p2901_p3)
}
  0x8b   : > { %s2905_s24 = scalar_lea.vmem %s280_s7, 256  ;;  %p2913_p11 = scmp.lt.s32.totalorder %s280_s7, %s280_s7 }
  0x8c   : > { %p2906_p10 = scmp.ne.s32.totalorder %s280_s7, %s2905_s24  ;;  %p2914_p12 = scmp.lt.s32.totalorder %s2905_s24, %s2905_s24 }
  0x8e   : > { %p2908_p8 = pnand %p2906_p10, %p4330_p6  ;;  %p2915_p5 = por %p2914_p12, %p2913_p11 }
  0x90   : > { %p2909_p9 = pneg %p2908_p8 }
  0x92   : > { %p2916_p1 = pnand %p2915_p5, %p2909_p9 }
  0x94   : > { %2919 = shalt.err (!%p2916_p1)
}
  0x95   : > { %p4331_p4 = scmp.ne.s32.totalorder %s4320_s25, 0  ;;  %s30_s11 = sadd.s32 1, %s3150_s15 }
  0x96   : > { %p31_p2 = scmp.ge.s32.totalorder %s30_s11, 2  ;;  %s176_s22 = sadd.s32 1, %s3126_s9 }
  0x97   : > { %2613 = dma.hbm_to_vmem [thread:$0]  (!%p4331_p4), %s4329_s1, 256, %s280_s7, [#allocation5], %s4326_s27, %s4326_s27, %s4325_s13  }
  0x98   : > { %p183_p0 = scmp.ne.s32.totalorder %s3126_s9, %s3122_s30  ;;  %s230_s4 = sadd.s32 1, %s3114_s28 }
  0x99   : > { %s4404_s11 = smov (%p31_p2, %s30_s11), 0  ;;  %s4333_s8 = sadd.s32 1, %s3154_s16 }
  0x9a   : > { %4332 = sst [smem:[#allocation30_spill]] %s4404_s11  ;;  %s4406_s8 = smov (!%p31_p2, %s4333_s8), %s3154_s16 }
  0x9b   : > { %s173_s29 = ssub.s32 %s3150_s15, %s4404_s11  ;;  %p4334_p7 = scmp.eq.s32.totalorder %s3158_s17, 0 }
  0x9c   : > { %p35_p3 = scmp.ge.s32.totalorder %s4406_s8, 2  ;;  %p174_p10 = scmp.eq.s32.totalorder %s173_s29, 0 }
  0x9d   : > { %p3459_p13 = por %p183_p0, %p4334_p7  ;;  %s357_s7 = sand.u32 1, %s3126_s9  }
  0x9e   : > { %s4294_s18 = sshll.u32 %s3150_s15, 10  ;;  %s4408_s8 = smov (%p35_p3, %s4406_s8), 0 }
  0x9f   : > { %4336 = sst [smem:[#allocation31_spill]] %s4408_s8  ;;  %s121_s19 = ssub.s32 %s3154_s16, %s4408_s8 }
  0xa0   : > { %s3468_s21 = scalar_select %p174_p10, %s3126_s9, %s176_s22  }
  0xa1   : > { %s3472_s20 = sshll.u32 %s357_s7, 7  ;;  %p122_p8 = scmp.eq.s32.totalorder %s121_s19, 0 }
  0xa2   : > { %s227_s24 = sor.u32 %s173_s29, %s121_s19  ;;  %s4337_s26 = sadd.s32 1, %s3138_s12 }
  0xa3   : > { %p228_p9 = scmp.eq.s32.totalorder %s227_s24, 0  ;;  %s4339_s6 = sld [smem:[#allocation47_spill]] }
  0xa4   : > { %s3477_s0 = scalar_select %p122_p8, %s3138_s12, %s4337_s26  }
  0xa5   : > { %s3480_s1 = scalar_select %p228_p9, %s3114_s28, %s230_s4  }
  0xa6   : > { %4338 = sst [smem:[#allocation32_spill]] %s3477_s0  ;;  %s359_s22 = scalar_lea.vmem [#allocation11], %s3472_s20 }
  0xa7   : > { %s366_s7 = sshll.u32 %s359_s22, 4  ;;  %p4340_p11 = scmp.lt.s32.totalorder %s3158_s17, 4  ;;  %s3490_s7 = int_to_ptr.vmem [resolvable:$true] %s366_s7 }
  0xa9   : > { %s3487_s30 = scalar_lea.hbm %s4339_s6, %s4294_s18  ;;  %p3496_p12 = pnand %p4340_p11, %p3459_p13 }
  0xaa   : > { %s2920_s4 = scalar_lea.hbm %s3487_s30, 2048  ;;  %s2925_s19 = scalar_lea.hbm %s4339_s6, 4096 }
  0xab   : > { %p2921_p5 = scmp.ne.s32.totalorder %s3487_s30, %s2920_s4  ;;  %p4297_p1 = pneg %p3496_p12 }
  0xac   : > { %p2926_p7 = scmp.lt.u32.totalorder %s3487_s30, %s4339_s6  ;;  %p2927_p13 = scmp.lt.u32.totalorder %s2925_s19, %s2920_s4 }
  0xad   : > { %p2923_p2 = pnand %p4297_p1, %p2921_p5  ;;  %p2929_p10 = scmp.lt.u32.totalorder %s2920_s4, %s3487_s30 }
  0xae   : > { %p2928_p3 = por %p2927_p13, %p2926_p7 }
  0xaf   : > { %p2924_p0 = pneg %p2923_p2 }
  0xb0   : > { %p2930_p8 = por %p2929_p10, %p2928_p3 }
  0xb2   : > { %p2931_p9 = pnand %p2930_p8, %p2924_p0 }
  0xb4   : > { %2934 = shalt.err (!%p2931_p9)
}
  0xb5   : > { %s2935_s26 = scalar_lea.vmem %s3490_s7, 2048  ;;  %s3166_s22 = smov [#allocation11]  }
  0xb6   : > { %p2936_p11 = scmp.ne.s32.totalorder %s3490_s7, %s2935_s26  ;;  %s2940_s5 = sshll.u32 %s3166_s22, 4  ;;  %s2941_s5 = int_to_ptr.vmem [resolvable:$false] %s2940_s5 }
  0xb7   : > { %s2942_s11 = scalar_lea.vmem %s2941_s5, 4096  ;;  %p2943_p4 = scmp.lt.s32.totalorder %s3490_s7, %s2941_s5 }
  0xb8   : > { %p2938_p5 = pnand %p2936_p11, %p4297_p1  ;;  %p2944_p7 = scmp.lt.s32.totalorder %s2942_s11, %s2935_s26 }
  0xba   : > { %p2939_p2 = pneg %p2938_p5  ;;  %p2945_p13 = por %p2944_p7, %p2943_p4 }
  0xbc   : > { %p2946_p3 = pnand %p2945_p13, %p2939_p2 }
  0xbe   : > { %2949 = shalt.err (!%p2946_p3)
}
  0xbf   : > { %s3167_s4 = smov 2048   ;;  %s3168_s19 = smov 1024  }
  0xc0   : > { %s3169_s14 = smov 64   ;;  %s3170_s24 = smov [#allocation6]  }
  0xc1   : > { %2629 = dma.hbm_to_vmem [thread:$0]  (!%p3496_p12), %s3487_s30, 2048, %s3490_s7, %s3372_s10, %s3167_s4, %s3168_s19, %s3169_s14  }
  0xc2   : > { %s293_s22 = sshll.u32 %s3170_s24, 4  ;;  %s3171_s5 = smov [#allocation7]   ;;  %s294_s22 = int_to_ptr.vmem [resolvable:$true] %s293_s22 }
  0xc3   : > { %s303_s26 = sshll.u32 %s3171_s5, 4  ;;  %s2950_s6 = scalar_lea.hbm %s4259_s2, 16  ;;  %s3529_s26 = int_to_ptr.vmem [resolvable:$true] %s303_s26 }
  0xc4   : > { %p2951_p4 = scmp.ne.s32.totalorder %s4259_s2, %s2950_s6  ;;  %p2957_p8 = scmp.lt.u32.totalorder %s2950_s6, %s4259_s2 }
  0xc6   : > { %p2953_p0 = pnand %p2951_p4, %p4330_p6 }
  0xc8   : > { %p2954_p10 = pneg %p2953_p0 }
  0xca   : > { %p2959_p9 = pnand %p2957_p8, %p2954_p10 }
  0xcc   : > { %2962 = shalt.err (!%p2959_p9)
}
  0xcd   : > { %s2963_s7 = scalar_lea.vmem %s294_s22, 16  ;;  %s2970_s18 = scalar_lea.vmem %s294_s22, 32 }
  0xce   : > { %p2964_p11 = scmp.ne.s32.totalorder %s294_s22, %s2963_s7  ;;  %p2971_p7 = scmp.lt.s32.totalorder %s294_s22, %s294_s22 }
  0xcf   : > { %p2972_p13 = scmp.lt.s32.totalorder %s2970_s18, %s2963_s7 }
  0xd0   : > { %p2966_p5 = pnand %p2964_p11, %p4330_p6 }
  0xd1   : > { %p2973_p3 = por %p2972_p13, %p2971_p7 }
  0xd2   : > { %p2967_p2 = pneg %p2966_p5 }
  0xd4   : > { %p2974_p1 = pnand %p2973_p3, %p2967_p2 }
  0xd6   : > { %2977 = shalt.err (!%p2974_p1)
}
  0xd7   : > { %p4342_p4 = scmp.ne.s32.totalorder %s4320_s25, 0  ;;  %s2978_s24 = scalar_lea.hbm %s4260_s3, 256 }
  0xd8   : > { %p2979_p0 = scmp.ne.s32.totalorder %s4260_s3, %s2978_s24  ;;  %p2985_p1 = scmp.lt.u32.totalorder %s2978_s24, %s4260_s3 }
  0xd9   : > { %2616 = dma.hbm_to_vmem [thread:$0]  (!%p4342_p4), %s4259_s2, 16, %s294_s22, [#allocation5]  }
  0xda   : > { %p2981_p10 = pnand %p2979_p0, %p4330_p6 }
  0xdc   : > { %p2982_p8 = pneg %p2981_p10 }
  0xde   : > { %p2987_p9 = pnand %p2985_p1, %p2982_p8 }
  0xe0   : > { %2990 = shalt.err (!%p2987_p9)
}
  0xe1   : > { %s2991_s22 = scalar_lea.vmem %s3529_s26, 256  ;;  %p2999_p7 = scmp.lt.s32.totalorder %s3529_s26, %s3529_s26 }
  0xe2   : > { %p2992_p11 = scmp.ne.s32.totalorder %s3529_s26, %s2991_s22  ;;  %p3000_p13 = scmp.lt.s32.totalorder %s2991_s22, %s2991_s22 }
  0xe4   : > { %p2994_p5 = pnand %p2992_p11, %p4330_p6  ;;  %p3001_p3 = por %p3000_p13, %p2999_p7 }
  0xe6   : > { %p2995_p2 = pneg %p2994_p5 }
  0xe8   : > { %p3002_p0 = pnand %p3001_p3, %p2995_p2 }
  0xea   : > { %3005 = shalt.err (!%p3002_p0)
}
  0xeb   : > { %2619 = dma.hbm_to_vmem [thread:$0]  (!%p4342_p4), %s4260_s3, 256, %s3529_s26, [#allocation8], %s4326_s27, %s4326_s27, %s4325_s13  }
  0xec   : > { %s4343_s23 = sshll.u32 %s3150_s15, 10  ;;  %s4344_s0 = sld [smem:[#allocation48_spill]] }
  0xed   : > { %s380_s25 = scalar_lea.vmem [#allocation12], %s3472_s20  ;;  %p4345_p10 = pneg %p3496_p12 }
  0xee   : > { %s387_s5 = sshll.u32 %s380_s25, 4  ;;  %s3583_s5 = int_to_ptr.vmem [resolvable:$true] %s387_s5 }
  0xf2   : > { %s3580_s24 = scalar_lea.hbm %s4344_s0, %s4343_s23  ;;  %s3011_s26 = scalar_lea.hbm %s4344_s0, 4096 }
  0xf3   : > { %s3006_s11 = scalar_lea.hbm %s3580_s24, 2048  ;;  %p3012_p1 = scmp.lt.u32.totalorder %s3580_s24, %s4344_s0 }
  0xf4   : > { %p3007_p6 = scmp.ne.s32.totalorder %s3580_s24, %s3006_s11  ;;  %p3013_p9 = scmp.lt.u32.totalorder %s3011_s26, %s3006_s11 }
  0xf5   : > { %p3015_p5 = scmp.lt.u32.totalorder %s3006_s11, %s3580_s24 }
  0xf6   : > { %p3009_p8 = pnand %p3007_p6, %p4345_p10  ;;  %p3014_p11 = por %p3013_p9, %p3012_p1 }
  0xf8   : > { %p3010_p4 = pneg %p3009_p8  ;;  %p3016_p2 = por %p3015_p5, %p3014_p11 }
  0xfa   : > { %p3017_p7 = pnand %p3016_p2, %p3010_p4 }
  0xfc   : > { %3020 = shalt.err (!%p3017_p7)
}
  0xfd   : > { %s3021_s20 = scalar_lea.vmem %s3583_s5, 2048  ;;  %p4346_p3 = pmov %p4345_p10 }
  0xfe   : > { %p3022_p13 = scmp.ne.s32.totalorder %s3583_s5, %s3021_s20  ;;  %s3172_s22 = smov [#allocation12]  }
  0xff   : > { %s3026_s18 = sshll.u32 %s3172_s22, 4  ;;  %s3027_s18 = int_to_ptr.vmem [resolvable:$false] %s3026_s18 }
 0x100   : > { %p3024_p0 = pnand %p3022_p13, %p4346_p3  ;;  %s3028_s16 = scalar_lea.vmem %s3027_s18, 4096 }
 0x101   : > { %p3029_p10 = scmp.lt.s32.totalorder %s3583_s5, %s3027_s18  ;;  %p3030_p8 = scmp.lt.s32.totalorder %s3028_s16, %s3021_s20 }
 0x102   : > { %p3025_p6 = pneg %p3024_p0 }
 0x103   : > { %p3031_p1 = por %p3030_p8, %p3029_p10 }
 0x105   : > { %p3032_p9 = pnand %p3031_p1, %p3025_p6 }
 0x107   : > { %3035 = shalt.err (!%p3032_p9)
}
 0x108   : > { %2632 = dma.hbm_to_vmem [thread:$0]  (!%p3496_p12), %s3580_s24, 2048, %s3583_s5, %s3372_s10, %s3167_s4, %s3168_s19, %s3169_s14  }
 0x109   : > { %s4347_s23 = sld [smem:[#allocation29_spill]] }
 0x10f   : > { %p4348_p4 = scmp.ne.s32.totalorder %s4347_s23, 0 }
 0x111   : > { %399 = sbr.rel (%p4348_p4) target bundleno = 1173 (0x495), region = 52 }
 0x118   : > { %s4349_s8 = sld [smem:[#allocation25_spill]] }
 0x11e   : > { %p4350_p11 = scmp.eq.s32.totalorder %s4349_s8, 0 }
 0x120   : > { %3089 = dma.done.wait (%p4350_p11), [#allocation3], 512   ;;  %p4351_p5 = pmov %p4350_p11 }
 0x122   : > { %3091 = vsyncadd (%p4351_p5), [#allocation3], 4294966784  ;;  %p4352_p2 = pmov %p4351_p5 }
 0x124   : > { %3093 = dma.done.wait (%p4352_p2), [#allocation5], 272   ;;  %p4353_p7 = pmov %p4352_p2 }
 0x125   : > { %p4354_p13 = pmov %p4352_p2 }
 0x126   : > { %3095 = vsyncadd (%p4353_p7), [#allocation5], 4294967024 }
 0x127   : > { %3097 = dma.done.wait (%p4354_p13), [#allocation8], 256   ;;  %p4355_p12 = pmov %p4352_p2 }
 0x128   : > { %s4356_s10 = sld [smem:[#allocation21_spill]]  ;;  %s4357_s29 = sld [smem:[#allocation26_spill]] }
 0x129   : > { %3099 = vsyncadd (%p4355_p12), [#allocation8], 4294967040  ;;  %s417_s4 = sand.u32 1, %s4349_s8  }
 0x12a   : > { %s418_s6 = scalar_lea.sflag [#allocation3], %s417_s4 }
 0x12e   : > { %s419_s19 = sand.u32 1, %s4356_s10   ;;  %p4358_p3 = scmp.ne.s32.totalorder %s4357_s29, 0 }
 0x12f   : > { %s2430_s14 = sshll.u32 %s419_s19, 4 }
 0x130   : > { %s421_s24 = scalar_lea.vmem [#allocation9], %s2430_s14 }
 0x131   : > { %3101 = dma.done.wait (%p4358_p3), %s418_s6, 272  }
 0x132   : > { %3103 = vsyncadd (%p4358_p3), %s418_s6, 4294967024  ;;  %s4359_s25 = sld [smem:[#allocation20_spill]]  ;;  %s4360_s5 = sld [smem:[#allocation27_spill]] }
 0x133   : > { %s3635_s27 = scalar_lea.vmem [#allocation10], %s419_s19 }
 0x138   : > { %s436_s11 = sand.u32 1, %s4359_s25   ;;  %p4361_p0 = scmp.ne.s32.totalorder %s4360_s5, 0 }
 0x139   : > { %s3633_s13 = sshll.u32 %s436_s11, 7 }
 0x13a   : > { %s3638_s26 = scalar_lea.vmem [#allocation11], %s3633_s13 }
 0x13b   : > { %3105 = dma.done.wait (%p4361_p0), %s418_s6, 4096  }
 0x13c   : > { %3107 = vsyncadd (%p4361_p0), %s418_s6, 4294963200  ;;  %vm510_vm0 = vcmask 130048   ;;  %v501_v0 = vld [vmem:[#allocation4] sm:$0xff]  ;;  %v502_v1 = vld [vmem:[#allocation4 + $0x8] sm:$0xff]  ;;  %s3674_s30 = scalar_lea.vmem [#allocation12], %s3633_s13  ;;  %s4362_s7 = sld [smem:[#allocation19_spill]] }
 0x13d   : > { %v497_v2 = vld [vmem:[#allocation2] sm:$0xff]  ;;  %v2569_v3 = vpack.c.bf16 %v502_v1, %v501_v0  ;;  %v499_v7 = vld [vmem:[#allocation2 + $0x10] sm:$0xff]  ;;  %v498_v8 = vld [vmem:[#allocation2 + $0x8] sm:$0xff]  ;;  %s4383_s16 = sld [smem:[#allocation28_spill]] }
 0x13e   : > { %2543 = vmatprep.mubr.msk.f32.mxu0 %vm510_vm0, %v497_v2  ;;  %v759_v4 = vld [vmem:[%s421_s24] sm:$0xff]  ;;  %v760_v5 = vld [vmem:[%s421_s24 + $0x8] sm:$0xff]  ;;  %2546 = vmatprep.mubr.msk.f32.mxu1 %vm510_vm0, %v499_v7 }
 0x13f   : > { %v2577_v6 = vpack.c.bf16 %v760_v5, %v759_v4  ;;  %2570 = vmatprep.subr.bf16.mxu0 %v2569_v3  ;;  %2581 = vmatprep.subr.bf16.mxu1 %v2569_v3  ;;  %v500_v9 = vld [vmem:[#allocation2 + $0x18] sm:$0xff]  ;;  %v2434_v13 = vld [vmem:[#allocation6] ss:$0 sm:$0xff]  ;;  %v2443_v23 = vld [vmem:[%s3635_s27] ss:$0 sm:$0xff] }
 0x140   : > { %2572 = vmatpush3.bf16.msra.mxu0 %v2569_v3  ;;  %2582 = vmatpush3.bf16.msra.mxu1 %v2569_v3  ;;  %v652_v10 = vld [vmem:[#allocation7] sm:$0xff]  ;;  %v653_v11 = vld [vmem:[#allocation7 + $0x8] sm:$0xff] }
 0x141   : > { %2578 = vmatprep.subr.bf16.mxu0 %v2577_v6  ;;  %v2573_v12 = vpack.c.bf16 %v653_v11, %v652_v10  ;;  %v899_v11 = vld [vmem:[%s3674_s30] sm:$0xff] }
 0x142   : > { %s490_s20 = sand.u32 1, %s4362_s7  }
 0x143   : > { %2544 = vmatmul.mubr.msk.f32.vlgmr.msra.gmra.mrb[0].mxu0 %vm510_vm0, %v498_v8  ;;  %2547 = vmatmul.mubr.msk.f32.vlgmr.msra.gmra.mrb[0].mxu1 %vm510_vm0, %v500_v9  ;;  %s2433_s22 = sshll.u32 %s490_s20, 9  ;;  %p4384_p6 = scmp.ne.s32.totalorder %s4383_s16, 0 }
 0x144   : > { %2580 = vmatpush3.bf16.msra.mxu0 %v2577_v6  ;;  %2563 = vmatprep.mubr.msk.f32.mxu0 %vm510_vm0, %v497_v2  ;;  %s3949_s18 = scalar_lea.vmem [#allocation13], %s2433_s22  ;;  %s4385_s23 = sld [smem:[#allocation22_spill]] (%p4384_p6) }
 0x145   : > { %2574 = vmatprep.subr.bf16.mxu1 %v2573_v12  ;;  %s4386_s8 = sld [smem:[#allocation23_spill]] (%p4384_p6)  ;;  %s4387_s24 = sld [smem:[#allocation49_spill]] (%p4384_p6) }
 0x146   : > { %2576 = vmatpush3.bf16.msra.mxu1 %v2573_v12  ;;  %v907_v12 = vld [vmem:[%s3674_s30 + $0x40] sm:$0xff] }
 0x147   : > { %2564 = vmatmul.mubr.msk.f32.vlgmr.msra.gmra.mrb[2].mxu0 %vm510_vm0, %v498_v8 }
 0x148   : > { %2566 = vmatprep.mubr.msk.f32.mxu0 %vm510_vm0, %v499_v7 }
 0x14a   : > { %s2513_s10 = sshll.u32 (%p4384_p6), %s4385_s23, 4 }
 0x14b   : > { %2567 = vmatmul.mubr.msk.f32.gmra.mrb[4].mxu0 %vm510_vm0, %v500_v9  ;;  %s2514_s29 = sshll.u32 (%p4384_p6), %s4386_s8, 7 }
 0x14c   : > { %s2090_s4 = sadd.s32 (%p4384_p6), %s2514_s29, %s2513_s10 }
 0x14d   : > { %s2515_s19 = sshll.u32 (%p4384_p6), %s2090_s4, 3 }
 0x14e   : > { %s4091_s25 = scalar_lea.vmem (%p4384_p6), %s4387_s24, %s2515_s19 }
 0x216   : > { %v2545_v14 = vpop.f32.mrb[0].mxu0  ;;  %v2548_v15 = vpop.f32.mrb[0].mxu1 }
 0x217   : > { %v595_v16 = vadd.f32 %v2545_v14, %v2434_v13  ;;  %v589_v17 = vpop.f32.mrb[1].mxu0  ;;  %v605_v18 = vadd.f32 %v2548_v15, %v2434_v13  ;;  %v599_v19 = vpop.f32.mrb[1].mxu1  ;;  %v2449_v14 = vcombine.high %v899_v11, %v907_v12  ;;  %v908_v15 = vld [vmem:[%s3674_s30 + $0x48] sm:$0xff] }
 0x218   : > { %v590_v20 = vadd.f32 %v2434_v13, %v589_v17  ;;  %v600_v21 = vadd.f32 %v2434_v13, %v599_v19  ;;  %v900_v13 = vld [vmem:[%s3674_s30 + $0x8] sm:$0xff] }
 0x219   : > { %v609_v22 = vsub.f32 0.0, %v595_v16  ;;  %v611_v24 = vsub.f32 0.0, %v605_v18  ;;  %v2448_v16 = vcombine.low %v899_v11, %v907_v12  ;;  %v2450_v17 = vcombine.low %v900_v13, %v908_v15  ;;  %1001 = vmatprep.subr.bf16.mxu1 %v2449_v14  ;;  %v1427_v12 = vld [vmem:[%s3638_s26] sm:$0xff]  ;;  %v1428_v14 = vld [vmem:[%s3638_s26 + $0x8] sm:$0xff] }
 0x21a   : > { %v608_v25 = vsub.f32 0.0, %v590_v20  ;;  %v2565_v26 = vpop.f32.mrb[2].mxu0  ;;  %v610_v27 = vsub.f32 0.0, %v600_v21  ;;  %v2451_v18 = vcombine.high %v900_v13, %v908_v15  ;;  %v3173_v21 = vmov 0   ;;  %v1435_v13 = vld [vmem:[%s3638_s26 + $0x40] sm:$0xff]  ;;  %v1436_v15 = vld [vmem:[%s3638_s26 + $0x48] sm:$0xff] }
 0x21b   : > { %v614_v28 = vmul.f32 1.442695, %v609_v22  ;;  %v618_v29 = vmul.f32 1.442695, %v611_v24  ;;  %v834_v30 = vpop.f32.mrb[3].mxu0  ;;  %v3653_v32 = vadd.f32 %v2565_v26, %v2443_v23  ;;  %1086 = vmatprep.mubr.bf16.mxu0 %v3173_v21  ;;  %v909_v26 = vld [vmem:[%s3674_s30 + $0x50] sm:$0xff] }
 0x21c   : > { %v612_v31 = vmul.f32 1.442695, %v608_v25  ;;  %v3655_v33 = vadd.f32 %v2443_v23, %v834_v30  ;;  %v616_v34 = vmul.f32 1.442695, %v610_v27  ;;  %1054 = vmatprep.subr.bf16.mxu0 %v2451_v18  ;;  %v901_v25 = vld [vmem:[%s3674_s30 + $0x10] sm:$0xff]  ;;  %v902_v27 = vld [vmem:[%s3674_s30 + $0x18] sm:$0xff]  ;;  %v2481_v18 = vcombine.high %v1427_v12, %v1435_v13 }
 0x21d   : > { %2756 = vpow2.f32 %v614_v28  ;;  %v856_v40 = vsel %vm510_vm0, %v3653_v32, -inf  ;;  %1055 = vmatpush1.bf16.msra.mxu0 %v2450_v17  ;;  %v2452_v30 = vcombine.low %v901_v25, %v909_v26 }
 0x21e   : > { %2758 = vpow2.f32 %v612_v31  ;;  %v2568_v35 = vpop.f32.mrb[4].mxu0  ;;  %v853_v36 = vsel %vm510_vm0, %v3655_v33, -inf  ;;  %v910_v31 = vld [vmem:[%s3674_s30 + $0x58] sm:$0xff] }
 0x21f   : > { %2760 = vpow2.f32 %v618_v29  ;;  %v844_v37 = vpop.f32.mrb[5].mxu0  ;;  %854 = vmax.xlane.f32.xlu0 %v853_v36  ;;  %v3659_v38 = vadd.f32 %v2568_v35, %v2443_v23  ;;  %v2455_v35 = vcombine.high %v902_v27, %v910_v31 }
 0x220   : > { %2762 = vpow2.f32 %v616_v34  ;;  %v3661_v39 = vadd.f32 %v2443_v23, %v844_v37  ;;  %v2454_v34 = vcombine.low %v902_v27, %v910_v31  ;;  %v2480_v27 = vcombine.low %v1427_v12, %v1435_v13 }
 0x221   : > { %v862_v42 = vsel %vm510_vm0, %v3659_v38, -inf  ;;  %1160 = vmatprep.subr.bf16.mxu0 %v2455_v35 }
 0x222   : > { %v859_v41 = vsel %vm510_vm0, %v3661_v39, -inf }
 0x223   : > { %860 = vmax.xlane.f32.xlu1 %v859_v41  ;;  %857 = vmax.xlane.f32.xlu0 %v856_v40 }
 0x227   : > { %v2757_v43 = vpop.eup %2756  ;;  %863 = vmax.xlane.f32.xlu1 %v862_v42 }
 0x228   : > { %v2759_v44 = vpop.eup %2758  ;;  %v621_v45 = vadd.f32 1.0, %v2757_v43 }
 0x229   : > { %v2761_v46 = vpop.eup %2760  ;;  %v620_v47 = vadd.f32 1.0, %v2759_v44 }
 0x22a   : > { %v2763_v48 = vpop.eup %2762  ;;  %2764 = vrcp.f32 %v621_v45  ;;  %v623_v49 = vadd.f32 1.0, %v2761_v46 }
 0x22b   : > { %2766 = vrcp.f32 %v620_v47  ;;  %v622_v50 = vadd.f32 1.0, %v2763_v48 }
 0x22c   : > { %2768 = vrcp.f32 %v623_v49 }
 0x22d   : > { %2770 = vrcp.f32 %v622_v50 }
 0x234   : > { %v2765_v51 = vpop.eup %2764 }
 0x235   : > { %v2767_v52 = vpop.eup %2766  ;;  %v633_v53 = vmul.f32 0.9702, %v2765_v51 }
 0x236   : > { %v2769_v54 = vpop.eup %2768  ;;  %v632_v55 = vmul.f32 0.9702, %v2767_v52 }
 0x237   : > { %v2771_v56 = vpop.eup %2770  ;;  %v637_v57 = vadd.f32 0.02, %v633_v53  ;;  %v635_v58 = vmul.f32 0.9702, %v2769_v54 }
 0x238   : > { %v636_v59 = vadd.f32 0.02, %v632_v55  ;;  %v634_v60 = vmul.f32 0.9702, %v2771_v56  ;;  %v903_v56 = vld [vmem:[%s3674_s30 + $0x20] sm:$0xff] }
 0x239   : > { %v641_v61 = vadd.f32 1e-12, %v637_v57  ;;  %v639_v62 = vadd.f32 0.02, %v635_v58  ;;  %v911_v58 = vld [vmem:[%s3674_s30 + $0x60] sm:$0xff] }
 0x23a   : > { %v640_v63 = vadd.f32 1e-12, %v636_v59  ;;  %v638_v0 = vadd.f32 0.02, %v634_v60  ;;  %v904_v59 = vld [vmem:[%s3674_s30 + $0x28] sm:$0xff] }
 0x23b   : > { %2772 = vlog2.f32 %v641_v61  ;;  %v643_v1 = vadd.f32 1e-12, %v639_v62  ;;  %v912_v60 = vld [vmem:[%s3674_s30 + $0x68] sm:$0xff] }
 0x23c   : > { %2774 = vlog2.f32 %v640_v63  ;;  %v642_v2 = vadd.f32 1e-12, %v638_v0  ;;  %v2457_v63 = vcombine.high %v903_v56, %v911_v58  ;;  %v2459_v0 = vcombine.high %v904_v59, %v912_v60 }
 0x23d   : > { %2776 = vlog2.f32 %v643_v1 }
 0x23e   : > { %2778 = vlog2.f32 %v642_v2 }
 0x245   : > { %v2773_v3 = vpop.eup %2772 }
 0x246   : > { %v2775_v4 = vpop.eup %2774  ;;  %v647_v8 = vmul.f32 0.6931472, %v2773_v3 }
 0x247   : > { %v2777_v5 = vpop.eup %2776  ;;  %v645_v6 = vmul.f32 0.6931472, %v2775_v4  ;;  %v905_v4 = vld [vmem:[%s3674_s30 + $0x30] sm:$0xff] }
 0x248   : > { %v2779_v7 = vpop.eup %2778  ;;  %v651_v10 = vmul.f32 0.6931472, %v2777_v5  ;;  %v913_v5 = vld [vmem:[%s3674_s30 + $0x70] sm:$0xff] }
 0x249   : > { %2553 = vmatprep.mubr.msk.f32.mxu1 %vm510_vm0, %v645_v6  ;;  %v649_v9 = vmul.f32 0.6931472, %v2779_v7  ;;  %v906_v6 = vld [vmem:[%s3674_s30 + $0x38] sm:$0xff] }
 0x24a   : > { %2554 = vmatmul.mubr.msk.f32.vlgmr.msra.gmra.mrb[2].mxu1 %vm510_vm0, %v647_v8  ;;  %v914_v7 = vld [vmem:[%s3674_s30 + $0x78] sm:$0xff]  ;;  %v2456_v8 = vcombine.low %v903_v56, %v911_v58 }
 0x24b   : > { %2556 = vmatprep.mubr.msk.f32.mxu1 %vm510_vm0, %v649_v9  ;;  %1002 = vmatpush1.bf16.msra.mxu1 %v2448_v16  ;;  %v2458_v9 = vcombine.low %v904_v59, %v912_v60  ;;  %v2463_v11 = vcombine.high %v906_v6, %v914_v7  ;;  %v2460_v16 = vcombine.low %v905_v4, %v913_v5 }
 0x24c   : > { %v2462_v17 = vcombine.low %v906_v6, %v914_v7 }
 0x24e   : > { %2557 = vmatmul.mubr.msk.f32.gmra.mrb[4].mxu1 %vm510_vm0, %v651_v10  ;;  %v2461_v10 = vcombine.high %v905_v4, %v913_v5 }
 0x24f   : > { %1033 = vmatprep.mubr.bf16.mxu1 %v3173_v21 }
 0x2ac   : > { %v855_v19 = vpop.xlane.xlu0 %854 }
 0x2ad   : > { %v865_v20 = vsub.f32 %v3655_v33, %v855_v19  ;;  %v2453_v33 = vcombine.high %v901_v25, %v909_v26  ;;  %v2483_v19 = vcombine.high %v1428_v14, %v1436_v15  ;;  %v1430_v25 = vld [vmem:[%s3638_s26 + $0x18] sm:$0xff] }
 0x2ae   : > { %v1438_v26 = vld [vmem:[%s3638_s26 + $0x58] sm:$0xff] }
 0x2af   : > { %v869_v22 = vmul.f32 1.442695, %v865_v20  ;;  %1107 = vmatprep.subr.bf16.mxu1 %v2453_v33 }
 0x2b0   : > { %v861_v23 = vpop.xlane.xlu1 %860  ;;  %v858_v24 = vpop.xlane.xlu0 %857 }
 0x2b1   : > { %2780 = vpow2.f32 %v869_v22  ;;  %v867_v28 = vsub.f32 %v3661_v39, %v861_v23  ;;  %v866_v29 = vsub.f32 %v3653_v32, %v858_v24  ;;  %v1429_v22 = vld [vmem:[%s3638_s26 + $0x10] sm:$0xff] }
 0x2b2   : > { %v1437_v24 = vld [vmem:[%s3638_s26 + $0x50] sm:$0xff] }
 0x2b3   : > { %v873_v36 = vmul.f32 1.442695, %v867_v28  ;;  %v871_v37 = vmul.f32 1.442695, %v866_v29  ;;  %v2482_v28 = vcombine.low %v1428_v14, %v1436_v15  ;;  %v2485_v29 = vcombine.high %v1429_v22, %v1437_v24 }
 0x2b4   : > { %v864_v40 = vpop.xlane.xlu1 %863 }
 0x2b5   : > { %2782 = vpow2.f32 %v873_v36  ;;  %v868_v41 = vsub.f32 %v3659_v38, %v864_v40 }
 0x2b6   : > { %2784 = vpow2.f32 %v871_v37  ;;  %v1431_v37 = vld [vmem:[%s3638_s26 + $0x20] sm:$0xff] }
 0x2b7   : > { %v875_v42 = vmul.f32 1.442695, %v868_v41  ;;  %v1439_v41 = vld [vmem:[%s3638_s26 + $0x60] sm:$0xff] }
 0x2b8   : > { %v2488_v56 = vcombine.low %v1431_v37, %v1439_v41 }
 0x2b9   : > { %2786 = vpow2.f32 %v875_v42  ;;  %v1432_v42 = vld [vmem:[%s3638_s26 + $0x28] sm:$0xff] }
 0x2bb   : > { %v3690_v43 = vpop.eup %2780 }
 0x2bc   : > { %v877_v32 = vsel %vm510_vm0, %v3690_v43, 0.0 }
 0x2bd   : > { %878 = vadd.xlane.f32.xlu0 %v877_v32  ;;  %v1440_v32 = vld [vmem:[%s3638_s26 + $0x68] sm:$0xff] }
 0x2bf   : > { %v3694_v39 = vpop.eup %2782 }
 0x2c0   : > { %v3696_v44 = vpop.eup %2784  ;;  %v883_v45 = vsel %vm510_vm0, %v3694_v39, 0.0 }
 0x2c1   : > { %884 = vadd.xlane.f32.xlu0 %v883_v45  ;;  %v880_v38 = vsel %vm510_vm0, %v3696_v44, 0.0  ;;  %v2484_v45 = vcombine.low %v1429_v22, %v1437_v24 }
 0x2c2   : > { %881 = vadd.xlane.f32.xlu1 %v880_v38  ;;  %v2486_v38 = vcombine.low %v1430_v25, %v1438_v26 }
 0x2c3   : > { %v3702_v46 = vpop.eup %2786 }
 0x2c4   : > { %v886_v47 = vsel %vm510_vm0, %v3702_v46, 0.0 }
 0x2c6   : > { %887 = vadd.xlane.f32.xlu1 %v886_v47 }
 0x31d   : > { %v2555_v48 = vpop.f32.mrb[2].mxu1 }
 0x31e   : > { %v753_v49 = vmul.f32 1.442695, %v2555_v48  ;;  %v732_v50 = vpop.f32.mrb[3].mxu1 }
 0x31f   : > { %v751_v51 = vmul.f32 1.442695, %v732_v50  ;;  %v2491_v50 = vcombine.high %v1432_v42, %v1440_v32 }
 0x320   : > { %2788 = vpow2.f32 %v753_v49  ;;  %v2489_v49 = vcombine.high %v1431_v37, %v1439_v41 }
 0x321   : > { %2790 = vpow2.f32 %v751_v51  ;;  %v2558_v52 = vpop.f32.mrb[4].mxu1 }
 0x322   : > { %v757_v53 = vmul.f32 1.442695, %v2558_v52  ;;  %v742_v54 = vpop.f32.mrb[5].mxu1 }
 0x323   : > { %v755_v55 = vmul.f32 1.442695, %v742_v54  ;;  %v1441_v54 = vld [vmem:[%s3638_s26 + $0x70] sm:$0xff] }
 0x324   : > { %2792 = vpow2.f32 %v757_v53  ;;  %v1433_v53 = vld [vmem:[%s3638_s26 + $0x30] sm:$0xff] }
 0x325   : > { %2794 = vpow2.f32 %v755_v55  ;;  %v1442_v55 = vld [vmem:[%s3638_s26 + $0x78] sm:$0xff]  ;;  %v2493_v58 = vcombine.high %v1433_v53, %v1441_v54 }
 0x32a   : > { %v2789_v57 = vpop.eup %2788 }
 0x32b   : > { %v2791_v61 = vpop.eup %2790 }
 0x32c   : > { %v3710_v62 = vpack.c.bf16 %v2789_v57, %v2791_v61  ;;  %v2490_v57 = vcombine.low %v1432_v42, %v1440_v32 }
 0x32e   : > { %v2793_v1 = vpop.eup %2792  ;;  %2464 = vmatmul.mubr.msk.bf16.vlgmr.msra.gmra.mrb[8].mxu1 %vm510_vm0, %v3710_v62  ;;  %2466 = vmatmul.mubr.msk.bf16.vlgmr.msra.gmra.mrb[8].mxu0 %vm510_vm0, %v3710_v62 }
 0x32f   : > { %v2795_v2 = vpop.eup %2794  ;;  %1108 = vmatpush1.bf16.msra.mxu1 %v2452_v30  ;;  %1161 = vmatpush1.bf16.msra.mxu0 %v2454_v34  ;;  %v2487_v30 = vcombine.high %v1430_v25, %v1438_v26 }
 0x330   : > { %v3716_v3 = vpack.c.bf16 %v2793_v1, %v2795_v2  ;;  %1043 = vmatprep.mubr.bf16.mxu1 %v3173_v21  ;;  %1096 = vmatprep.mubr.bf16.mxu0 %v3173_v21 }
 0x331   : > { %1213 = vmatprep.subr.bf16.mxu1 %v2457_v63  ;;  %1266 = vmatprep.subr.bf16.mxu0 %v2459_v0 }
 0x336   : > { %2465 = vmatmul.mubr.msk.bf16.gmra.mrb[12].mxu1 %vm510_vm0, %v3716_v3  ;;  %2467 = vmatmul.mubr.msk.bf16.gmra.mrb[12].mxu0 %vm510_vm0, %v3716_v3 }
 0x337   : > { %1139 = vmatprep.mubr.bf16.mxu1 %v3173_v21  ;;  %1192 = vmatprep.mubr.bf16.mxu0 %v3173_v21 }
 0x33e   : > { %2468 = vmatmul.mubr.msk.bf16.vlgmr.msra.gmra.mrb[16].mxu1 %vm510_vm0, %v3710_v62  ;;  %2470 = vmatmul.mubr.msk.bf16.vlgmr.msra.gmra.mrb[16].mxu0 %vm510_vm0, %v3710_v62 }
 0x33f   : > { %1214 = vmatpush1.bf16.msra.mxu1 %v2456_v8  ;;  %1267 = vmatpush1.bf16.msra.mxu0 %v2458_v9 }
 0x340   : > { %1149 = vmatprep.mubr.bf16.mxu1 %v3173_v21  ;;  %1202 = vmatprep.mubr.bf16.mxu0 %v3173_v21 }
 0x341   : > { %1319 = vmatprep.subr.bf16.mxu1 %v2461_v10  ;;  %1372 = vmatprep.subr.bf16.mxu0 %v2463_v11 }
 0x346   : > { %2469 = vmatmul.mubr.msk.bf16.gmra.mrb[20].mxu1 %vm510_vm0, %v3716_v3  ;;  %2471 = vmatmul.mubr.msk.bf16.gmra.mrb[20].mxu0 %vm510_vm0, %v3716_v3 }
 0x347   : > { %1245 = vmatprep.mubr.bf16.mxu1 %v3173_v21  ;;  %1298 = vmatprep.mubr.bf16.mxu0 %v3173_v21 }
 0x34a   : > { %v879_v23 = vpop.xlane.xlu0 %878 }
 0x34e   : > { %2472 = vmatmul.mubr.msk.bf16.vlgmr.msra.gmra.mrb[24].mxu1 %vm510_vm0, %v3710_v62  ;;  %2474 = vmatmul.mubr.msk.bf16.vlgmr.msra.gmra.mrb[24].mxu0 %vm510_vm0, %v3710_v62  ;;  %v885_v33 = vpop.xlane.xlu0 %884 }
 0x34f   : > { %1320 = vmatpush1.bf16.msra.mxu1 %v2460_v16  ;;  %1373 = vmatpush1.bf16.msra.mxu0 %v2462_v17  ;;  %v882_v20 = vpop.xlane.xlu1 %881 }
 0x350   : > { %1255 = vmatprep.mubr.bf16.mxu1 %v3173_v21  ;;  %1308 = vmatprep.mubr.bf16.mxu0 %v3173_v21  ;;  %2796 = vrcp.f32 %v882_v20 }
 0x351   : > { %1529 = vmatprep.subr.bf16.mxu1 %v2481_v18  ;;  %1582 = vmatprep.subr.bf16.mxu0 %v2483_v19  ;;  %2798 = vrcp.f32 %v879_v23 }
 0x353   : > { %v888_v31 = vpop.xlane.xlu1 %887 }
 0x354   : > { %2800 = vrcp.f32 %v888_v31 }
 0x355   : > { %2802 = vrcp.f32 %v885_v33 }
 0x356   : > { %2473 = vmatmul.mubr.msk.bf16.gmra.mrb[28].mxu1 %vm510_vm0, %v3716_v3  ;;  %2475 = vmatmul.mubr.msk.bf16.gmra.mrb[28].mxu0 %vm510_vm0, %v3716_v3 }
 0x357   : > { %1351 = vmatprep.mubr.bf16.mxu1 %v3173_v21  ;;  %1404 = vmatprep.mubr.bf16.mxu0 %v3173_v21 }
 0x35a   : > { %v2797_v34 = vpop.eup %2796 }
 0x35b   : > { %v2799_v35 = vpop.eup %2798  ;;  %v894_v36 = vmul.f32 %v2797_v34, %v3696_v44 }
 0x35c   : > { %v893_v40 = vmul.f32 %v2799_v35, %v3690_v43 }
 0x35e   : > { %2476 = vmatmul.mubr.msk.bf16.vlgmr.msra.gmra.mrb[32].mxu1 %vm510_vm0, %v3710_v62  ;;  %2478 = vmatmul.mubr.msk.bf16.vlgmr.msra.gmra.mrb[32].mxu0 %vm510_vm0, %v3710_v62  ;;  %v1425_v47 = vpack.c.bf16 %v894_v36, %v893_v40  ;;  %v2801_v48 = vpop.eup %2800 }
 0x35f   : > { %1530 = vmatpush1.bf16.msra.mxu1 %v2480_v27  ;;  %1583 = vmatpush1.bf16.msra.mxu0 %v2482_v28  ;;  %v2803_v51 = vpop.eup %2802  ;;  %v896_v43 = vmul.f32 %v2801_v48, %v3702_v46  ;;  %v1434_v46 = vld [vmem:[%s3638_s26 + $0x38] sm:$0xff] }
 0x360   : > { %1361 = vmatprep.mubr.bf16.mxu1 %v3173_v21  ;;  %1414 = vmatprep.mubr.bf16.mxu0 %v3173_v21  ;;  %v895_v44 = vmul.f32 %v2803_v51, %v3694_v39  ;;  %v2495_v59 = vcombine.high %v1434_v46, %v1442_v55  ;;  %v2492_v39 = vcombine.low %v1433_v53, %v1441_v54 }
 0x361   : > { %1635 = vmatprep.subr.bf16.mxu1 %v2485_v29  ;;  %1688 = vmatprep.subr.bf16.mxu0 %v2487_v30  ;;  %v2494_v60 = vcombine.low %v1434_v46, %v1442_v55 }
 0x362   : > { %v1426_v52 = vpack.c.bf16 %v896_v43, %v895_v44 }
 0x366   : > { %2477 = vmatmul.mubr.msk.bf16.gmra.mrb[36].mxu1 %vm510_vm0, %v3716_v3  ;;  %2479 = vmatmul.mubr.msk.bf16.gmra.mrb[36].mxu0 %vm510_vm0, %v3716_v3 }
 0x367   : > { %1561 = vmatprep.mubr.bf16.mxu1 %v3173_v21  ;;  %1614 = vmatprep.mubr.bf16.mxu0 %v3173_v21 }
 0x36e   : > { %2496 = vmatmul.mubr.msk.bf16.vlgmr.msra.gmra.mrb[40].mxu1 %vm510_vm0, %v1425_v47  ;;  %2498 = vmatmul.mubr.msk.bf16.vlgmr.msra.gmra.mrb[40].mxu0 %vm510_vm0, %v1425_v47 }
 0x36f   : > { %1636 = vmatpush1.bf16.msra.mxu1 %v2484_v45  ;;  %1689 = vmatpush1.bf16.msra.mxu0 %v2486_v38 }
 0x370   : > { %1571 = vmatprep.mubr.bf16.mxu1 %v3173_v21  ;;  %1624 = vmatprep.mubr.bf16.mxu0 %v3173_v21 }
 0x371   : > { %1741 = vmatprep.subr.bf16.mxu1 %v2489_v49  ;;  %1794 = vmatprep.subr.bf16.mxu0 %v2491_v50 }
 0x376   : > { %2497 = vmatmul.mubr.msk.bf16.gmra.mrb[44].mxu1 %vm510_vm0, %v1426_v52  ;;  %2499 = vmatmul.mubr.msk.bf16.gmra.mrb[44].mxu0 %vm510_vm0, %v1426_v52 }
 0x377   : > { %1667 = vmatprep.mubr.bf16.mxu1 %v3173_v21  ;;  %1720 = vmatprep.mubr.bf16.mxu0 %v3173_v21 }
 0x37e   : > { %2500 = vmatmul.mubr.msk.bf16.vlgmr.msra.gmra.mrb[48].mxu1 %vm510_vm0, %v1425_v47  ;;  %2502 = vmatmul.mubr.msk.bf16.vlgmr.msra.gmra.mrb[48].mxu0 %vm510_vm0, %v1425_v47 }
 0x37f   : > { %1742 = vmatpush1.bf16.msra.mxu1 %v2488_v56  ;;  %1795 = vmatpush1.bf16.msra.mxu0 %v2490_v57 }
 0x380   : > { %1677 = vmatprep.mubr.bf16.mxu1 %v3173_v21  ;;  %1730 = vmatprep.mubr.bf16.mxu0 %v3173_v21 }
 0x381   : > { %1847 = vmatprep.subr.bf16.mxu1 %v2493_v58  ;;  %1900 = vmatprep.subr.bf16.mxu0 %v2495_v59 }
 0x386   : > { %2501 = vmatmul.mubr.msk.bf16.gmra.mrb[52].mxu1 %vm510_vm0, %v1426_v52  ;;  %2503 = vmatmul.mubr.msk.bf16.gmra.mrb[52].mxu0 %vm510_vm0, %v1426_v52 }
 0x387   : > { %1773 = vmatprep.mubr.bf16.mxu1 %v3173_v21  ;;  %1826 = vmatprep.mubr.bf16.mxu0 %v3173_v21 }
 0x38e   : > { %2504 = vmatmul.mubr.msk.bf16.vlgmr.msra.gmra.mrb[56].mxu1 %vm510_vm0, %v1425_v47  ;;  %2506 = vmatmul.mubr.msk.bf16.vlgmr.msra.gmra.mrb[56].mxu0 %vm510_vm0, %v1425_v47 }
 0x38f   : > { %1848 = vmatpush1.bf16.msra.mxu1 %v2492_v39  ;;  %1901 = vmatpush1.bf16.msra.mxu0 %v2494_v60 }
 0x390   : > { %1783 = vmatprep.mubr.bf16.mxu1 %v3173_v21  ;;  %1836 = vmatprep.mubr.bf16.mxu0 %v3173_v21 }
 0x396   : > { %2505 = vmatmul.mubr.msk.bf16.gmra.mrb[60].mxu1 %vm510_vm0, %v1426_v52  ;;  %2507 = vmatmul.mubr.msk.bf16.gmra.mrb[60].mxu0 %vm510_vm0, %v1426_v52 }
 0x397   : > { %1879 = vmatprep.mubr.bf16.mxu1 %v3173_v21  ;;  %1932 = vmatprep.mubr.bf16.mxu0 %v3173_v21 }
 0x39e   : > { %2508 = vmatmul.mubr.msk.bf16.vlgmr.msra.gmra.mrb[64].mxu1 %vm510_vm0, %v1425_v47  ;;  %2510 = vmatmul.mubr.msk.bf16.vlgmr.msra.gmra.mrb[64].mxu0 %vm510_vm0, %v1425_v47 }
 0x39f   : > { %1889 = vmatprep.mubr.bf16.mxu1 %v3173_v21  ;;  %1942 = vmatprep.mubr.bf16.mxu0 %v3173_v21 }
 0x3a6   : > { %2509 = vmatmul.mubr.msk.bf16.gmra.mrb[68].mxu1 %vm510_vm0, %v1426_v52  ;;  %2511 = vmatmul.mubr.msk.bf16.gmra.mrb[68].mxu0 %vm510_vm0, %v1426_v52 }
 0x401   : > { %v3816_v61 = vpop.f32.mrb[8].mxu1  ;;  %v3818_v62 = vpop.f32.mrb[8].mxu0 }
 0x402   : > { %v3820_v63 = vpop.f32.mrb[9].mxu1  ;;  %v3822_v0 = vpop.f32.mrb[9].mxu0 }
 0x403   : > { %v3824_v1 = vpop.f32.mrb[10].mxu1  ;;  %v3826_v2 = vpop.f32.mrb[10].mxu0 }
 0x404   : > { %v3828_v3 = vpop.f32.mrb[11].mxu1  ;;  %v3830_v4 = vpop.f32.mrb[11].mxu0 }
 0x409   : > { %v3832_v21 = vpop.f32.mrb[12].mxu1  ;;  %v3834_v5 = vpop.f32.mrb[12].mxu0 }
 0x40a   : > { %v3836_v6 = vpop.f32.mrb[13].mxu1  ;;  %v3838_v7 = vpop.f32.mrb[13].mxu0 }
 0x40b   : > { %v3840_v8 = vpop.f32.mrb[14].mxu1  ;;  %v3842_v9 = vpop.f32.mrb[14].mxu0 }
 0x40c   : > { %v3844_v10 = vpop.f32.mrb[15].mxu1  ;;  %v3846_v11 = vpop.f32.mrb[15].mxu0 }
 0x411   : > { %v3848_v12 = vpop.f32.mrb[16].mxu1  ;;  %v3850_v13 = vpop.f32.mrb[16].mxu0 }
 0x412   : > { %v3852_v14 = vpop.f32.mrb[17].mxu1  ;;  %v3854_v15 = vpop.f32.mrb[17].mxu0 }
 0x413   : > { %v3856_v16 = vpop.f32.mrb[18].mxu1  ;;  %v3858_v17 = vpop.f32.mrb[18].mxu0 }
 0x414   : > { %v3860_v18 = vpop.f32.mrb[19].mxu1  ;;  %v3862_v19 = vpop.f32.mrb[19].mxu0 }
 0x419   : > { %v3864_v20 = vpop.f32.mrb[20].mxu1  ;;  %v3866_v22 = vpop.f32.mrb[20].mxu0 }
 0x41a   : > { %v3868_v23 = vpop.f32.mrb[21].mxu1  ;;  %v3870_v24 = vpop.f32.mrb[21].mxu0 }
 0x41b   : > { %v3872_v25 = vpop.f32.mrb[22].mxu1  ;;  %v3874_v26 = vpop.f32.mrb[22].mxu0 }
 0x41c   : > { %v3876_v27 = vpop.f32.mrb[23].mxu1  ;;  %v3878_v28 = vpop.f32.mrb[23].mxu0 }
 0x421   : > { %v3880_v29 = vpop.f32.mrb[24].mxu1  ;;  %v3882_v30 = vpop.f32.mrb[24].mxu0 }
 0x422   : > { %v3884_v31 = vpop.f32.mrb[25].mxu1  ;;  %v3886_v33 = vpop.f32.mrb[25].mxu0 }
 0x423   : > { %v3888_v34 = vpop.f32.mrb[26].mxu1  ;;  %v3890_v35 = vpop.f32.mrb[26].mxu0 }
 0x424   : > { %v3892_v36 = vpop.f32.mrb[27].mxu1  ;;  %v3894_v37 = vpop.f32.mrb[27].mxu0 }
 0x429   : > { %v3896_v40 = vpop.f32.mrb[28].mxu1  ;;  %v3898_v41 = vpop.f32.mrb[28].mxu0 }
 0x42a   : > { %v3900_v42 = vpop.f32.mrb[29].mxu1  ;;  %v3902_v32 = vpop.f32.mrb[29].mxu0 }
 0x42b   : > { %v3904_v45 = vpop.f32.mrb[30].mxu1  ;;  %v3906_v38 = vpop.f32.mrb[30].mxu0 }
 0x42c   : > { %v3908_v47 = vpop.f32.mrb[31].mxu1  ;;  %v3910_v48 = vpop.f32.mrb[31].mxu0 }
 0x431   : > { %v3912_v49 = vpop.f32.mrb[32].mxu1  ;;  %v3914_v50 = vpop.f32.mrb[32].mxu0 }
 0x432   : > { %v3916_v51 = vpop.f32.mrb[33].mxu1  ;;  %v3918_v43 = vpop.f32.mrb[33].mxu0 }
 0x433   : > { %v3920_v44 = vpop.f32.mrb[34].mxu1  ;;  %v3922_v52 = vpop.f32.mrb[34].mxu0 }
 0x434   : > { %4363 = vst [vmem:[#allocation33_spill] sm:$0xff] %v3920_v44  ;;  %4364 = vst [vmem:[#allocation34_spill] sm:$0xff] %v3922_v52  ;;  %v3924_v53 = vpop.f32.mrb[35].mxu1  ;;  %v3926_v54 = vpop.f32.mrb[35].mxu0 }
 0x435   : > { %4365 = vst [vmem:[#allocation35_spill] sm:$0xff] %v3924_v53  ;;  %4366 = vst [vmem:[#allocation36_spill] sm:$0xff] %v3926_v54 }
 0x439   : > { %v3928_v46 = vpop.f32.mrb[36].mxu1  ;;  %v3930_v55 = vpop.f32.mrb[36].mxu0 }
 0x43a   : > { %4367 = vst [vmem:[#allocation37_spill] sm:$0xff] %v3928_v46  ;;  %4368 = vst [vmem:[#allocation38_spill] sm:$0xff] %v3930_v55  ;;  %v3932_v56 = vpop.f32.mrb[37].mxu1  ;;  %v3934_v57 = vpop.f32.mrb[37].mxu0 }
 0x43b   : > { %4369 = vst [vmem:[#allocation39_spill] sm:$0xff] %v3932_v56  ;;  %4370 = vst [vmem:[#allocation40_spill] sm:$0xff] %v3934_v57  ;;  %v3936_v58 = vpop.f32.mrb[38].mxu1  ;;  %v3938_v59 = vpop.f32.mrb[38].mxu0 }
 0x43c   : > { %4371 = vst [vmem:[#allocation41_spill] sm:$0xff] %v3936_v58  ;;  %4372 = vst [vmem:[#allocation42_spill] sm:$0xff] %v3938_v59  ;;  %v3941_v39 = vpop.f32.mrb[39].mxu1  ;;  %v3943_v60 = vpop.f32.mrb[39].mxu0 }
 0x441   : > { %v1563_v53 = vpop.f32.mrb[40].mxu1  ;;  %v1616_v54 = vpop.f32.mrb[40].mxu0 }
 0x442   : > { %v1953_v46 = vmul.f32 %v1563_v53, %v3816_v61  ;;  %v1955_v55 = vmul.f32 %v1616_v54, %v3818_v62  ;;  %v1565_v52 = vpop.f32.mrb[41].mxu1  ;;  %v1618_v56 = vpop.f32.mrb[41].mxu0 }
 0x443   : > { %v1954_v57 = vmul.f32 %v1565_v52, %v3820_v63  ;;  %v1956_v58 = vmul.f32 %v1618_v56, %v3822_v0  ;;  %v1567_v44 = vpop.f32.mrb[42].mxu1  ;;  %v1620_v59 = vpop.f32.mrb[42].mxu0 }
 0x444   : > { %2017 = vst [vmem:[%s3949_s18] sm:$0xff] %v1953_v46  ;;  %2019 = vst [vmem:[%s3949_s18 + $0x10] sm:$0xff] %v1955_v55  ;;  %v1969_v61 = vmul.f32 %v1567_v44, %v3824_v1  ;;  %v1971_v62 = vmul.f32 %v1620_v59, %v3826_v2  ;;  %v1569_v63 = vpop.f32.mrb[43].mxu1  ;;  %v1622_v0 = vpop.f32.mrb[43].mxu0 }
 0x445   : > { %2018 = vst [vmem:[%s3949_s18 + $0x8] sm:$0xff] %v1954_v57  ;;  %2020 = vst [vmem:[%s3949_s18 + $0x18] sm:$0xff] %v1956_v58  ;;  %v1970_v52 = vmul.f32 %v1569_v63, %v3828_v3  ;;  %v1972_v53 = vmul.f32 %v1622_v0, %v3830_v4 }
 0x446   : > { %2033 = vst [vmem:[%s3949_s18 + $0x80] sm:$0xff] %v1969_v61  ;;  %2035 = vst [vmem:[%s3949_s18 + $0x90] sm:$0xff] %v1971_v62 }
 0x447   : > { %2034 = vst [vmem:[%s3949_s18 + $0x88] sm:$0xff] %v1970_v52  ;;  %2036 = vst [vmem:[%s3949_s18 + $0x98] sm:$0xff] %v1972_v53 }
 0x449   : > { %v1573_v54 = vpop.f32.mrb[44].mxu1  ;;  %v1626_v46 = vpop.f32.mrb[44].mxu0 }
 0x44a   : > { %v1985_v1 = vmul.f32 %v1573_v54, %v3832_v21  ;;  %v1987_v2 = vmul.f32 %v1626_v46, %v3834_v5  ;;  %v1575_v44 = vpop.f32.mrb[45].mxu1  ;;  %v1628_v55 = vpop.f32.mrb[45].mxu0 }
 0x44b   : > { %v1986_v3 = vmul.f32 %v1575_v44, %v3836_v6  ;;  %v1988_v4 = vmul.f32 %v1628_v55, %v3838_v7  ;;  %v1577_v56 = vpop.f32.mrb[46].mxu1  ;;  %v1630_v57 = vpop.f32.mrb[46].mxu0 }
 0x44c   : > { %2049 = vst [vmem:[%s3949_s18 + $0x100] sm:$0xff] %v1985_v1  ;;  %2051 = vst [vmem:[%s3949_s18 + $0x110] sm:$0xff] %v1987_v2  ;;  %v2001_v58 = vmul.f32 %v1577_v56, %v3840_v8  ;;  %v2003_v21 = vmul.f32 %v1630_v57, %v3842_v9  ;;  %v1579_v59 = vpop.f32.mrb[47].mxu1  ;;  %v1632_v5 = vpop.f32.mrb[47].mxu0 }
 0x44d   : > { %2050 = vst [vmem:[%s3949_s18 + $0x108] sm:$0xff] %v1986_v3  ;;  %2052 = vst [vmem:[%s3949_s18 + $0x118] sm:$0xff] %v1988_v4  ;;  %v2002_v61 = vmul.f32 %v1579_v59, %v3844_v10  ;;  %v2004_v6 = vmul.f32 %v1632_v5, %v3846_v11 }
 0x44e   : > { %2065 = vst [vmem:[%s3949_s18 + $0x180] sm:$0xff] %v2001_v58  ;;  %2067 = vst [vmem:[%s3949_s18 + $0x190] sm:$0xff] %v2003_v21 }
 0x44f   : > { %2066 = vst [vmem:[%s3949_s18 + $0x188] sm:$0xff] %v2002_v61  ;;  %2068 = vst [vmem:[%s3949_s18 + $0x198] sm:$0xff] %v2004_v6 }
 0x451   : > { %v1669_v7 = vpop.f32.mrb[48].mxu1  ;;  %v1722_v62 = vpop.f32.mrb[48].mxu0 }
 0x452   : > { %v1957_v8 = vmul.f32 %v1669_v7, %v3848_v12  ;;  %v1959_v9 = vmul.f32 %v1722_v62, %v3850_v13  ;;  %v1671_v63 = vpop.f32.mrb[49].mxu1  ;;  %v1724_v0 = vpop.f32.mrb[49].mxu0 }
 0x453   : > { %v1958_v10 = vmul.f32 %v1671_v63, %v3852_v14  ;;  %v1960_v11 = vmul.f32 %v1724_v0, %v3854_v15  ;;  %v1673_v52 = vpop.f32.mrb[50].mxu1  ;;  %v1726_v53 = vpop.f32.mrb[50].mxu0 }
 0x454   : > { %2021 = vst [vmem:[%s3949_s18 + $0x20] sm:$0xff] %v1957_v8  ;;  %2023 = vst [vmem:[%s3949_s18 + $0x30] sm:$0xff] %v1959_v9  ;;  %v1973_v54 = vmul.f32 %v1673_v52, %v3856_v16  ;;  %v1975_v12 = vmul.f32 %v1726_v53, %v3858_v17  ;;  %v1675_v46 = vpop.f32.mrb[51].mxu1  ;;  %v1728_v13 = vpop.f32.mrb[51].mxu0 }
 0x455   : > { %2022 = vst [vmem:[%s3949_s18 + $0x28] sm:$0xff] %v1958_v10  ;;  %2024 = vst [vmem:[%s3949_s18 + $0x38] sm:$0xff] %v1960_v11  ;;  %v1974_v1 = vmul.f32 %v1675_v46, %v3860_v18  ;;  %v1976_v14 = vmul.f32 %v1728_v13, %v3862_v19 }
 0x456   : > { %2037 = vst [vmem:[%s3949_s18 + $0xa0] sm:$0xff] %v1973_v54  ;;  %2039 = vst [vmem:[%s3949_s18 + $0xb0] sm:$0xff] %v1975_v12 }
 0x457   : > { %2038 = vst [vmem:[%s3949_s18 + $0xa8] sm:$0xff] %v1974_v1  ;;  %2040 = vst [vmem:[%s3949_s18 + $0xb8] sm:$0xff] %v1976_v14 }
 0x459   : > { %v1679_v15 = vpop.f32.mrb[52].mxu1  ;;  %v1732_v2 = vpop.f32.mrb[52].mxu0 }
 0x45a   : > { %v1989_v16 = vmul.f32 %v1679_v15, %v3864_v20  ;;  %v1991_v17 = vmul.f32 %v1732_v2, %v3866_v22  ;;  %v1681_v44 = vpop.f32.mrb[53].mxu1  ;;  %v1734_v55 = vpop.f32.mrb[53].mxu0  ;;  %v4373_v15 = vld [vmem:[#allocation33_spill] sm:$0xff] }
 0x45b   : > { %v1990_v18 = vmul.f32 %v1681_v44, %v3868_v23  ;;  %v1992_v19 = vmul.f32 %v1734_v55, %v3870_v24  ;;  %v1683_v3 = vpop.f32.mrb[54].mxu1  ;;  %v1736_v4 = vpop.f32.mrb[54].mxu0  ;;  %v4375_v44 = vld [vmem:[#allocation35_spill] sm:$0xff] }
 0x45c   : > { %2053 = vst [vmem:[%s3949_s18 + $0x120] sm:$0xff] %v1989_v16  ;;  %2055 = vst [vmem:[%s3949_s18 + $0x130] sm:$0xff] %v1991_v17  ;;  %v2005_v56 = vmul.f32 %v1683_v3, %v3872_v25  ;;  %v2007_v20 = vmul.f32 %v1736_v4, %v3874_v26  ;;  %v1685_v57 = vpop.f32.mrb[55].mxu1  ;;  %v1738_v22 = vpop.f32.mrb[55].mxu0  ;;  %v4374_v16 = vld [vmem:[#allocation34_spill] sm:$0xff]  ;;  %v4377_v3 = vld [vmem:[#allocation37_spill] sm:$0xff] }
 0x45d   : > { %2054 = vst [vmem:[%s3949_s18 + $0x128] sm:$0xff] %v1990_v18  ;;  %2056 = vst [vmem:[%s3949_s18 + $0x138] sm:$0xff] %v1992_v19  ;;  %v2006_v58 = vmul.f32 %v1685_v57, %v3876_v27  ;;  %v2008_v23 = vmul.f32 %v1738_v22, %v3878_v28  ;;  %v4376_v18 = vld [vmem:[#allocation36_spill] sm:$0xff] }
 0x45e   : > { %2069 = vst [vmem:[%s3949_s18 + $0x1a0] sm:$0xff] %v2005_v56  ;;  %2071 = vst [vmem:[%s3949_s18 + $0x1b0] sm:$0xff] %v2007_v20  ;;  %v4378_v56 = vld [vmem:[#allocation38_spill] sm:$0xff] }
 0x45f   : > { %2070 = vst [vmem:[%s3949_s18 + $0x1a8] sm:$0xff] %v2006_v58  ;;  %2072 = vst [vmem:[%s3949_s18 + $0x1b8] sm:$0xff] %v2008_v23  ;;  %v4379_v58 = vld [vmem:[#allocation39_spill] sm:$0xff] }
 0x461   : > { %v1775_v24 = vpop.f32.mrb[56].mxu1  ;;  %v1828_v21 = vpop.f32.mrb[56].mxu0 }
 0x462   : > { %v1961_v25 = vmul.f32 %v1775_v24, %v3880_v29  ;;  %v1963_v26 = vmul.f32 %v1828_v21, %v3882_v30  ;;  %v1777_v59 = vpop.f32.mrb[57].mxu1  ;;  %v1830_v5 = vpop.f32.mrb[57].mxu0  ;;  %v4380_v24 = vld [vmem:[#allocation40_spill] sm:$0xff] }
 0x463   : > { %v1962_v27 = vmul.f32 %v1777_v59, %v3884_v31  ;;  %v1964_v28 = vmul.f32 %v1830_v5, %v3886_v33  ;;  %v1779_v61 = vpop.f32.mrb[58].mxu1  ;;  %v1832_v6 = vpop.f32.mrb[58].mxu0  ;;  %v4381_v59 = vld [vmem:[#allocation41_spill] sm:$0xff] }
 0x464   : > { %2025 = vst [vmem:[%s3949_s18 + $0x40] sm:$0xff] %v1961_v25  ;;  %2027 = vst [vmem:[%s3949_s18 + $0x50] sm:$0xff] %v1963_v26  ;;  %v1977_v7 = vmul.f32 %v1779_v61, %v3888_v34  ;;  %v1979_v29 = vmul.f32 %v1832_v6, %v3890_v35  ;;  %v1781_v62 = vpop.f32.mrb[59].mxu1  ;;  %v1834_v30 = vpop.f32.mrb[59].mxu0 }
 0x465   : > { %2026 = vst [vmem:[%s3949_s18 + $0x48] sm:$0xff] %v1962_v27  ;;  %2028 = vst [vmem:[%s3949_s18 + $0x58] sm:$0xff] %v1964_v28  ;;  %v1978_v8 = vmul.f32 %v1781_v62, %v3892_v36  ;;  %v1980_v31 = vmul.f32 %v1834_v30, %v3894_v37  ;;  %v4382_v27 = vld [vmem:[#allocation42_spill] sm:$0xff]  ;;  %v2109_v62 = vld [vmem:[%s3949_s18 + $0x10] sm:$0xff] (%p4384_p6) }
 0x466   : > { %2041 = vst [vmem:[%s3949_s18 + $0xc0] sm:$0xff] %v1977_v7  ;;  %2043 = vst [vmem:[%s3949_s18 + $0xd0] sm:$0xff] %v1979_v29  ;;  %v2111_v30 = vld [vmem:[%s3949_s18 + $0x18] sm:$0xff] (%p4384_p6) }
 0x467   : > { %2042 = vst [vmem:[%s3949_s18 + $0xc8] sm:$0xff] %v1978_v8  ;;  %2044 = vst [vmem:[%s3949_s18 + $0xd8] sm:$0xff] %v1980_v31  ;;  %v2113_v8 = vld [vmem:[%s3949_s18 + $0x20] sm:$0xff] (%p4384_p6)  ;;  %v2115_v31 = vld [vmem:[%s3949_s18 + $0x28] sm:$0xff] (%p4384_p6) }
 0x468   : > { %2110 = vst [vmem:[%s4091_s25 + $0x10] sm:$0xff] (%p4384_p6), %v2109_v62  ;;  %2112 = vst [vmem:[%s4091_s25 + $0x18] sm:$0xff] (%p4384_p6), %v2111_v30 }
 0x469   : > { %v1785_v33 = vpop.f32.mrb[60].mxu1  ;;  %v1838_v9 = vpop.f32.mrb[60].mxu0  ;;  %2114 = vst [vmem:[%s4091_s25 + $0x20] sm:$0xff] (%p4384_p6), %v2113_v8  ;;  %2116 = vst [vmem:[%s4091_s25 + $0x28] sm:$0xff] (%p4384_p6), %v2115_v31 }
 0x46a   : > { %v1993_v34 = vmul.f32 %v1785_v33, %v3896_v40  ;;  %v1995_v35 = vmul.f32 %v1838_v9, %v3898_v41  ;;  %v1787_v63 = vpop.f32.mrb[61].mxu1  ;;  %v1840_v0 = vpop.f32.mrb[61].mxu0  ;;  %v2117_v33 = vld [vmem:[%s3949_s18 + $0x30] sm:$0xff] (%p4384_p6)  ;;  %v2119_v9 = vld [vmem:[%s3949_s18 + $0x38] sm:$0xff] (%p4384_p6) }
 0x46b   : > { %v1994_v36 = vmul.f32 %v1787_v63, %v3900_v42  ;;  %v1996_v37 = vmul.f32 %v1840_v0, %v3902_v32  ;;  %v1789_v10 = vpop.f32.mrb[62].mxu1  ;;  %v1842_v11 = vpop.f32.mrb[62].mxu0  ;;  %v2125_v63 = vld [vmem:[%s3949_s18 + $0x50] sm:$0xff] (%p4384_p6)  ;;  %2118 = vst [vmem:[%s4091_s25 + $0x30] sm:$0xff] (%p4384_p6), %v2117_v33  ;;  %2120 = vst [vmem:[%s4091_s25 + $0x38] sm:$0xff] (%p4384_p6), %v2119_v9 }
 0x46c   : > { %2057 = vst [vmem:[%s3949_s18 + $0x140] sm:$0xff] %v1993_v34  ;;  %2059 = vst [vmem:[%s3949_s18 + $0x150] sm:$0xff] %v1995_v35  ;;  %v2009_v52 = vmul.f32 %v1789_v10, %v3904_v45  ;;  %v2011_v40 = vmul.f32 %v1842_v11, %v3906_v38  ;;  %v1791_v53 = vpop.f32.mrb[63].mxu1  ;;  %v1844_v41 = vpop.f32.mrb[63].mxu0  ;;  %v2121_v34 = vld [vmem:[%s3949_s18 + $0x40] sm:$0xff] (%p4384_p6)  ;;  %v2123_v35 = vld [vmem:[%s3949_s18 + $0x48] sm:$0xff] (%p4384_p6) }
 0x46d   : > { %2058 = vst [vmem:[%s3949_s18 + $0x148] sm:$0xff] %v1994_v36  ;;  %2060 = vst [vmem:[%s3949_s18 + $0x158] sm:$0xff] %v1996_v37  ;;  %v2010_v54 = vmul.f32 %v1791_v53, %v3908_v47  ;;  %v2012_v42 = vmul.f32 %v1844_v41, %v3910_v48  ;;  %v2127_v0 = vld [vmem:[%s3949_s18 + $0x58] sm:$0xff] (%p4384_p6)  ;;  %v2141_v53 = vld [vmem:[%s3949_s18 + $0x90] sm:$0xff] (%p4384_p6) }
 0x46e   : > { %2073 = vst [vmem:[%s3949_s18 + $0x1c0] sm:$0xff] %v2009_v52  ;;  %2075 = vst [vmem:[%s3949_s18 + $0x1d0] sm:$0xff] %v2011_v40  ;;  %v2137_v52 = vld [vmem:[%s3949_s18 + $0x80] sm:$0xff] (%p4384_p6)  ;;  %v2139_v40 = vld [vmem:[%s3949_s18 + $0x88] sm:$0xff] (%p4384_p6) }
 0x46f   : > { %2074 = vst [vmem:[%s3949_s18 + $0x1c8] sm:$0xff] %v2010_v54  ;;  %2076 = vst [vmem:[%s3949_s18 + $0x1d8] sm:$0xff] %v2012_v42  ;;  %v2143_v41 = vld [vmem:[%s3949_s18 + $0x98] sm:$0xff] (%p4384_p6)  ;;  %v2145_v54 = vld [vmem:[%s3949_s18 + $0xa0] sm:$0xff] (%p4384_p6) }
 0x470   : > { %2122 = vst [vmem:[%s4091_s25 + $0x40] sm:$0xff] (%p4384_p6), %v2121_v34  ;;  %2124 = vst [vmem:[%s4091_s25 + $0x48] sm:$0xff] (%p4384_p6), %v2123_v35  ;;  %v2147_v42 = vld [vmem:[%s3949_s18 + $0xa8] sm:$0xff] (%p4384_p6) }
 0x471   : > { %v1881_v32 = vpop.f32.mrb[64].mxu1  ;;  %v1934_v12 = vpop.f32.mrb[64].mxu0  ;;  %2126 = vst [vmem:[%s4091_s25 + $0x50] sm:$0xff] (%p4384_p6), %v2125_v63  ;;  %2128 = vst [vmem:[%s4091_s25 + $0x58] sm:$0xff] (%p4384_p6), %v2127_v0 }
 0x472   : > { %v1965_v45 = vmul.f32 %v1881_v32, %v3912_v49  ;;  %v1967_v38 = vmul.f32 %v1934_v12, %v3914_v50  ;;  %v1883_v46 = vpop.f32.mrb[65].mxu1  ;;  %v1936_v13 = vpop.f32.mrb[65].mxu0  ;;  %2138 = vst [vmem:[%s4091_s25 + $0x100] sm:$0xff] (%p4384_p6), %v2137_v52  ;;  %2140 = vst [vmem:[%s4091_s25 + $0x108] sm:$0xff] (%p4384_p6), %v2139_v40  ;;  %v2149_v32 = vld [vmem:[%s3949_s18 + $0xb0] sm:$0xff] (%p4384_p6)  ;;  %v2151_v12 = vld [vmem:[%s3949_s18 + $0xb8] sm:$0xff] (%p4384_p6) }
 0x473   : > { %v1966_v47 = vmul.f32 %v1883_v46, %v3916_v51  ;;  %v1968_v48 = vmul.f32 %v1936_v13, %v3918_v43  ;;  %v1885_v1 = vpop.f32.mrb[66].mxu1  ;;  %v1938_v14 = vpop.f32.mrb[66].mxu0  ;;  %2142 = vst [vmem:[%s4091_s25 + $0x110] sm:$0xff] (%p4384_p6), %v2141_v53  ;;  %2144 = vst [vmem:[%s4091_s25 + $0x118] sm:$0xff] (%p4384_p6), %v2143_v41  ;;  %v2157_v46 = vld [vmem:[%s3949_s18 + $0xd0] sm:$0xff] (%p4384_p6)  ;;  %v2159_v13 = vld [vmem:[%s3949_s18 + $0xd8] sm:$0xff] (%p4384_p6) }
 0x474   : > { %2029 = vst [vmem:[%s3949_s18 + $0x60] sm:$0xff] %v1965_v45  ;;  %2031 = vst [vmem:[%s3949_s18 + $0x70] sm:$0xff] %v1967_v38  ;;  %v1981_v2 = vmul.f32 %v1885_v1, %v4373_v15  ;;  %v1983_v49 = vmul.f32 %v1938_v14, %v4374_v16  ;;  %v1887_v17 = vpop.f32.mrb[67].mxu1  ;;  %v1940_v50 = vpop.f32.mrb[67].mxu0  ;;  %v2153_v45 = vld [vmem:[%s3949_s18 + $0xc0] sm:$0xff] (%p4384_p6)  ;;  %v2155_v38 = vld [vmem:[%s3949_s18 + $0xc8] sm:$0xff] (%p4384_p6) }
 0x475   : > { %2030 = vst [vmem:[%s3949_s18 + $0x68] sm:$0xff] %v1966_v47  ;;  %2032 = vst [vmem:[%s3949_s18 + $0x78] sm:$0xff] %v1968_v48  ;;  %v1982_v55 = vmul.f32 %v1887_v17, %v4375_v44  ;;  %v1984_v51 = vmul.f32 %v1940_v50, %v4376_v18  ;;  %v2169_v15 = vld [vmem:[%s3949_s18 + $0x100] sm:$0xff] (%p4384_p6)  ;;  %v2173_v16 = vld [vmem:[%s3949_s18 + $0x110] sm:$0xff] (%p4384_p6) }
 0x476   : > { %2045 = vst [vmem:[%s3949_s18 + $0xe0] sm:$0xff] %v1981_v2  ;;  %2047 = vst [vmem:[%s3949_s18 + $0xf0] sm:$0xff] %v1983_v49  ;;  %v2171_v2 = vld [vmem:[%s3949_s18 + $0x108] sm:$0xff] (%p4384_p6)  ;;  %v2175_v49 = vld [vmem:[%s3949_s18 + $0x118] sm:$0xff] (%p4384_p6) }
 0x477   : > { %2046 = vst [vmem:[%s3949_s18 + $0xe8] sm:$0xff] %v1982_v55  ;;  %2048 = vst [vmem:[%s3949_s18 + $0xf8] sm:$0xff] %v1984_v51  ;;  %v2177_v17 = vld [vmem:[%s3949_s18 + $0x120] sm:$0xff] (%p4384_p6)  ;;  %v2179_v50 = vld [vmem:[%s3949_s18 + $0x128] sm:$0xff] (%p4384_p6) }
 0x478   : > { %2146 = vst [vmem:[%s4091_s25 + $0x120] sm:$0xff] (%p4384_p6), %v2145_v54  ;;  %2148 = vst [vmem:[%s4091_s25 + $0x128] sm:$0xff] (%p4384_p6), %v2147_v42  ;;  %v2181_v44 = vld [vmem:[%s3949_s18 + $0x130] sm:$0xff] (%p4384_p6)  ;;  %v2183_v55 = vld [vmem:[%s3949_s18 + $0x138] sm:$0xff] (%p4384_p6) }
 0x479   : > { %v1891_v43 = vpop.f32.mrb[68].mxu1  ;;  %v1944_v19 = vpop.f32.mrb[68].mxu0  ;;  %2087 = sbr.rel (!%p4384_p6) target bundleno = 1173 (0x495), region = 88  ;;  %2150 = vst [vmem:[%s4091_s25 + $0x130] sm:$0xff] (%p4384_p6), %v2149_v32  ;;  %2152 = vst [vmem:[%s4091_s25 + $0x138] sm:$0xff] (%p4384_p6), %v2151_v12  ;;  %v2185_v18 = vld [vmem:[%s3949_s18 + $0x140] sm:$0xff] (%p4384_p6) }
 0x47a   : > { %v1997_v4 = vmul.f32 %v1891_v43, %v4377_v3  ;;  %v1999_v20 = vmul.f32 %v1944_v19, %v4378_v56  ;;  %v1893_v57 = vpop.f32.mrb[69].mxu1  ;;  %v1946_v22 = vpop.f32.mrb[69].mxu0  ;;  %2154 = vst [vmem:[%s4091_s25 + $0x140] sm:$0xff] (%p4384_p6), %v2153_v45  ;;  %2156 = vst [vmem:[%s4091_s25 + $0x148] sm:$0xff] (%p4384_p6), %v2155_v38  ;;  %v2187_v51 = vld [vmem:[%s3949_s18 + $0x148] sm:$0xff] (%p4384_p6)  ;;  %v2189_v43 = vld [vmem:[%s3949_s18 + $0x150] sm:$0xff] (%p4384_p6) }
 0x47b   : > { %v1998_v23 = vmul.f32 %v1893_v57, %v4379_v58  ;;  %v2000_v21 = vmul.f32 %v1946_v22, %v4380_v24  ;;  %v1895_v25 = vpop.f32.mrb[70].mxu1  ;;  %v1948_v26 = vpop.f32.mrb[70].mxu0  ;;  %v2129_v36 = vld [vmem:[%s3949_s18 + $0x60] sm:$0xff] (%p4384_p6)  ;;  %v2133_v10 = vld [vmem:[%s3949_s18 + $0x70] sm:$0xff] (%p4384_p6)  ;;  %2158 = vst [vmem:[%s4091_s25 + $0x150] sm:$0xff] (%p4384_p6), %v2157_v46  ;;  %2160 = vst [vmem:[%s4091_s25 + $0x158] sm:$0xff] (%p4384_p6), %v2159_v13 }
 0x47c   : > { %2061 = vst [vmem:[%s3949_s18 + $0x160] sm:$0xff] %v1997_v4  ;;  %2063 = vst [vmem:[%s3949_s18 + $0x170] sm:$0xff] %v1999_v20  ;;  %v2013_v5 = vmul.f32 %v1895_v25, %v4381_v59  ;;  %v2015_v28 = vmul.f32 %v1948_v26, %v4382_v27  ;;  %v1897_v61 = vpop.f32.mrb[71].mxu1  ;;  %v1950_v6 = vpop.f32.mrb[71].mxu0  ;;  %v2131_v37 = vld [vmem:[%s3949_s18 + $0x68] sm:$0xff] (%p4384_p6)  ;;  %v2135_v11 = vld [vmem:[%s3949_s18 + $0x78] sm:$0xff] (%p4384_p6) }
 0x47d   : > { %2062 = vst [vmem:[%s3949_s18 + $0x168] sm:$0xff] %v1998_v23  ;;  %2064 = vst [vmem:[%s3949_s18 + $0x178] sm:$0xff] %v2000_v21  ;;  %v2014_v7 = vmul.f32 %v1897_v61, %v3941_v39  ;;  %v2016_v29 = vmul.f32 %v1950_v6, %v3943_v60  ;;  %v2105_v39 = vld [vmem:[%s3949_s18] sm:$0xff] (%p4384_p6)  ;;  %v2107_v60 = vld [vmem:[%s3949_s18 + $0x8] sm:$0xff] (%p4384_p6) }
 0x47e   : > { %2077 = vst [vmem:[%s3949_s18 + $0x1e0] sm:$0xff] %v2013_v5  ;;  %2079 = vst [vmem:[%s3949_s18 + $0x1f0] sm:$0xff] %v2015_v28  ;;  %v2161_v47 = vld [vmem:[%s3949_s18 + $0xe0] sm:$0xff] (%p4384_p6)  ;;  %v2163_v48 = vld [vmem:[%s3949_s18 + $0xe8] sm:$0xff] (%p4384_p6) }
 0x47f   : > { %2078 = vst [vmem:[%s3949_s18 + $0x1e8] sm:$0xff] %v2014_v7  ;;  %2080 = vst [vmem:[%s3949_s18 + $0x1f8] sm:$0xff] %v2016_v29  ;;  %v2165_v1 = vld [vmem:[%s3949_s18 + $0xf0] sm:$0xff] (%p4384_p6)  ;;  %v2167_v14 = vld [vmem:[%s3949_s18 + $0xf8] sm:$0xff] (%p4384_p6) }
 0x480   : > { %2106 = vst [vmem:[%s4091_s25] sm:$0xff] %v2105_v39  ;;  %2108 = vst [vmem:[%s4091_s25 + $0x8] sm:$0xff] %v2107_v60  ;;  %v2191_v19 = vld [vmem:[%s3949_s18 + $0x158] sm:$0xff]  ;;  %v2201_v57 = vld [vmem:[%s3949_s18 + $0x180] sm:$0xff] }
 0x481   : > { %2130 = vst [vmem:[%s4091_s25 + $0x60] sm:$0xff] %v2129_v36  ;;  %2132 = vst [vmem:[%s4091_s25 + $0x68] sm:$0xff] %v2131_v37  ;;  %v2203_v22 = vld [vmem:[%s3949_s18 + $0x188] sm:$0xff]  ;;  %v2205_v58 = vld [vmem:[%s3949_s18 + $0x190] sm:$0xff] }
 0x482   : > { %2134 = vst [vmem:[%s4091_s25 + $0x70] sm:$0xff] %v2133_v10  ;;  %2136 = vst [vmem:[%s4091_s25 + $0x78] sm:$0xff] %v2135_v11  ;;  %v2207_v23 = vld [vmem:[%s3949_s18 + $0x198] sm:$0xff]  ;;  %v2209_v24 = vld [vmem:[%s3949_s18 + $0x1a0] sm:$0xff] }
 0x483   : > { %2162 = vst [vmem:[%s4091_s25 + $0x160] sm:$0xff] %v2161_v47  ;;  %2164 = vst [vmem:[%s4091_s25 + $0x168] sm:$0xff] %v2163_v48  ;;  %v2193_v3 = vld [vmem:[%s3949_s18 + $0x160] sm:$0xff]  ;;  %v2197_v56 = vld [vmem:[%s3949_s18 + $0x170] sm:$0xff] }
 0x484   : > { %2166 = vst [vmem:[%s4091_s25 + $0x170] sm:$0xff] %v2165_v1  ;;  %2168 = vst [vmem:[%s4091_s25 + $0x178] sm:$0xff] %v2167_v14  ;;  %v2195_v4 = vld [vmem:[%s3949_s18 + $0x168] sm:$0xff]  ;;  %v2199_v20 = vld [vmem:[%s3949_s18 + $0x178] sm:$0xff] }
 0x485   : > { %2170 = vst [vmem:[%s4091_s25 + $0x200] sm:$0xff] %v2169_v15  ;;  %2172 = vst [vmem:[%s4091_s25 + $0x208] sm:$0xff] %v2171_v2  ;;  %v2211_v21 = vld [vmem:[%s3949_s18 + $0x1a8] sm:$0xff]  ;;  %v2213_v25 = vld [vmem:[%s3949_s18 + $0x1b0] sm:$0xff] }
 0x486   : > { %2174 = vst [vmem:[%s4091_s25 + $0x210] sm:$0xff] %v2173_v16  ;;  %2176 = vst [vmem:[%s4091_s25 + $0x218] sm:$0xff] %v2175_v49  ;;  %v2215_v26 = vld [vmem:[%s3949_s18 + $0x1b8] sm:$0xff]  ;;  %v2217_v59 = vld [vmem:[%s3949_s18 + $0x1c0] sm:$0xff] }
 0x487   : > { %2178 = vst [vmem:[%s4091_s25 + $0x220] sm:$0xff] %v2177_v17  ;;  %2180 = vst [vmem:[%s4091_s25 + $0x228] sm:$0xff] %v2179_v50  ;;  %v2219_v5 = vld [vmem:[%s3949_s18 + $0x1c8] sm:$0xff]  ;;  %v2221_v27 = vld [vmem:[%s3949_s18 + $0x1d0] sm:$0xff] }
 0x488   : > { %2182 = vst [vmem:[%s4091_s25 + $0x230] sm:$0xff] %v2181_v44  ;;  %2184 = vst [vmem:[%s4091_s25 + $0x238] sm:$0xff] %v2183_v55  ;;  %v2223_v28 = vld [vmem:[%s3949_s18 + $0x1d8] sm:$0xff]  ;;  %v2225_v61 = vld [vmem:[%s3949_s18 + $0x1e0] sm:$0xff] }
 0x489   : > { %2186 = vst [vmem:[%s4091_s25 + $0x240] sm:$0xff] %v2185_v18  ;;  %2188 = vst [vmem:[%s4091_s25 + $0x248] sm:$0xff] %v2187_v51  ;;  %v2227_v6 = vld [vmem:[%s3949_s18 + $0x1e8] sm:$0xff]  ;;  %v2229_v7 = vld [vmem:[%s3949_s18 + $0x1f0] sm:$0xff] }
 0x48a   : > { %2190 = vst [vmem:[%s4091_s25 + $0x250] sm:$0xff] %v2189_v43  ;;  %2192 = vst [vmem:[%s4091_s25 + $0x258] sm:$0xff] %v2191_v19  ;;  %v2231_v29 = vld [vmem:[%s3949_s18 + $0x1f8] sm:$0xff] }
 0x48b   : > { %2194 = vst [vmem:[%s4091_s25 + $0x260] sm:$0xff] %v2193_v3  ;;  %2196 = vst [vmem:[%s4091_s25 + $0x268] sm:$0xff] %v2195_v4 }
 0x48c   : > { %2198 = vst [vmem:[%s4091_s25 + $0x270] sm:$0xff] %v2197_v56  ;;  %2200 = vst [vmem:[%s4091_s25 + $0x278] sm:$0xff] %v2199_v20 }
 0x48d   : > { %2202 = vst [vmem:[%s4091_s25 + $0x300] sm:$0xff] %v2201_v57  ;;  %2204 = vst [vmem:[%s4091_s25 + $0x308] sm:$0xff] %v2203_v22 }
 0x48e   : > { %2206 = vst [vmem:[%s4091_s25 + $0x310] sm:$0xff] %v2205_v58  ;;  %2208 = vst [vmem:[%s4091_s25 + $0x318] sm:$0xff] %v2207_v23 }
 0x48f   : > { %2210 = vst [vmem:[%s4091_s25 + $0x320] sm:$0xff] %v2209_v24  ;;  %2212 = vst [vmem:[%s4091_s25 + $0x328] sm:$0xff] %v2211_v21 }
 0x490   : > { %2214 = vst [vmem:[%s4091_s25 + $0x330] sm:$0xff] %v2213_v25  ;;  %2216 = vst [vmem:[%s4091_s25 + $0x338] sm:$0xff] %v2215_v26 }
 0x491   : > { %2218 = vst [vmem:[%s4091_s25 + $0x340] sm:$0xff] %v2217_v59  ;;  %2220 = vst [vmem:[%s4091_s25 + $0x348] sm:$0xff] %v2219_v5 }
 0x492   : > { %2222 = vst [vmem:[%s4091_s25 + $0x350] sm:$0xff] %v2221_v27  ;;  %2224 = vst [vmem:[%s4091_s25 + $0x358] sm:$0xff] %v2223_v28 }
 0x493   : > { %2226 = vst [vmem:[%s4091_s25 + $0x360] sm:$0xff] %v2225_v61  ;;  %2228 = vst [vmem:[%s4091_s25 + $0x368] sm:$0xff] %v2227_v6 }
 0x494   : > { %2230 = vst [vmem:[%s4091_s25 + $0x370] sm:$0xff] %v2229_v7  ;;  %2232 = vst [vmem:[%s4091_s25 + $0x378] sm:$0xff] %v2231_v29 }
 0x495 PF: > { %s21_s17 = sadd.s32 1, %s3158_s17   ;;  %s4389_s29 = sld [smem:[#allocation20_spill]] }
 0x496   : > { %p4213_p10 = scmp.ge.s32.totalorder %s21_s17, 6   ;;  %s4390_s10 = sld [smem:[#allocation21_spill]] }
 0x497   : > { %s4391_s13 = sld [smem:[#allocation32_spill]]  ;;  %s4392_s14 = sld [smem:[#allocation24_spill]] }
 0x498   : > { %s4393_s26 = sld [smem:[#allocation30_spill]]  ;;  %s4394_s16 = sld [smem:[#allocation31_spill]] }
 0x499   : > { %s4395_s27 = smov %s3114_s28  ;;  %s4396_s28 = smov %s3480_s1 }
 0x49a   : > { %s4397_s30 = smov %s3126_s9  ;;  %s4398_s9 = smov %s3468_s21 }
 0x49b   : > { %s4399_s11 = smov %s3138_s12  ;;  %20 = sbr.rel (!%p4213_p10) target bundleno = 17 (0x11), region = 163 }
 0x49d   : > { %s4400_s12 = smov %s4391_s13  ;;  %s4401_s13 = smov %s3150_s15 }
 0x49e   : > { %s4402_s15 = smov %s4393_s26 }
 0x4a2   :  { %2248 = vsyncpa [#allocation3], 1 }
 0x4a3   :  { %2250 = vsyncpa [#allocation3 + $0x1], 1 }
 0x4a4   :  { %2251 = vsyncpa [#allocation5], 1 }
 0x4a5   :  { %2252 = vsyncpa [#allocation8], 1 }

// kernel: reverse.5
= control target key start
LH: loop header
LB: loop body
LE: loop exit
PB: predicated region body
PF: predicated region fallthrough
CT: control target
= control target key end

     0   :  { %v2_v0 = vlaneseq  ;;  %s454_s0 = inlined_call_operand.vmem [shape: f32[2,32,4096], index: 0, kind: input, shape index: {}]   ;;  %s455_s1 = inlined_call_operand.vmem [shape: f32[2,32,4096], index: 1, kind: output, shape index: {}]  }
   0x2   :  { %v408_v1 = vsub.s32 127, %v2_v0 }
   0x4   :  { %4 = vset.pattern.permute.xlu0 %v408_v1 }
   0x5   :  { %s411_s6 = smov 0   ;;  %s413_s7 = smov 0  }
   0x6   :  { %s415_s8 = smov 0  }
   0x7 LB: > { %s323_s9 = sadd.s32 4294967295, %s396_s8   ;;  %s22_s10 = sadd.s32 1, %s392_s7  ;;  %s396_s8 = sphi %s415_s8, %s10_s8   ;;  %s392_s7 = sphi %s413_s7, %s457_s7   ;;  %s388_s6 = sphi %s411_s6, %s456_s6  }
   0x8   : > { %p23_p0 = scmp.ge.s32.totalorder %s22_s10, 32  ;;  %p325_p1 = scmp.ge.s32.totalorder %s396_s8, 32 }
   0x9   : > { %s45_s11 = sand.u32 (!%p325_p1), 1, %s396_s8   ;;  %s48_s12 = ssub.s32 (!%p325_p1), 31, %s392_s7 }
   0xa   : > { %s459_s10 = smov (%p23_p0, %s22_s10), 0  ;;  %43 = sbr.rel (%p325_p1) target bundleno = 22 (0x16), region = 16 }
   0xb   : > { %s326_s13 = sshll.u32 (!%p325_p1), %s45_s11, 6  ;;  %s327_s14 = sshll.u32 (!%p325_p1), %s48_s12, 3 }
   0xc   : > { %s56_s17 = scalar_lea.vmem (!%p325_p1), %s454_s0, %s327_s14  ;;  %s47_s18 = scalar_lea.vmem (!%p325_p1), [#allocation0], %s326_s13 }
   0xd   : > { %v98_v2 = vld [vmem:[%s56_s17] sm:$0xff] (!%p325_p1) }
   0xe   : > { %v100_v3 = vld [vmem:[%s56_s17 + $0x100] sm:$0xff] (!%p325_p1)  ;;  %99 = vst [vmem:[%s47_s18] sm:$0xff] (!%p325_p1), %v98_v2 }
   0xf   : > { %v102_v4 = vld [vmem:[%s56_s17 + $0x200] sm:$0xff] (!%p325_p1)  ;;  %101 = vst [vmem:[%s47_s18 + $0x8] sm:$0xff] (!%p325_p1), %v100_v3 }
  0x10   : > { %103 = vst [vmem:[%s47_s18 + $0x10] sm:$0xff] (!%p325_p1), %v102_v4  ;;  %v104_v5 = vld [vmem:[%s56_s17 + $0x300] sm:$0xff] (!%p325_p1) }
  0x11   : > { %v106_v6 = vld [vmem:[%s56_s17 + $0x400] sm:$0xff]  ;;  %105 = vst [vmem:[%s47_s18 + $0x18] sm:$0xff] %v104_v5 }
  0x12   : > { %v108_v7 = vld [vmem:[%s56_s17 + $0x500] sm:$0xff]  ;;  %107 = vst [vmem:[%s47_s18 + $0x20] sm:$0xff] %v106_v6 }
  0x13   : > { %109 = vst [vmem:[%s47_s18 + $0x28] sm:$0xff] %v108_v7  ;;  %v110_v8 = vld [vmem:[%s56_s17 + $0x600] sm:$0xff] }
  0x14   : > { %v112_v9 = vld [vmem:[%s56_s17 + $0x700] sm:$0xff]  ;;  %111 = vst [vmem:[%s47_s18 + $0x30] sm:$0xff] %v110_v8 }
  0x15   : > { %113 = vst [vmem:[%s47_s18 + $0x38] sm:$0xff] %v112_v9 }
  0x16 PF: > { %p328_p2 = scmp.ge.s32.totalorder %s396_s8, 1  ;;  %p118_p3 = scmp.lt.s32.totalorder %s396_s8, 33 }
  0x18   : > { %p119_p4 = pnand %p328_p2, %p118_p3 }
  0x19   : > { %373 = vset.pattern.permute.xlu1 (!%p119_p4), %v408_v1  ;;  %s125_s19 = sand.u32 (!%p119_p4), 1, %s323_s9   ;;  %s346_s22 = sshll.u32 (!%p119_p4), %s388_s6, 3 }
  0x1a   : > { %122 = sbr.rel (%p119_p4) target bundleno = 170 (0xaa), region = 54  ;;  %s329_s20 = sshll.u32 (!%p119_p4), %s125_s19, 6 }
  0x1b   : > { %s127_s21 = scalar_lea.vmem (!%p119_p4), [#allocation0], %s329_s20  ;;  %s198_s25 = scalar_lea.vmem (!%p119_p4), %s455_s1, %s346_s22 }
  0x1c   : > { %v333_v10 = vld [vmem:[%s127_s21 + $0x10] sm:$0xff] (!%p119_p4)  ;;  %v141_v11 = vld [vmem:[%s127_s21] sm:$0xff] (!%p119_p4)  ;;  %v335_v12 = vld [vmem:[%s127_s21 + $0x18] sm:$0xff] (!%p119_p4) }
  0x1d   : > { %154 = vperm.xlu1 (!%p119_p4), %373, %v333_v10   ;;  %142 = vperm.xlu0 (!%p119_p4), %4, %v141_v11   ;;  %v331_v13 = vld [vmem:[%s127_s21 + $0x8] sm:$0xff] (!%p119_p4)  ;;  %v337_v15 = vld [vmem:[%s127_s21 + $0x20] sm:$0xff] (!%p119_p4)  ;;  %v343_v16 = vld [vmem:[%s127_s21 + $0x38] sm:$0xff] (!%p119_p4) }
  0x1e   : > { %v339_v14 = vld [vmem:[%s127_s21 + $0x28] sm:$0xff] (!%p119_p4)  ;;  %v341_v17 = vld [vmem:[%s127_s21 + $0x30] sm:$0xff] (!%p119_p4) }
  0x21   : > { %160 = vperm.xlu1 %373, %v335_v12   ;;  %148 = vperm.xlu0 %4, %v331_v13  }
  0x25   : > { %172 = vperm.xlu1 %373, %v339_v14   ;;  %166 = vperm.xlu0 %4, %v337_v15  }
  0x29   : > { %184 = vperm.xlu1 %373, %v343_v16   ;;  %178 = vperm.xlu0 %4, %v341_v17  }
  0x9c   : > { %v155_v18 = vpop.permute.xlu1 %154  ;;  %v143_v19 = vpop.permute.xlu0 %142 }
  0x9d   : > { %245 = vst [vmem:[%s198_s25 + $0x200] sm:$0xff] %v155_v18  ;;  %241 = vst [vmem:[%s198_s25] sm:$0xff] %v143_v19 }
  0xa0   : > { %v161_v20 = vpop.permute.xlu1 %160  ;;  %v149_v21 = vpop.permute.xlu0 %148 }
  0xa1   : > { %247 = vst [vmem:[%s198_s25 + $0x300] sm:$0xff] %v161_v20  ;;  %243 = vst [vmem:[%s198_s25 + $0x100] sm:$0xff] %v149_v21 }
  0xa4   : > { %v173_v22 = vpop.permute.xlu1 %172  ;;  %v167_v23 = vpop.permute.xlu0 %166 }
  0xa5   : > { %251 = vst [vmem:[%s198_s25 + $0x500] sm:$0xff] %v173_v22  ;;  %249 = vst [vmem:[%s198_s25 + $0x400] sm:$0xff] %v167_v23 }
  0xa8   : > { %v185_v24 = vpop.permute.xlu1 %184  ;;  %v179_v25 = vpop.permute.xlu0 %178 }
  0xa9   : > { %255 = vst [vmem:[%s198_s25 + $0x700] sm:$0xff] %v185_v24  ;;  %253 = vst [vmem:[%s198_s25 + $0x600] sm:$0xff] %v179_v25 }
  0xaa PF: > { %s10_s8 = sadd.s32 1, %s396_s8   ;;  %s456_s6 = smov %s392_s7 }
  0xab   : > { %p7_p5 = scmp.ge.s32.totalorder %s10_s8, 34   ;;  %s457_s7 = smov %s459_s10 }
  0xad   :  { %9 = sbr.rel (!%p7_p5) target bundleno = 7 (0x7), region = 132 }

// kernel: forward.4
= control target key start
LH: loop header
LB: loop body
LE: loop exit
PB: predicated region body
PF: predicated region fallthrough
CT: control target
= control target key end

     0   :  { %s8126_s15 = smov 0   ;;  %s8128_s16 = smov 0   ;;  %s12600_s0 = inlined_call_operand.vmem [shape: f32[2,32,16], index: 0, kind: input, shape index: {}]   ;;  %s12601_s1 = inlined_call_operand.vmem [shape: bf16[16,4096], index: 1, kind: input, shape index: {}]   ;;  %s12602_s2 = inlined_call_operand.vmem [shape: f32[2,32,4096], index: 2, kind: input, shape index: {}]   ;;  %s12603_s3 = inlined_call_operand.vmem [shape: f32[1,512], index: 3, kind: input, shape index: {}]   ;;  %s12604_s4 = inlined_call_operand.vmem [shape: f32[32,16,512], index: 4, kind: output, shape index: {}]  }
   0x1   :  { %s8130_s17 = smov 0  }
   0x2 LB: > { %s7192_s18 = sadd.s32 4294967295, %s8097_s17   ;;  %s8143_s19 = sadd.s32 1, %s8097_s17   ;;  %s8097_s17 = sphi %s8130_s17, %s13514_s17   ;;  %s8093_s16 = sphi %s8128_s16, %s13513_s16   ;;  %s8089_s15 = sphi %s8126_s15, %s13512_s15  }
   0x3   : > { %s18_s20 = ssub.s32 %s8097_s17, %s8143_s19  ;;  %s21_s21 = sadd.s32 1, %s8093_s16 }
   0x4   : > { %p19_p0 = scmp.eq.s32.totalorder %s18_s20, 0  ;;  %p28_p1 = scmp.ne.s32.totalorder %s8093_s16, %s8089_s15 }
   0x5   : > { %p29_p2 = scmp.eq.s32.totalorder %s8097_s17, 0  ;;  %p7195_p4 = scmp.ge.s32.totalorder %s8097_s17, 2 }
   0x6   : > { %s8152_s22 = scalar_select %p19_p0, %s8093_s16, %s21_s21  }
   0x7   : > { %p8154_p3 = por %p29_p2, %p28_p1  ;;  %154 = sbr.rel (%p7195_p4) target bundleno = 89 (0x59), region = 24 }
   0xe   : > { %157 = sbr.rel (!%p8154_p3) target bundleno = 21 (0x15), region = 28  ;;  %s159_s24 = sand.u32 (%p8154_p3), 1, %s8093_s16  }
   0xf   : > { %s7596_s25 = sshll.u32 (%p8154_p3), %s8097_s17, 4  ;;  %s7196_s26 = sshll.u32 (%p8154_p3), %s159_s24, 5 }
  0x10   : > { %s164_s29 = scalar_lea.vmem (%p8154_p3), %s12600_s0, %s7596_s25  ;;  %s161_s30 = scalar_lea.vmem (%p8154_p3), [#allocation2], %s7196_s26 }
  0x11   : > { %v198_v0 = vld [vmem:[%s164_s29] sm:$0xff] (%p8154_p3)  ;;  %v200_v1 = vld [vmem:[%s164_s29 + $0x8] sm:$0xff] (%p8154_p3) }
  0x12   : > { %v202_v2 = vld [vmem:[%s164_s29 + $0x20] sm:$0xff] (%p8154_p3)  ;;  %199 = vst [vmem:[%s161_s30] sm:$0xff] (%p8154_p3), %v198_v0  ;;  %201 = vst [vmem:[%s161_s30 + $0x8] sm:$0xff] (%p8154_p3), %v200_v1  ;;  %v204_v3 = vld [vmem:[%s164_s29 + $0x28] sm:$0xff] (%p8154_p3) }
  0x13   : > { %203 = vst [vmem:[%s161_s30 + $0x10] sm:$0xff] (%p8154_p3), %v202_v2  ;;  %205 = vst [vmem:[%s161_s30 + $0x18] sm:$0xff] (%p8154_p3), %v204_v3 }
  0x15 PF: > { %211 = sbr.rel (!%p8154_p3) target bundleno = 89 (0x59), region = 66  ;;  %s213_s5 = sand.u32 (%p8154_p3), 1, %s8093_s16  }
  0x16   : > { %s7598_s6 = sshll.u32 (%p8154_p3), %s8097_s17, 9  ;;  %s7199_s7 = sshll.u32 (%p8154_p3), %s213_s5, 10 }
  0x17   : > { %s8173_s10 = scalar_lea.vmem (%p8154_p3), %s12602_s2, %s7598_s6  ;;  %s8178_s11 = scalar_lea.vmem (%p8154_p3), [#allocation3], %s7199_s7 }
  0x18   : > { %v232_v4 = vld [vmem:[%s8173_s10] sm:$0xff] (%p8154_p3)  ;;  %v234_v5 = vld [vmem:[%s8173_s10 + $0x8] sm:$0xff] (%p8154_p3)  ;;  %v236_v6 = vld [vmem:[%s8173_s10 + $0x10] sm:$0xff] (%p8154_p3) }
  0x19   : > { %233 = vst [vmem:[%s8178_s11] sm:$0xff] (%p8154_p3), %v232_v4  ;;  %235 = vst [vmem:[%s8178_s11 + $0x8] sm:$0xff] (%p8154_p3), %v234_v5  ;;  %v238_v7 = vld [vmem:[%s8173_s10 + $0x18] sm:$0xff] (%p8154_p3)  ;;  %v240_v8 = vld [vmem:[%s8173_s10 + $0x20] sm:$0xff] (%p8154_p3) }
  0x1a   : > { %237 = vst [vmem:[%s8178_s11 + $0x10] sm:$0xff] (%p8154_p3), %v236_v6  ;;  %v242_v9 = vld [vmem:[%s8173_s10 + $0x28] sm:$0xff] (%p8154_p3)  ;;  %239 = vst [vmem:[%s8178_s11 + $0x18] sm:$0xff] (%p8154_p3), %v238_v7  ;;  %v244_v10 = vld [vmem:[%s8173_s10 + $0x30] sm:$0xff] (%p8154_p3) }
  0x1b   : > { %241 = vst [vmem:[%s8178_s11 + $0x20] sm:$0xff] (%p8154_p3), %v240_v8  ;;  %243 = vst [vmem:[%s8178_s11 + $0x28] sm:$0xff] (%p8154_p3), %v242_v9  ;;  %v246_v11 = vld [vmem:[%s8173_s10 + $0x38] sm:$0xff] (%p8154_p3)  ;;  %v248_v12 = vld [vmem:[%s8173_s10 + $0x40] sm:$0xff] (%p8154_p3) }
  0x1c   : > { %245 = vst [vmem:[%s8178_s11 + $0x30] sm:$0xff] %v244_v10  ;;  %247 = vst [vmem:[%s8178_s11 + $0x38] sm:$0xff] %v246_v11  ;;  %v250_v13 = vld [vmem:[%s8173_s10 + $0x48] sm:$0xff]  ;;  %v252_v14 = vld [vmem:[%s8173_s10 + $0x50] sm:$0xff] }
  0x1d   : > { %249 = vst [vmem:[%s8178_s11 + $0x40] sm:$0xff] %v248_v12  ;;  %v254_v15 = vld [vmem:[%s8173_s10 + $0x58] sm:$0xff]  ;;  %251 = vst [vmem:[%s8178_s11 + $0x48] sm:$0xff] %v250_v13  ;;  %v256_v16 = vld [vmem:[%s8173_s10 + $0x60] sm:$0xff] }
  0x1e   : > { %253 = vst [vmem:[%s8178_s11 + $0x50] sm:$0xff] %v252_v14  ;;  %255 = vst [vmem:[%s8178_s11 + $0x58] sm:$0xff] %v254_v15  ;;  %v258_v17 = vld [vmem:[%s8173_s10 + $0x68] sm:$0xff]  ;;  %v260_v18 = vld [vmem:[%s8173_s10 + $0x70] sm:$0xff] }
  0x1f   : > { %257 = vst [vmem:[%s8178_s11 + $0x60] sm:$0xff] %v256_v16  ;;  %259 = vst [vmem:[%s8178_s11 + $0x68] sm:$0xff] %v258_v17  ;;  %v262_v19 = vld [vmem:[%s8173_s10 + $0x78] sm:$0xff]  ;;  %v264_v20 = vld [vmem:[%s8173_s10 + $0x80] sm:$0xff] }
  0x20   : > { %261 = vst [vmem:[%s8178_s11 + $0x70] sm:$0xff] %v260_v18  ;;  %v266_v21 = vld [vmem:[%s8173_s10 + $0x88] sm:$0xff]  ;;  %263 = vst [vmem:[%s8178_s11 + $0x78] sm:$0xff] %v262_v19  ;;  %v268_v22 = vld [vmem:[%s8173_s10 + $0x90] sm:$0xff] }
  0x21   : > { %265 = vst [vmem:[%s8178_s11 + $0x80] sm:$0xff] %v264_v20  ;;  %267 = vst [vmem:[%s8178_s11 + $0x88] sm:$0xff] %v266_v21  ;;  %v270_v23 = vld [vmem:[%s8173_s10 + $0x98] sm:$0xff]  ;;  %v272_v24 = vld [vmem:[%s8173_s10 + $0xa0] sm:$0xff] }
  0x22   : > { %269 = vst [vmem:[%s8178_s11 + $0x90] sm:$0xff] %v268_v22  ;;  %271 = vst [vmem:[%s8178_s11 + $0x98] sm:$0xff] %v270_v23  ;;  %v274_v25 = vld [vmem:[%s8173_s10 + $0xa8] sm:$0xff]  ;;  %v276_v26 = vld [vmem:[%s8173_s10 + $0xb0] sm:$0xff] }
  0x23   : > { %273 = vst [vmem:[%s8178_s11 + $0xa0] sm:$0xff] %v272_v24  ;;  %v278_v27 = vld [vmem:[%s8173_s10 + $0xb8] sm:$0xff]  ;;  %275 = vst [vmem:[%s8178_s11 + $0xa8] sm:$0xff] %v274_v25  ;;  %v280_v28 = vld [vmem:[%s8173_s10 + $0xc0] sm:$0xff] }
  0x24   : > { %277 = vst [vmem:[%s8178_s11 + $0xb0] sm:$0xff] %v276_v26  ;;  %279 = vst [vmem:[%s8178_s11 + $0xb8] sm:$0xff] %v278_v27  ;;  %v282_v29 = vld [vmem:[%s8173_s10 + $0xc8] sm:$0xff]  ;;  %v284_v30 = vld [vmem:[%s8173_s10 + $0xd0] sm:$0xff] }
  0x25   : > { %281 = vst [vmem:[%s8178_s11 + $0xc0] sm:$0xff] %v280_v28  ;;  %283 = vst [vmem:[%s8178_s11 + $0xc8] sm:$0xff] %v282_v29  ;;  %v286_v31 = vld [vmem:[%s8173_s10 + $0xd8] sm:$0xff]  ;;  %v288_v32 = vld [vmem:[%s8173_s10 + $0xe0] sm:$0xff] }
  0x26   : > { %285 = vst [vmem:[%s8178_s11 + $0xd0] sm:$0xff] %v284_v30  ;;  %v290_v33 = vld [vmem:[%s8173_s10 + $0xe8] sm:$0xff]  ;;  %287 = vst [vmem:[%s8178_s11 + $0xd8] sm:$0xff] %v286_v31  ;;  %v292_v34 = vld [vmem:[%s8173_s10 + $0xf0] sm:$0xff] }
  0x27   : > { %289 = vst [vmem:[%s8178_s11 + $0xe0] sm:$0xff] %v288_v32  ;;  %291 = vst [vmem:[%s8178_s11 + $0xe8] sm:$0xff] %v290_v33  ;;  %v294_v35 = vld [vmem:[%s8173_s10 + $0xf8] sm:$0xff]  ;;  %v296_v36 = vld [vmem:[%s8173_s10 + $0x100] sm:$0xff] }
  0x28   : > { %293 = vst [vmem:[%s8178_s11 + $0xf0] sm:$0xff] %v292_v34  ;;  %295 = vst [vmem:[%s8178_s11 + $0xf8] sm:$0xff] %v294_v35  ;;  %v298_v37 = vld [vmem:[%s8173_s10 + $0x108] sm:$0xff]  ;;  %v300_v38 = vld [vmem:[%s8173_s10 + $0x110] sm:$0xff] }
  0x29   : > { %297 = vst [vmem:[%s8178_s11 + $0x100] sm:$0xff] %v296_v36  ;;  %v302_v39 = vld [vmem:[%s8173_s10 + $0x118] sm:$0xff]  ;;  %299 = vst [vmem:[%s8178_s11 + $0x108] sm:$0xff] %v298_v37  ;;  %v304_v40 = vld [vmem:[%s8173_s10 + $0x120] sm:$0xff] }
  0x2a   : > { %301 = vst [vmem:[%s8178_s11 + $0x110] sm:$0xff] %v300_v38  ;;  %303 = vst [vmem:[%s8178_s11 + $0x118] sm:$0xff] %v302_v39  ;;  %v306_v41 = vld [vmem:[%s8173_s10 + $0x128] sm:$0xff]  ;;  %v308_v42 = vld [vmem:[%s8173_s10 + $0x130] sm:$0xff] }
  0x2b   : > { %305 = vst [vmem:[%s8178_s11 + $0x120] sm:$0xff] %v304_v40  ;;  %307 = vst [vmem:[%s8178_s11 + $0x128] sm:$0xff] %v306_v41  ;;  %v310_v43 = vld [vmem:[%s8173_s10 + $0x138] sm:$0xff]  ;;  %v312_v44 = vld [vmem:[%s8173_s10 + $0x140] sm:$0xff] }
  0x2c   : > { %309 = vst [vmem:[%s8178_s11 + $0x130] sm:$0xff] %v308_v42  ;;  %v314_v45 = vld [vmem:[%s8173_s10 + $0x148] sm:$0xff]  ;;  %311 = vst [vmem:[%s8178_s11 + $0x138] sm:$0xff] %v310_v43  ;;  %v316_v46 = vld [vmem:[%s8173_s10 + $0x150] sm:$0xff] }
  0x2d   : > { %313 = vst [vmem:[%s8178_s11 + $0x140] sm:$0xff] %v312_v44  ;;  %315 = vst [vmem:[%s8178_s11 + $0x148] sm:$0xff] %v314_v45  ;;  %v318_v47 = vld [vmem:[%s8173_s10 + $0x158] sm:$0xff]  ;;  %v320_v48 = vld [vmem:[%s8173_s10 + $0x160] sm:$0xff] }
  0x2e   : > { %317 = vst [vmem:[%s8178_s11 + $0x150] sm:$0xff] %v316_v46  ;;  %319 = vst [vmem:[%s8178_s11 + $0x158] sm:$0xff] %v318_v47  ;;  %v322_v49 = vld [vmem:[%s8173_s10 + $0x168] sm:$0xff]  ;;  %v324_v50 = vld [vmem:[%s8173_s10 + $0x170] sm:$0xff] }
  0x2f   : > { %321 = vst [vmem:[%s8178_s11 + $0x160] sm:$0xff] %v320_v48  ;;  %v326_v51 = vld [vmem:[%s8173_s10 + $0x178] sm:$0xff]  ;;  %323 = vst [vmem:[%s8178_s11 + $0x168] sm:$0xff] %v322_v49  ;;  %v328_v52 = vld [vmem:[%s8173_s10 + $0x180] sm:$0xff] }
  0x30   : > { %325 = vst [vmem:[%s8178_s11 + $0x170] sm:$0xff] %v324_v50  ;;  %327 = vst [vmem:[%s8178_s11 + $0x178] sm:$0xff] %v326_v51  ;;  %v330_v53 = vld [vmem:[%s8173_s10 + $0x188] sm:$0xff]  ;;  %v332_v54 = vld [vmem:[%s8173_s10 + $0x190] sm:$0xff] }
  0x31   : > { %329 = vst [vmem:[%s8178_s11 + $0x180] sm:$0xff] %v328_v52  ;;  %331 = vst [vmem:[%s8178_s11 + $0x188] sm:$0xff] %v330_v53  ;;  %v334_v55 = vld [vmem:[%s8173_s10 + $0x198] sm:$0xff]  ;;  %v336_v56 = vld [vmem:[%s8173_s10 + $0x1a0] sm:$0xff] }
  0x32   : > { %333 = vst [vmem:[%s8178_s11 + $0x190] sm:$0xff] %v332_v54  ;;  %v338_v57 = vld [vmem:[%s8173_s10 + $0x1a8] sm:$0xff]  ;;  %335 = vst [vmem:[%s8178_s11 + $0x198] sm:$0xff] %v334_v55  ;;  %v340_v58 = vld [vmem:[%s8173_s10 + $0x1b0] sm:$0xff] }
  0x33   : > { %337 = vst [vmem:[%s8178_s11 + $0x1a0] sm:$0xff] %v336_v56  ;;  %339 = vst [vmem:[%s8178_s11 + $0x1a8] sm:$0xff] %v338_v57  ;;  %v342_v59 = vld [vmem:[%s8173_s10 + $0x1b8] sm:$0xff]  ;;  %v344_v60 = vld [vmem:[%s8173_s10 + $0x1c0] sm:$0xff] }
  0x34   : > { %341 = vst [vmem:[%s8178_s11 + $0x1b0] sm:$0xff] %v340_v58  ;;  %343 = vst [vmem:[%s8178_s11 + $0x1b8] sm:$0xff] %v342_v59  ;;  %v346_v61 = vld [vmem:[%s8173_s10 + $0x1c8] sm:$0xff]  ;;  %v348_v62 = vld [vmem:[%s8173_s10 + $0x1d0] sm:$0xff] }
  0x35   : > { %345 = vst [vmem:[%s8178_s11 + $0x1c0] sm:$0xff] %v344_v60  ;;  %v350_v63 = vld [vmem:[%s8173_s10 + $0x1d8] sm:$0xff]  ;;  %347 = vst [vmem:[%s8178_s11 + $0x1c8] sm:$0xff] %v346_v61  ;;  %v352_v0 = vld [vmem:[%s8173_s10 + $0x1e0] sm:$0xff] }
  0x36   : > { %349 = vst [vmem:[%s8178_s11 + $0x1d0] sm:$0xff] %v348_v62  ;;  %351 = vst [vmem:[%s8178_s11 + $0x1d8] sm:$0xff] %v350_v63  ;;  %v354_v1 = vld [vmem:[%s8173_s10 + $0x1e8] sm:$0xff]  ;;  %v356_v2 = vld [vmem:[%s8173_s10 + $0x1f0] sm:$0xff] }
  0x37   : > { %353 = vst [vmem:[%s8178_s11 + $0x1e0] sm:$0xff] %v352_v0  ;;  %355 = vst [vmem:[%s8178_s11 + $0x1e8] sm:$0xff] %v354_v1  ;;  %v358_v3 = vld [vmem:[%s8173_s10 + $0x1f8] sm:$0xff]  ;;  %v360_v4 = vld [vmem:[%s8173_s10 + $0x400] sm:$0xff] }
  0x38   : > { %357 = vst [vmem:[%s8178_s11 + $0x1f0] sm:$0xff] %v356_v2  ;;  %v362_v5 = vld [vmem:[%s8173_s10 + $0x408] sm:$0xff]  ;;  %359 = vst [vmem:[%s8178_s11 + $0x1f8] sm:$0xff] %v358_v3  ;;  %v364_v6 = vld [vmem:[%s8173_s10 + $0x410] sm:$0xff] }
  0x39   : > { %361 = vst [vmem:[%s8178_s11 + $0x200] sm:$0xff] %v360_v4  ;;  %363 = vst [vmem:[%s8178_s11 + $0x208] sm:$0xff] %v362_v5  ;;  %v366_v7 = vld [vmem:[%s8173_s10 + $0x418] sm:$0xff]  ;;  %v368_v8 = vld [vmem:[%s8173_s10 + $0x420] sm:$0xff] }
  0x3a   : > { %365 = vst [vmem:[%s8178_s11 + $0x210] sm:$0xff] %v364_v6  ;;  %367 = vst [vmem:[%s8178_s11 + $0x218] sm:$0xff] %v366_v7  ;;  %v370_v9 = vld [vmem:[%s8173_s10 + $0x428] sm:$0xff]  ;;  %v372_v10 = vld [vmem:[%s8173_s10 + $0x430] sm:$0xff] }
  0x3b   : > { %369 = vst [vmem:[%s8178_s11 + $0x220] sm:$0xff] %v368_v8  ;;  %v374_v11 = vld [vmem:[%s8173_s10 + $0x438] sm:$0xff]  ;;  %371 = vst [vmem:[%s8178_s11 + $0x228] sm:$0xff] %v370_v9  ;;  %v376_v12 = vld [vmem:[%s8173_s10 + $0x440] sm:$0xff] }
  0x3c   : > { %373 = vst [vmem:[%s8178_s11 + $0x230] sm:$0xff] %v372_v10  ;;  %375 = vst [vmem:[%s8178_s11 + $0x238] sm:$0xff] %v374_v11  ;;  %v378_v13 = vld [vmem:[%s8173_s10 + $0x448] sm:$0xff]  ;;  %v380_v14 = vld [vmem:[%s8173_s10 + $0x450] sm:$0xff] }
  0x3d   : > { %377 = vst [vmem:[%s8178_s11 + $0x240] sm:$0xff] %v376_v12  ;;  %379 = vst [vmem:[%s8178_s11 + $0x248] sm:$0xff] %v378_v13  ;;  %v382_v15 = vld [vmem:[%s8173_s10 + $0x458] sm:$0xff]  ;;  %v384_v16 = vld [vmem:[%s8173_s10 + $0x460] sm:$0xff] }
  0x3e   : > { %381 = vst [vmem:[%s8178_s11 + $0x250] sm:$0xff] %v380_v14  ;;  %v386_v17 = vld [vmem:[%s8173_s10 + $0x468] sm:$0xff]  ;;  %383 = vst [vmem:[%s8178_s11 + $0x258] sm:$0xff] %v382_v15  ;;  %v388_v18 = vld [vmem:[%s8173_s10 + $0x470] sm:$0xff] }
  0x3f   : > { %385 = vst [vmem:[%s8178_s11 + $0x260] sm:$0xff] %v384_v16  ;;  %387 = vst [vmem:[%s8178_s11 + $0x268] sm:$0xff] %v386_v17  ;;  %v390_v19 = vld [vmem:[%s8173_s10 + $0x478] sm:$0xff]  ;;  %v392_v20 = vld [vmem:[%s8173_s10 + $0x480] sm:$0xff] }
  0x40   : > { %389 = vst [vmem:[%s8178_s11 + $0x270] sm:$0xff] %v388_v18  ;;  %391 = vst [vmem:[%s8178_s11 + $0x278] sm:$0xff] %v390_v19  ;;  %v394_v21 = vld [vmem:[%s8173_s10 + $0x488] sm:$0xff]  ;;  %v396_v22 = vld [vmem:[%s8173_s10 + $0x490] sm:$0xff] }
  0x41   : > { %393 = vst [vmem:[%s8178_s11 + $0x280] sm:$0xff] %v392_v20  ;;  %v398_v23 = vld [vmem:[%s8173_s10 + $0x498] sm:$0xff]  ;;  %395 = vst [vmem:[%s8178_s11 + $0x288] sm:$0xff] %v394_v21  ;;  %v400_v24 = vld [vmem:[%s8173_s10 + $0x4a0] sm:$0xff] }
  0x42   : > { %397 = vst [vmem:[%s8178_s11 + $0x290] sm:$0xff] %v396_v22  ;;  %399 = vst [vmem:[%s8178_s11 + $0x298] sm:$0xff] %v398_v23  ;;  %v402_v25 = vld [vmem:[%s8173_s10 + $0x4a8] sm:$0xff]  ;;  %v404_v26 = vld [vmem:[%s8173_s10 + $0x4b0] sm:$0xff] }
  0x43   : > { %401 = vst [vmem:[%s8178_s11 + $0x2a0] sm:$0xff] %v400_v24  ;;  %403 = vst [vmem:[%s8178_s11 + $0x2a8] sm:$0xff] %v402_v25  ;;  %v406_v27 = vld [vmem:[%s8173_s10 + $0x4b8] sm:$0xff]  ;;  %v408_v28 = vld [vmem:[%s8173_s10 + $0x4c0] sm:$0xff] }
  0x44   : > { %405 = vst [vmem:[%s8178_s11 + $0x2b0] sm:$0xff] %v404_v26  ;;  %v410_v29 = vld [vmem:[%s8173_s10 + $0x4c8] sm:$0xff]  ;;  %407 = vst [vmem:[%s8178_s11 + $0x2b8] sm:$0xff] %v406_v27  ;;  %v412_v30 = vld [vmem:[%s8173_s10 + $0x4d0] sm:$0xff] }
  0x45   : > { %409 = vst [vmem:[%s8178_s11 + $0x2c0] sm:$0xff] %v408_v28  ;;  %411 = vst [vmem:[%s8178_s11 + $0x2c8] sm:$0xff] %v410_v29  ;;  %v414_v31 = vld [vmem:[%s8173_s10 + $0x4d8] sm:$0xff]  ;;  %v416_v32 = vld [vmem:[%s8173_s10 + $0x4e0] sm:$0xff] }
  0x46   : > { %413 = vst [vmem:[%s8178_s11 + $0x2d0] sm:$0xff] %v412_v30  ;;  %415 = vst [vmem:[%s8178_s11 + $0x2d8] sm:$0xff] %v414_v31  ;;  %v418_v33 = vld [vmem:[%s8173_s10 + $0x4e8] sm:$0xff]  ;;  %v420_v34 = vld [vmem:[%s8173_s10 + $0x4f0] sm:$0xff] }
  0x47   : > { %417 = vst [vmem:[%s8178_s11 + $0x2e0] sm:$0xff] %v416_v32  ;;  %v422_v35 = vld [vmem:[%s8173_s10 + $0x4f8] sm:$0xff]  ;;  %419 = vst [vmem:[%s8178_s11 + $0x2e8] sm:$0xff] %v418_v33  ;;  %v424_v36 = vld [vmem:[%s8173_s10 + $0x500] sm:$0xff] }
  0x48   : > { %421 = vst [vmem:[%s8178_s11 + $0x2f0] sm:$0xff] %v420_v34  ;;  %423 = vst [vmem:[%s8178_s11 + $0x2f8] sm:$0xff] %v422_v35  ;;  %v426_v37 = vld [vmem:[%s8173_s10 + $0x508] sm:$0xff]  ;;  %v428_v38 = vld [vmem:[%s8173_s10 + $0x510] sm:$0xff] }
  0x49   : > { %425 = vst [vmem:[%s8178_s11 + $0x300] sm:$0xff] %v424_v36  ;;  %427 = vst [vmem:[%s8178_s11 + $0x308] sm:$0xff] %v426_v37  ;;  %v430_v39 = vld [vmem:[%s8173_s10 + $0x518] sm:$0xff]  ;;  %v432_v40 = vld [vmem:[%s8173_s10 + $0x520] sm:$0xff] }
  0x4a   : > { %429 = vst [vmem:[%s8178_s11 + $0x310] sm:$0xff] %v428_v38  ;;  %v434_v41 = vld [vmem:[%s8173_s10 + $0x528] sm:$0xff]  ;;  %431 = vst [vmem:[%s8178_s11 + $0x318] sm:$0xff] %v430_v39  ;;  %v436_v42 = vld [vmem:[%s8173_s10 + $0x530] sm:$0xff] }
  0x4b   : > { %433 = vst [vmem:[%s8178_s11 + $0x320] sm:$0xff] %v432_v40  ;;  %435 = vst [vmem:[%s8178_s11 + $0x328] sm:$0xff] %v434_v41  ;;  %v438_v43 = vld [vmem:[%s8173_s10 + $0x538] sm:$0xff]  ;;  %v440_v44 = vld [vmem:[%s8173_s10 + $0x540] sm:$0xff] }
  0x4c   : > { %437 = vst [vmem:[%s8178_s11 + $0x330] sm:$0xff] %v436_v42  ;;  %439 = vst [vmem:[%s8178_s11 + $0x338] sm:$0xff] %v438_v43  ;;  %v442_v45 = vld [vmem:[%s8173_s10 + $0x548] sm:$0xff]  ;;  %v444_v46 = vld [vmem:[%s8173_s10 + $0x550] sm:$0xff] }
  0x4d   : > { %441 = vst [vmem:[%s8178_s11 + $0x340] sm:$0xff] %v440_v44  ;;  %v446_v47 = vld [vmem:[%s8173_s10 + $0x558] sm:$0xff]  ;;  %443 = vst [vmem:[%s8178_s11 + $0x348] sm:$0xff] %v442_v45  ;;  %v448_v48 = vld [vmem:[%s8173_s10 + $0x560] sm:$0xff] }
  0x4e   : > { %445 = vst [vmem:[%s8178_s11 + $0x350] sm:$0xff] %v444_v46  ;;  %447 = vst [vmem:[%s8178_s11 + $0x358] sm:$0xff] %v446_v47  ;;  %v450_v49 = vld [vmem:[%s8173_s10 + $0x568] sm:$0xff]  ;;  %v452_v50 = vld [vmem:[%s8173_s10 + $0x570] sm:$0xff] }
  0x4f   : > { %449 = vst [vmem:[%s8178_s11 + $0x360] sm:$0xff] %v448_v48  ;;  %451 = vst [vmem:[%s8178_s11 + $0x368] sm:$0xff] %v450_v49  ;;  %v454_v51 = vld [vmem:[%s8173_s10 + $0x578] sm:$0xff]  ;;  %v456_v52 = vld [vmem:[%s8173_s10 + $0x580] sm:$0xff] }
  0x50   : > { %453 = vst [vmem:[%s8178_s11 + $0x370] sm:$0xff] %v452_v50  ;;  %v458_v53 = vld [vmem:[%s8173_s10 + $0x588] sm:$0xff]  ;;  %455 = vst [vmem:[%s8178_s11 + $0x378] sm:$0xff] %v454_v51  ;;  %v460_v54 = vld [vmem:[%s8173_s10 + $0x590] sm:$0xff] }
  0x51   : > { %457 = vst [vmem:[%s8178_s11 + $0x380] sm:$0xff] %v456_v52  ;;  %459 = vst [vmem:[%s8178_s11 + $0x388] sm:$0xff] %v458_v53  ;;  %v462_v55 = vld [vmem:[%s8173_s10 + $0x598] sm:$0xff]  ;;  %v464_v56 = vld [vmem:[%s8173_s10 + $0x5a0] sm:$0xff] }
  0x52   : > { %461 = vst [vmem:[%s8178_s11 + $0x390] sm:$0xff] %v460_v54  ;;  %463 = vst [vmem:[%s8178_s11 + $0x398] sm:$0xff] %v462_v55  ;;  %v466_v57 = vld [vmem:[%s8173_s10 + $0x5a8] sm:$0xff]  ;;  %v468_v58 = vld [vmem:[%s8173_s10 + $0x5b0] sm:$0xff] }
  0x53   : > { %465 = vst [vmem:[%s8178_s11 + $0x3a0] sm:$0xff] %v464_v56  ;;  %v470_v59 = vld [vmem:[%s8173_s10 + $0x5b8] sm:$0xff]  ;;  %467 = vst [vmem:[%s8178_s11 + $0x3a8] sm:$0xff] %v466_v57  ;;  %v472_v60 = vld [vmem:[%s8173_s10 + $0x5c0] sm:$0xff] }
  0x54   : > { %469 = vst [vmem:[%s8178_s11 + $0x3b0] sm:$0xff] %v468_v58  ;;  %471 = vst [vmem:[%s8178_s11 + $0x3b8] sm:$0xff] %v470_v59  ;;  %v474_v61 = vld [vmem:[%s8173_s10 + $0x5c8] sm:$0xff]  ;;  %v476_v62 = vld [vmem:[%s8173_s10 + $0x5d0] sm:$0xff] }
  0x55   : > { %473 = vst [vmem:[%s8178_s11 + $0x3c0] sm:$0xff] %v472_v60  ;;  %475 = vst [vmem:[%s8178_s11 + $0x3c8] sm:$0xff] %v474_v61  ;;  %v478_v63 = vld [vmem:[%s8173_s10 + $0x5d8] sm:$0xff]  ;;  %v480_v0 = vld [vmem:[%s8173_s10 + $0x5e0] sm:$0xff] }
  0x56   : > { %477 = vst [vmem:[%s8178_s11 + $0x3d0] sm:$0xff] %v476_v62  ;;  %v482_v1 = vld [vmem:[%s8173_s10 + $0x5e8] sm:$0xff]  ;;  %479 = vst [vmem:[%s8178_s11 + $0x3d8] sm:$0xff] %v478_v63  ;;  %v484_v2 = vld [vmem:[%s8173_s10 + $0x5f0] sm:$0xff] }
  0x57   : > { %481 = vst [vmem:[%s8178_s11 + $0x3e0] sm:$0xff] %v480_v0  ;;  %483 = vst [vmem:[%s8178_s11 + $0x3e8] sm:$0xff] %v482_v1  ;;  %v486_v3 = vld [vmem:[%s8173_s10 + $0x5f8] sm:$0xff] }
  0x58   : > { %485 = vst [vmem:[%s8178_s11 + $0x3f0] sm:$0xff] %v484_v2  ;;  %487 = vst [vmem:[%s8178_s11 + $0x3f8] sm:$0xff] %v486_v3 }
  0x59 PF: > { %p7203_p5 = scmp.ge.s32.totalorder %s8097_s17, 1  ;;  %p492_p6 = scmp.lt.s32.totalorder %s8097_s17, 3 }
  0x5b   : > { %p493_p7 = pnand %p7203_p5, %p492_p6 }
  0x5d   : > { %496 = sbr.rel (%p493_p7) target bundleno = 981 (0x3d5), region = 89 }
  0x64   : > { %v546_v4 = vld [vmem:[%s12601_s1] sm:$0xff]  ;;  %v547_v6 = vld [vmem:[%s12601_s1 + $0x8] sm:$0xff]  ;;  %s499_s24 = sand.u32 1, %s8089_s15   ;;  %v8099_v10 = vmov 0   ;;  %v548_v11 = vld [vmem:[%s12601_s1 + $0x10] sm:$0xff]  ;;  %vm741_vm0 = vcmask 130048  }
  0x65   : > { %v562_v5 = vld [vmem:[%s12601_s1 + $0x80] sm:$0xff]  ;;  %v563_v8 = vld [vmem:[%s12601_s1 + $0x88] sm:$0xff]  ;;  %777 = vmatprep.mubr.bf16.mxu0 %v8099_v10  ;;  %820 = vmatprep.mubr.bf16.mxu1 %v8099_v10  ;;  %s7204_s27 = sshll.u32 %s499_s24, 5  ;;  %v564_v12 = vld [vmem:[%s12601_s1 + $0x90] sm:$0xff]  ;;  %s9575_s5 = sshll.u32 %s499_s24, 10 }
  0x66   : > { %v8445_v7 = vcombine.high %v546_v4, %v562_v5  ;;  %v8450_v9 = vcombine.low %v546_v4, %v562_v5  ;;  %v8462_v13 = vcombine.high %v547_v6, %v563_v8  ;;  %v8464_v14 = vcombine.low %v547_v6, %v563_v8  ;;  %v549_v16 = vld [vmem:[%s12601_s1 + $0x18] sm:$0xff]  ;;  %v550_v18 = vld [vmem:[%s12601_s1 + $0x20] sm:$0xff]  ;;  %s8478_s12 = scalar_lea.vmem [#allocation2], %s7204_s27  ;;  %v551_v25 = vld [vmem:[%s12601_s1 + $0x28] sm:$0xff]  ;;  %s9637_s15 = scalar_lea.vmem [#allocation3], %s9575_s5 }
  0x67   : > { %v8466_v15 = vcombine.high %v548_v11, %v564_v12  ;;  %v565_v17 = vld [vmem:[%s12601_s1 + $0x98] sm:$0xff]  ;;  %v578_v19 = vld [vmem:[%s8478_s12] sm:$0xff]  ;;  %v579_v20 = vld [vmem:[%s8478_s12 + $0x8] sm:$0xff]  ;;  %v8491_v24 = vcombine.low %v548_v11, %v564_v12  ;;  %s7206_s7 = sshll.u32 %s7192_s18, 4 }
  0x68   : > { %745 = vmatprep.subr.bf16.mxu0 %v8445_v7  ;;  %v8482_v21 = vcombine.high %v549_v16, %v565_v17  ;;  %v566_v22 = vld [vmem:[%s12601_s1 + $0xa0] sm:$0xff]  ;;  %788 = vmatprep.subr.bf16.mxu1 %v8462_v13  ;;  %v8489_v23 = vpack.c.bf16 %v579_v20, %v578_v19  ;;  %v567_v26 = vld [vmem:[%s12601_s1 + $0xa8] sm:$0xff]  ;;  %v8501_v27 = vcombine.low %v549_v16, %v565_v17  ;;  %v552_v30 = vld [vmem:[%s12601_s1 + $0x30] sm:$0xff]  ;;  %p539_p8 = scmp.lt.s32.totalorder %s7206_s7, 31 }
  0x69   : > { %746 = vmatpush1.bf16.msra.mxu0 %v8450_v9  ;;  %789 = vmatpush1.bf16.msra.mxu1 %v8464_v14  ;;  %v8504_v28 = vcombine.high %v550_v18, %v566_v22  ;;  %v8508_v29 = vcombine.high %v551_v25, %v567_v26  ;;  %v568_v31 = vld [vmem:[%s12601_s1 + $0xb0] sm:$0xff]  ;;  %v8524_v32 = vcombine.low %v550_v18, %v566_v22  ;;  %v553_v33 = vld [vmem:[%s12601_s1 + $0x38] sm:$0xff]  ;;  %v554_v38 = vld [vmem:[%s12601_s1 + $0x40] sm:$0xff] }
  0x6a   : > { %831 = vmatprep.subr.bf16.mxu0 %v8466_v15  ;;  %874 = vmatprep.subr.bf16.mxu1 %v8482_v21  ;;  %v569_v34 = vld [vmem:[%s12601_s1 + $0xb8] sm:$0xff]  ;;  %v8532_v35 = vcombine.low %v551_v25, %v567_v26  ;;  %v8534_v36 = vcombine.high %v552_v30, %v568_v31  ;;  %v570_v39 = vld [vmem:[%s12601_s1 + $0xc0] sm:$0xff]  ;;  %v8554_v40 = vcombine.low %v552_v30, %v568_v31  ;;  %v555_v41 = vld [vmem:[%s12601_s1 + $0x48] sm:$0xff]  ;;  %s13516_s7 = smov (!%p539_p8, %s7206_s7), 31 }
  0x6b   : > { %v8538_v37 = vcombine.high %v553_v33, %v569_v34  ;;  %v571_v42 = vld [vmem:[%s12601_s1 + $0xc8] sm:$0xff]  ;;  %v8562_v43 = vcombine.low %v553_v33, %v569_v34  ;;  %v8564_v44 = vcombine.high %v554_v38, %v570_v39  ;;  %v556_v46 = vld [vmem:[%s12601_s1 + $0x50] sm:$0xff]  ;;  %v8584_v48 = vcombine.low %v554_v38, %v570_v39  ;;  %v557_v49 = vld [vmem:[%s12601_s1 + $0x58] sm:$0xff]  ;;  %s7599_s17 = sshll.u32 %s13516_s7, 6 }
  0x6c   : > { %7241 = vmatmul.mubr.msk.bf16.vlgmr.msra.gmra.mrb[0].mxu0 %vm741_vm0, %v8489_v23  ;;  %7242 = vmatmul.mubr.msk.bf16.vlgmr.msra.gmra.mrb[0].mxu1 %vm741_vm0, %v8489_v23  ;;  %v8568_v45 = vcombine.high %v555_v41, %v571_v42  ;;  %v572_v47 = vld [vmem:[%s12601_s1 + $0xd0] sm:$0xff]  ;;  %v573_v50 = vld [vmem:[%s12601_s1 + $0xd8] sm:$0xff]  ;;  %v8592_v51 = vcombine.low %v555_v41, %v571_v42  ;;  %v558_v54 = vld [vmem:[%s12601_s1 + $0x60] sm:$0xff]  ;;  %s11335_s9 = scalar_lea.vmem %s12604_s4, %s7599_s17 }
  0x6d   : > { %832 = vmatpush1.bf16.msra.mxu0 %v8491_v24  ;;  %875 = vmatpush1.bf16.msra.mxu1 %v8501_v27  ;;  %v8594_v52 = vcombine.high %v556_v46, %v572_v47  ;;  %v8598_v53 = vcombine.high %v557_v49, %v573_v50  ;;  %v574_v55 = vld [vmem:[%s12601_s1 + $0xe0] sm:$0xff]  ;;  %v8614_v56 = vcombine.low %v556_v46, %v572_v47  ;;  %v559_v57 = vld [vmem:[%s12601_s1 + $0x68] sm:$0xff]  ;;  %v560_v62 = vld [vmem:[%s12601_s1 + $0x70] sm:$0xff] }
  0x6e   : > { %863 = vmatprep.mubr.bf16.mxu0 %v8099_v10  ;;  %906 = vmatprep.mubr.bf16.mxu1 %v8099_v10  ;;  %v575_v58 = vld [vmem:[%s12601_s1 + $0xe8] sm:$0xff]  ;;  %v8622_v59 = vcombine.low %v557_v49, %v573_v50  ;;  %v8624_v60 = vcombine.high %v558_v54, %v574_v55  ;;  %v576_v63 = vld [vmem:[%s12601_s1 + $0xf0] sm:$0xff]  ;;  %v8644_v0 = vcombine.low %v558_v54, %v574_v55  ;;  %v561_v1 = vld [vmem:[%s12601_s1 + $0x78] sm:$0xff] }
  0x6f   : > { %917 = vmatprep.subr.bf16.mxu0 %v8504_v28  ;;  %960 = vmatprep.subr.bf16.mxu1 %v8508_v29  ;;  %v8628_v61 = vcombine.high %v559_v57, %v575_v58  ;;  %v577_v2 = vld [vmem:[%s12601_s1 + $0xf8] sm:$0xff]  ;;  %v8652_v3 = vcombine.low %v559_v57, %v575_v58  ;;  %v8654_v4 = vcombine.high %v560_v62, %v576_v63  ;;  %v7257_v11 = vld [vmem:[%s8478_s12 + $0x10] sm:$0xff] }
  0x70   : > { %v8658_v5 = vcombine.high %v561_v1, %v577_v2  ;;  %v8668_v6 = vcombine.low %v560_v62, %v576_v63  ;;  %v8670_v8 = vcombine.low %v561_v1, %v577_v2  ;;  %v7258_v12 = vld [vmem:[%s8478_s12 + $0x18] sm:$0xff] }
  0x74   : > { %7243 = vmatmul.mubr.msk.bf16.vlgmr.msra.gmra.mrb[4].mxu0 %vm741_vm0, %v8489_v23  ;;  %7244 = vmatmul.mubr.msk.bf16.vlgmr.msra.gmra.mrb[4].mxu1 %vm741_vm0, %v8489_v23 }
  0x75   : > { %918 = vmatpush1.bf16.msra.mxu0 %v8524_v32  ;;  %961 = vmatpush1.bf16.msra.mxu1 %v8532_v35 }
  0x76   : > { %949 = vmatprep.mubr.bf16.mxu0 %v8099_v10  ;;  %992 = vmatprep.mubr.bf16.mxu1 %v8099_v10 }
  0x77   : > { %1003 = vmatprep.subr.bf16.mxu0 %v8534_v36  ;;  %1046 = vmatprep.subr.bf16.mxu1 %v8538_v37 }
  0x7c   : > { %7245 = vmatmul.mubr.msk.bf16.vlgmr.msra.gmra.mrb[8].mxu0 %vm741_vm0, %v8489_v23  ;;  %7246 = vmatmul.mubr.msk.bf16.vlgmr.msra.gmra.mrb[8].mxu1 %vm741_vm0, %v8489_v23 }
  0x7d   : > { %1004 = vmatpush1.bf16.msra.mxu0 %v8554_v40  ;;  %1047 = vmatpush1.bf16.msra.mxu1 %v8562_v43 }
  0x7e   : > { %1035 = vmatprep.mubr.bf16.mxu0 %v8099_v10  ;;  %1078 = vmatprep.mubr.bf16.mxu1 %v8099_v10 }
  0x7f   : > { %1089 = vmatprep.subr.bf16.mxu0 %v8564_v44  ;;  %1132 = vmatprep.subr.bf16.mxu1 %v8568_v45 }
  0x84   : > { %7247 = vmatmul.mubr.msk.bf16.vlgmr.msra.gmra.mrb[12].mxu0 %vm741_vm0, %v8489_v23  ;;  %7248 = vmatmul.mubr.msk.bf16.vlgmr.msra.gmra.mrb[12].mxu1 %vm741_vm0, %v8489_v23 }
  0x85   : > { %1090 = vmatpush1.bf16.msra.mxu0 %v8584_v48  ;;  %1133 = vmatpush1.bf16.msra.mxu1 %v8592_v51 }
  0x86   : > { %1121 = vmatprep.mubr.bf16.mxu0 %v8099_v10  ;;  %1164 = vmatprep.mubr.bf16.mxu1 %v8099_v10 }
  0x87   : > { %1175 = vmatprep.subr.bf16.mxu0 %v8594_v52  ;;  %1218 = vmatprep.subr.bf16.mxu1 %v8598_v53 }
  0x8c   : > { %7249 = vmatmul.mubr.msk.bf16.vlgmr.msra.gmra.mrb[16].mxu0 %vm741_vm0, %v8489_v23  ;;  %7250 = vmatmul.mubr.msk.bf16.vlgmr.msra.gmra.mrb[16].mxu1 %vm741_vm0, %v8489_v23 }
  0x8d   : > { %1176 = vmatpush1.bf16.msra.mxu0 %v8614_v56  ;;  %1219 = vmatpush1.bf16.msra.mxu1 %v8622_v59 }
  0x8e   : > { %1207 = vmatprep.mubr.bf16.mxu0 %v8099_v10  ;;  %1250 = vmatprep.mubr.bf16.mxu1 %v8099_v10 }
  0x8f   : > { %1261 = vmatprep.subr.bf16.mxu0 %v8624_v60  ;;  %1304 = vmatprep.subr.bf16.mxu1 %v8628_v61 }
  0x94   : > { %7251 = vmatmul.mubr.msk.bf16.vlgmr.msra.gmra.mrb[20].mxu0 %vm741_vm0, %v8489_v23  ;;  %7252 = vmatmul.mubr.msk.bf16.vlgmr.msra.gmra.mrb[20].mxu1 %vm741_vm0, %v8489_v23 }
  0x95   : > { %1262 = vmatpush1.bf16.msra.mxu0 %v8644_v0  ;;  %1305 = vmatpush1.bf16.msra.mxu1 %v8652_v3 }
  0x96   : > { %1293 = vmatprep.mubr.bf16.mxu0 %v8099_v10  ;;  %1336 = vmatprep.mubr.bf16.mxu1 %v8099_v10 }
  0x97   : > { %1347 = vmatprep.subr.bf16.mxu0 %v8654_v4  ;;  %1390 = vmatprep.subr.bf16.mxu1 %v8658_v5 }
  0x9c   : > { %7253 = vmatmul.mubr.msk.bf16.vlgmr.msra.gmra.mrb[24].mxu0 %vm741_vm0, %v8489_v23  ;;  %7254 = vmatmul.mubr.msk.bf16.vlgmr.msra.gmra.mrb[24].mxu1 %vm741_vm0, %v8489_v23 }
  0x9d   : > { %1348 = vmatpush1.bf16.msra.mxu0 %v8668_v6  ;;  %1391 = vmatpush1.bf16.msra.mxu1 %v8670_v8 }
  0x9e   : > { %1379 = vmatprep.mubr.bf16.mxu0 %v8099_v10  ;;  %1422 = vmatprep.mubr.bf16.mxu1 %v8099_v10 }
  0x9f   : > { %1440 = vmatprep.subr.bf16.mxu0 %v8445_v7  ;;  %1483 = vmatprep.subr.bf16.mxu1 %v8462_v13  ;;  %v1436_v7 = vpack.c.bf16 %v7258_v12, %v7257_v11 }
  0xa4   : > { %7255 = vmatmul.mubr.msk.bf16.vlgmr.msra.gmra.mrb[28].mxu0 %vm741_vm0, %v8489_v23  ;;  %7256 = vmatmul.mubr.msk.bf16.vlgmr.msra.gmra.mrb[28].mxu1 %vm741_vm0, %v8489_v23 }
  0xa5   : > { %1441 = vmatpush1.bf16.msra.mxu0 %v8450_v9  ;;  %1484 = vmatpush1.bf16.msra.mxu1 %v8464_v14 }
  0xa6   : > { %1472 = vmatprep.mubr.bf16.mxu0 %v8099_v10  ;;  %1515 = vmatprep.mubr.bf16.mxu1 %v8099_v10 }
  0xa7   : > { %1526 = vmatprep.subr.bf16.mxu0 %v8466_v15  ;;  %1569 = vmatprep.subr.bf16.mxu1 %v8482_v21 }
  0xac   : > { %7259 = vmatmul.mubr.msk.bf16.vlgmr.msra.gmra.mrb[32].mxu0 %vm741_vm0, %v1436_v7  ;;  %7260 = vmatmul.mubr.msk.bf16.vlgmr.msra.gmra.mrb[32].mxu1 %vm741_vm0, %v1436_v7 }
  0xad   : > { %1527 = vmatpush1.bf16.msra.mxu0 %v8491_v24  ;;  %1570 = vmatpush1.bf16.msra.mxu1 %v8501_v27 }
  0xae   : > { %1558 = vmatprep.mubr.bf16.mxu0 %v8099_v10  ;;  %1601 = vmatprep.mubr.bf16.mxu1 %v8099_v10 }
  0xaf   : > { %1612 = vmatprep.subr.bf16.mxu0 %v8504_v28  ;;  %1655 = vmatprep.subr.bf16.mxu1 %v8508_v29 }
  0xb4   : > { %7261 = vmatmul.mubr.msk.bf16.vlgmr.msra.gmra.mrb[36].mxu0 %vm741_vm0, %v1436_v7  ;;  %7262 = vmatmul.mubr.msk.bf16.vlgmr.msra.gmra.mrb[36].mxu1 %vm741_vm0, %v1436_v7 }
  0xb5   : > { %1613 = vmatpush1.bf16.msra.mxu0 %v8524_v32  ;;  %1656 = vmatpush1.bf16.msra.mxu1 %v8532_v35 }
  0xb6   : > { %1644 = vmatprep.mubr.bf16.mxu0 %v8099_v10  ;;  %1687 = vmatprep.mubr.bf16.mxu1 %v8099_v10 }
  0xb7   : > { %1698 = vmatprep.subr.bf16.mxu0 %v8534_v36  ;;  %1741 = vmatprep.subr.bf16.mxu1 %v8538_v37 }
  0xbc   : > { %7263 = vmatmul.mubr.msk.bf16.vlgmr.msra.gmra.mrb[40].mxu0 %vm741_vm0, %v1436_v7  ;;  %7264 = vmatmul.mubr.msk.bf16.vlgmr.msra.gmra.mrb[40].mxu1 %vm741_vm0, %v1436_v7 }
  0xbd   : > { %1699 = vmatpush1.bf16.msra.mxu0 %v8554_v40  ;;  %1742 = vmatpush1.bf16.msra.mxu1 %v8562_v43 }
  0xbe   : > { %1730 = vmatprep.mubr.bf16.mxu0 %v8099_v10  ;;  %1773 = vmatprep.mubr.bf16.mxu1 %v8099_v10 }
  0xbf   : > { %1784 = vmatprep.subr.bf16.mxu0 %v8564_v44  ;;  %1827 = vmatprep.subr.bf16.mxu1 %v8568_v45 }
  0xc4   : > { %7265 = vmatmul.mubr.msk.bf16.vlgmr.msra.gmra.mrb[44].mxu0 %vm741_vm0, %v1436_v7  ;;  %7266 = vmatmul.mubr.msk.bf16.vlgmr.msra.gmra.mrb[44].mxu1 %vm741_vm0, %v1436_v7 }
  0xc5   : > { %1785 = vmatpush1.bf16.msra.mxu0 %v8584_v48  ;;  %1828 = vmatpush1.bf16.msra.mxu1 %v8592_v51 }
  0xc6   : > { %1816 = vmatprep.mubr.bf16.mxu0 %v8099_v10  ;;  %1859 = vmatprep.mubr.bf16.mxu1 %v8099_v10 }
  0xc7   : > { %1870 = vmatprep.subr.bf16.mxu0 %v8594_v52  ;;  %1913 = vmatprep.subr.bf16.mxu1 %v8598_v53 }
  0xcc   : > { %7267 = vmatmul.mubr.msk.bf16.vlgmr.msra.gmra.mrb[48].mxu0 %vm741_vm0, %v1436_v7  ;;  %7268 = vmatmul.mubr.msk.bf16.vlgmr.msra.gmra.mrb[48].mxu1 %vm741_vm0, %v1436_v7 }
  0xcd   : > { %1871 = vmatpush1.bf16.msra.mxu0 %v8614_v56  ;;  %1914 = vmatpush1.bf16.msra.mxu1 %v8622_v59 }
  0xce   : > { %1902 = vmatprep.mubr.bf16.mxu0 %v8099_v10  ;;  %1945 = vmatprep.mubr.bf16.mxu1 %v8099_v10 }
  0xcf   : > { %1956 = vmatprep.subr.bf16.mxu0 %v8624_v60  ;;  %1999 = vmatprep.subr.bf16.mxu1 %v8628_v61 }
  0xd4   : > { %7269 = vmatmul.mubr.msk.bf16.vlgmr.msra.gmra.mrb[52].mxu0 %vm741_vm0, %v1436_v7  ;;  %7270 = vmatmul.mubr.msk.bf16.vlgmr.msra.gmra.mrb[52].mxu1 %vm741_vm0, %v1436_v7 }
  0xd5   : > { %1957 = vmatpush1.bf16.msra.mxu0 %v8644_v0  ;;  %2000 = vmatpush1.bf16.msra.mxu1 %v8652_v3 }
  0xd6   : > { %1988 = vmatprep.mubr.bf16.mxu0 %v8099_v10  ;;  %2031 = vmatprep.mubr.bf16.mxu1 %v8099_v10 }
  0xd7   : > { %2042 = vmatprep.subr.bf16.mxu0 %v8654_v4  ;;  %2085 = vmatprep.subr.bf16.mxu1 %v8658_v5 }
  0xdc   : > { %7271 = vmatmul.mubr.msk.bf16.vlgmr.msra.gmra.mrb[56].mxu0 %vm741_vm0, %v1436_v7  ;;  %7272 = vmatmul.mubr.msk.bf16.vlgmr.msra.gmra.mrb[56].mxu1 %vm741_vm0, %v1436_v7 }
  0xdd   : > { %2043 = vmatpush1.bf16.msra.mxu0 %v8668_v6  ;;  %2086 = vmatpush1.bf16.msra.mxu1 %v8670_v8 }
  0xde   : > { %2074 = vmatprep.mubr.bf16.mxu0 %v8099_v10  ;;  %2117 = vmatprep.mubr.bf16.mxu1 %v8099_v10 }
  0xe4   : > { %7273 = vmatmul.mubr.msk.bf16.vlgmr.msra.gmra.mrb[60].mxu0 %vm741_vm0, %v1436_v7  ;;  %7274 = vmatmul.mubr.msk.bf16.vlgmr.msra.gmra.mrb[60].mxu1 %vm741_vm0, %v1436_v7 }
 0x13f   : > { %v8750_v9 = vpop.f32.mrb[0].mxu0  ;;  %v8754_v14 = vpop.f32.mrb[0].mxu1 }
 0x140   : > { %v8752_v13 = vpop.f32.mrb[1].mxu0  ;;  %v8758_v16 = vpop.f32.mrb[1].mxu1 }
 0x141   : > { %v8756_v15 = vpop.f32.mrb[2].mxu0  ;;  %v8762_v18 = vpop.f32.mrb[2].mxu1 }
 0x142   : > { %v8760_v17 = vpop.f32.mrb[3].mxu0  ;;  %v8764_v19 = vpop.f32.mrb[3].mxu1 }
 0x147   : > { %v8766_v10 = vpop.f32.mrb[4].mxu0  ;;  %v8770_v21 = vpop.f32.mrb[4].mxu1 }
 0x148   : > { %v8768_v20 = vpop.f32.mrb[5].mxu0  ;;  %v8774_v23 = vpop.f32.mrb[5].mxu1 }
 0x149   : > { %v8772_v22 = vpop.f32.mrb[6].mxu0  ;;  %v8778_v25 = vpop.f32.mrb[6].mxu1 }
 0x14a   : > { %v8776_v24 = vpop.f32.mrb[7].mxu0  ;;  %v8780_v26 = vpop.f32.mrb[7].mxu1 }
 0x14f   : > { %v8782_v27 = vpop.f32.mrb[8].mxu0  ;;  %v8786_v29 = vpop.f32.mrb[8].mxu1 }
 0x150   : > { %v8784_v28 = vpop.f32.mrb[9].mxu0  ;;  %v8790_v31 = vpop.f32.mrb[9].mxu1 }
 0x151   : > { %v8788_v30 = vpop.f32.mrb[10].mxu0  ;;  %v8794_v33 = vpop.f32.mrb[10].mxu1 }
 0x152   : > { %v8792_v32 = vpop.f32.mrb[11].mxu0  ;;  %v8796_v34 = vpop.f32.mrb[11].mxu1 }
 0x157   : > { %v8798_v35 = vpop.f32.mrb[12].mxu0  ;;  %v8802_v37 = vpop.f32.mrb[12].mxu1 }
 0x158   : > { %v8800_v36 = vpop.f32.mrb[13].mxu0  ;;  %v8806_v39 = vpop.f32.mrb[13].mxu1 }
 0x159   : > { %v8804_v38 = vpop.f32.mrb[14].mxu0  ;;  %v8810_v41 = vpop.f32.mrb[14].mxu1 }
 0x15a   : > { %v8808_v40 = vpop.f32.mrb[15].mxu0  ;;  %v8812_v42 = vpop.f32.mrb[15].mxu1 }
 0x15f   : > { %v8814_v43 = vpop.f32.mrb[16].mxu0  ;;  %v8818_v45 = vpop.f32.mrb[16].mxu1 }
 0x160   : > { %v8816_v44 = vpop.f32.mrb[17].mxu0  ;;  %12903 = vst [vmem:[#allocation5_spill] sm:$0xff] %v8818_v45  ;;  %v8822_v47 = vpop.f32.mrb[17].mxu1 }
 0x161   : > { %12902 = vst [vmem:[#allocation4_spill] sm:$0xff] %v8816_v44  ;;  %v8820_v46 = vpop.f32.mrb[18].mxu0  ;;  %12905 = vst [vmem:[#allocation7_spill] sm:$0xff] %v8822_v47  ;;  %v8826_v49 = vpop.f32.mrb[18].mxu1 }
 0x162   : > { %12904 = vst [vmem:[#allocation6_spill] sm:$0xff] %v8820_v46  ;;  %v8824_v48 = vpop.f32.mrb[19].mxu0  ;;  %12907 = vst [vmem:[#allocation9_spill] sm:$0xff] %v8826_v49  ;;  %v8828_v50 = vpop.f32.mrb[19].mxu1 }
 0x163   : > { %12906 = vst [vmem:[#allocation8_spill] sm:$0xff] %v8824_v48  ;;  %12908 = vst [vmem:[#allocation10_spill] sm:$0xff] %v8828_v50 }
 0x167   : > { %v8830_v51 = vpop.f32.mrb[20].mxu0  ;;  %v8834_v53 = vpop.f32.mrb[20].mxu1 }
 0x168   : > { %12909 = vst [vmem:[#allocation11_spill] sm:$0xff] %v8830_v51  ;;  %v8832_v52 = vpop.f32.mrb[21].mxu0  ;;  %12911 = vst [vmem:[#allocation13_spill] sm:$0xff] %v8834_v53  ;;  %v8838_v55 = vpop.f32.mrb[21].mxu1 }
 0x169   : > { %12910 = vst [vmem:[#allocation12_spill] sm:$0xff] %v8832_v52  ;;  %v8836_v54 = vpop.f32.mrb[22].mxu0  ;;  %12913 = vst [vmem:[#allocation15_spill] sm:$0xff] %v8838_v55  ;;  %v8842_v57 = vpop.f32.mrb[22].mxu1 }
 0x16a   : > { %12912 = vst [vmem:[#allocation14_spill] sm:$0xff] %v8836_v54  ;;  %v8840_v56 = vpop.f32.mrb[23].mxu0  ;;  %12915 = vst [vmem:[#allocation17_spill] sm:$0xff] %v8842_v57  ;;  %v8844_v58 = vpop.f32.mrb[23].mxu1 }
 0x16b   : > { %12914 = vst [vmem:[#allocation16_spill] sm:$0xff] %v8840_v56  ;;  %12916 = vst [vmem:[#allocation18_spill] sm:$0xff] %v8844_v58 }
 0x16f   : > { %v8846_v59 = vpop.f32.mrb[24].mxu0  ;;  %v8850_v61 = vpop.f32.mrb[24].mxu1 }
 0x170   : > { %12917 = vst [vmem:[#allocation19_spill] sm:$0xff] %v8846_v59  ;;  %v8848_v60 = vpop.f32.mrb[25].mxu0  ;;  %12919 = vst [vmem:[#allocation21_spill] sm:$0xff] %v8850_v61  ;;  %v8854_v63 = vpop.f32.mrb[25].mxu1 }
 0x171   : > { %12918 = vst [vmem:[#allocation20_spill] sm:$0xff] %v8848_v60  ;;  %v8852_v62 = vpop.f32.mrb[26].mxu0  ;;  %12921 = vst [vmem:[#allocation23_spill] sm:$0xff] %v8854_v63  ;;  %v8858_v1 = vpop.f32.mrb[26].mxu1 }
 0x172   : > { %12920 = vst [vmem:[#allocation22_spill] sm:$0xff] %v8852_v62  ;;  %v8856_v0 = vpop.f32.mrb[27].mxu0  ;;  %12923 = vst [vmem:[#allocation25_spill] sm:$0xff] %v8858_v1  ;;  %v8860_v2 = vpop.f32.mrb[27].mxu1 }
 0x173   : > { %12922 = vst [vmem:[#allocation24_spill] sm:$0xff] %v8856_v0  ;;  %12924 = vst [vmem:[#allocation26_spill] sm:$0xff] %v8860_v2  ;;  %v12627_v0 = vlaneseq }
 0x177   : > { %v8862_v3 = vpop.f32.mrb[28].mxu0  ;;  %v8866_v5 = vpop.f32.mrb[28].mxu1 }
 0x178   : > { %12925 = vst [vmem:[#allocation27_spill] sm:$0xff] %v8862_v3  ;;  %v8864_v4 = vpop.f32.mrb[29].mxu0  ;;  %12927 = vst [vmem:[#allocation29_spill] sm:$0xff] %v8866_v5  ;;  %v8870_v8 = vpop.f32.mrb[29].mxu1 }
 0x179   : > { %12926 = vst [vmem:[#allocation28_spill] sm:$0xff] %v8864_v4  ;;  %v8868_v6 = vpop.f32.mrb[30].mxu0  ;;  %12929 = vst [vmem:[#allocation31_spill] sm:$0xff] %v8870_v8  ;;  %v8874_v12 = vpop.f32.mrb[30].mxu1  ;;  %v8882_v8 = vshrl.u32 %v12627_v0, 7 }
 0x17a   : > { %12928 = vst [vmem:[#allocation30_spill] sm:$0xff] %v8868_v6  ;;  %v8872_v11 = vpop.f32.mrb[31].mxu0  ;;  %12931 = vst [vmem:[#allocation33_spill] sm:$0xff] %v8874_v12  ;;  %v8876_v7 = vpop.f32.mrb[31].mxu1 }
 0x17b   : > { %12930 = vst [vmem:[#allocation32_spill] sm:$0xff] %v8872_v11  ;;  %12932 = vst [vmem:[#allocation34_spill] sm:$0xff] %v8876_v7  ;;  %v3157_v50 = vsub.s32 0, %v8882_v8 }
 0x17c   : > { %12933 = vst [vmem:[#allocation35_spill] sm:$0xff] %v8882_v8 }
 0x17f   : > { %v1474_v1 = vpop.f32.mrb[32].mxu0  ;;  %v1517_v62 = vpop.f32.mrb[32].mxu1 }
 0x180   : > { %v2128_v2 = vmax.f32 %v8750_v9, %v1474_v1  ;;  %v1476_v3 = vpop.f32.mrb[33].mxu0  ;;  %v2130_v4 = vmax.f32 %v8754_v14, %v1517_v62  ;;  %v1519_v63 = vpop.f32.mrb[33].mxu1 }
 0x181   : > { %v2129_v5 = vmax.f32 %v8752_v13, %v1476_v3  ;;  %v1478_v6 = vpop.f32.mrb[34].mxu0  ;;  %v2131_v7 = vmax.f32 %v8758_v16, %v1519_v63  ;;  %v1521_v59 = vpop.f32.mrb[34].mxu1 }
 0x182   : > { %v2192_v11 = vsub.f32 %v8750_v9, %v2128_v2  ;;  %v2384_v12 = vsub.f32 %v1474_v1, %v2128_v2  ;;  %v2160_v60 = vmax.f32 %v8756_v15, %v1478_v6  ;;  %v1480_v61 = vpop.f32.mrb[35].mxu0  ;;  %v2194_v58 = vsub.f32 %v8754_v14, %v2130_v4  ;;  %v8889_v55 = vpop.f32.mrb[35].mxu1 }
 0x183   : > { %v2386_v56 = vsub.f32 %v1517_v62, %v2130_v4  ;;  %v2193_v57 = vsub.f32 %v8752_v13, %v2129_v5  ;;  %v2385_v54 = vsub.f32 %v1476_v3, %v2129_v5  ;;  %v2195_v53 = vsub.f32 %v8758_v16, %v2131_v7 }
 0x184   : > { %v2256_v52 = vmul.f32 1.442695, %v2192_v11  ;;  %v2448_v0 = vmul.f32 1.442695, %v2384_v12  ;;  %v2387_v9 = vsub.f32 %v1519_v63, %v2131_v7  ;;  %v2260_v1 = vmul.f32 1.442695, %v2194_v58 }
 0x185   : > { %v2452_v2 = vmul.f32 1.442695, %v2386_v56  ;;  %v2224_v51 = vsub.f32 %v8756_v15, %v2160_v60  ;;  %v2258_v48 = vmul.f32 1.442695, %v2193_v57  ;;  %v2450_v14 = vmul.f32 1.442695, %v2385_v54 }
 0x186   : > { %7626 = vpow2.f32 %v2256_v52  ;;  %v2262_v62 = vmul.f32 1.442695, %v2195_v53  ;;  %v2454_v13 = vmul.f32 1.442695, %v2387_v9  ;;  %v2416_v3 = vsub.f32 %v1478_v6, %v2160_v60 }
 0x187   : > { %7628 = vpow2.f32 %v2448_v0  ;;  %v2162_v4 = vmax.f32 %v8762_v18, %v1521_v59  ;;  %v8895_v5 = vpop.f32.mrb[36].mxu0  ;;  %v2161_v16 = vmax.f32 %v8760_v17, %v1480_v61  ;;  %v2163_v56 = vmax.f32 %v8764_v19, %v8889_v55  ;;  %v8902_v52 = vpop.f32.mrb[36].mxu1  ;;  %v8914_v0 = vld [vmem:[%s12603_s3] sm:$0xf] }
 0x188   : > { %7630 = vpow2.f32 %v2260_v1  ;;  %v2132_v15 = vmax.f32 %v8766_v10, %v8895_v5  ;;  %v8904_v54 = vpop.f32.mrb[37].mxu0  ;;  %v2320_v53 = vmul.f32 1.442695, %v2224_v51  ;;  %v8907_v60 = vpop.f32.mrb[37].mxu1  ;;  %12934 = vst [vmem:[#allocation36_spill] sm:$0xff] %v8914_v0 }
 0x189   : > { %7632 = vpow2.f32 %v2452_v2  ;;  %v2226_v57 = vsub.f32 %v8762_v18, %v2162_v4  ;;  %v2418_v58 = vsub.f32 %v1521_v59, %v2162_v4  ;;  %v8909_v63 = vpop.f32.mrb[38].mxu0  ;;  %v2225_v6 = vsub.f32 %v8760_v17, %v2161_v16  ;;  %v8918_v7 = vpop.f32.mrb[38].mxu1 }
 0x18a   : > { %7634 = vpow2.f32 %v2258_v48  ;;  %v2417_v11 = vsub.f32 %v1480_v61, %v2161_v16  ;;  %v2227_v12 = vsub.f32 %v8764_v19, %v2163_v56  ;;  %v8920_v51 = vpop.f32.mrb[39].mxu0  ;;  %v2512_v18 = vmul.f32 1.442695, %v2416_v3  ;;  %v8923_v9 = vpop.f32.mrb[39].mxu1 }
 0x18b   : > { %7636 = vpow2.f32 %v2450_v14  ;;  %v2419_v59 = vsub.f32 %v8889_v55, %v2163_v56  ;;  %v2324_v2 = vmul.f32 1.442695, %v2226_v57  ;;  %v2516_v48 = vmul.f32 1.442695, %v2418_v58 }
 0x18c   : > { %7638 = vpow2.f32 %v2262_v62  ;;  %v8927_v17 = vrot.slane %v8914_v0, %v3157_v50  ;;  %v2322_v19 = vmul.f32 1.442695, %v2225_v6  ;;  %v2196_v61 = vsub.f32 %v8766_v10, %v2132_v15 }
 0x18d   : > { %7640 = vpow2.f32 %v2454_v13  ;;  %v2388_v4 = vsub.f32 %v8895_v5, %v2132_v15  ;;  %v2134_v55 = vmax.f32 %v8770_v21, %v8902_v52  ;;  %v2133_v14 = vmax.f32 %v8768_v20, %v8904_v54 }
 0x18e   : > { %12935 = vst [vmem:[#allocation37_spill] sm:$0xff] %v8927_v17  ;;  %7642 = vpow2.f32 %v2320_v53  ;;  %v8937_v62 = vmax.f32 %v8774_v23, %v8907_v60  ;;  %v2514_v50 = vmul.f32 1.442695, %v2417_v11  ;;  %v2326_v3 = vmul.f32 1.442695, %v2227_v12 }
 0x18f   : > { %7644 = vpow2.f32 %v2512_v18  ;;  %v8941_v13 = vmax.f32 %v8772_v22, %v8909_v63  ;;  %v8943_v10 = vpop.f32.mrb[40].mxu0  ;;  %v2198_v16 = vsub.f32 %v8770_v21, %v2134_v55  ;;  %v2390_v56 = vsub.f32 %v8902_v52, %v2134_v55  ;;  %v8950_v53 = vpop.f32.mrb[40].mxu1 }
 0x190   : > { %v8945_v5 = vpop.eup %7626  ;;  %7646 = vpow2.f32 %v2324_v2  ;;  %v2197_v15 = vsub.f32 %v8768_v20, %v2133_v14  ;;  %v8952_v57 = vpop.f32.mrb[41].mxu0  ;;  %v2389_v6 = vsub.f32 %v8904_v54, %v2133_v14  ;;  %v2199_v11 = vsub.f32 %v8774_v23, %v8937_v62 }
 0x191   : > { %12936 = vst [vmem:[#allocation38_spill] sm:$0xff] %v8945_v5  ;;  %v8954_v58 = vpop.eup %7628  ;;  %7648 = vpow2.f32 %v2516_v48  ;;  %v2391_v12 = vsub.f32 %v8907_v60, %v8937_v62  ;;  %v8961_v21 = vpop.f32.mrb[41].mxu1  ;;  %v2518_v2 = vmul.f32 1.442695, %v2419_v59  ;;  %v2264_v60 = vmul.f32 1.442695, %v2196_v61 }
 0x192   : > { %v8963_v52 = vpop.f32.mrb[42].mxu0  ;;  %v8965_v20 = vpop.eup %7630  ;;  %v2576_v18 = vadd.f32 %v8954_v58, %v8945_v5  ;;  %7650 = vpow2.f32 %v2322_v19  ;;  %v2456_v14 = vmul.f32 1.442695, %v2388_v4  ;;  %v2268_v62 = vmul.f32 1.442695, %v2198_v16 }
 0x193   : > { %12937 = vst [vmem:[#allocation39_spill] sm:$0xff] %v8965_v20  ;;  %v8969_v48 = vpop.f32.mrb[42].mxu1  ;;  %v8971_v54 = vpop.f32.mrb[43].mxu0  ;;  %7652 = vpow2.f32 %v2514_v50  ;;  %v8980_v19 = vmul.f32 1.442695, %v2390_v56  ;;  %v2228_v59 = vsub.f32 %v8772_v22, %v8941_v13  ;;  %v2420_v61 = vsub.f32 %v8909_v63, %v8941_v13 }
 0x194   : > { %v8974_v55 = vpop.eup %7632  ;;  %7654 = vrcp.f32 %v2576_v18  ;;  %v8984_v0 = vpop.f32.mrb[43].mxu1  ;;  %v2166_v4 = vmax.f32 %v8778_v25, %v8918_v7  ;;  %v2165_v50 = vmax.f32 %v8776_v24, %v8920_v51  ;;  %v8998_v56 = vmul.f32 1.442695, %v2197_v15 }
 0x195   : > { %12938 = vst [vmem:[#allocation40_spill] sm:$0xff] %v8974_v55  ;;  %v8976_v1 = vpop.eup %7634  ;;  %v2578_v17 = vadd.f32 %v8974_v55, %v8965_v20  ;;  %7656 = vpow2.f32 %v2326_v3  ;;  %v2167_v3 = vmax.f32 %v8780_v26, %v8923_v9  ;;  %v9004_v63 = vmul.f32 1.442695, %v2389_v6 }
 0x196   : > { %12939 = vst [vmem:[#allocation41_spill] sm:$0xff] %v8976_v1  ;;  %v8986_v23 = vpop.eup %7636  ;;  %v2230_v13 = vsub.f32 %v8778_v25, %v2166_v4  ;;  %v2422_v8 = vsub.f32 %v8918_v7, %v2166_v4  ;;  %v2229_v20 = vsub.f32 %v8776_v24, %v2165_v50  ;;  %v2270_v25 = vmul.f32 1.442695, %v2199_v11 }
 0x197   : > { %v8994_v16 = vpop.eup %7638  ;;  %7658 = vrcp.f32 %v2578_v17  ;;  %v2577_v22 = vadd.f32 %v8986_v23, %v8976_v1  ;;  %v9008_v55 = vpop.f32.mrb[44].mxu0  ;;  %v2421_v1 = vsub.f32 %v8920_v51, %v2165_v50  ;;  %v9022_v7 = vmul.f32 1.442695, %v2391_v12 }
 0x198   : > { %12940 = vst [vmem:[#allocation42_spill] sm:$0xff] %v8994_v16  ;;  %v9002_v18 = vpop.eup %7640  ;;  %7660 = vpow2.f32 %v2518_v2  ;;  %v9016_v5 = vpop.f32.mrb[44].mxu1  ;;  %v2231_v4 = vsub.f32 %v8780_v26, %v2167_v3  ;;  %v9033_v51 = vmul.f32 1.442695, %v2228_v59  ;;  %v9035_v50 = vmul.f32 1.442695, %v2420_v61 }
 0x199   : > { %12941 = vst [vmem:[#allocation43_spill] sm:$0xff] %v9002_v18  ;;  %v9010_v17 = vpop.eup %7642  ;;  %7662 = vrcp.f32 %v2577_v22  ;;  %v2579_v15 = vadd.f32 %v9002_v18, %v8994_v16  ;;  %v9018_v6 = vpop.f32.mrb[45].mxu0  ;;  %v9043_v26 = vmul.f32 1.442695, %v2230_v13  ;;  %v2423_v16 = vsub.f32 %v8923_v9, %v2167_v3 }
 0x19a   : > { %12942 = vst [vmem:[#allocation44_spill] sm:$0xff] %v9010_v17  ;;  %v9020_v2 = vpop.eup %7644  ;;  %7664 = vpow2.f32 %v2264_v60  ;;  %v9025_v22 = vpop.f32.mrb[45].mxu1  ;;  %v9060_v9 = vmul.f32 1.442695, %v2422_v8 }
 0x19b   : > { %v9027_v49 = vpop.f32.mrb[46].mxu0  ;;  %v9029_v18 = vpop.eup %7646  ;;  %7666 = vrcp.f32 %v2579_v15  ;;  %v2608_v24 = vadd.f32 %v9020_v2, %v9010_v17  ;;  %v2136_v15 = vmax.f32 %v8782_v27, %v8943_v10  ;;  %v2138_v17 = vmax.f32 %v8786_v29, %v8950_v53 }
 0x19c   : > { %12943 = vst [vmem:[#allocation45_spill] sm:$0xff] %v9029_v18  ;;  %v9037_v60 = vpop.f32.mrb[46].mxu1  ;;  %v9039_v11 = vpop.f32.mrb[47].mxu0  ;;  %7668 = vpow2.f32 %v2456_v14  ;;  %v2137_v14 = vmax.f32 %v8784_v28, %v8952_v57 }
 0x19d   : > { %v9041_v12 = vpop.eup %7648  ;;  %v9048_v46 = vpop.f32.mrb[47].mxu1  ;;  %7670 = vrcp.f32 %v2608_v24  ;;  %v2200_v3 = vsub.f32 %v8782_v27, %v2136_v15  ;;  %v2392_v47 = vsub.f32 %v8943_v10, %v2136_v15  ;;  %v9077_v27 = vmul.f32 1.442695, %v2229_v20 }
 0x19e   : > { %12944 = vst [vmem:[#allocation46_spill] sm:$0xff] %v9041_v12  ;;  %v9050_v59 = vpop.eup %7650  ;;  %v2610_v61 = vadd.f32 %v9041_v12, %v9029_v18  ;;  %7672 = vpow2.f32 %v2268_v62  ;;  %v2202_v12 = vsub.f32 %v8786_v29, %v2138_v17  ;;  %v2394_v18 = vsub.f32 %v8950_v53, %v2138_v17 }
 0x19f   : > { %12945 = vst [vmem:[#allocation47_spill] sm:$0xff] %v9050_v59  ;;  %v9058_v13 = vpop.eup %7652  ;;  %v9079_v10 = vmul.f32 1.442695, %v2421_v1  ;;  %v9081_v62 = vpop.f32.mrb[48].mxu0  ;;  %v9085_v29 = vmul.f32 1.442695, %v2231_v4  ;;  %v2201_v17 = vsub.f32 %v8784_v28, %v2137_v14  ;;  %v2393_v1 = vsub.f32 %v8952_v57, %v2137_v14 }
 0x1a0   : > { %v9064_v44 = vpop.eup %7654  ;;  %7674 = vrcp.f32 %v2610_v61  ;;  %v2609_v24 = vadd.f32 %v9058_v13, %v9050_v59  ;;  %v9087_v53 = vmul.f32 1.442695, %v2423_v16  ;;  %v9090_v61 = vpop.f32.mrb[48].mxu1  ;;  %v2139_v20 = vmax.f32 %v8790_v31, %v8961_v21 }
 0x1a1   : > { %12946 = vst [vmem:[#allocation48_spill] sm:$0xff] %v9064_v44  ;;  %v9070_v45 = vpop.eup %7656  ;;  %v9074_v8 = vmul.f32 %v9064_v44, %v8954_v58  ;;  %7676 = vpow2.f32 %v8980_v19  ;;  %v9092_v58 = vpop.f32.mrb[49].mxu0  ;;  %v9102_v4 = vmax.f32 %v8788_v30, %v8963_v52  ;;  %v9117_v57 = vmax.f32 %v8794_v33, %v8969_v48 }
 0x1a2   : > { %12947 = vst [vmem:[#allocation49_spill] sm:$0xff] %v9070_v45  ;;  %v9083_v15 = vpop.eup %7658  ;;  %7678 = vrcp.f32 %v2609_v24  ;;  %v9104_v16 = vpop.f32.mrb[49].mxu1 }
 0x1a3   : > { %12948 = vst [vmem:[#allocation50_spill] sm:$0xff] %v9074_v8  ;;  %12949 = vst [vmem:[#allocation51_spill] sm:$0xff] %v9083_v15  ;;  %v9094_v19 = vpop.eup %7660  ;;  %7680 = vpow2.f32 %v8998_v56  ;;  %v9106_v28 = vpop.f32.mrb[50].mxu0  ;;  %v9113_v56 = vmul.f32 1.442695, %v2200_v3 }
 0x1a4   : > { %12950 = vst [vmem:[#allocation52_spill] sm:$0xff] %v9094_v19  ;;  %12951 = vst [vmem:[#allocation53_spill] sm:$0xff] %v9106_v28  ;;  %v9108_v24 = vpop.eup %7662  ;;  %v2611_v59 = vadd.f32 %v9094_v19, %v9070_v45  ;;  %7682 = vpow2.f32 %v9004_v63  ;;  %v9119_v14 = vpop.f32.mrb[50].mxu1  ;;  %v9129_v19 = vmul.f32 1.442695, %v2392_v47  ;;  %v2203_v63 = vsub.f32 %v8790_v31, %v2139_v20 }
 0x1a5   : > { %12952 = vst [vmem:[#allocation54_spill] sm:$0xff] %v9108_v24  ;;  %12953 = vst [vmem:[#allocation55_spill] sm:$0xff] %v9119_v14  ;;  %v9121_v8 = vpop.f32.mrb[51].mxu0  ;;  %v9123_v15 = vpop.eup %7664  ;;  %v9127_v44 = vmul.f32 %v9108_v24, %v8986_v23  ;;  %7684 = vpow2.f32 %v2270_v25  ;;  %v2395_v14 = vsub.f32 %v8961_v21, %v2139_v20  ;;  %v2424_v28 = vsub.f32 %v8963_v52, %v9102_v4 }
 0x1a6   : > { %12954 = vst [vmem:[#allocation56_spill] sm:$0xff] %v9121_v8  ;;  %12955 = vst [vmem:[#allocation57_spill] sm:$0xff] %v9123_v15  ;;  %v9132_v3 = vpop.f32.mrb[51].mxu1  ;;  %v9134_v45 = vpop.eup %7666  ;;  %7686 = vrcp.f32 %v2611_v59  ;;  %v2232_v8 = vsub.f32 %v8788_v30, %v9102_v4  ;;  %v9144_v47 = vmul.f32 1.442695, %v2202_v12  ;;  %v2234_v31 = vsub.f32 %v8794_v33, %v9117_v57 }
 0x1a7   : > { %12956 = vst [vmem:[#allocation58_spill] sm:$0xff] %v9127_v44  ;;  %12957 = vst [vmem:[#allocation59_spill] sm:$0xff] %v9134_v45  ;;  %v9141_v23 = vpop.eup %7668  ;;  %7688 = vpow2.f32 %v9022_v7  ;;  %v2426_v25 = vsub.f32 %v8969_v48, %v9117_v57  ;;  %v9155_v21 = vmul.f32 1.442695, %v2394_v18  ;;  %v9157_v52 = vmul.f32 1.442695, %v2201_v17 }
 0x1a8   : > { %12958 = vst [vmem:[#allocation60_spill] sm:$0xff] %v9141_v23  ;;  %v9150_v59 = vpop.eup %7670  ;;  %v2580_v30 = vadd.f32 %v9141_v23, %v9123_v15  ;;  %7690 = vpow2.f32 %v9033_v51  ;;  %v9166_v33 = vmul.f32 1.442695, %v2393_v1  ;;  %v9168_v48 = vmul.f32 1.442695, %v2203_v63  ;;  %v9170_v20 = vpop.f32.mrb[52].mxu0 }
 0x1a9   : > { %12959 = vst [vmem:[#allocation61_spill] sm:$0xff] %v9150_v59  ;;  %v9159_v7 = vpop.eup %7672  ;;  %v9163_v12 = vmul.f32 %v9150_v59, %v9020_v2  ;;  %7692 = vpow2.f32 %v9035_v50  ;;  %v9174_v18 = vmul.f32 1.442695, %v2395_v14  ;;  %v2169_v51 = vmax.f32 %v8792_v32, %v8971_v54  ;;  %v9180_v17 = vpop.f32.mrb[52].mxu1 }
 0x1aa   : > { %12960 = vst [vmem:[#allocation62_spill] sm:$0xff] %v9159_v7  ;;  %v9172_v4 = vpop.eup %7674  ;;  %7694 = vrcp.f32 %v2580_v30  ;;  %v2171_v2 = vmax.f32 %v8796_v34, %v8984_v0  ;;  %v9182_v50 = vpop.f32.mrb[53].mxu0  ;;  %v2140_v57 = vmax.f32 %v8798_v35, %v9008_v55  ;;  %v9191_v14 = vmax.f32 %v8802_v37, %v9016_v5 }
 0x1ab   : > { %12961 = vst [vmem:[#allocation63_spill] sm:$0xff] %v9163_v12  ;;  %12962 = vst [vmem:[#allocation64_spill] sm:$0xff] %v9172_v4  ;;  %v9184_v1 = vpop.eup %7676  ;;  %7696 = vpow2.f32 %v9043_v26  ;;  %v9195_v63 = vmax.f32 %v8800_v36, %v9018_v6  ;;  %v9197_v30 = vpop.f32.mrb[53].mxu1  ;;  %v2233_v12 = vsub.f32 %v8792_v32, %v2169_v51  ;;  %v2425_v4 = vsub.f32 %v8971_v54, %v2169_v51 }
 0x1ac   : > { %12963 = vst [vmem:[#allocation65_spill] sm:$0xff] %v9184_v1  ;;  %v9199_v23 = vpop.f32.mrb[54].mxu0  ;;  %v9201_v15 = vpop.eup %7678  ;;  %v2582_v26 = vadd.f32 %v9184_v1, %v9159_v7  ;;  %7698 = vpow2.f32 %v9060_v9  ;;  %v2235_v1 = vsub.f32 %v8796_v34, %v2171_v2  ;;  %v2427_v9 = vsub.f32 %v8984_v0, %v2171_v2 }
 0x1ad   : > { %12964 = vst [vmem:[#allocation66_spill] sm:$0xff] %v9201_v15  ;;  %v9208_v59 = vpop.f32.mrb[54].mxu1  ;;  %v9210_v44 = vpop.f32.mrb[55].mxu0  ;;  %v9216_v24 = vmul.f32 %v9201_v15, %v9058_v13  ;;  %7700 = vpow2.f32 %v9077_v27  ;;  %v9225_v54 = vmul.f32 1.442695, %v2232_v8 }
 0x1ae   : > { %12965 = vst [vmem:[#allocation67_spill] sm:$0xff] %v9208_v59  ;;  %12966 = vst [vmem:[#allocation68_spill] sm:$0xff] %v9210_v44  ;;  %v9212_v45 = vpop.eup %7680  ;;  %v9221_v7 = vpop.f32.mrb[55].mxu1  ;;  %7702 = vrcp.f32 %v2582_v26  ;;  %v9227_v51 = vmul.f32 1.442695, %v2424_v28  ;;  %v2204_v44 = vsub.f32 %v8798_v35, %v2140_v57  ;;  %v2396_v28 = vsub.f32 %v9008_v55, %v2140_v57 }
 0x1af   : > { %12967 = vst [vmem:[#allocation69_spill] sm:$0xff] %v9212_v45  ;;  %12968 = vst [vmem:[#allocation70_spill] sm:$0xff] %v9216_v24  ;;  %v9223_v32 = vpop.eup %7682  ;;  %7704 = vpow2.f32 %v9079_v10  ;;  %v9235_v34 = vmul.f32 1.442695, %v2234_v31  ;;  %v9237_v0 = vmul.f32 1.442695, %v2426_v25  ;;  %v2206_v35 = vsub.f32 %v8802_v37, %v9191_v14 }
 0x1b0   : > { %12969 = vst [vmem:[#allocation71_spill] sm:$0xff] %v9223_v32  ;;  %v9230_v59 = vpop.eup %7684  ;;  %v2581_v13 = vadd.f32 %v9223_v32, %v9212_v45  ;;  %7706 = vpow2.f32 %v9085_v29  ;;  %v9242_v8 = vmul.f32 1.442695, %v2233_v12  ;;  %v2398_v10 = vsub.f32 %v9016_v5, %v9191_v14  ;;  %v9255_v29 = vpop.f32.mrb[56].mxu0 }
 0x1b1   : > { %12970 = vst [vmem:[#allocation72_spill] sm:$0xff] %v9230_v59  ;;  %v9239_v27 = vpop.eup %7686  ;;  %v2205_v31 = vsub.f32 %v8800_v36, %v9195_v63  ;;  %v2397_v25 = vsub.f32 %v9018_v6, %v9195_v63  ;;  %v9262_v37 = vmul.f32 1.442695, %v2425_v4  ;;  %v9264_v57 = vmul.f32 1.442695, %v2235_v1  ;;  %v9266_v5 = vpop.f32.mrb[56].mxu1 }
 0x1b2   : > { %12971 = vst [vmem:[#allocation73_spill] sm:$0xff] %v9239_v27  ;;  %v9247_v2 = vpop.eup %7688  ;;  %7708 = vrcp.f32 %v2581_v13  ;;  %v9268_v14 = vpop.f32.mrb[57].mxu0  ;;  %v9273_v6 = vmul.f32 1.442695, %v2427_v9  ;;  %v9275_v63 = vmul.f32 1.442695, %v2204_v44  ;;  %v2143_v4 = vmax.f32 %v8806_v39, %v9025_v22 }
 0x1b3   : > { %12972 = vst [vmem:[#allocation74_spill] sm:$0xff] %v9247_v2  ;;  %v9257_v12 = vpop.eup %7690  ;;  %v2583_v55 = vadd.f32 %v9247_v2, %v9230_v59  ;;  %7710 = vpow2.f32 %v9087_v53  ;;  %v9277_v26 = vmul.f32 1.442695, %v2396_v28  ;;  %v2172_v1 = vmax.f32 %v8804_v38, %v9027_v49  ;;  %v9287_v2 = vpop.f32.mrb[57].mxu1 }
 0x1b4   : > { %12973 = vst [vmem:[#allocation75_spill] sm:$0xff] %v9257_v12  ;;  %v9270_v36 = vpop.eup %7692  ;;  %7712 = vpow2.f32 %v9113_v56  ;;  %v9289_v56 = vpop.f32.mrb[58].mxu0  ;;  %v2174_v9 = vmax.f32 %v8810_v41, %v9037_v60  ;;  %v9298_v28 = vmax.f32 %v8808_v40, %v9039_v11  ;;  %v2399_v32 = vsub.f32 %v9025_v22, %v2143_v4 }
 0x1b5   : > { %12974 = vst [vmem:[#allocation76_spill] sm:$0xff] %v9270_v36  ;;  %v9279_v13 = vpop.eup %7694  ;;  %7714 = vrcp.f32 %v2583_v55  ;;  %v2612_v53 = vadd.f32 %v9270_v36, %v9257_v12  ;;  %v9302_v55 = vmax.f32 %v8812_v42, %v9048_v46  ;;  %v9304_v36 = vpop.f32.mrb[58].mxu1  ;;  %v2236_v45 = vsub.f32 %v8804_v38, %v2172_v1 }
 0x1b6   : > { %12975 = vst [vmem:[#allocation77_spill] sm:$0xff] %v9279_v13  ;;  %v9291_v44 = vpop.eup %7696  ;;  %7716 = vpow2.f32 %v9129_v19  ;;  %v9306_v12 = vpop.f32.mrb[59].mxu0  ;;  %v2207_v19 = vsub.f32 %v8806_v39, %v2143_v4  ;;  %v2428_v15 = vsub.f32 %v9027_v49, %v2172_v1  ;;  %v9325_v39 = vmul.f32 1.442695, %v2206_v35 }
 0x1b7   : > { %12976 = vst [vmem:[#allocation78_spill] sm:$0xff] %v9291_v44  ;;  %12977 = vst [vmem:[#allocation79_spill] sm:$0xff] %v9306_v12  ;;  %v9308_v59 = vpop.eup %7698  ;;  %7718 = vrcp.f32 %v2612_v53  ;;  %v9313_v13 = vpop.f32.mrb[59].mxu1  ;;  %v2238_v12 = vsub.f32 %v8810_v41, %v2174_v9  ;;  %v9327_v38 = vmul.f32 1.442695, %v2398_v10  ;;  %v2430_v49 = vsub.f32 %v9037_v60, %v2174_v9 }
 0x1b8   : > { %12978 = vst [vmem:[#allocation80_spill] sm:$0xff] %v9308_v59  ;;  %v9315_v24 = vpop.eup %7700  ;;  %v2614_v27 = vadd.f32 %v9308_v59, %v9291_v44  ;;  %7720 = vpow2.f32 %v9144_v47  ;;  %v9329_v22 = vmul.f32 1.442695, %v2205_v31  ;;  %v9333_v59 = vmul.f32 1.442695, %v2397_v25  ;;  %v9338_v41 = vpop.f32.mrb[60].mxu0 }
 0x1b9   : > { %12979 = vst [vmem:[#allocation81_spill] sm:$0xff] %v9315_v24  ;;  %v9322_v53 = vpop.eup %7702  ;;  %7722 = vpow2.f32 %v9155_v21  ;;  %v9335_v47 = vmul.f32 1.442695, %v2207_v19  ;;  %12982 = vst [vmem:[#allocation84_spill] sm:$0xff] %v9338_v41  ;;  %v2237_v35 = vsub.f32 %v8808_v40, %v9298_v28  ;;  %v9349_v10 = vpop.f32.mrb[60].mxu1  ;;  %v2239_v9 = vsub.f32 %v8812_v42, %v9302_v55 }
 0x1ba   : > { %12980 = vst [vmem:[#allocation82_spill] sm:$0xff] %v9322_v53  ;;  %v9331_v4 = vpop.eup %7704  ;;  %7724 = vrcp.f32 %v2614_v27  ;;  %v2429_v27 = vsub.f32 %v9039_v11, %v9298_v28  ;;  %12984 = vst [vmem:[#allocation86_spill] sm:$0xff] %v9349_v10  ;;  %v9351_v31 = vpop.f32.mrb[61].mxu0  ;;  %v9356_v25 = vmul.f32 1.442695, %v2399_v32 }
 0x1bb   : > { %12981 = vst [vmem:[#allocation83_spill] sm:$0xff] %v9331_v4  ;;  %v9340_v1 = vpop.eup %7706  ;;  %v2613_v21 = vadd.f32 %v9331_v4, %v9315_v24  ;;  %7726 = vpow2.f32 %v9157_v52  ;;  %12985 = vst [vmem:[#allocation87_spill] sm:$0xff] %v9351_v31  ;;  %v2431_v52 = vsub.f32 %v9048_v46, %v9302_v55  ;;  %v9362_v40 = vpop.f32.mrb[61].mxu1  ;;  %v9368_v28 = vmul.f32 1.442695, %v2236_v45  ;;  %v12999_v24 = vld [vmem:[#allocation6_spill] sm:$0xff] }
 0x1bc   : > { %12983 = vst [vmem:[#allocation85_spill] sm:$0xff] %v9340_v1  ;;  %v9353_v60 = vpop.eup %7708  ;;  %7728 = vpow2.f32 %v9166_v33  ;;  %12986 = vst [vmem:[#allocation88_spill] sm:$0xff] %v9362_v40  ;;  %v9364_v19 = vpop.f32.mrb[62].mxu0  ;;  %v9370_v44 = vmul.f32 1.442695, %v2428_v15  ;;  %v2144_v33 = vmax.f32 %v8814_v43, %v9081_v62 }
 0x1bd   : > { %12987 = vst [vmem:[#allocation89_spill] sm:$0xff] %v9364_v19  ;;  %v9366_v11 = vpop.eup %7710  ;;  %7730 = vrcp.f32 %v2613_v21  ;;  %v9374_v32 = vpop.f32.mrb[62].mxu1  ;;  %v9383_v55 = vmul.f32 1.442695, %v2238_v12  ;;  %v9385_v45 = vmul.f32 1.442695, %v2430_v49 }
 0x1be   : > { %12988 = vst [vmem:[#allocation90_spill] sm:$0xff] %v9366_v11  ;;  %12989 = vst [vmem:[#allocation91_spill] sm:$0xff] %v9374_v32  ;;  %v9376_v42 = vpop.f32.mrb[63].mxu0  ;;  %v9378_v31 = vpop.eup %7712  ;;  %v2615_v46 = vadd.f32 %v9366_v11, %v9340_v1  ;;  %7732 = vpow2.f32 %v9168_v48  ;;  %v2208_v32 = vsub.f32 %v8814_v43, %v2144_v33  ;;  %v12994_v19 = vld [vmem:[#allocation5_spill] sm:$0xff]  ;;  %v12996_v48 = vld [vmem:[#allocation4_spill] sm:$0xff] }
 0x1bf   : > { %12990 = vst [vmem:[#allocation92_spill] sm:$0xff] %v9376_v42  ;;  %12991 = vst [vmem:[#allocation93_spill] sm:$0xff] %v9378_v31  ;;  %v9387_v15 = vpop.f32.mrb[63].mxu1  ;;  %v9389_v21 = vpop.eup %7714  ;;  %7734 = vpow2.f32 %v9174_v18  ;;  %v2400_v42 = vsub.f32 %v9081_v62, %v2144_v33  ;;  %v2146_v4 = vmax.f32 %v12994_v19, %v9090_v61  ;;  %v2145_v12 = vmax.f32 %v12996_v48, %v9092_v58  ;;  %v12997_v49 = vld [vmem:[#allocation7_spill] sm:$0xff] }
 0x1c0   : > { %12992 = vst [vmem:[#allocation94_spill] sm:$0xff] %v9387_v15  ;;  %12993 = vst [vmem:[#allocation95_spill] sm:$0xff] %v9389_v21  ;;  %v9396_v11 = vpop.eup %7716  ;;  %7736 = vrcp.f32 %v2615_v46  ;;  %v2147_v1 = vmax.f32 %v12997_v49, %v9104_v16  ;;  %v12998_v15 = vld [vmem:[#allocation53_spill] sm:$0xff]  ;;  %v9409_v62 = vmul.f32 1.442695, %v2237_v35 }
 0x1c1   : > { %12995 = vst [vmem:[#allocation5_spill] sm:$0xff] %v9396_v11  ;;  %v2176_v40 = vmax.f32 %v12999_v24, %v12998_v15  ;;  %v9404_v18 = vpop.eup %7718  ;;  %v2584_v43 = vadd.f32 %v9396_v11, %v9378_v31  ;;  %7738 = vpow2.f32 %v9225_v54  ;;  %v9411_v33 = vmul.f32 1.442695, %v2429_v27 }
 0x1c2   : > { %13000 = vst [vmem:[#allocation4_spill] sm:$0xff] %v9404_v18  ;;  %v9413_v46 = vpop.eup %7720  ;;  %7740 = vpow2.f32 %v9227_v51  ;;  %v2210_v41 = vsub.f32 %v12994_v19, %v2146_v4  ;;  %v2402_v21 = vsub.f32 %v9090_v61, %v2146_v4  ;;  %v2209_v53 = vsub.f32 %v12996_v48, %v2145_v12 }
 0x1c3   : > { %13001 = vst [vmem:[#allocation7_spill] sm:$0xff] %v9413_v46  ;;  %v9419_v18 = vpop.eup %7722  ;;  %7742 = vrcp.f32 %v2584_v43  ;;  %v2401_v11 = vsub.f32 %v9092_v58, %v2145_v12  ;;  %v2211_v54 = vsub.f32 %v12997_v49, %v2147_v1  ;;  %v2403_v35 = vsub.f32 %v9104_v16, %v2147_v1  ;;  %v13009_v49 = vld [vmem:[#allocation56_spill] sm:$0xff] }
 0x1c4   : > { %13002 = vst [vmem:[#allocation53_spill] sm:$0xff] %v9419_v18  ;;  %v9424_v27 = vpop.eup %7724  ;;  %v2586_v51 = vadd.f32 %v9419_v18, %v9413_v46  ;;  %7744 = vpow2.f32 %v9235_v34  ;;  %v9429_v19 = vmul.f32 1.442695, %v2239_v9  ;;  %v9431_v61 = vmul.f32 1.442695, %v2431_v52  ;;  %v13010_v43 = vld [vmem:[#allocation8_spill] sm:$0xff] }
 0x1c5   : > { %13003 = vst [vmem:[#allocation6_spill] sm:$0xff] %v9424_v27  ;;  %v9433_v4 = vpop.eup %7726  ;;  %7746 = vpow2.f32 %v9237_v0  ;;  %v9436_v58 = vmul.f32 1.442695, %v2208_v32  ;;  %v9438_v48 = vmul.f32 1.442695, %v2400_v42  ;;  %v2240_v34 = vsub.f32 %v12999_v24, %v2176_v40  ;;  %v13007_v32 = vld [vmem:[#allocation55_spill] sm:$0xff] }
 0x1c6   : > { %13004 = vst [vmem:[#allocation96_spill] sm:$0xff] %v9433_v4  ;;  %v9440_v16 = vmul.f32 1.442695, %v2210_v41  ;;  %v9442_v1 = vpop.eup %7728  ;;  %7748 = vrcp.f32 %v2586_v51  ;;  %v9444_v12 = vmul.f32 1.442695, %v2402_v21  ;;  %v2432_v9 = vsub.f32 %v12998_v15, %v2176_v40  ;;  %v13008_v42 = vld [vmem:[#allocation9_spill] sm:$0xff] }
 0x1c7   : > { %13005 = vst [vmem:[#allocation97_spill] sm:$0xff] %v9442_v1  ;;  %v9448_v52 = vpop.eup %7730  ;;  %v2585_v0 = vadd.f32 %v9442_v1, %v9433_v4  ;;  %7750 = vpow2.f32 %v9242_v8  ;;  %v2178_v41 = vmax.f32 %v13008_v42, %v13007_v32  ;;  %v2177_v18 = vmax.f32 %v13010_v43, %v13009_v49  ;;  %v13012_v15 = vld [vmem:[#allocation10_spill] sm:$0xff] }
 0x1c8   : > { %13006 = vst [vmem:[#allocation98_spill] sm:$0xff] %v9448_v52  ;;  %v9457_v51 = vpop.eup %7732  ;;  %7752 = vpow2.f32 %v9262_v37  ;;  %v9460_v24 = vmul.f32 1.442695, %v2209_v53  ;;  %v9462_v40 = vmul.f32 1.442695, %v2401_v11  ;;  %v2179_v21 = vmax.f32 %v13012_v15, %v9132_v3 }
 0x1c9   : > { %13011 = vst [vmem:[#allocation55_spill] sm:$0xff] %v9457_v51  ;;  %v9466_v46 = vpop.eup %7734  ;;  %7754 = vrcp.f32 %v2585_v0  ;;  %v2242_v8 = vsub.f32 %v13008_v42, %v2178_v41  ;;  %v2434_v1 = vsub.f32 %v13007_v32, %v2178_v41  ;;  %v2241_v4 = vsub.f32 %v13010_v43, %v2177_v18 }
 0x1ca   : > { %13013 = vst [vmem:[#allocation9_spill] sm:$0xff] %v9466_v46  ;;  %v9471_v31 = vpop.eup %7736  ;;  %v2587_v37 = vadd.f32 %v9466_v46, %v9457_v51  ;;  %7756 = vpow2.f32 %v9264_v57  ;;  %v2433_v53 = vsub.f32 %v13009_v49, %v2177_v18  ;;  %v2243_v11 = vsub.f32 %v13012_v15, %v2179_v21 }
 0x1cb   : > { %13014 = vst [vmem:[#allocation56_spill] sm:$0xff] %v9471_v31  ;;  %v9478_v27 = vpop.eup %7738  ;;  %7758 = vpow2.f32 %v9273_v6  ;;  %v9481_v0 = vmul.f32 1.442695, %v2211_v54  ;;  %v9483_v32 = vmul.f32 1.442695, %v2403_v35  ;;  %v2435_v18 = vsub.f32 %v9132_v3, %v2179_v21  ;;  %v13018_v54 = vld [vmem:[#allocation11_spill] sm:$0xff] }
 0x1cc   : > { %13015 = vst [vmem:[#allocation8_spill] sm:$0xff] %v9478_v27  ;;  %v9485_v42 = vmul.f32 1.442695, %v2240_v34  ;;  %v9487_v41 = vpop.eup %7740  ;;  %7760 = vrcp.f32 %v2587_v37  ;;  %v9489_v43 = vmul.f32 1.442695, %v2432_v9  ;;  %v2148_v35 = vmax.f32 %v13018_v54, %v9170_v20  ;;  %v13019_v34 = vld [vmem:[#allocation13_spill] sm:$0xff] }
 0x1cd   : > { %13016 = vst [vmem:[#allocation10_spill] sm:$0xff] %v9487_v41  ;;  %v9491_v57 = vmul.f32 1.442695, %v2242_v8  ;;  %v9494_v49 = vpop.eup %7742  ;;  %v2616_v6 = vadd.f32 %v9487_v41, %v9478_v27  ;;  %7762 = vpow2.f32 %v9275_v63  ;;  %v2150_v15 = vmax.f32 %v13019_v34, %v9180_v17  ;;  %v13021_v3 = vld [vmem:[#allocation12_spill] sm:$0xff]  ;;  %v13022_v8 = vld [vmem:[#allocation15_spill] sm:$0xff] }
 0x1ce   : > { %13017 = vst [vmem:[#allocation99_spill] sm:$0xff] %v9494_v49  ;;  %v9503_v37 = vpop.eup %7744  ;;  %7764 = vpow2.f32 %v9277_v26  ;;  %v9506_v9 = vmul.f32 1.442695, %v2434_v1  ;;  %v2149_v21 = vmax.f32 %v13021_v3, %v9182_v50  ;;  %v2151_v41 = vmax.f32 %v13022_v8, %v9197_v30 }
 0x1cf   : > { %13020 = vst [vmem:[#allocation11_spill] sm:$0xff] %v9503_v37  ;;  %v9512_v27 = vpop.eup %7746  ;;  %7766 = vrcp.f32 %v2616_v6  ;;  %v2212_v63 = vsub.f32 %v13018_v54, %v2148_v35  ;;  %v2404_v46 = vsub.f32 %v9170_v20, %v2148_v35  ;;  %v2214_v51 = vsub.f32 %v13019_v34, %v2150_v15 }
 0x1d0   : > { %13023 = vst [vmem:[#allocation13_spill] sm:$0xff] %v9512_v27  ;;  %v9517_v49 = vpop.eup %7748  ;;  %v2618_v26 = vadd.f32 %v9512_v27, %v9503_v37  ;;  %7768 = vpow2.f32 %v9325_v39  ;;  %v2406_v1 = vsub.f32 %v9180_v17, %v2150_v15  ;;  %v2213_v31 = vsub.f32 %v13021_v3, %v2149_v21 }
 0x1d1   : > { %13024 = vst [vmem:[#allocation12_spill] sm:$0xff] %v9517_v49  ;;  %v9524_v52 = vpop.eup %7750  ;;  %7770 = vpow2.f32 %v9327_v38  ;;  %v9527_v6 = vmul.f32 1.442695, %v2241_v4  ;;  %v9529_v20 = vmul.f32 1.442695, %v2433_v53  ;;  %v2405_v17 = vsub.f32 %v9182_v50, %v2149_v21  ;;  %v13029_v50 = vld [vmem:[#allocation14_spill] sm:$0xff] }
 0x1d2   : > { %13025 = vst [vmem:[#allocation15_spill] sm:$0xff] %v9524_v52  ;;  %v9531_v54 = vmul.f32 1.442695, %v2243_v11  ;;  %v9533_v35 = vpop.eup %7752  ;;  %7772 = vrcp.f32 %v2618_v26  ;;  %v9535_v34 = vmul.f32 1.442695, %v2435_v18  ;;  %v2215_v4 = vsub.f32 %v13022_v8, %v2151_v41  ;;  %v13030_v21 = vld [vmem:[#allocation67_spill] sm:$0xff] }
 0x1d3   : > { %13026 = vst [vmem:[#allocation100_spill] sm:$0xff] %v9533_v35  ;;  %v9537_v39 = vmul.f32 1.442695, %v2212_v63  ;;  %v9540_v15 = vpop.eup %7754  ;;  %v2617_v38 = vadd.f32 %v9533_v35, %v9524_v52  ;;  %7774 = vpow2.f32 %v9329_v22  ;;  %v2407_v53 = vsub.f32 %v9197_v30, %v2151_v41  ;;  %v13031_v63 = vld [vmem:[#allocation17_spill] sm:$0xff]  ;;  %v13033_v30 = vld [vmem:[#allocation68_spill] sm:$0xff] }
 0x1d4   : > { %13027 = vst [vmem:[#allocation101_spill] sm:$0xff] %v9540_v15  ;;  %v9547_v11 = vpop.eup %7756  ;;  %7776 = vpow2.f32 %v9333_v59  ;;  %v9550_v18 = vmul.f32 1.442695, %v2404_v46  ;;  %v2180_v3 = vmax.f32 %v13029_v50, %v9199_v23  ;;  %v2182_v26 = vmax.f32 %v13031_v63, %v13030_v21  ;;  %v13034_v41 = vld [vmem:[#allocation16_spill] sm:$0xff] }
 0x1d5   : > { %13028 = vst [vmem:[#allocation102_spill] sm:$0xff] %v9547_v11  ;;  %v9556_v27 = vpop.eup %7758  ;;  %7778 = vrcp.f32 %v2617_v38  ;;  %v9558_v22 = vmul.f32 1.442695, %v2214_v51  ;;  %v9560_v8 = vmul.f32 1.442695, %v2406_v1  ;;  %v2181_v37 = vmax.f32 %v13034_v41, %v13033_v30 }
 0x1d6   : > { %13032 = vst [vmem:[#allocation14_spill] sm:$0xff] %v9556_v27  ;;  %v9564_v35 = vpop.eup %7760  ;;  %v2619_v59 = vadd.f32 %v9556_v27, %v9547_v11  ;;  %7780 = vpow2.f32 %v9335_v47  ;;  %v2244_v46 = vsub.f32 %v13029_v50, %v2180_v3  ;;  %v2436_v52 = vsub.f32 %v9199_v23, %v2180_v3 }
 0x1d7   : > { %13035 = vst [vmem:[#allocation67_spill] sm:$0xff] %v9564_v35  ;;  %v9571_v49 = vpop.eup %7762  ;;  %7782 = vpow2.f32 %v9356_v25  ;;  %v2246_v51 = vsub.f32 %v13031_v63, %v2182_v26  ;;  %v2438_v1 = vsub.f32 %v13030_v21, %v2182_v26  ;;  %v2245_v38 = vsub.f32 %v13034_v41, %v2181_v37 }
 0x1d8   : > { %13036 = vst [vmem:[#allocation17_spill] sm:$0xff] %v9571_v49  ;;  %v9581_v27 = vpop.eup %7764  ;;  %7784 = vrcp.f32 %v2619_v59  ;;  %v9583_v47 = vmul.f32 1.442695, %v2213_v31  ;;  %v9585_v50 = vmul.f32 1.442695, %v2405_v17  ;;  %v2437_v23 = vsub.f32 %v13033_v30, %v2181_v37  ;;  %v13044_v37 = vld [vmem:[#allocation18_spill] sm:$0xff] }
 0x1d9   : > { %13037 = vst [vmem:[#allocation68_spill] sm:$0xff] %v9581_v27  ;;  %v9588_v3 = vpop.eup %7766  ;;  %v2588_v25 = vadd.f32 %v9581_v27, %v9571_v49  ;;  %7786 = vpow2.f32 %v9368_v28  ;;  %v9593_v63 = vmul.f32 1.442695, %v2215_v4  ;;  %v9595_v21 = vmul.f32 1.442695, %v2407_v53  ;;  %v13046_v28 = vld [vmem:[#allocation21_spill] sm:$0xff] }
 0x1da   : > { %13038 = vst [vmem:[#allocation16_spill] sm:$0xff] %v9588_v3  ;;  %v9597_v26 = vpop.eup %7768  ;;  %7788 = vpow2.f32 %v9370_v44  ;;  %v9600_v31 = vmul.f32 1.442695, %v2244_v46  ;;  %v9602_v17 = vmul.f32 1.442695, %v2436_v52  ;;  %v9606_v30 = vmax.f32 %v13044_v37, %v9221_v7  ;;  %v13047_v53 = vld [vmem:[#allocation38_spill] sm:$0xff] }
 0x1db   : > { %13039 = vst [vmem:[#allocation103_spill] sm:$0xff] %v9593_v63  ;;  %13040 = vst [vmem:[#allocation104_spill] sm:$0xff] %v9595_v21  ;;  %v9608_v41 = vpop.eup %7770  ;;  %7790 = vrcp.f32 %v2588_v25  ;;  %v9612_v4 = vmax.f32 %v13046_v28, %v9266_v5  ;;  %v13048_v59 = vld [vmem:[#allocation48_spill] sm:$0xff]  ;;  %v13049_v44 = vld [vmem:[#allocation41_spill] sm:$0xff] }
 0x1dc   : > { %13041 = vst [vmem:[#allocation105_spill] sm:$0xff] %v9597_v26  ;;  %13042 = vst [vmem:[#allocation106_spill] sm:$0xff] %v9600_v31  ;;  %v2704_v27 = vmul.f32 %v13048_v59, %v13047_v53  ;;  %v13050_v46 = vld [vmem:[#allocation54_spill] sm:$0xff]  ;;  %v9618_v52 = vpop.eup %7772  ;;  %v2590_v11 = vadd.f32 %v9608_v41, %v9597_v26  ;;  %7792 = vpow2.f32 %v9383_v55  ;;  %v2247_v25 = vsub.f32 %v13044_v37, %v9606_v30  ;;  %v2769_v55 = vld [vmem:[%s9637_s15 + $0x8] sm:$0xff] }
 0x1dd   : > { %13043 = vst [vmem:[#allocation107_spill] sm:$0xff] %v9602_v17  ;;  %13045 = vst [vmem:[#allocation18_spill] sm:$0xff] %v9608_v41  ;;  %v2705_v49 = vmul.f32 %v13050_v46, %v13049_v44  ;;  %v2439_v3 = vsub.f32 %v9221_v7, %v9606_v30  ;;  %v9627_v35 = vpop.eup %7774  ;;  %7794 = vpow2.f32 %v9385_v45  ;;  %v13053_v44 = vld [vmem:[#allocation39_spill] sm:$0xff]  ;;  %v2768_v7 = vld [vmem:[%s9637_s15] sm:$0xff]  ;;  %v9644_v30 = vmul.f32 1.442695, %v2246_v51 }
 0x1de   : > { %13051 = vst [vmem:[#allocation21_spill] sm:$0xff] %v9618_v52  ;;  %13052 = vst [vmem:[#allocation38_spill] sm:$0xff] %v9627_v35  ;;  %v13054_v46 = vld [vmem:[#allocation51_spill] sm:$0xff]  ;;  %v2770_v45 = vld [vmem:[%s9637_s15 + $0x10] sm:$0xff]  ;;  %v9642_v37 = vpop.eup %7776  ;;  %7796 = vrcp.f32 %v2590_v11  ;;  %v9646_v59 = vmul.f32 1.442695, %v2438_v1 }
 0x1df   : > { %v2706_v41 = vmul.f32 %v13054_v46, %v13053_v44  ;;  %13055 = vst [vmem:[#allocation48_spill] sm:$0xff] %v9642_v37  ;;  %13056 = vst [vmem:[#allocation41_spill] sm:$0xff] %v9644_v30  ;;  %v13058_v44 = vld [vmem:[#allocation42_spill] sm:$0xff]  ;;  %v13059_v53 = vld [vmem:[#allocation59_spill] sm:$0xff]  ;;  %v9651_v15 = vpop.eup %7778  ;;  %v2589_v17 = vadd.f32 %v9642_v37, %v9627_v35  ;;  %7798 = vpow2.f32 %v9409_v62  ;;  %v9656_v31 = vmul.f32 1.442695, %v2245_v38 }
 0x1e0   : > { %13057 = vst [vmem:[#allocation54_spill] sm:$0xff] %v9646_v59  ;;  %v2707_v26 = vmul.f32 %v13059_v53, %v13058_v44  ;;  %v2771_v52 = vld [vmem:[%s9637_s15 + $0x18] sm:$0xff]  ;;  %13060 = vst [vmem:[#allocation39_spill] sm:$0xff] %v9651_v15  ;;  %v9658_v11 = vmul.f32 1.442695, %v2437_v23  ;;  %v7275_v51 = vld [vmem:[%s9637_s15 + $0x200] sm:$0xff]  ;;  %v9662_v1 = vpop.eup %7780  ;;  %7800 = vpow2.f32 %v9411_v33  ;;  %v2832_v59 = vmul.f32 %v2768_v7, %v2704_v27 }
 0x1e1   : > { %v7276_v30 = vld [vmem:[%s9637_s15 + $0x208] sm:$0xff]  ;;  %v2833_v44 = vmul.f32 %v2769_v55, %v2705_v49  ;;  %v2834_v10 = vmul.f32 %v2770_v45, %v2706_v41  ;;  %v7277_v21 = vld [vmem:[%s9637_s15 + $0x210] sm:$0xff]  ;;  %v7278_v15 = vld [vmem:[%s9637_s15 + $0x218] sm:$0xff]  ;;  %v9667_v63 = vpop.eup %7782  ;;  %7802 = vrcp.f32 %v2589_v17 }
 0x1e2   : > { %13061 = vst [vmem:[#allocation51_spill] sm:$0xff] %v9658_v11  ;;  %13062 = vst [vmem:[#allocation42_spill] sm:$0xff] %v9667_v63  ;;  %v2835_v37 = vmul.f32 %v2771_v52, %v2707_v26  ;;  %v13063_v62 = vld [vmem:[#allocation40_spill] sm:$0xff]  ;;  %v13064_v23 = vld [vmem:[#allocation43_spill] sm:$0xff]  ;;  %v9673_v11 = vpop.eup %7784  ;;  %v2591_v33 = vadd.f32 %v9667_v63, %v9662_v1  ;;  %7804 = vpow2.f32 %v9429_v19 }
 0x1e3   : > { %v2898_v38 = vmul.f32 %v13054_v46, %v13063_v62  ;;  %v2899_v35 = vmul.f32 %v13059_v53, %v13064_v23  ;;  %v13065_v27 = vld [vmem:[#allocation50_spill] sm:$0xff]  ;;  %v9680_v55 = vpop.eup %7786  ;;  %7806 = vpow2.f32 %v9431_v61  ;;  %v13068_v52 = vld [vmem:[#allocation35_spill] sm:$0xff]  ;;  %v13070_v53 = vld [vmem:[#allocation36_spill] sm:$0xff] }
 0x1e4   : > { %v3025_v49 = vmul.f32 %v7275_v51, %v13065_v27  ;;  %v13066_v41 = vld [vmem:[#allocation58_spill] sm:$0xff]  ;;  %13067 = vst [vmem:[#allocation59_spill] sm:$0xff] %v9680_v55  ;;  %v13069_v46 = vsub.s32 1, %v13068_v52  ;;  %v9688_v62 = vpop.eup %7788  ;;  %7808 = vrcp.f32 %v2591_v33  ;;  %v13072_v51 = vsub.s32 2, %v13068_v52 }
 0x1e5   : > { %v3026_v7 = vmul.f32 %v7276_v30, %v13066_v41  ;;  %v3027_v26 = vmul.f32 %v7277_v21, %v2898_v38  ;;  %v3028_v17 = vmul.f32 %v7278_v15, %v2899_v35  ;;  %13071 = vst [vmem:[#allocation40_spill] sm:$0xff] %v9688_v62  ;;  %v9695_v27 = vpop.eup %7790  ;;  %v2620_v61 = vadd.f32 %v9688_v62, %v9680_v55 }
 0x1e6   : > { %v9686_v45 = vrot.slane %v13070_v53, %v13069_v46  ;;  %v3089_v23 = vadd.f32 %v3025_v49, %v2832_v59  ;;  %v9693_v30 = vrot.slane %v13070_v53, %v13072_v51  ;;  %7810 = vpow2.f32 %v9436_v58  ;;  %v9704_v21 = vpop.eup %7792 }
 0x1e7   : > { %v3090_v19 = vadd.f32 %v3026_v7, %v2833_v44  ;;  %v9700_v35 = vadd.f32 %v3027_v26, %v2834_v10  ;;  %v9702_v15 = vadd.f32 %v3028_v17, %v2835_v37  ;;  %13073 = vst [vmem:[#allocation43_spill] sm:$0xff] %v9704_v21  ;;  %7812 = vpow2.f32 %v9438_v48  ;;  %v13074_v44 = vld [vmem:[#allocation37_spill] sm:$0xff]  ;;  %v9714_v49 = vpop.eup %7794  ;;  %v8074_v7 = vld [vmem:[%s12603_s3] sm:$0xf] }
 0x1e8   : > { %v3169_v59 = vsub.s32 3, %v13068_v52  ;;  %v9709_v38 = vmul.f32 %v13074_v44, %v3089_v23  ;;  %13077 = vst [vmem:[#allocation36_spill] sm:$0xff] %v9714_v49  ;;  %7814 = vrcp.f32 %v2620_v61  ;;  %v9716_v58 = vmul.f32 1.442695, %v2247_v25  ;;  %v9724_v48 = vpop.eup %7796  ;;  %v13085_v61 = vld [vmem:[#allocation20_spill] sm:$0xff] }
 0x1e9   : > { %v9712_v33 = vmul.f32 %v9686_v45, %v3090_v19  ;;  %v9718_v10 = vmul.f32 1.442695, %v2439_v3  ;;  %v9722_v37 = vmul.f32 %v9693_v30, %v9700_v35  ;;  %v2622_v41 = vadd.f32 %v9714_v49, %v9704_v21  ;;  %v9736_v25 = vpop.eup %7798 }
 0x1ea   : > { %13075 = vst [vmem:[#allocation50_spill] sm:$0xff] %v9709_v38  ;;  %7816 = vpow2.f32 %v9440_v16  ;;  %v9732_v26 = vrot.slane %v8074_v7, %v3169_v59  ;;  %v3183_v3 = vmul.f32 %v9709_v38, %v9709_v38  ;;  %13079 = vst [vmem:[#allocation108_spill] sm:$0xff] %v9736_v25  ;;  %v13080_v17 = vsub.f32 %v13046_v28, %v9612_v4  ;;  %v9751_v19 = vpop.eup %7800 }
 0x1eb   : > { %13076 = vst [vmem:[#allocation58_spill] sm:$0xff] %v9712_v33  ;;  %13078 = vst [vmem:[#allocation37_spill] sm:$0xff] %v9722_v37  ;;  %7818 = vpow2.f32 %v9444_v12  ;;  %v13081_v16 = vsub.f32 %v9266_v5, %v9612_v4  ;;  %v3184_v23 = vmul.f32 %v9712_v33, %v9712_v33  ;;  %v13084_v12 = vld [vmem:[#allocation19_spill] sm:$0xff]  ;;  %v2153_v59 = vmax.f32 %v13085_v61, %v9268_v14  ;;  %v9761_v7 = vpop.eup %7802 }
 0x1ec   : > { %v9742_v46 = vmul.f32 1.442695, %v13080_v17  ;;  %13082 = vst [vmem:[#allocation109_spill] sm:$0xff] %v9751_v19  ;;  %7820 = vrcp.f32 %v2622_v41  ;;  %v9755_v51 = vmul.f32 %v9732_v26, %v9702_v15  ;;  %v2152_v28 = vmax.f32 %v13084_v12, %v9255_v29  ;;  %v9768_v17 = vpop.eup %7804 }
 0x1ed   : > { %v9747_v53 = vmul.f32 1.442695, %v13081_v16  ;;  %v2621_v5 = vadd.f32 %v9751_v19, %v9736_v25  ;;  %7822 = vpow2.f32 %v9460_v24  ;;  %v3185_v4 = vmul.f32 %v9722_v37, %v9722_v37  ;;  %13086 = vst [vmem:[#allocation19_spill] sm:$0xff] %v9768_v17  ;;  %v9773_v38 = vpop.eup %7806  ;;  %v7308_v25 = vld [vmem:[%s9637_s15 + $0x308] sm:$0xff] }
 0x1ee   : > { %13083 = vst [vmem:[#allocation110_spill] sm:$0xff] %v9755_v51  ;;  %v3191_v41 = vadd.f32 %v3184_v23, %v3183_v3  ;;  %7824 = vpow2.f32 %v9462_v40  ;;  %v2216_v16 = vsub.f32 %v13084_v12, %v2152_v28  ;;  %v2408_v33 = vsub.f32 %v9255_v29, %v2152_v28  ;;  %13087 = vst [vmem:[#allocation20_spill] sm:$0xff] %v9773_v38  ;;  %v9778_v21 = vpop.eup %7808 }
 0x1ef   : > { %7826 = vrcp.f32 %v2621_v5  ;;  %v3186_v52 = vmul.f32 %v9755_v51, %v9755_v51  ;;  %v2217_v24 = vsub.f32 %v13085_v61, %v2153_v59  ;;  %v2623_v3 = vadd.f32 %v9773_v38, %v9768_v17 }
 0x1f0   : > { %v3192_v49 = vadd.f32 %v3191_v41, %v3185_v4  ;;  %7828 = vpow2.f32 %v9481_v0  ;;  %v9783_v40 = vmul.f32 1.442695, %v2216_v16  ;;  %v9785_v23 = vmul.f32 1.442695, %v2408_v33  ;;  %v9787_v29 = vpop.eup %7810  ;;  %v13090_v4 = vld [vmem:[#allocation23_spill] sm:$0xff]  ;;  %v13091_v0 = vld [vmem:[#allocation22_spill] sm:$0xff] }
 0x1f1   : > { %13088 = vst [vmem:[#allocation111_spill] sm:$0xff] %v9787_v29  ;;  %7830 = vpow2.f32 %v9483_v32  ;;  %v9790_v28 = vmul.f32 1.442695, %v2217_v24  ;;  %v2409_v61 = vsub.f32 %v9268_v14, %v2153_v59  ;;  %v9793_v5 = vpop.eup %7812  ;;  %v2155_v41 = vmax.f32 %v13090_v4, %v9287_v2  ;;  %v13092_v33 = vld [vmem:[#allocation25_spill] sm:$0xff] }
 0x1f2   : > { %v3193_v12 = vadd.f32 %v3192_v49, %v3186_v52  ;;  %13089 = vst [vmem:[#allocation112_spill] sm:$0xff] %v9793_v5  ;;  %7832 = vrcp.f32 %v2623_v3  ;;  %v2184_v16 = vmax.f32 %v13091_v0, %v9289_v56  ;;  %v2186_v51 = vmax.f32 %v13092_v33, %v9304_v36  ;;  %v9801_v37 = vpop.eup %7814  ;;  %v13094_v52 = vld [vmem:[#allocation79_spill] sm:$0xff]  ;;  %v13095_v49 = vld [vmem:[#allocation24_spill] sm:$0xff] }
 0x1f3   : > { %13093 = vst [vmem:[#allocation23_spill] sm:$0xff] %v9801_v37  ;;  %v2592_v32 = vadd.f32 %v9793_v5, %v9787_v29  ;;  %7834 = vpow2.f32 %v9485_v42  ;;  %v9806_v14 = vmul.f32 1.442695, %v2409_v61  ;;  %v2185_v59 = vmax.f32 %v13095_v49, %v13094_v52  ;;  %v13110_v29 = vld [vmem:[#allocation64_spill] sm:$0xff]  ;;  %v7309_v37 = vld [vmem:[%s9637_s15 + $0x310] sm:$0xff] }
 0x1f4   : > { %3194 = vadd.xlane.f32.xlu0 %v3193_v12  ;;  %v9810_v24 = vpop.eup %7816  ;;  %7836 = vpow2.f32 %v9489_v43  ;;  %v2219_v3 = vsub.f32 %v13090_v4, %v2155_v41  ;;  %v2411_v38 = vsub.f32 %v9287_v2, %v2155_v41  ;;  %v2248_v17 = vsub.f32 %v13091_v0, %v2184_v16 }
 0x1f5   : > { %13096 = vst [vmem:[#allocation22_spill] sm:$0xff] %v9810_v24  ;;  %v9816_v19 = vpop.eup %7818  ;;  %7838 = vrcp.f32 %v2592_v32  ;;  %v2440_v42 = vsub.f32 %v9289_v56, %v2184_v16  ;;  %v2250_v12 = vsub.f32 %v13092_v33, %v2186_v51  ;;  %v2442_v61 = vsub.f32 %v9304_v36, %v2186_v51 }
 0x1f6   : > { %13097 = vst [vmem:[#allocation25_spill] sm:$0xff] %v9816_v19  ;;  %v9821_v5 = vpop.eup %7820  ;;  %v2594_v43 = vadd.f32 %v9816_v19, %v9810_v24  ;;  %7840 = vpow2.f32 %v9491_v57  ;;  %v9826_v4 = vmul.f32 1.442695, %v2219_v3  ;;  %v9828_v2 = vmul.f32 1.442695, %v2411_v38  ;;  %v13103_v3 = vld [vmem:[#allocation44_spill] sm:$0xff] }
 0x1f7   : > { %13098 = vst [vmem:[#allocation79_spill] sm:$0xff] %v9821_v5  ;;  %v9830_v41 = vpop.eup %7822  ;;  %7842 = vpow2.f32 %v9506_v9  ;;  %v9833_v56 = vmul.f32 1.442695, %v2248_v17  ;;  %v9835_v0 = vmul.f32 1.442695, %v2440_v42  ;;  %v2249_v38 = vsub.f32 %v13095_v49, %v2185_v59  ;;  %v13102_v17 = vld [vmem:[#allocation26_spill] sm:$0xff] }
 0x1f8   : > { %13099 = vst [vmem:[#allocation24_spill] sm:$0xff] %v9830_v41  ;;  %v9837_v36 = vmul.f32 1.442695, %v2250_v12  ;;  %v9839_v51 = vpop.eup %7824  ;;  %7844 = vrcp.f32 %v2594_v43  ;;  %v9841_v57 = vmul.f32 1.442695, %v2442_v61  ;;  %v2441_v16 = vsub.f32 %v13094_v52, %v2185_v59  ;;  %v13104_v42 = vld [vmem:[#allocation61_spill] sm:$0xff] }
 0x1f9   : > { %13100 = vst [vmem:[#allocation113_spill] sm:$0xff] %v9839_v51  ;;  %v9845_v33 = vpop.eup %7826  ;;  %v2593_v9 = vadd.f32 %v9839_v51, %v9830_v41  ;;  %7846 = vpow2.f32 %v9527_v6  ;;  %v2187_v32 = vmax.f32 %v13102_v17, %v9313_v13  ;;  %v2736_v12 = vmul.f32 %v13104_v42, %v13103_v3  ;;  %v2800_v61 = vld [vmem:[%s9637_s15 + $0x100] sm:$0xff]  ;;  %v13106_v59 = vld [vmem:[#allocation47_spill] sm:$0xff]  ;;  %v13107_v19 = vld [vmem:[#allocation66_spill] sm:$0xff] }
 0x1fa   : > { %13101 = vst [vmem:[#allocation114_spill] sm:$0xff] %v9845_v33  ;;  %v9855_v43 = vpop.eup %7828  ;;  %7848 = vpow2.f32 %v9529_v20  ;;  %v9858_v52 = vmul.f32 1.442695, %v2249_v38  ;;  %v9860_v49 = vmul.f32 1.442695, %v2441_v16  ;;  %v2737_v6 = vmul.f32 %v13107_v19, %v13106_v59  ;;  %v2801_v24 = vld [vmem:[%s9637_s15 + $0x108] sm:$0xff] }
 0x1fb   : > { %13105 = vst [vmem:[#allocation26_spill] sm:$0xff] %v9855_v43  ;;  %v9865_v51 = vpop.eup %7830  ;;  %7850 = vrcp.f32 %v2593_v9  ;;  %v2251_v41 = vsub.f32 %v13102_v17, %v2187_v32  ;;  %v2443_v3 = vsub.f32 %v9313_v13, %v2187_v32  ;;  %v13109_v42 = vld [vmem:[#allocation45_spill] sm:$0xff]  ;;  %v2802_v38 = vld [vmem:[%s9637_s15 + $0x110] sm:$0xff]  ;;  %v2803_v5 = vld [vmem:[%s9637_s15 + $0x118] sm:$0xff]  ;;  %v2864_v62 = vmul.f32 %v2800_v61, %v2736_v12 }
 0x1fc   : > { %13108 = vst [vmem:[#allocation44_spill] sm:$0xff] %v9865_v51  ;;  %v2738_v20 = vmul.f32 %v13110_v29, %v13109_v42  ;;  %v9873_v16 = vpop.eup %7832  ;;  %v2595_v19 = vadd.f32 %v9865_v51, %v9855_v43  ;;  %7852 = vpow2.f32 %v9531_v54  ;;  %v13112_v59 = vld [vmem:[#allocation49_spill] sm:$0xff]  ;;  %v7307_v33 = vld [vmem:[%s9637_s15 + $0x300] sm:$0xff]  ;;  %v7310_v61 = vld [vmem:[%s9637_s15 + $0x318] sm:$0xff] }
 0x1fd   : > { %13111 = vst [vmem:[#allocation61_spill] sm:$0xff] %v9873_v16  ;;  %v13113_v9 = vld [vmem:[#allocation73_spill] sm:$0xff]  ;;  %v9881_v13 = vpop.eup %7834  ;;  %7854 = vpow2.f32 %v9535_v34  ;;  %v9884_v32 = vmul.f32 1.442695, %v2251_v41  ;;  %v9886_v42 = vmul.f32 1.442695, %v2443_v3  ;;  %v2865_v16 = vmul.f32 %v2801_v24, %v2737_v6 }
 0x1fe   : > { %v2739_v17 = vmul.f32 %v13113_v9, %v13112_v59  ;;  %13114 = vst [vmem:[#allocation47_spill] sm:$0xff] %v9881_v13  ;;  %v9890_v51 = vpop.eup %7836  ;;  %7856 = vrcp.f32 %v2595_v19  ;;  %v2866_v54 = vmul.f32 %v2802_v38, %v2738_v20  ;;  %v13116_v59 = vld [vmem:[#allocation46_spill] sm:$0xff]  ;;  %v13118_v24 = vld [vmem:[#allocation52_spill] sm:$0xff]  ;;  %v13119_v6 = vld [vmem:[#allocation63_spill] sm:$0xff] }
 0x1ff   : > { %13115 = vst [vmem:[#allocation66_spill] sm:$0xff] %v9890_v51  ;;  %v2930_v12 = vmul.f32 %v13110_v29, %v13116_v59  ;;  %v9895_v55 = vpop.eup %7838  ;;  %v2624_v34 = vadd.f32 %v9890_v51, %v9881_v13  ;;  %7858 = vpow2.f32 %v9537_v39  ;;  %v2931_v41 = vmul.f32 %v13113_v9, %v13118_v24  ;;  %v13122_v38 = vld [vmem:[#allocation57_spill] sm:$0xff] }
 0x200   : > { %v2867_v43 = vmul.f32 %v2803_v5, %v2739_v17  ;;  %13117 = vst [vmem:[#allocation45_spill] sm:$0xff] %v9895_v55  ;;  %v3057_v3 = vmul.f32 %v7307_v33, %v13119_v6  ;;  %v9903_v19 = vpop.eup %7840  ;;  %7860 = vpow2.f32 %v9550_v18  ;;  %v13121_v5 = vld [vmem:[#allocation70_spill] sm:$0xff]  ;;  %v13123_v17 = vld [vmem:[#allocation77_spill] sm:$0xff]  ;;  %v2772_v55 = vld [vmem:[%s9637_s15 + $0x20] sm:$0xff] }
 0x201   : > { %13120 = vst [vmem:[#allocation64_spill] sm:$0xff] %v9903_v19  ;;  %v3058_v29 = vmul.f32 %v7308_v25, %v13121_v5  ;;  %v3059_v20 = vmul.f32 %v7309_v37, %v2930_v12  ;;  %v2708_v59 = vmul.f32 %v13123_v17, %v13122_v38  ;;  %v9910_v63 = vpop.eup %7842  ;;  %7862 = vrcp.f32 %v2624_v34  ;;  %v13125_v13 = vld [vmem:[#allocation69_spill] sm:$0xff] }
 0x202   : > { %13124 = vst [vmem:[#allocation49_spill] sm:$0xff] %v9910_v63  ;;  %v3060_v39 = vmul.f32 %v7310_v61, %v2931_v41  ;;  %v3121_v51 = vadd.f32 %v3057_v3, %v2864_v62  ;;  %v2709_v9 = vmul.f32 %v9353_v60, %v13125_v13  ;;  %v2773_v33 = vld [vmem:[%s9637_s15 + $0x28] sm:$0xff]  ;;  %v9915_v24 = vpop.eup %7844  ;;  %v2626_v18 = vadd.f32 %v9910_v63, %v9903_v19  ;;  %v13161_v19 = vld [vmem:[#allocation74_spill] sm:$0xff] }
 0x203   : > { %7864 = vpow2.f32 %v9558_v22  ;;  %v3122_v37 = vadd.f32 %v3058_v29, %v2865_v16  ;;  %v9920_v25 = vadd.f32 %v3059_v20, %v2866_v54  ;;  %v9922_v12 = vpop.eup %7846  ;;  %v2836_v61 = vmul.f32 %v2772_v55, %v2708_v59  ;;  %v13132_v29 = vld [vmem:[#allocation60_spill] sm:$0xff]  ;;  %v7280_v20 = vld [vmem:[%s9637_s15 + $0x228] sm:$0xff] }
 0x204   : > { %7866 = vpow2.f32 %v9560_v8  ;;  %v9925_v62 = vadd.f32 %v3060_v39, %v2867_v43  ;;  %v9928_v13 = vmul.f32 %v13074_v44, %v3121_v51  ;;  %v9930_v34 = vpop.eup %7848  ;;  %v2837_v54 = vmul.f32 %v2773_v33, %v2709_v9  ;;  %v7279_v43 = vld [vmem:[%s9637_s15 + $0x220] sm:$0xff]  ;;  %v13134_v39 = vld [vmem:[#allocation71_spill] sm:$0xff]  ;;  %v13158_v63 = vld [vmem:[#allocation65_spill] sm:$0xff] }
 0x205   : > { %13127 = vst [vmem:[#allocation46_spill] sm:$0xff] %v9930_v34  ;;  %7868 = vrcp.f32 %v2626_v18  ;;  %v9933_v22 = vmul.f32 %v9686_v45, %v3122_v37  ;;  %v9937_v16 = vmul.f32 %v9693_v30, %v9920_v25  ;;  %v9939_v41 = vpop.eup %7850  ;;  %v2625_v8 = vadd.f32 %v9930_v34, %v9922_v12 }
 0x206   : > { %13126 = vst [vmem:[#allocation73_spill] sm:$0xff] %v9928_v13  ;;  %7870 = vpow2.f32 %v9583_v47  ;;  %v9946_v55 = vmul.f32 %v9732_v26, %v9925_v62  ;;  %v3187_v51 = vmul.f32 %v9928_v13, %v9928_v13  ;;  %v9951_v6 = vpop.eup %7852  ;;  %v2900_v47 = vmul.f32 %v13123_v17, %v13132_v29  ;;  %v13136_v17 = vld [vmem:[#allocation103_spill] sm:$0xff] }
 0x207   : > { %13128 = vst [vmem:[#allocation52_spill] sm:$0xff] %v9933_v22  ;;  %13129 = vst [vmem:[#allocation63_spill] sm:$0xff] %v9937_v16  ;;  %7872 = vpow2.f32 %v9585_v50  ;;  %v3188_v3 = vmul.f32 %v9933_v22, %v9933_v22  ;;  %v3189_v5 = vmul.f32 %v9937_v16, %v9937_v16  ;;  %v9961_v38 = vpop.eup %7854  ;;  %v2901_v9 = vmul.f32 %v9353_v60, %v13134_v39  ;;  %v13138_v16 = vld [vmem:[#allocation104_spill] sm:$0xff] }
 0x208   : > { %13130 = vst [vmem:[#allocation70_spill] sm:$0xff] %v9946_v55  ;;  %13131 = vst [vmem:[#allocation57_spill] sm:$0xff] %v9951_v6  ;;  %7874 = vrcp.f32 %v2625_v8  ;;  %v3190_v59 = vmul.f32 %v9946_v55, %v9946_v55  ;;  %v9969_v50 = vmul.f32 %v13074_v44, %v9700_v35  ;;  %v9971_v33 = vpop.eup %7856  ;;  %v2627_v18 = vadd.f32 %v9961_v38, %v9951_v6  ;;  %v7281_v6 = vld [vmem:[%s9637_s15 + $0x230] sm:$0xff] }
 0x209   : > { %13133 = vst [vmem:[#allocation77_spill] sm:$0xff] %v9961_v38  ;;  %7876 = vpow2.f32 %v13136_v17  ;;  %v3196_v37 = vadd.f32 %v3188_v3, %v3187_v51  ;;  %v3029_v29 = vmul.f32 %v7279_v43, %v2900_v47  ;;  %v9976_v8 = vpop.eup %7858  ;;  %v3030_v55 = vmul.f32 %v7280_v20, %v2901_v9  ;;  %v13141_v17 = vld [vmem:[#allocation86_spill] sm:$0xff]  ;;  %v13142_v51 = vld [vmem:[#allocation29_spill] sm:$0xff] }
 0x20a   : > { %13135 = vst [vmem:[#allocation69_spill] sm:$0xff] %v9969_v50  ;;  %13137 = vst [vmem:[#allocation60_spill] sm:$0xff] %v9976_v8  ;;  %7878 = vpow2.f32 %v13138_v16  ;;  %v9981_v60 = vmul.f32 %v9686_v45, %v9702_v15  ;;  %v3432_v35 = vmul.f32 %v9969_v50, %v9969_v50  ;;  %v9985_v39 = vpop.eup %7860  ;;  %v2158_v43 = vmax.f32 %v13142_v51, %v13141_v17  ;;  %v13143_v47 = vld [vmem:[#allocation106_spill] sm:$0xff]  ;;  %v13145_v50 = vld [vmem:[#allocation107_spill] sm:$0xff] }
 0x20b   : > { %13140 = vst [vmem:[#allocation103_spill] sm:$0xff] %v9985_v39  ;;  %7880 = vrcp.f32 %v2627_v18  ;;  %v3197_v22 = vadd.f32 %v3196_v37, %v3189_v5  ;;  %v3093_v13 = vadd.f32 %v3029_v29, %v2836_v61  ;;  %v9989_v3 = vpop.eup %7862  ;;  %v2596_v16 = vadd.f32 %v9985_v39, %v9976_v8  ;;  %v13157_v8 = vld [vmem:[#allocation95_spill] sm:$0xff] }
 0x20c   : > { %13139 = vst [vmem:[#allocation71_spill] sm:$0xff] %v9981_v60  ;;  %7882 = vpow2.f32 %v13143_v47  ;;  %v3094_v15 = vadd.f32 %v3030_v55, %v2837_v54  ;;  %v3433_v20 = vmul.f32 %v9981_v60, %v9981_v60  ;;  %v2222_v18 = vsub.f32 %v13142_v51, %v2158_v43 }
 0x20d   : > { %v9996_v9 = vpop.eup %7864  ;;  %7884 = vpow2.f32 %v13145_v50  ;;  %v3198_v61 = vadd.f32 %v3197_v22, %v3190_v59  ;;  %v10000_v5 = vmul.f32 %v9693_v30, %v3093_v13  ;;  %v13151_v59 = vld [vmem:[#allocation41_spill] sm:$0xff] }
 0x20e   : > { %13144 = vst [vmem:[#allocation104_spill] sm:$0xff] %v9996_v9  ;;  %v10003_v37 = vpop.eup %7866  ;;  %7886 = vrcp.f32 %v2596_v16  ;;  %v10006_v54 = vmul.f32 %v9732_v26, %v3094_v15  ;;  %v3440_v55 = vadd.f32 %v3433_v20, %v3432_v35  ;;  %v10009_v29 = vmul.f32 %v9686_v45, %v3094_v15  ;;  %v2774_v16 = vld [vmem:[%s9637_s15 + $0x30] sm:$0xff] }
 0x20f   : > { %13146 = vst [vmem:[#allocation86_spill] sm:$0xff] %v10000_v5  ;;  %13147 = vst [vmem:[#allocation29_spill] sm:$0xff] %v10003_v37  ;;  %v10011_v47 = vpop.eup %7868  ;;  %v2598_v22 = vadd.f32 %v10003_v37, %v9996_v9  ;;  %7888 = vpow2.f32 %v13151_v59  ;;  %3199 = vadd.xlane.f32.xlu0 %v3198_v61  ;;  %v3434_v50 = vmul.f32 %v10000_v5, %v10000_v5  ;;  %v10018_v51 = vmul.f32 1.442695, %v2222_v18  ;;  %v13152_v35 = vld [vmem:[#allocation54_spill] sm:$0xff]  ;;  %v2775_v61 = vld [vmem:[%s9637_s15 + $0x38] sm:$0xff] }
 0x210   : > { %13148 = vst [vmem:[#allocation106_spill] sm:$0xff] %v10006_v54  ;;  %13149 = vst [vmem:[#allocation107_spill] sm:$0xff] %v10009_v29  ;;  %v10021_v60 = vpop.eup %7870  ;;  %7890 = vpow2.f32 %v13152_v35  ;;  %v3435_v15 = vmul.f32 %v10006_v54, %v10006_v54  ;;  %v2414_v20 = vsub.f32 %v13141_v17, %v2158_v43  ;;  %v13153_v37 = vld [vmem:[#allocation62_spill] sm:$0xff]  ;;  %v13156_v5 = vld [vmem:[#allocation72_spill] sm:$0xff] }
 0x211   : > { %13150 = vst [vmem:[#allocation115_spill] sm:$0xff] %v10011_v47  ;;  %v13154_v59 = vld [vmem:[#allocation82_spill] sm:$0xff]  ;;  %v10030_v39 = vpop.eup %7872  ;;  %7892 = vrcp.f32 %v2598_v22  ;;  %v3441_v18 = vadd.f32 %v3440_v55, %v3434_v50  ;;  %v2711_v38 = vmul.f32 %v13157_v8, %v13156_v5  ;;  %v7282_v54 = vld [vmem:[%s9637_s15 + $0x238] sm:$0xff] }
 0x212   : > { %v2710_v9 = vmul.f32 %v13154_v59, %v13153_v37  ;;  %13155 = vst [vmem:[#allocation41_spill] sm:$0xff] %v10030_v39  ;;  %v2902_v35 = vmul.f32 %v13154_v59, %v13158_v63  ;;  %v10037_v47 = vpop.eup %7874  ;;  %v2597_v17 = vadd.f32 %v10030_v39, %v10021_v60  ;;  %7894 = vpow2.f32 %v9656_v31  ;;  %v13160_v55 = vld [vmem:[#allocation51_spill] sm:$0xff] }
 0x213   : > { %v10042_v43 = vmul.f32 1.442695, %v2414_v20  ;;  %v10045_v22 = vpop.eup %7876  ;;  %7896 = vpow2.f32 %v13160_v55  ;;  %v3442_v5 = vadd.f32 %v3441_v18, %v3435_v15  ;;  %v2839_v50 = vmul.f32 %v2775_v61, %v2711_v38  ;;  %v13167_v61 = vld [vmem:[#allocation88_spill] sm:$0xff]  ;;  %v13168_v18 = vld [vmem:[#allocation31_spill] sm:$0xff] }
 0x214   : > { %v2838_v37 = vmul.f32 %v2774_v16, %v2710_v9  ;;  %13159 = vst [vmem:[#allocation54_spill] sm:$0xff] %v10045_v22  ;;  %v2903_v63 = vmul.f32 %v13157_v8, %v13161_v19  ;;  %v10050_v59 = vpop.eup %7878  ;;  %7898 = vrcp.f32 %v2597_v17  ;;  %v3031_v34 = vmul.f32 %v7281_v6, %v2902_v35  ;;  %v13164_v19 = vld [vmem:[#allocation84_spill] sm:$0xff]  ;;  %v13165_v8 = vld [vmem:[#allocation27_spill] sm:$0xff] }
 0x215   : > { %13162 = vst [vmem:[#allocation62_spill] sm:$0xff] %v10050_v59  ;;  %v10053_v39 = vmul.f32 %v13074_v44, %v3093_v13  ;;  %v3679_v31 = vmul.f32 %v10009_v29, %v10009_v29  ;;  %v10057_v9 = vpop.eup %7880  ;;  %v2599_v16 = vadd.f32 %v10050_v59, %v10045_v22  ;;  %7900 = vpow2.f32 %v9716_v58  ;;  %3443 = vadd.xlane.f32.xlu1 %v3442_v5  ;;  %v13180_v59 = vld [vmem:[#allocation76_spill] sm:$0xff]  ;;  %v7312_v22 = vld [vmem:[%s9637_s15 + $0x328] sm:$0xff] }
 0x216   : > { %v3032_v38 = vmul.f32 %v7282_v54, %v2903_v63  ;;  %v2156_v15 = vmax.f32 %v13165_v8, %v13164_v19  ;;  %v10064_v20 = vpop.eup %7882  ;;  %7902 = vpow2.f32 %v9718_v10  ;;  %v10067_v13 = vadd.f32 %v3031_v34, %v2838_v37 }
 0x217   : > { %13163 = vst [vmem:[#allocation82_spill] sm:$0xff] %v10053_v39  ;;  %13166 = vst [vmem:[#allocation72_spill] sm:$0xff] %v10064_v20  ;;  %v3678_v6 = vmul.f32 %v10053_v39, %v10053_v39  ;;  %v2159_v35 = vmax.f32 %v13168_v18, %v13167_v61  ;;  %v10073_v17 = vpop.eup %7884  ;;  %7904 = vrcp.f32 %v2599_v16  ;;  %v2805_v39 = vld [vmem:[%s9637_s15 + $0x128] sm:$0xff] }
 0x218   : > { %13169 = vst [vmem:[#allocation95_spill] sm:$0xff] %v10073_v17  ;;  %v10075_v58 = vadd.f32 %v3032_v38, %v2839_v50  ;;  %v2220_v54 = vsub.f32 %v13165_v8, %v2156_v15  ;;  %v2412_v55 = vsub.f32 %v13164_v19, %v2156_v15  ;;  %v10079_v5 = vpop.eup %7886  ;;  %v2628_v10 = vadd.f32 %v10073_v17, %v10064_v20  ;;  %v2804_v8 = vld [vmem:[%s9637_s15 + $0x120] sm:$0xff]  ;;  %v13179_v17 = vld [vmem:[#allocation98_spill] sm:$0xff] }
 0x219   : > { %7906 = vpow2.f32 %v9742_v46  ;;  %v10086_v34 = vmul.f32 %v9693_v30, %v10067_v13  ;;  %v3686_v37 = vadd.f32 %v3679_v31, %v3678_v6  ;;  %v10088_v63 = vpop.eup %7888  ;;  %v2223_v31 = vsub.f32 %v13168_v18, %v2159_v35 }
 0x21a   : > { %13171 = vst [vmem:[#allocation51_spill] sm:$0xff] %v10088_v63  ;;  %7908 = vpow2.f32 %v9747_v53  ;;  %v10093_v50 = vmul.f32 %v9732_v26, %v10075_v58  ;;  %v10095_v16 = vmul.f32 1.442695, %v2220_v54  ;;  %v10097_v38 = vmul.f32 1.442695, %v2412_v55  ;;  %v10099_v19 = vpop.eup %7890  ;;  %v13175_v55 = vld [vmem:[#allocation75_spill] sm:$0xff] }
 0x21b   : > { %13170 = vst [vmem:[#allocation65_spill] sm:$0xff] %v10086_v34  ;;  %13173 = vst [vmem:[#allocation84_spill] sm:$0xff] %v10099_v19  ;;  %7910 = vrcp.f32 %v2628_v10  ;;  %v3680_v46 = vmul.f32 %v10086_v34, %v10086_v34  ;;  %v2415_v53 = vsub.f32 %v13167_v61, %v2159_v35  ;;  %v10106_v15 = vpop.eup %7892  ;;  %v2630_v6 = vadd.f32 %v10099_v19, %v10088_v63  ;;  %v13176_v10 = vld [vmem:[#allocation4_spill] sm:$0xff] }
 0x21c   : > { %13172 = vst [vmem:[#allocation74_spill] sm:$0xff] %v10093_v50  ;;  %13174 = vst [vmem:[#allocation27_spill] sm:$0xff] %v10106_v15  ;;  %7912 = vpow2.f32 %v9783_v40  ;;  %v3681_v54 = vmul.f32 %v10093_v50, %v10093_v50  ;;  %v2740_v29 = vmul.f32 %v13176_v10, %v13175_v55  ;;  %v10115_v34 = vpop.eup %7894  ;;  %v10118_v18 = vmul.f32 1.442695, %v2223_v31  ;;  %v7311_v19 = vld [vmem:[%s9637_s15 + $0x320] sm:$0xff]  ;;  %v13178_v40 = vld [vmem:[#allocation81_spill] sm:$0xff] }
 0x21d   : > { %7914 = vpow2.f32 %v9785_v23  ;;  %v3687_v61 = vadd.f32 %v3686_v37, %v3680_v46  ;;  %v10120_v35 = vmul.f32 1.442695, %v2415_v53  ;;  %v10124_v63 = vpop.eup %7896  ;;  %v2741_v50 = vmul.f32 %v13179_v17, %v13178_v40  ;;  %v13181_v46 = vld [vmem:[#allocation83_spill] sm:$0xff] }
 0x21e   : > { %13177 = vst [vmem:[#allocation88_spill] sm:$0xff] %v10124_v63  ;;  %7916 = vrcp.f32 %v2630_v6  ;;  %v2868_v20 = vmul.f32 %v2804_v8, %v2740_v29  ;;  %v2932_v55 = vmul.f32 %v13176_v10, %v13180_v59  ;;  %v10131_v15 = vpop.eup %7898  ;;  %v2629_v23 = vadd.f32 %v10124_v63, %v10115_v34 }
 0x21f   : > { %7918 = vpow2.f32 %v9790_v28  ;;  %v3688_v37 = vadd.f32 %v3687_v61, %v3681_v54  ;;  %v2933_v31 = vmul.f32 %v13179_v17, %v13181_v46  ;;  %v10138_v53 = vpop.eup %7900  ;;  %v2869_v29 = vmul.f32 %v2805_v39, %v2741_v50  ;;  %v13186_v17 = vld [vmem:[#allocation87_spill] sm:$0xff]  ;;  %v13187_v54 = vld [vmem:[#allocation28_spill] sm:$0xff] }
 0x220   : > { %13182 = vst [vmem:[#allocation31_spill] sm:$0xff] %v10138_v53  ;;  %7920 = vpow2.f32 %v9806_v14  ;;  %v3061_v8 = vmul.f32 %v7311_v19, %v2932_v55  ;;  %v10143_v59 = vmul.f32 %v13074_v44, %v9920_v25  ;;  %v10145_v6 = vpop.eup %7902  ;;  %v10149_v28 = vmul.f32 %v9686_v45, %v9925_v62 }
 0x221   : > { %13184 = vst [vmem:[#allocation4_spill] sm:$0xff] %v10145_v6  ;;  %7922 = vrcp.f32 %v2629_v23  ;;  %3689 = vadd.xlane.f32.xlu0 %v3688_v37  ;;  %v3062_v10 = vmul.f32 %v7312_v22, %v2933_v31  ;;  %v2157_v61 = vmax.f32 %v13187_v54, %v13186_v17  ;;  %v10153_v40 = vpop.eup %7904  ;;  %v2631_v14 = vadd.f32 %v10145_v6, %v10138_v53  ;;  %v13191_v23 = vld [vmem:[#allocation89_spill] sm:$0xff]  ;;  %v13192_v37 = vld [vmem:[#allocation30_spill] sm:$0xff]  ;;  %v13211_v53 = vld [vmem:[#allocation56_spill] sm:$0xff] }
 0x222   : > { %13183 = vst [vmem:[#allocation75_spill] sm:$0xff] %v10143_v59  ;;  %13185 = vst [vmem:[#allocation81_spill] sm:$0xff] %v10149_v28  ;;  %7924 = vpow2.f32 %v9826_v4  ;;  %v10158_v25 = vadd.f32 %v3061_v8, %v2868_v20  ;;  %v3436_v39 = vmul.f32 %v10143_v59, %v10143_v59  ;;  %v3437_v50 = vmul.f32 %v10149_v28, %v10149_v28  ;;  %v7313_v6 = vld [vmem:[%s9637_s15 + $0x330] sm:$0xff] }
 0x223   : > { %v10162_v22 = vpop.eup %7906  ;;  %7926 = vpow2.f32 %v9828_v2  ;;  %v10165_v62 = vadd.f32 %v3062_v10, %v2869_v29  ;;  %v2221_v19 = vsub.f32 %v13187_v54, %v2157_v61  ;;  %v2413_v20 = vsub.f32 %v13186_v17, %v2157_v61 }
 0x224   : > { %13188 = vst [vmem:[#allocation98_spill] sm:$0xff] %v10162_v22  ;;  %v10170_v55 = vpop.eup %7908  ;;  %7928 = vrcp.f32 %v2631_v14  ;;  %v10174_v4 = vmul.f32 %v9693_v30, %v10158_v25  ;;  %v2188_v46 = vmax.f32 %v13192_v37, %v13191_v23  ;;  %v3445_v8 = vadd.f32 %v3437_v50, %v3436_v39 }
 0x225   : > { %13189 = vst [vmem:[#allocation76_spill] sm:$0xff] %v10170_v55  ;;  %v10179_v2 = vpop.eup %7910  ;;  %v2602_v31 = vadd.f32 %v10170_v55, %v10162_v22  ;;  %7930 = vpow2.f32 %v9833_v56  ;;  %v10186_v29 = vmul.f32 %v9732_v26, %v10165_v62  ;;  %v10193_v54 = vmul.f32 1.442695, %v2221_v19 }
 0x226   : > { %13190 = vst [vmem:[#allocation83_spill] sm:$0xff] %v10174_v4  ;;  %v10188_v10 = vpop.eup %7912  ;;  %7932 = vpow2.f32 %v9835_v0  ;;  %v3438_v17 = vmul.f32 %v10174_v4, %v10174_v4  ;;  %v10195_v61 = vmul.f32 1.442695, %v2413_v20  ;;  %v2252_v28 = vsub.f32 %v13192_v37, %v2188_v46  ;;  %v13197_v20 = vld [vmem:[#allocation91_spill] sm:$0xff]  ;;  %v13198_v4 = vld [vmem:[#allocation33_spill] sm:$0xff] }
 0x227   : > { %13193 = vst [vmem:[#allocation87_spill] sm:$0xff] %v10186_v29  ;;  %13194 = vst [vmem:[#allocation28_spill] sm:$0xff] %v10188_v10  ;;  %v10197_v14 = vpop.eup %7914  ;;  %7934 = vrcp.f32 %v2602_v31  ;;  %v3439_v56 = vmul.f32 %v10186_v29, %v10186_v29  ;;  %v2444_v39 = vsub.f32 %v13191_v23, %v2188_v46  ;;  %v2190_v59 = vmax.f32 %v13198_v4, %v13197_v20  ;;  %v13200_v23 = vld [vmem:[#allocation92_spill] sm:$0xff] }
 0x228   : > { %13195 = vst [vmem:[#allocation89_spill] sm:$0xff] %v10197_v14  ;;  %v10203_v50 = vpop.eup %7916  ;;  %v2600_v0 = vadd.f32 %v10197_v14, %v10188_v10  ;;  %7936 = vpow2.f32 %v9837_v36  ;;  %v3446_v19 = vadd.f32 %v3445_v8, %v3438_v17  ;;  %v10213_v31 = vmul.f32 1.442695, %v2252_v28  ;;  %v13201_v46 = vld [vmem:[#allocation32_spill] sm:$0xff] }
 0x229   : > { %13196 = vst [vmem:[#allocation30_spill] sm:$0xff] %v10203_v50  ;;  %v10210_v55 = vpop.eup %7918  ;;  %7938 = vpow2.f32 %v9841_v57  ;;  %v10215_v37 = vmul.f32 1.442695, %v2444_v39  ;;  %v2189_v29 = vmax.f32 %v13201_v46, %v13200_v23  ;;  %v2254_v8 = vsub.f32 %v13198_v4, %v2190_v59 }
 0x22a   : > { %13199 = vst [vmem:[#allocation91_spill] sm:$0xff] %v10210_v55  ;;  %v10219_v22 = vpop.eup %7920  ;;  %7940 = vrcp.f32 %v2600_v0  ;;  %v3447_v36 = vadd.f32 %v3446_v19, %v3439_v56  ;;  %v2446_v17 = vsub.f32 %v13197_v20, %v2190_v59  ;;  %v13204_v56 = vld [vmem:[#allocation94_spill] sm:$0xff] }
 0x22b   : > { %13202 = vst [vmem:[#allocation33_spill] sm:$0xff] %v10219_v22  ;;  %v10223_v14 = vpop.eup %7922  ;;  %v2601_v57 = vadd.f32 %v10219_v22, %v10210_v55  ;;  %7942 = vpow2.f32 %v9858_v52  ;;  %v2253_v28 = vsub.f32 %v13201_v46, %v2189_v29  ;;  %v2445_v39 = vsub.f32 %v13200_v23, %v2189_v29  ;;  %v13205_v0 = vld [vmem:[#allocation34_spill] sm:$0xff] }
 0x22c   : > { %v10230_v10 = vpop.eup %7924  ;;  %7944 = vpow2.f32 %v9860_v49  ;;  %3448 = vadd.xlane.f32.xlu1 %v3447_v36  ;;  %v10233_v4 = vmul.f32 1.442695, %v2254_v8  ;;  %v10235_v59 = vmul.f32 1.442695, %v2446_v17  ;;  %v2191_v19 = vmax.f32 %v13205_v0, %v13204_v56  ;;  %v2806_v20 = vld [vmem:[%s9637_s15 + $0x130] sm:$0xff] }
 0x22d   : > { %13203 = vst [vmem:[#allocation92_spill] sm:$0xff] %v10230_v10  ;;  %v10240_v52 = vpop.eup %7926  ;;  %7946 = vrcp.f32 %v2601_v57  ;;  %v10242_v29 = vmul.f32 1.442695, %v2253_v28  ;;  %v10244_v23 = vmul.f32 1.442695, %v2445_v39  ;;  %v13207_v49 = vld [vmem:[#allocation78_spill] sm:$0xff] }
 0x22e   : > { %13206 = vst [vmem:[#allocation32_spill] sm:$0xff] %v10240_v52  ;;  %v13208_v46 = vld [vmem:[#allocation6_spill] sm:$0xff]  ;;  %v10248_v22 = vpop.eup %7928  ;;  %v2603_v8 = vadd.f32 %v10240_v52, %v10230_v10  ;;  %7948 = vpow2.f32 %v9884_v32  ;;  %v2255_v17 = vsub.f32 %v13205_v0, %v2191_v19  ;;  %v2447_v55 = vsub.f32 %v13204_v56, %v2191_v19  ;;  %v2807_v57 = vld [vmem:[%s9637_s15 + $0x138] sm:$0xff]  ;;  %v13210_v39 = vld [vmem:[#allocation85_spill] sm:$0xff] }
 0x22f   : > { %v2742_v36 = vmul.f32 %v13208_v46, %v13207_v49  ;;  %13209 = vst [vmem:[#allocation94_spill] sm:$0xff] %v10248_v22  ;;  %v10257_v28 = vpop.eup %7930  ;;  %7950 = vpow2.f32 %v9886_v42  ;;  %v2743_v49 = vmul.f32 %v13211_v53, %v13210_v39  ;;  %v13212_v22 = vld [vmem:[#allocation80_spill] sm:$0xff]  ;;  %v7314_v52 = vld [vmem:[%s9637_s15 + $0x338] sm:$0xff]  ;;  %v13214_v19 = vld [vmem:[#allocation90_spill] sm:$0xff] }
 0x230   : > { %v2934_v63 = vmul.f32 %v13208_v46, %v13212_v22  ;;  %v10265_v32 = vpop.eup %7932  ;;  %7952 = vrcp.f32 %v2603_v8  ;;  %v10267_v0 = vmul.f32 1.442695, %v2255_v17  ;;  %v10269_v56 = vmul.f32 1.442695, %v2447_v55  ;;  %v2776_v17 = vld [vmem:[%s9637_s15 + $0x40] sm:$0xff] }
 0x231   : > { %v2870_v50 = vmul.f32 %v2806_v20, %v2742_v36  ;;  %13213 = vst [vmem:[#allocation34_spill] sm:$0xff] %v10265_v32  ;;  %v2935_v10 = vmul.f32 %v13211_v53, %v13214_v19  ;;  %v10273_v42 = vpop.eup %7934  ;;  %v2632_v20 = vadd.f32 %v10265_v32, %v10257_v28  ;;  %7954 = vpow2.f32 %v10018_v51 }
 0x232   : > { %v2871_v22 = vmul.f32 %v2807_v57, %v2743_v49  ;;  %v3063_v46 = vmul.f32 %v7313_v6, %v2934_v63  ;;  %v10278_v36 = vpop.eup %7936  ;;  %7956 = vpow2.f32 %v10042_v43  ;;  %v10283_v55 = vmul.f32 %v13074_v44, %v10158_v25  ;;  %v13219_v63 = vld [vmem:[#allocation93_spill] sm:$0xff]  ;;  %v13220_v6 = vld [vmem:[#allocation99_spill] sm:$0xff]  ;;  %v13221_v43 = vld [vmem:[#allocation96_spill] sm:$0xff] }
 0x233   : > { %13215 = vst [vmem:[#allocation78_spill] sm:$0xff] %v10278_v36  ;;  %v3064_v8 = vmul.f32 %v7314_v52, %v2935_v10  ;;  %v10287_v53 = vmul.f32 %v9686_v45, %v10165_v62  ;;  %v10290_v39 = vpop.eup %7938  ;;  %7958 = vrcp.f32 %v2632_v20  ;;  %v2712_v57 = vmul.f32 %v13220_v6, %v13219_v63  ;;  %v13222_v10 = vld [vmem:[#allocation101_spill] sm:$0xff] }
 0x234   : > { %13216 = vst [vmem:[#allocation6_spill] sm:$0xff] %v10283_v55  ;;  %13218 = vst [vmem:[#allocation56_spill] sm:$0xff] %v10290_v39  ;;  %v10292_v51 = vadd.f32 %v3063_v46, %v2870_v50  ;;  %v2713_v52 = vmul.f32 %v13222_v10, %v13221_v43  ;;  %v2777_v49 = vld [vmem:[%s9637_s15 + $0x48] sm:$0xff]  ;;  %v10299_v25 = vpop.eup %7940  ;;  %v2634_v62 = vadd.f32 %v10290_v39, %v10278_v36  ;;  %7960 = vpow2.f32 %v10095_v16  ;;  %v7283_v39 = vld [vmem:[%s9637_s15 + $0x240] sm:$0xff] }
 0x235   : > { %13217 = vst [vmem:[#allocation85_spill] sm:$0xff] %v10287_v53  ;;  %v10304_v19 = vadd.f32 %v3064_v8, %v2871_v22  ;;  %v3682_v50 = vmul.f32 %v10283_v55, %v10283_v55  ;;  %v10308_v20 = vpop.eup %7942  ;;  %7962 = vpow2.f32 %v10097_v38  ;;  %v3683_v63 = vmul.f32 %v10287_v53, %v10287_v53  ;;  %v13226_v55 = vld [vmem:[#allocation5_spill] sm:$0xff] }
 0x236   : > { %v10313_v46 = vmul.f32 %v9693_v30, %v10292_v51  ;;  %v2840_v43 = vmul.f32 %v2776_v17, %v2712_v57  ;;  %v10318_v16 = vpop.eup %7944  ;;  %7964 = vrcp.f32 %v2634_v62  ;;  %v2841_v8 = vmul.f32 %v2777_v49, %v2713_v52  ;;  %v7284_v62 = vld [vmem:[%s9637_s15 + $0x248] sm:$0xff] }
 0x237   : > { %13224 = vst [vmem:[#allocation90_spill] sm:$0xff] %v10318_v16  ;;  %v10322_v22 = vmul.f32 %v9732_v26, %v10304_v19  ;;  %v2904_v38 = vmul.f32 %v13220_v6, %v13226_v55  ;;  %v10326_v36 = vpop.eup %7946  ;;  %v2633_v32 = vadd.f32 %v10318_v16, %v10308_v20  ;;  %7966 = vpow2.f32 %v10118_v18  ;;  %v13228_v55 = vld [vmem:[#allocation97_spill] sm:$0xff] }
 0x238   : > { %13223 = vst [vmem:[#allocation80_spill] sm:$0xff] %v10313_v46  ;;  %v3684_v17 = vmul.f32 %v10313_v46, %v10313_v46  ;;  %v3691_v57 = vadd.f32 %v3683_v63, %v3682_v50  ;;  %v10334_v53 = vpop.eup %7948  ;;  %7968 = vpow2.f32 %v10120_v35  ;;  %v2905_v6 = vmul.f32 %v13222_v10, %v13228_v55 }
 0x239   : > { %13225 = vst [vmem:[#allocation93_spill] sm:$0xff] %v10322_v22  ;;  %13227 = vst [vmem:[#allocation99_spill] sm:$0xff] %v10334_v53  ;;  %v3685_v52 = vmul.f32 %v10322_v22, %v10322_v22  ;;  %v3033_v49 = vmul.f32 %v7283_v39, %v2904_v38  ;;  %v10341_v16 = vpop.eup %7950  ;;  %7970 = vrcp.f32 %v2633_v32  ;;  %v10345_v50 = vmul.f32 %v13074_v44, %v10067_v13 }
 0x23a   : > { %13229 = vst [vmem:[#allocation96_spill] sm:$0xff] %v10341_v16  ;;  %v3692_v18 = vadd.f32 %v3691_v57, %v3684_v17  ;;  %v10349_v63 = vmul.f32 %v9686_v45, %v10075_v58  ;;  %v10351_v35 = vpop.eup %7952  ;;  %v2635_v10 = vadd.f32 %v10341_v16, %v10334_v53  ;;  %7972 = vpow2.f32 %v10193_v54  ;;  %v2778_v57 = vld [vmem:[%s9637_s15 + $0x50] sm:$0xff] }
 0x23b   : > { %13230 = vst [vmem:[#allocation101_spill] sm:$0xff] %v10345_v50  ;;  %v3034_v39 = vmul.f32 %v7284_v62, %v2905_v6  ;;  %v3097_v38 = vadd.f32 %v3033_v49, %v2840_v43  ;;  %v10356_v32 = vpop.eup %7954  ;;  %7974 = vpow2.f32 %v10195_v61  ;;  %v3924_v17 = vmul.f32 %v10345_v50, %v10345_v50  ;;  %v13235_v43 = vld [vmem:[#allocation7_spill] sm:$0xff]  ;;  %v13236_v62 = vld [vmem:[#allocation12_spill] sm:$0xff]  ;;  %v7285_v16 = vld [vmem:[%s9637_s15 + $0x250] sm:$0xff] }
 0x23c   : > { %13231 = vst [vmem:[#allocation5_spill] sm:$0xff] %v10349_v63  ;;  %13232 = vst [vmem:[#allocation97_spill] sm:$0xff] %v10356_v32  ;;  %v3693_v13 = vadd.f32 %v3692_v18, %v3685_v52  ;;  %v3925_v58 = vmul.f32 %v10349_v63, %v10349_v63  ;;  %v10364_v55 = vpop.eup %7956  ;;  %7976 = vrcp.f32 %v2635_v10  ;;  %v2714_v61 = vmul.f32 %v13236_v62, %v13235_v43  ;;  %v2779_v52 = vld [vmem:[%s9637_s15 + $0x58] sm:$0xff] }
 0x23d   : > { %13233 = vst [vmem:[#allocation116_spill] sm:$0xff] %v10364_v55  ;;  %v3098_v22 = vadd.f32 %v3034_v39, %v2841_v8  ;;  %v10367_v54 = vmul.f32 %v9693_v30, %v3097_v38  ;;  %v10372_v6 = vpop.eup %7958  ;;  %v2606_v49 = vadd.f32 %v10364_v55, %v10356_v32  ;;  %7978 = vpow2.f32 %v10213_v31  ;;  %v13237_v10 = vld [vmem:[#allocation55_spill] sm:$0xff] }
 0x23e   : > { %3694 = vadd.xlane.f32.xlu1 %v3693_v13  ;;  %v3932_v18 = vadd.f32 %v3925_v58, %v3924_v17  ;;  %v13238_v63 = vld [vmem:[#allocation67_spill] sm:$0xff]  ;;  %v10379_v39 = vpop.eup %7960  ;;  %7980 = vpow2.f32 %v10215_v37  ;;  %v2842_v46 = vmul.f32 %v2778_v57, %v2714_v61  ;;  %v13242_v13 = vld [vmem:[#allocation53_spill] sm:$0xff] }
 0x23f   : > { %13234 = vst [vmem:[#allocation117_spill] sm:$0xff] %v10367_v54  ;;  %v2715_v8 = vmul.f32 %v13238_v63, %v13237_v10  ;;  %13239 = vst [vmem:[#allocation7_spill] sm:$0xff] %v10379_v39  ;;  %v10383_v50 = vmul.f32 %v9732_v26, %v3098_v22  ;;  %v3926_v43 = vmul.f32 %v10367_v54, %v10367_v54  ;;  %v7286_v55 = vld [vmem:[%s9637_s15 + $0x258] sm:$0xff]  ;;  %v10389_v32 = vpop.eup %7962  ;;  %7982 = vrcp.f32 %v2606_v49  ;;  %v13243_v58 = vld [vmem:[#allocation9_spill] sm:$0xff] }
 0x240   : > { %13241 = vst [vmem:[#allocation55_spill] sm:$0xff] %v10389_v32  ;;  %v2906_v17 = vmul.f32 %v13236_v62, %v13242_v13  ;;  %v2907_v10 = vmul.f32 %v13238_v63, %v13243_v58  ;;  %v10395_v37 = vpop.eup %7964  ;;  %v2604_v53 = vadd.f32 %v10389_v32, %v10379_v39  ;;  %7984 = vpow2.f32 %v10233_v4  ;;  %v13248_v58 = vld [vmem:[#allocation8_spill] sm:$0xff]  ;;  %v13266_v32 = vld [vmem:[#allocation102_spill] sm:$0xff]  ;;  %v7318_v39 = vld [vmem:[%s9637_s15 + $0x358] sm:$0xff] }
 0x241   : > { %13240 = vst [vmem:[#allocation12_spill] sm:$0xff] %v10383_v50  ;;  %v2843_v31 = vmul.f32 %v2779_v52, %v2715_v8  ;;  %v3927_v57 = vmul.f32 %v10383_v50, %v10383_v50  ;;  %v3933_v61 = vadd.f32 %v3932_v18, %v3926_v43  ;;  %v10402_v49 = vpop.eup %7966  ;;  %7986 = vpow2.f32 %v10235_v59  ;;  %v13249_v50 = vld [vmem:[#allocation16_spill] sm:$0xff] }
 0x242   : > { %13244 = vst [vmem:[#allocation67_spill] sm:$0xff] %v10402_v49  ;;  %v3035_v62 = vmul.f32 %v7285_v16, %v2906_v17  ;;  %v3036_v52 = vmul.f32 %v7286_v55, %v2907_v10  ;;  %v10406_v63 = vmul.f32 %v13074_v44, %v3097_v38  ;;  %v10408_v8 = vpop.eup %7968  ;;  %7988 = vrcp.f32 %v2604_v53  ;;  %v2808_v43 = vld [vmem:[%s9637_s15 + $0x140] sm:$0xff]  ;;  %v2809_v53 = vld [vmem:[%s9637_s15 + $0x148] sm:$0xff]  ;;  %v13251_v10 = vld [vmem:[#allocation15_spill] sm:$0xff] }
 0x243   : > { %13246 = vst [vmem:[#allocation9_spill] sm:$0xff] %v10408_v8  ;;  %v3934_v13 = vadd.f32 %v3933_v61, %v3927_v57  ;;  %v10411_v4 = vmul.f32 %v9686_v45, %v3098_v22  ;;  %v2744_v18 = vmul.f32 %v13249_v50, %v13248_v58  ;;  %v10416_v54 = vpop.eup %7970  ;;  %v2607_v59 = vadd.f32 %v10408_v8, %v10402_v49  ;;  %v13252_v57 = vld [vmem:[#allocation39_spill] sm:$0xff]  ;;  %v7316_v8 = vld [vmem:[%s9637_s15 + $0x348] sm:$0xff] }
 0x244   : > { %13245 = vst [vmem:[#allocation53_spill] sm:$0xff] %v10406_v63  ;;  %7990 = vpow2.f32 %v10242_v29  ;;  %v10421_v16 = vadd.f32 %v3035_v62, %v2842_v46  ;;  %v10423_v38 = vadd.f32 %v3036_v52, %v2843_v31  ;;  %v10426_v55 = vpop.eup %7972  ;;  %v4170_v22 = vmul.f32 %v10406_v63, %v10406_v63 }
 0x245   : > { %13247 = vst [vmem:[#allocation118_spill] sm:$0xff] %v10411_v4  ;;  %13250 = vst [vmem:[#allocation8_spill] sm:$0xff] %v10426_v55  ;;  %7992 = vpow2.f32 %v10244_v23  ;;  %3935 = vadd.xlane.f32.xlu0 %v3934_v13  ;;  %v4171_v17 = vmul.f32 %v10411_v4, %v10411_v4  ;;  %v2745_v29 = vmul.f32 %v13252_v57, %v13251_v10  ;;  %v10435_v46 = vpop.eup %7974 }
 0x246   : > { %13253 = vst [vmem:[#allocation16_spill] sm:$0xff] %v10435_v46  ;;  %7994 = vrcp.f32 %v2607_v59  ;;  %v10439_v31 = vmul.f32 %v9693_v30, %v10421_v16  ;;  %v10443_v23 = vmul.f32 %v9732_v26, %v10423_v38  ;;  %v2872_v61 = vmul.f32 %v2808_v43, %v2744_v18  ;;  %v10445_v62 = vpop.eup %7976  ;;  %v7315_v59 = vld [vmem:[%s9637_s15 + $0x340] sm:$0xff]  ;;  %v13257_v43 = vld [vmem:[#allocation10_spill] sm:$0xff] }
 0x247   : > { %v2605_v52 = vadd.f32 %v10435_v46, %v10426_v55  ;;  %7996 = vpow2.f32 %v10267_v0  ;;  %v4178_v13 = vadd.f32 %v4171_v17, %v4170_v22  ;;  %v2873_v58 = vmul.f32 %v2809_v53, %v2745_v29  ;;  %v10451_v10 = vpop.eup %7978  ;;  %v13259_v0 = vld [vmem:[#allocation100_spill] sm:$0xff]  ;;  %v2810_v17 = vld [vmem:[%s9637_s15 + $0x150] sm:$0xff] }
 0x248   : > { %13254 = vst [vmem:[#allocation15_spill] sm:$0xff] %v10439_v31  ;;  %13255 = vst [vmem:[#allocation39_spill] sm:$0xff] %v10443_v23  ;;  %7998 = vpow2.f32 %v10269_v56  ;;  %v4172_v4 = vmul.f32 %v10439_v31, %v10439_v31  ;;  %v4173_v18 = vmul.f32 %v10443_v23, %v10443_v23  ;;  %v2936_v63 = vmul.f32 %v13249_v50, %v13257_v43  ;;  %v10461_v49 = vpop.eup %7980  ;;  %v13264_v31 = vld [vmem:[#allocation21_spill] sm:$0xff]  ;;  %v7317_v55 = vld [vmem:[%s9637_s15 + $0x350] sm:$0xff] }
 0x249   : > { %13256 = vst [vmem:[#allocation119_spill] sm:$0xff] %v10451_v10  ;;  %13258 = vst [vmem:[#allocation10_spill] sm:$0xff] %v10461_v49  ;;  %8000 = vrcp.f32 %v2605_v52  ;;  %v2937_v53 = vmul.f32 %v13252_v57, %v13259_v0  ;;  %v10467_v56 = vmul.f32 %v13074_v44, %v10292_v51  ;;  %v10471_v22 = vmul.f32 %v9686_v45, %v10304_v19  ;;  %v10474_v29 = vpop.eup %7982  ;;  %v13263_v52 = vld [vmem:[#allocation11_spill] sm:$0xff] }
 0x24a   : > { %13262 = vst [vmem:[#allocation121_spill] sm:$0xff] %v10474_v29  ;;  %v2636_v50 = vadd.f32 %v10461_v49, %v10451_v10  ;;  %v4179_v43 = vadd.f32 %v4178_v13, %v4172_v4  ;;  %v3065_v23 = vmul.f32 %v7315_v59, %v2936_v63  ;;  %v2746_v46 = vmul.f32 %v13264_v31, %v13263_v52  ;;  %v2811_v57 = vld [vmem:[%s9637_s15 + $0x158] sm:$0xff]  ;;  %v10481_v0 = vpop.eup %7984 }
 0x24b   : > { %13260 = vst [vmem:[#allocation100_spill] sm:$0xff] %v10467_v56  ;;  %13261 = vst [vmem:[#allocation120_spill] sm:$0xff] %v10471_v22  ;;  %v3066_v51 = vmul.f32 %v7316_v8, %v2937_v53  ;;  %v3928_v19 = vmul.f32 %v10467_v56, %v10467_v56  ;;  %v3929_v29 = vmul.f32 %v10471_v22, %v10471_v22  ;;  %v10489_v4 = vpop.eup %7986 }
 0x24c   : > { %13265 = vst [vmem:[#allocation11_spill] sm:$0xff] %v10481_v0  ;;  %v2747_v49 = vmul.f32 %v9673_v11, %v13266_v32  ;;  %13267 = vst [vmem:[#allocation21_spill] sm:$0xff] %v10489_v4  ;;  %8002 = vrcp.f32 %v2636_v50  ;;  %v4180_v63 = vadd.f32 %v4179_v43, %v4173_v18  ;;  %v3129_v13 = vadd.f32 %v3065_v23, %v2872_v61  ;;  %v10491_v52 = vpop.eup %7988  ;;  %v13270_v23 = vld [vmem:[#allocation13_spill] sm:$0xff]  ;;  %v13271_v61 = vld [vmem:[#allocation14_spill] sm:$0xff] }
 0x24d   : > { %v2874_v59 = vmul.f32 %v2810_v17, %v2746_v46  ;;  %v2638_v8 = vadd.f32 %v10489_v4, %v10481_v0  ;;  %v3130_v53 = vadd.f32 %v3066_v51, %v2873_v58  ;;  %v3937_v10 = vadd.f32 %v3929_v29, %v3928_v19  ;;  %v13276_v50 = vld [vmem:[#allocation17_spill] sm:$0xff] }
 0x24e   : > { %v2875_v56 = vmul.f32 %v2811_v57, %v2747_v49  ;;  %v10497_v22 = vpop.eup %7990  ;;  %4181 = vadd.xlane.f32.xlu0 %v4180_v63  ;;  %v10500_v32 = vmul.f32 %v9693_v30, %v3129_v13  ;;  %v2938_v46 = vmul.f32 %v13264_v31, %v13270_v23  ;;  %v2939_v18 = vmul.f32 %v9673_v11, %v13271_v61  ;;  %v2780_v63 = vld [vmem:[%s9637_s15 + $0x60] sm:$0xff] }
 0x24f   : > { %13268 = vst [vmem:[#allocation102_spill] sm:$0xff] %v10497_v22  ;;  %v10507_v58 = vmul.f32 %v13074_v44, %v3129_v13  ;;  %v10509_v49 = vpop.eup %7992  ;;  %8004 = vrcp.f32 %v2638_v8  ;;  %v10512_v17 = vmul.f32 %v9732_v26, %v3130_v53  ;;  %v10515_v29 = vmul.f32 %v9686_v45, %v3130_v53  ;;  %v2781_v13 = vld [vmem:[%s9637_s15 + $0x68] sm:$0xff] }
 0x250   : > { %13269 = vst [vmem:[#allocation122_spill] sm:$0xff] %v10500_v32  ;;  %13273 = vst [vmem:[#allocation14_spill] sm:$0xff] %v10509_v49  ;;  %v2716_v43 = vmul.f32 %v9695_v27, %v13276_v50  ;;  %v10519_v57 = vpop.eup %7994  ;;  %v2637_v11 = vadd.f32 %v10509_v49, %v10497_v22  ;;  %v3930_v31 = vmul.f32 %v10500_v32, %v10500_v32  ;;  %v13278_v50 = vld [vmem:[#allocation38_spill] sm:$0xff]  ;;  %v7287_v49 = vld [vmem:[%s9637_s15 + $0x260] sm:$0xff] }
 0x251   : > { %13272 = vst [vmem:[#allocation13_spill] sm:$0xff] %v10507_v58  ;;  %13274 = vst [vmem:[#allocation123_spill] sm:$0xff] %v10512_v17  ;;  %v3067_v51 = vmul.f32 %v7317_v55, %v2938_v46  ;;  %v3068_v19 = vmul.f32 %v7318_v39, %v2939_v18  ;;  %v10527_v8 = vpop.eup %7996  ;;  %v3931_v53 = vmul.f32 %v10512_v17, %v10512_v17 }
 0x252   : > { %13275 = vst [vmem:[#allocation124_spill] sm:$0xff] %v10515_v29  ;;  %13277 = vst [vmem:[#allocation17_spill] sm:$0xff] %v10527_v8  ;;  %v4174_v23 = vmul.f32 %v10507_v58, %v10507_v58  ;;  %v4175_v61 = vmul.f32 %v10515_v29, %v10515_v29  ;;  %v2717_v4 = vmul.f32 %v9761_v7, %v13278_v50  ;;  %v10537_v55 = vpop.eup %7998  ;;  %8006 = vrcp.f32 %v2637_v11 }
 0x253   : > { %13279 = vst [vmem:[#allocation38_spill] sm:$0xff] %v10537_v55  ;;  %v3938_v39 = vadd.f32 %v3937_v10, %v3930_v31  ;;  %v10539_v46 = vadd.f32 %v3067_v51, %v2874_v59  ;;  %v10541_v18 = vadd.f32 %v3068_v19, %v2875_v56  ;;  %v10543_v17 = vpop.eup %8000  ;;  %v2639_v58 = vadd.f32 %v10537_v55, %v10527_v8  ;;  %v13282_v56 = vld [vmem:[#allocation68_spill] sm:$0xff]  ;;  %v7288_v31 = vld [vmem:[%s9637_s15 + $0x268] sm:$0xff]  ;;  %v13288_v8 = vld [vmem:[#allocation42_spill] sm:$0xff] }
 0x254   : > { %v4183_v32 = vadd.f32 %v4175_v61, %v4174_v23  ;;  %v2844_v29 = vmul.f32 %v2780_v63, %v2716_v43  ;;  %v2845_v0 = vmul.f32 %v2781_v13, %v2717_v4  ;;  %v2908_v59 = vmul.f32 %v9695_v27, %v13282_v56  ;;  %v13283_v51 = vld [vmem:[#allocation48_spill] sm:$0xff]  ;;  %v2782_v63 = vld [vmem:[%s9637_s15 + $0x70] sm:$0xff]  ;;  %v2783_v23 = vld [vmem:[%s9637_s15 + $0x78] sm:$0xff] }
 0x255   : > { %v3939_v50 = vadd.f32 %v3938_v39, %v3931_v53  ;;  %v10550_v11 = vmul.f32 %v9693_v30, %v10539_v46  ;;  %v10554_v10 = vmul.f32 %v9732_v26, %v10541_v18  ;;  %8008 = vrcp.f32 %v2639_v58  ;;  %v13286_v53 = vld [vmem:[#allocation105_spill] sm:$0xff]  ;;  %v7289_v56 = vld [vmem:[%s9637_s15 + $0x270] sm:$0xff] }
 0x256   : > { %v2909_v4 = vmul.f32 %v9761_v7, %v13283_v51  ;;  %v10563_v43 = vmul.f32 %v13074_v44, %v10421_v16  ;;  %v10567_v19 = vmul.f32 %v9686_v45, %v10423_v38  ;;  %v10570_v13 = vpop.eup %8002  ;;  %v3037_v7 = vmul.f32 %v7287_v49, %v2908_v59  ;;  %v13287_v49 = vld [vmem:[#allocation18_spill] sm:$0xff] }
 0x257   : > { %13280 = vst [vmem:[#allocation125_spill] sm:$0xff] %v10550_v11  ;;  %13281 = vst [vmem:[#allocation126_spill] sm:$0xff] %v10554_v10  ;;  %3940 = vadd.xlane.f32.xlu1 %v3939_v50  ;;  %v4176_v27 = vmul.f32 %v10550_v11, %v10550_v11  ;;  %v4177_v58 = vmul.f32 %v10554_v10, %v10554_v10  ;;  %v2718_v16 = vmul.f32 %v9724_v48, %v13286_v53  ;;  %v7290_v53 = vld [vmem:[%s9637_s15 + $0x278] sm:$0xff] }
 0x258   : > { %13284 = vst [vmem:[#allocation68_spill] sm:$0xff] %v10563_v43  ;;  %13285 = vst [vmem:[#allocation48_spill] sm:$0xff] %v10567_v19  ;;  %v3038_v61 = vmul.f32 %v7288_v31, %v2909_v4  ;;  %v4416_v38 = vmul.f32 %v10563_v43, %v10563_v43  ;;  %v4417_v39 = vmul.f32 %v10567_v19, %v10567_v19 }
 0x259   : > { %v2719_v50 = vmul.f32 %v9778_v21, %v9662_v1  ;;  %v4184_v51 = vadd.f32 %v4183_v32, %v4176_v27  ;;  %v3101_v11 = vadd.f32 %v3037_v7, %v2844_v29  ;;  %v2846_v10 = vmul.f32 %v2782_v63, %v2718_v16  ;;  %v10589_v31 = vpop.eup %8004  ;;  %v2812_v63 = vld [vmem:[%s9637_s15 + $0x160] sm:$0xff]  ;;  %v13293_v7 = vld [vmem:[#allocation59_spill] sm:$0xff] }
 0x25a   : > { %v2910_v59 = vmul.f32 %v9724_v48, %v13287_v49  ;;  %v3102_v4 = vadd.f32 %v3038_v61, %v2845_v0  ;;  %v4424_v43 = vadd.f32 %v4417_v39, %v4416_v38  ;;  %v2911_v19 = vmul.f32 %v9778_v21, %v13288_v8  ;;  %v13294_v16 = vld [vmem:[#allocation23_spill] sm:$0xff]  ;;  %v2813_v8 = vld [vmem:[%s9637_s15 + $0x168] sm:$0xff]  ;;  %v13296_v38 = vld [vmem:[#allocation114_spill] sm:$0xff] }
 0x25b   : > { %v2847_v55 = vmul.f32 %v2783_v23, %v2719_v50  ;;  %v4185_v22 = vadd.f32 %v4184_v51, %v4177_v58  ;;  %v10594_v1 = vmul.f32 %v9693_v30, %v3101_v11  ;;  %v10597_v29 = vmul.f32 %v13074_v44, %v3101_v11  ;;  %v7319_v49 = vld [vmem:[%s9637_s15 + $0x360] sm:$0xff] }
 0x25c   : > { %v3039_v32 = vmul.f32 %v7289_v56, %v2910_v59  ;;  %v10601_v48 = vmul.f32 %v9732_v26, %v3102_v4  ;;  %v3040_v27 = vmul.f32 %v7290_v53, %v2911_v19  ;;  %v10604_v0 = vmul.f32 %v9686_v45, %v3102_v4  ;;  %v10609_v58 = vpop.eup %8006  ;;  %v13295_v19 = vld [vmem:[#allocation108_spill] sm:$0xff] }
 0x25d   : > { %13289 = vst [vmem:[#allocation105_spill] sm:$0xff] %v10594_v1  ;;  %13290 = vst [vmem:[#allocation18_spill] sm:$0xff] %v10597_v29  ;;  %v2748_v21 = vmul.f32 %v13294_v16, %v13293_v7  ;;  %4186 = vadd.xlane.f32.xlu1 %v4185_v22  ;;  %v4418_v11 = vmul.f32 %v10594_v1, %v10594_v1  ;;  %v4662_v61 = vmul.f32 %v10597_v29, %v10597_v29  ;;  %v13298_v4 = vld [vmem:[#allocation40_spill] sm:$0xff]  ;;  %v7320_v7 = vld [vmem:[%s9637_s15 + $0x368] sm:$0xff] }
 0x25e   : > { %13291 = vst [vmem:[#allocation42_spill] sm:$0xff] %v10601_v48  ;;  %13292 = vst [vmem:[#allocation127_spill] sm:$0xff] %v10604_v0  ;;  %v10613_v23 = vadd.f32 %v3039_v32, %v2846_v10  ;;  %v2749_v39 = vmul.f32 %v13296_v38, %v13295_v19  ;;  %v4419_v50 = vmul.f32 %v10601_v48, %v10601_v48 }
 0x25f   : > { %v10621_v56 = vadd.f32 %v3040_v27, %v2847_v55  ;;  %v4663_v51 = vmul.f32 %v10604_v0, %v10604_v0  ;;  %v2876_v22 = vmul.f32 %v2812_v63, %v2748_v21  ;;  %v4425_v59 = vadd.f32 %v4424_v43, %v4418_v11  ;;  %v10633_v19 = vpop.eup %8008  ;;  %v13301_v27 = vld [vmem:[#allocation109_spill] sm:$0xff] }
 0x260   : > { %v10628_v10 = vmul.f32 %v9693_v30, %v10613_v23  ;;  %v2877_v53 = vmul.f32 %v2813_v8, %v2749_v39  ;;  %v2940_v32 = vmul.f32 %v13294_v16, %v13298_v4  ;;  %13299 = vst [vmem:[#allocation23_spill] sm:$0xff] %v10633_v19  ;;  %v2941_v43 = vmul.f32 %v13296_v38, %v13301_v27  ;;  %v2814_v4 = vld [vmem:[%s9637_s15 + $0x170] sm:$0xff]  ;;  %v13305_v27 = vld [vmem:[#allocation79_spill] sm:$0xff] }
 0x261   : > { %v10637_v55 = vmul.f32 %v9732_v26, %v10621_v56  ;;  %v4670_v63 = vadd.f32 %v4663_v51, %v4662_v61  ;;  %v10643_v21 = vmul.f32 %v13074_v44, %v10539_v46  ;;  %v4426_v8 = vadd.f32 %v4425_v59, %v4419_v50  ;;  %v13304_v51 = vld [vmem:[#allocation43_spill] sm:$0xff] }
 0x262   : > { %13297 = vst [vmem:[#allocation59_spill] sm:$0xff] %v10628_v10  ;;  %v4664_v16 = vmul.f32 %v10628_v10, %v10628_v10  ;;  %v3069_v11 = vmul.f32 %v7319_v49, %v2940_v32  ;;  %v10649_v39 = vmul.f32 %v9686_v45, %v10541_v18  ;;  %v3070_v38 = vmul.f32 %v7320_v7, %v2941_v43  ;;  %v2815_v59 = vld [vmem:[%s9637_s15 + $0x178] sm:$0xff]  ;;  %v13307_v32 = vld [vmem:[#allocation61_spill] sm:$0xff] }
 0x263   : > { %13300 = vst [vmem:[#allocation108_spill] sm:$0xff] %v10637_v55  ;;  %13302 = vst [vmem:[#allocation114_spill] sm:$0xff] %v10643_v21  ;;  %v4665_v61 = vmul.f32 %v10637_v55, %v10637_v55  ;;  %v4420_v46 = vmul.f32 %v10643_v21, %v10643_v21  ;;  %v2750_v50 = vmul.f32 %v13305_v27, %v13304_v51  ;;  %4427 = vadd.xlane.f32.xlu0 %v4426_v8  ;;  %v13306_v18 = vld [vmem:[#allocation19_spill] sm:$0xff]  ;;  %v7321_v55 = vld [vmem:[%s9637_s15 + $0x370] sm:$0xff] }
 0x264   : > { %13303 = vst [vmem:[#allocation40_spill] sm:$0xff] %v10649_v39  ;;  %v4671_v0 = vadd.f32 %v4670_v63, %v4664_v16  ;;  %v3133_v10 = vadd.f32 %v3069_v11, %v2876_v22  ;;  %v4421_v49 = vmul.f32 %v10649_v39, %v10649_v39  ;;  %v2751_v29 = vmul.f32 %v13307_v32, %v13306_v18  ;;  %v7322_v7 = vld [vmem:[%s9637_s15 + $0x378] sm:$0xff]  ;;  %v13308_v21 = vld [vmem:[#allocation36_spill] sm:$0xff] }
 0x265   : > { %v3134_v43 = vadd.f32 %v3070_v38, %v2877_v53  ;;  %v2878_v48 = vmul.f32 %v2814_v4, %v2750_v50  ;;  %v2942_v1 = vmul.f32 %v13305_v27, %v13308_v21  ;;  %v13309_v51 = vld [vmem:[#allocation20_spill] sm:$0xff]  ;;  %v2785_v21 = vld [vmem:[%s9637_s15 + $0x88] sm:$0xff] }
 0x266   : > { %v2943_v8 = vmul.f32 %v13307_v32, %v13309_v51  ;;  %v4672_v63 = vadd.f32 %v4671_v0, %v4665_v61  ;;  %v10670_v22 = vmul.f32 %v9693_v30, %v3133_v10  ;;  %v4429_v16 = vadd.f32 %v4421_v49, %v4420_v46  ;;  %v2784_v4 = vld [vmem:[%s9637_s15 + $0x80] sm:$0xff]  ;;  %v13314_v38 = vld [vmem:[#allocation45_spill] sm:$0xff] }
 0x267   : > { %v2879_v11 = vmul.f32 %v2815_v59, %v2751_v29  ;;  %v10673_v39 = vmul.f32 %v9732_v26, %v3134_v43  ;;  %v3071_v18 = vmul.f32 %v7321_v55, %v2942_v1  ;;  %v10676_v53 = vmul.f32 %v13074_v44, %v3133_v10  ;;  %v13313_v29 = vld [vmem:[#allocation111_spill] sm:$0xff]  ;;  %v13315_v27 = vld [vmem:[#allocation24_spill] sm:$0xff] }
 0x268   : > { %v3072_v19 = vmul.f32 %v7322_v7, %v2943_v8  ;;  %4673 = vadd.xlane.f32.xlu0 %v4672_v63  ;;  %v4422_v0 = vmul.f32 %v10670_v22, %v10670_v22  ;;  %v10683_v61 = vmul.f32 %v9686_v45, %v3134_v43  ;;  %v2720_v46 = vmul.f32 %v13314_v38, %v13313_v29  ;;  %v7291_v51 = vld [vmem:[%s9637_s15 + $0x280] sm:$0xff]  ;;  %v7292_v8 = vld [vmem:[%s9637_s15 + $0x288] sm:$0xff] }
 0x269   : > { %13310 = vst [vmem:[#allocation109_spill] sm:$0xff] %v10673_v39  ;;  %13311 = vst [vmem:[#allocation43_spill] sm:$0xff] %v10676_v53  ;;  %v2721_v1 = vmul.f32 %v9939_v41, %v13315_v27  ;;  %v4423_v10 = vmul.f32 %v10673_v39, %v10673_v39  ;;  %v10691_v55 = vadd.f32 %v3071_v18, %v2878_v48 }
 0x26a   : > { %13312 = vst [vmem:[#allocation79_spill] sm:$0xff] %v10683_v61  ;;  %v10693_v50 = vadd.f32 %v3072_v19, %v2879_v11  ;;  %v4666_v59 = vmul.f32 %v10676_v53, %v10676_v53  ;;  %v4430_v49 = vadd.f32 %v4429_v16, %v4422_v0  ;;  %v4667_v32 = vmul.f32 %v10683_v61, %v10683_v61  ;;  %v13318_v19 = vld [vmem:[#allocation112_spill] sm:$0xff]  ;;  %v13319_v11 = vld [vmem:[#allocation113_spill] sm:$0xff] }
 0x26b   : > { %v2848_v7 = vmul.f32 %v2784_v4, %v2720_v46  ;;  %v2849_v43 = vmul.f32 %v2785_v21, %v2721_v1  ;;  %v10703_v63 = vmul.f32 %v9693_v30, %v10691_v55  ;;  %v2912_v16 = vmul.f32 %v13314_v38, %v13318_v19  ;;  %v2786_v1 = vld [vmem:[%s9637_s15 + $0x90] sm:$0xff] }
 0x26c   : > { %v10707_v48 = vmul.f32 %v9732_v26, %v10693_v50  ;;  %v2913_v18 = vmul.f32 %v9939_v41, %v13319_v11  ;;  %v4431_v4 = vadd.f32 %v4430_v49, %v4423_v10  ;;  %v4675_v21 = vadd.f32 %v4667_v32, %v4666_v59  ;;  %v2787_v10 = vld [vmem:[%s9637_s15 + $0x98] sm:$0xff]  ;;  %v13323_v32 = vld [vmem:[#allocation26_spill] sm:$0xff] }
 0x26d   : > { %13316 = vst [vmem:[#allocation19_spill] sm:$0xff] %v10703_v63  ;;  %v10715_v0 = vmul.f32 %v13074_v44, %v10613_v23  ;;  %v10719_v29 = vmul.f32 %v9686_v45, %v10621_v56  ;;  %v4668_v46 = vmul.f32 %v10703_v63, %v10703_v63  ;;  %v3041_v27 = vmul.f32 %v7291_v51, %v2912_v16  ;;  %v13322_v56 = vld [vmem:[#allocation22_spill] sm:$0xff]  ;;  %v13324_v16 = vld [vmem:[#allocation25_spill] sm:$0xff] }
 0x26e   : > { %13317 = vst [vmem:[#allocation61_spill] sm:$0xff] %v10707_v48  ;;  %v4669_v38 = vmul.f32 %v10707_v48, %v10707_v48  ;;  %v3042_v41 = vmul.f32 %v7292_v8, %v2913_v18  ;;  %4432 = vadd.xlane.f32.xlu1 %v4431_v4  ;;  %v2722_v49 = vmul.f32 %v9915_v24, %v13322_v56  ;;  %v7293_v11 = vld [vmem:[%s9637_s15 + $0x290] sm:$0xff]  ;;  %v7294_v4 = vld [vmem:[%s9637_s15 + $0x298] sm:$0xff] }
 0x26f   : > { %13320 = vst [vmem:[#allocation36_spill] sm:$0xff] %v10715_v0  ;;  %13321 = vst [vmem:[#allocation20_spill] sm:$0xff] %v10719_v29  ;;  %v4908_v23 = vmul.f32 %v10715_v0, %v10715_v0  ;;  %v4909_v59 = vmul.f32 %v10719_v29, %v10719_v29  ;;  %v2723_v19 = vmul.f32 %v9971_v33, %v13323_v32  ;;  %v13325_v29 = vld [vmem:[#allocation44_spill] sm:$0xff] }
 0x270   : > { %v4676_v48 = vadd.f32 %v4675_v21, %v4668_v46  ;;  %v3105_v51 = vadd.f32 %v3041_v27, %v2848_v7  ;;  %v3106_v8 = vadd.f32 %v3042_v41, %v2849_v43  ;;  %v2914_v18 = vmul.f32 %v9915_v24, %v13324_v16  ;;  %v2816_v43 = vld [vmem:[%s9637_s15 + $0x180] sm:$0xff]  ;;  %v13326_v27 = vld [vmem:[#allocation47_spill] sm:$0xff] }
 0x271   : > { %v4916_v0 = vadd.f32 %v4909_v59, %v4908_v23  ;;  %v2850_v63 = vmul.f32 %v2786_v1, %v2722_v49  ;;  %v2851_v61 = vmul.f32 %v2787_v10, %v2723_v19  ;;  %v2915_v53 = vmul.f32 %v9971_v33, %v13325_v29  ;;  %v7323_v49 = vld [vmem:[%s9637_s15 + $0x380] sm:$0xff] }
 0x272   : > { %v4677_v56 = vadd.f32 %v4676_v48, %v4669_v38  ;;  %v10742_v39 = vmul.f32 %v9693_v30, %v3105_v51  ;;  %v10745_v32 = vmul.f32 %v9732_v26, %v3106_v8  ;;  %v3043_v7 = vmul.f32 %v7293_v11, %v2914_v18  ;;  %v2817_v48 = vld [vmem:[%s9637_s15 + $0x188] sm:$0xff]  ;;  %v13328_v18 = vld [vmem:[#allocation46_spill] sm:$0xff] }
 0x273   : > { %v3044_v21 = vmul.f32 %v7294_v4, %v2915_v53  ;;  %v10749_v24 = vmul.f32 %v13074_v44, %v3105_v51  ;;  %v10752_v46 = vmul.f32 %v9686_v45, %v3106_v8  ;;  %v2752_v33 = vmul.f32 %v9989_v3, %v13326_v27  ;;  %v13327_v51 = vld [vmem:[#allocation66_spill] sm:$0xff] }
 0x274   : > { %4678 = vadd.xlane.f32.xlu1 %v4677_v56  ;;  %v4910_v29 = vmul.f32 %v10742_v39, %v10742_v39  ;;  %v4911_v38 = vmul.f32 %v10745_v32, %v10745_v32  ;;  %v10761_v41 = vadd.f32 %v3043_v7, %v2850_v63  ;;  %v2753_v53 = vmul.f32 %v10037_v47, %v9922_v12 }
 0x275   : > { %v10765_v1 = vadd.f32 %v3044_v21, %v2851_v61  ;;  %v5154_v10 = vmul.f32 %v10749_v24, %v10749_v24  ;;  %v5155_v23 = vmul.f32 %v10752_v46, %v10752_v46  ;;  %v2880_v59 = vmul.f32 %v2816_v43, %v2752_v33  ;;  %v7324_v61 = vld [vmem:[%s9637_s15 + $0x388] sm:$0xff]  ;;  %v2818_v21 = vld [vmem:[%s9637_s15 + $0x190] sm:$0xff]  ;;  %v13331_v33 = vld [vmem:[#allocation64_spill] sm:$0xff] }
 0x276   : > { %v4917_v19 = vadd.f32 %v4916_v0, %v4910_v29  ;;  %v10774_v11 = vmul.f32 %v9693_v30, %v10761_v41  ;;  %v2881_v63 = vmul.f32 %v2817_v48, %v2753_v53  ;;  %v2944_v12 = vmul.f32 %v9989_v3, %v13327_v51  ;;  %v13332_v48 = vld [vmem:[#allocation115_spill] sm:$0xff] }
 0x277   : > { %v10781_v8 = vmul.f32 %v9732_v26, %v10765_v1  ;;  %v5162_v16 = vadd.f32 %v5155_v23, %v5154_v10  ;;  %v2945_v4 = vmul.f32 %v10037_v47, %v13328_v18  ;;  %v10787_v0 = vmul.f32 %v13074_v44, %v10691_v55  ;;  %v7326_v51 = vld [vmem:[%s9637_s15 + $0x398] sm:$0xff]  ;;  %v13334_v18 = vld [vmem:[#allocation49_spill] sm:$0xff] }
 0x278   : > { %v4918_v56 = vadd.f32 %v4917_v19, %v4911_v38  ;;  %v5156_v7 = vmul.f32 %v10774_v11, %v10774_v11  ;;  %v3073_v3 = vmul.f32 %v7323_v49, %v2944_v12  ;;  %v10793_v43 = vmul.f32 %v9686_v45, %v10693_v50  ;;  %v2819_v38 = vld [vmem:[%s9637_s15 + $0x198] sm:$0xff]  ;;  %v13333_v50 = vld [vmem:[#allocation57_spill] sm:$0xff]  ;;  %v7325_v19 = vld [vmem:[%s9637_s15 + $0x390] sm:$0xff] }
 0x279   : > { %13329 = vst [vmem:[#allocation111_spill] sm:$0xff] %v10787_v0  ;;  %v5157_v27 = vmul.f32 %v10781_v8, %v10781_v8  ;;  %v3074_v47 = vmul.f32 %v7324_v61, %v2945_v4  ;;  %v4912_v55 = vmul.f32 %v10787_v0, %v10787_v0  ;;  %v2754_v29 = vmul.f32 %v13332_v48, %v13331_v33  ;;  %v13335_v33 = vld [vmem:[#allocation77_spill] sm:$0xff] }
 0x27a   : > { %13330 = vst [vmem:[#allocation45_spill] sm:$0xff] %v10793_v43  ;;  %4919 = vadd.xlane.f32.xlu0 %v4918_v56  ;;  %v5163_v53 = vadd.f32 %v5162_v16, %v5156_v7  ;;  %v3137_v10 = vadd.f32 %v3073_v3, %v2880_v59  ;;  %v4913_v23 = vmul.f32 %v10793_v43, %v10793_v43 }
 0x27b   : > { %v2755_v49 = vmul.f32 %v10057_v9, %v13333_v50  ;;  %v3138_v12 = vadd.f32 %v3074_v47, %v2881_v63  ;;  %v2882_v61 = vmul.f32 %v2818_v21, %v2754_v29  ;;  %v2946_v4 = vmul.f32 %v13332_v48, %v13334_v18  ;;  %v2788_v21 = vld [vmem:[%s9637_s15 + $0xa0] sm:$0xff]  ;;  %v2789_v47 = vld [vmem:[%s9637_s15 + $0xa8] sm:$0xff] }
 0x27c   : > { %v2947_v56 = vmul.f32 %v10057_v9, %v13335_v33  ;;  %v5164_v16 = vadd.f32 %v5163_v53, %v5157_v27  ;;  %v10814_v59 = vmul.f32 %v9693_v30, %v3137_v10  ;;  %v4921_v7 = vadd.f32 %v4913_v23, %v4912_v55  ;;  %v13338_v55 = vld [vmem:[#allocation60_spill] sm:$0xff] }
 0x27d   : > { %v2883_v3 = vmul.f32 %v2819_v38, %v2755_v49  ;;  %v10817_v43 = vmul.f32 %v9732_v26, %v3138_v12  ;;  %v3075_v50 = vmul.f32 %v7325_v19, %v2946_v4  ;;  %v10820_v63 = vmul.f32 %v13074_v44, %v3137_v10  ;;  %v7295_v18 = vld [vmem:[%s9637_s15 + $0x2a0] sm:$0xff] }
 0x27e   : > { %v3076_v0 = vmul.f32 %v7326_v51, %v2947_v56  ;;  %5165 = vadd.xlane.f32.xlu0 %v5164_v16  ;;  %v4914_v9 = vmul.f32 %v10814_v59, %v10814_v59  ;;  %v10827_v27 = vmul.f32 %v9686_v45, %v3138_v12  ;;  %v2724_v48 = vmul.f32 %v10079_v5, %v13338_v55  ;;  %v13342_v56 = vld [vmem:[#allocation41_spill] sm:$0xff]  ;;  %v2790_v55 = vld [vmem:[%s9637_s15 + $0xb0] sm:$0xff] }
 0x27f   : > { %13336 = vst [vmem:[#allocation24_spill] sm:$0xff] %v10820_v63  ;;  %v2725_v29 = vmul.f32 %v10131_v15, %v10021_v60  ;;  %v4915_v38 = vmul.f32 %v10817_v43, %v10817_v43  ;;  %v10835_v53 = vadd.f32 %v3075_v50, %v2882_v61  ;;  %v5158_v23 = vmul.f32 %v10820_v63, %v10820_v63  ;;  %v7296_v60 = vld [vmem:[%s9637_s15 + $0x2a8] sm:$0xff]  ;;  %v13341_v61 = vld [vmem:[#allocation103_spill] sm:$0xff] }
 0x280   : > { %13337 = vst [vmem:[#allocation112_spill] sm:$0xff] %v10827_v27  ;;  %v10837_v10 = vadd.f32 %v3076_v0, %v2883_v3  ;;  %v4922_v49 = vadd.f32 %v4921_v7, %v4914_v9  ;;  %v5159_v19 = vmul.f32 %v10827_v27, %v10827_v27  ;;  %v2852_v51 = vmul.f32 %v2788_v21, %v2724_v48  ;;  %v2791_v48 = vld [vmem:[%s9637_s15 + $0xb8] sm:$0xff] }
 0x281   : > { %v2853_v12 = vmul.f32 %v2789_v47, %v2725_v29  ;;  %v10847_v4 = vmul.f32 %v9693_v30, %v10835_v53  ;;  %v2916_v33 = vmul.f32 %v10079_v5, %v13341_v61  ;;  %v2917_v16 = vmul.f32 %v10131_v15, %v13342_v56  ;;  %v7297_v61 = vld [vmem:[%s9637_s15 + $0x2b0] sm:$0xff] }
 0x282   : > { %v10851_v0 = vmul.f32 %v9732_v26, %v10837_v10  ;;  %v4923_v7 = vadd.f32 %v4922_v49, %v4915_v38  ;;  %v5167_v3 = vadd.f32 %v5159_v19, %v5158_v23  ;;  %v10859_v50 = vmul.f32 %v13074_v44, %v10761_v41  ;;  %v13346_v38 = vld [vmem:[#allocation27_spill] sm:$0xff]  ;;  %v13347_v49 = vld [vmem:[#allocation54_spill] sm:$0xff] }
 0x283   : > { %13339 = vst [vmem:[#allocation113_spill] sm:$0xff] %v10847_v4  ;;  %v10863_v21 = vmul.f32 %v9686_v45, %v10765_v1  ;;  %v5160_v47 = vmul.f32 %v10847_v4, %v10847_v4  ;;  %v3045_v9 = vmul.f32 %v7295_v18, %v2916_v33  ;;  %v3046_v15 = vmul.f32 %v7296_v60, %v2917_v16  ;;  %v13345_v1 = vld [vmem:[#allocation104_spill] sm:$0xff]  ;;  %v13348_v33 = vld [vmem:[#allocation29_spill] sm:$0xff] }
 0x284   : > { %13340 = vst [vmem:[#allocation22_spill] sm:$0xff] %v10851_v0  ;;  %13343 = vst [vmem:[#allocation26_spill] sm:$0xff] %v10859_v50  ;;  %v5161_v5 = vmul.f32 %v10851_v0, %v10851_v0  ;;  %4924 = vadd.xlane.f32.xlu1 %v4923_v7  ;;  %v5400_v41 = vmul.f32 %v10859_v50, %v10859_v50  ;;  %v2726_v23 = vmul.f32 %v13346_v38, %v13345_v1  ;;  %v7298_v7 = vld [vmem:[%s9637_s15 + $0x2b8] sm:$0xff] }
 0x285   : > { %13344 = vst [vmem:[#allocation25_spill] sm:$0xff] %v10863_v21  ;;  %v5401_v29 = vmul.f32 %v10863_v21, %v10863_v21  ;;  %v2727_v19 = vmul.f32 %v10153_v40, %v13347_v49  ;;  %v5168_v56 = vadd.f32 %v5167_v3, %v5160_v47  ;;  %v3109_v18 = vadd.f32 %v3045_v9, %v2852_v51  ;;  %v13349_v21 = vld [vmem:[#allocation62_spill] sm:$0xff] }
 0x286   : > { %v3110_v60 = vadd.f32 %v3046_v15, %v2853_v12  ;;  %v2918_v16 = vmul.f32 %v13346_v38, %v13348_v33  ;;  %v2854_v0 = vmul.f32 %v2790_v55, %v2726_v23  ;;  %v2919_v27 = vmul.f32 %v10153_v40, %v13349_v21  ;;  %v2820_v12 = vld [vmem:[%s9637_s15 + $0x1a0] sm:$0xff]  ;;  %v2821_v21 = vld [vmem:[%s9637_s15 + $0x1a8] sm:$0xff] }
 0x287   : > { %v5408_v50 = vadd.f32 %v5401_v29, %v5400_v41  ;;  %v2855_v4 = vmul.f32 %v2791_v48, %v2727_v19  ;;  %v5169_v1 = vadd.f32 %v5168_v56, %v5161_v5  ;;  %v10886_v63 = vmul.f32 %v9693_v30, %v3109_v18  ;;  %v13350_v15 = vld [vmem:[#allocation72_spill] sm:$0xff] }
 0x288   : > { %v10889_v49 = vmul.f32 %v9732_v26, %v3110_v60  ;;  %v3047_v51 = vmul.f32 %v7297_v61, %v2918_v16  ;;  %v3048_v3 = vmul.f32 %v7298_v7, %v2919_v27  ;;  %v10893_v47 = vmul.f32 %v13074_v44, %v3109_v18  ;;  %v7327_v19 = vld [vmem:[%s9637_s15 + $0x3a0] sm:$0xff]  ;;  %v13351_v18 = vld [vmem:[#allocation95_spill] sm:$0xff] }
 0x289   : > { %v10896_v9 = vmul.f32 %v9686_v45, %v3110_v60  ;;  %v2756_v40 = vmul.f32 %v10179_v2, %v13350_v15  ;;  %5170 = vadd.xlane.f32.xlu1 %v5169_v1  ;;  %v5402_v5 = vmul.f32 %v10886_v63, %v10886_v63  ;;  %v2757_v27 = vmul.f32 %v10223_v14, %v10115_v34  ;;  %v13353_v16 = vld [vmem:[#allocation88_spill] sm:$0xff] }
 0x28a   : > { %v5403_v55 = vmul.f32 %v10889_v49, %v10889_v49  ;;  %v10905_v48 = vadd.f32 %v3047_v51, %v2854_v0  ;;  %v10909_v41 = vadd.f32 %v3048_v3, %v2855_v4  ;;  %v5646_v29 = vmul.f32 %v10893_v47, %v10893_v47  ;;  %v7328_v4 = vld [vmem:[%s9637_s15 + $0x3a8] sm:$0xff]  ;;  %v2822_v3 = vld [vmem:[%s9637_s15 + $0x1b0] sm:$0xff] }
 0x28b   : > { %v5647_v38 = vmul.f32 %v10896_v9, %v10896_v9  ;;  %v2884_v23 = vmul.f32 %v2820_v12, %v2756_v40  ;;  %v5409_v61 = vadd.f32 %v5408_v50, %v5402_v5  ;;  %v2885_v0 = vmul.f32 %v2821_v21, %v2757_v27  ;;  %v13356_v40 = vld [vmem:[#allocation51_spill] sm:$0xff]  ;;  %v13357_v21 = vld [vmem:[#allocation30_spill] sm:$0xff] }
 0x28c   : > { %v10918_v56 = vmul.f32 %v9693_v30, %v10905_v48  ;;  %v2948_v34 = vmul.f32 %v10179_v2, %v13351_v18  ;;  %v10925_v60 = vmul.f32 %v9732_v26, %v10909_v41  ;;  %v2949_v7 = vmul.f32 %v10223_v14, %v13353_v16  ;;  %v7329_v18 = vld [vmem:[%s9637_s15 + $0x3b0] sm:$0xff] }
 0x28d   : > { %v5654_v33 = vadd.f32 %v5647_v38, %v5646_v29  ;;  %v10931_v50 = vmul.f32 %v13074_v44, %v10835_v53  ;;  %v5410_v1 = vadd.f32 %v5409_v61, %v5403_v55  ;;  %v10937_v12 = vmul.f32 %v9686_v45, %v10837_v10  ;;  %v2823_v55 = vld [vmem:[%s9637_s15 + $0x1b8] sm:$0xff] }
 0x28e   : > { %13352 = vst [vmem:[#allocation44_spill] sm:$0xff] %v10925_v60  ;;  %v5648_v51 = vmul.f32 %v10918_v56, %v10918_v56  ;;  %v3077_v2 = vmul.f32 %v7327_v19, %v2948_v34  ;;  %v5649_v15 = vmul.f32 %v10925_v60, %v10925_v60  ;;  %v3078_v14 = vmul.f32 %v7328_v4, %v2949_v7  ;;  %v13358_v10 = vld [vmem:[#allocation31_spill] sm:$0xff]  ;;  %v13359_v19 = vld [vmem:[#allocation94_spill] sm:$0xff]  ;;  %v13360_v7 = vld [vmem:[#allocation84_spill] sm:$0xff] }
 0x28f   : > { %13354 = vst [vmem:[#allocation47_spill] sm:$0xff] %v10931_v50  ;;  %13355 = vst [vmem:[#allocation66_spill] sm:$0xff] %v10937_v12  ;;  %v5404_v53 = vmul.f32 %v10931_v50, %v10931_v50  ;;  %v2758_v5 = vmul.f32 %v13357_v21, %v13356_v40  ;;  %5411 = vadd.xlane.f32.xlu0 %v5410_v1  ;;  %v5405_v38 = vmul.f32 %v10937_v12, %v10937_v12  ;;  %v7330_v34 = vld [vmem:[%s9637_s15 + $0x3b8] sm:$0xff]  ;;  %v13361_v40 = vld [vmem:[#allocation4_spill] sm:$0xff] }
 0x290   : > { %v5655_v27 = vadd.f32 %v5654_v33, %v5648_v51  ;;  %v3141_v29 = vadd.f32 %v3077_v2, %v2884_v23  ;;  %v2759_v61 = vmul.f32 %v13359_v19, %v13358_v10  ;;  %v3142_v4 = vadd.f32 %v3078_v14, %v2885_v0  ;;  %v2793_v14 = vld [vmem:[%s9637_s15 + $0xc8] sm:$0xff] }
 0x291   : > { %v2886_v16 = vmul.f32 %v2822_v3, %v2758_v5  ;;  %v2950_v50 = vmul.f32 %v13357_v21, %v13360_v7  ;;  %v2951_v1 = vmul.f32 %v13359_v19, %v13361_v40  ;;  %v5413_v51 = vadd.f32 %v5405_v38, %v5404_v53  ;;  %v2792_v3 = vld [vmem:[%s9637_s15 + $0xc0] sm:$0xff]  ;;  %v7300_v40 = vld [vmem:[%s9637_s15 + $0x2c8] sm:$0xff] }
 0x292   : > { %v5656_v33 = vadd.f32 %v5655_v27, %v5649_v15  ;;  %v10958_v23 = vmul.f32 %v9693_v30, %v3141_v29  ;;  %v2887_v2 = vmul.f32 %v2823_v55, %v2759_v61  ;;  %v10961_v12 = vmul.f32 %v9732_v26, %v3142_v4  ;;  %v13364_v53 = vld [vmem:[#allocation28_spill] sm:$0xff]  ;;  %v13365_v55 = vld [vmem:[#allocation91_spill] sm:$0xff] }
 0x293   : > { %v3079_v10 = vmul.f32 %v7329_v18, %v2950_v50  ;;  %v3080_v60 = vmul.f32 %v7330_v34, %v2951_v1  ;;  %v10964_v0 = vmul.f32 %v13074_v44, %v3141_v29  ;;  %v10971_v21 = vmul.f32 %v9686_v45, %v3142_v4  ;;  %v7299_v7 = vld [vmem:[%s9637_s15 + $0x2c0] sm:$0xff] }
 0x294   : > { %5657 = vadd.xlane.f32.xlu0 %v5656_v33  ;;  %v5406_v15 = vmul.f32 %v10958_v23, %v10958_v23  ;;  %v2728_v5 = vmul.f32 %v10299_v25, %v13364_v53  ;;  %v2729_v50 = vmul.f32 %v10326_v36, %v13365_v55  ;;  %v5407_v27 = vmul.f32 %v10961_v12, %v10961_v12  ;;  %v2794_v55 = vld [vmem:[%s9637_s15 + $0xd0] sm:$0xff] }
 0x295   : > { %13362 = vst [vmem:[#allocation46_spill] sm:$0xff] %v10964_v0  ;;  %13363 = vst [vmem:[#allocation64_spill] sm:$0xff] %v10971_v21  ;;  %v10979_v29 = vadd.f32 %v3079_v10, %v2886_v16  ;;  %v10981_v38 = vadd.f32 %v3080_v60, %v2887_v2  ;;  %v5650_v19 = vmul.f32 %v10964_v0, %v10964_v0  ;;  %v13368_v16 = vld [vmem:[#allocation89_spill] sm:$0xff] }
 0x296   : > { %v5414_v61 = vadd.f32 %v5413_v51, %v5406_v15  ;;  %v5651_v18 = vmul.f32 %v10971_v21, %v10971_v21  ;;  %v2856_v34 = vmul.f32 %v2792_v3, %v2728_v5  ;;  %v2857_v4 = vmul.f32 %v2793_v14, %v2729_v50  ;;  %v13369_v51 = vld [vmem:[#allocation33_spill] sm:$0xff]  ;;  %v2795_v50 = vld [vmem:[%s9637_s15 + $0xd8] sm:$0xff] }
 0x297   : > { %v10991_v1 = vmul.f32 %v9693_v30, %v10979_v29  ;;  %v10995_v60 = vmul.f32 %v9732_v26, %v10981_v38  ;;  %v2920_v33 = vmul.f32 %v10299_v25, %v13368_v16  ;;  %v2921_v2 = vmul.f32 %v10326_v36, %v13369_v51  ;;  %v7301_v16 = vld [vmem:[%s9637_s15 + $0x2d0] sm:$0xff] }
 0x298   : > { %v5415_v10 = vadd.f32 %v5414_v61, %v5407_v27  ;;  %v5659_v3 = vadd.f32 %v5651_v18, %v5650_v19  ;;  %v11003_v14 = vmul.f32 %v13074_v44, %v10905_v48  ;;  %v11007_v15 = vmul.f32 %v9686_v45, %v10909_v41  ;;  %v13372_v41 = vld [vmem:[#allocation98_spill] sm:$0xff]  ;;  %v13373_v61 = vld [vmem:[#allocation92_spill] sm:$0xff] }
 0x299   : > { %13366 = vst [vmem:[#allocation115_spill] sm:$0xff] %v10991_v1  ;;  %13367 = vst [vmem:[#allocation57_spill] sm:$0xff] %v10995_v60  ;;  %v5652_v53 = vmul.f32 %v10991_v1, %v10991_v1  ;;  %v5653_v25 = vmul.f32 %v10995_v60, %v10995_v60  ;;  %v3049_v5 = vmul.f32 %v7299_v7, %v2920_v33  ;;  %v13374_v33 = vld [vmem:[#allocation76_spill] sm:$0xff] }
 0x29a   : > { %13370 = vst [vmem:[#allocation49_spill] sm:$0xff] %v11003_v14  ;;  %13371 = vst [vmem:[#allocation77_spill] sm:$0xff] %v11007_v15  ;;  %v3050_v36 = vmul.f32 %v7300_v40, %v2921_v2  ;;  %5416 = vadd.xlane.f32.xlu1 %v5415_v10  ;;  %v5892_v48 = vmul.f32 %v11003_v14, %v11003_v14  ;;  %v5893_v27 = vmul.f32 %v11007_v15, %v11007_v15  ;;  %v7302_v10 = vld [vmem:[%s9637_s15 + $0x2d8] sm:$0xff]  ;;  %v13375_v15 = vld [vmem:[#allocation32_spill] sm:$0xff] }
 0x29b   : > { %v2730_v19 = vmul.f32 %v10273_v42, %v13372_v41  ;;  %v2731_v18 = vmul.f32 %v10351_v35, %v13373_v61  ;;  %v5660_v51 = vadd.f32 %v5659_v3, %v5652_v53  ;;  %v3113_v7 = vadd.f32 %v3049_v5, %v2856_v34 }
 0x29c   : > { %v3114_v40 = vadd.f32 %v3050_v36, %v2857_v4  ;;  %v2922_v2 = vmul.f32 %v10273_v42, %v13374_v33  ;;  %v5900_v14 = vadd.f32 %v5893_v27, %v5892_v48  ;;  %v2923_v21 = vmul.f32 %v10351_v35, %v13375_v15  ;;  %v2824_v4 = vld [vmem:[%s9637_s15 + $0x1c0] sm:$0xff]  ;;  %v2825_v15 = vld [vmem:[%s9637_s15 + $0x1c8] sm:$0xff] }
 0x29d   : > { %v2858_v60 = vmul.f32 %v2794_v55, %v2730_v19  ;;  %v2859_v1 = vmul.f32 %v2795_v50, %v2731_v18  ;;  %v5661_v41 = vadd.f32 %v5660_v51, %v5653_v25  ;;  %v11030_v0 = vmul.f32 %v9693_v30, %v3113_v7  ;;  %v7331_v27 = vld [vmem:[%s9637_s15 + $0x3c0] sm:$0xff] }
 0x29e   : > { %v11033_v61 = vmul.f32 %v9732_v26, %v3114_v40  ;;  %v3051_v34 = vmul.f32 %v7301_v16, %v2922_v2  ;;  %v3052_v3 = vmul.f32 %v7302_v10, %v2923_v21  ;;  %v11037_v42 = vmul.f32 %v13074_v44, %v3113_v7  ;;  %v13376_v16 = vld [vmem:[#allocation34_spill] sm:$0xff] }
 0x29f   : > { %v11040_v53 = vmul.f32 %v9686_v45, %v3114_v40  ;;  %v2760_v35 = vmul.f32 %v10372_v6, %v10257_v28  ;;  %5662 = vadd.xlane.f32.xlu1 %v5661_v41  ;;  %v5894_v25 = vmul.f32 %v11030_v0, %v11030_v0  ;;  %v2761_v21 = vmul.f32 %v10416_v54, %v10308_v20  ;;  %v13377_v40 = vld [vmem:[#allocation90_spill] sm:$0xff] }
 0x2a0   : > { %v5895_v5 = vmul.f32 %v11033_v61, %v11033_v61  ;;  %v11049_v36 = vadd.f32 %v3051_v34, %v2858_v60  ;;  %v11053_v55 = vadd.f32 %v3052_v3, %v2859_v1  ;;  %v6138_v50 = vmul.f32 %v11037_v42, %v11037_v42  ;;  %v7332_v1 = vld [vmem:[%s9637_s15 + $0x3c8] sm:$0xff]  ;;  %v2826_v34 = vld [vmem:[%s9637_s15 + $0x1d0] sm:$0xff] }
 0x2a1   : > { %v6139_v28 = vmul.f32 %v11040_v53, %v11040_v53  ;;  %v2888_v48 = vmul.f32 %v2824_v4, %v2760_v35  ;;  %v5901_v19 = vadd.f32 %v5900_v14, %v5894_v25  ;;  %v2889_v60 = vmul.f32 %v2825_v15, %v2761_v21  ;;  %v13378_v3 = vld [vmem:[#allocation78_spill] sm:$0xff]  ;;  %v2827_v15 = vld [vmem:[%s9637_s15 + $0x1d8] sm:$0xff] }
 0x2a2   : > { %v11062_v18 = vmul.f32 %v9693_v30, %v11049_v36  ;;  %v2952_v20 = vmul.f32 %v10372_v6, %v13376_v16  ;;  %v11069_v51 = vmul.f32 %v9732_v26, %v11053_v55  ;;  %v2953_v33 = vmul.f32 %v10416_v54, %v13377_v40  ;;  %v13381_v40 = vld [vmem:[#allocation96_spill] sm:$0xff] }
 0x2a3   : > { %v6146_v7 = vadd.f32 %v6139_v28, %v6138_v50  ;;  %v11075_v14 = vmul.f32 %v13074_v44, %v10979_v29  ;;  %v5902_v2 = vadd.f32 %v5901_v19, %v5895_v5  ;;  %v11081_v41 = vmul.f32 %v9686_v45, %v10981_v38  ;;  %v13379_v38 = vld [vmem:[#allocation99_spill] sm:$0xff]  ;;  %v7333_v28 = vld [vmem:[%s9637_s15 + $0x3d0] sm:$0xff] }
 0x2a4   : > { %v6140_v10 = vmul.f32 %v11062_v18, %v11062_v18  ;;  %v3081_v6 = vmul.f32 %v7331_v27, %v2952_v20  ;;  %v6141_v4 = vmul.f32 %v11069_v51, %v11069_v51  ;;  %v3082_v54 = vmul.f32 %v7332_v1, %v2953_v33  ;;  %v7334_v27 = vld [vmem:[%s9637_s15 + $0x3d8] sm:$0xff]  ;;  %v13380_v20 = vld [vmem:[#allocation56_spill] sm:$0xff] }
 0x2a5   : > { %v5896_v29 = vmul.f32 %v11075_v14, %v11075_v14  ;;  %v2762_v35 = vmul.f32 %v10395_v37, %v13378_v3  ;;  %5903 = vadd.xlane.f32.xlu0 %v5902_v2  ;;  %v5897_v21 = vmul.f32 %v11081_v41, %v11081_v41  ;;  %v2763_v50 = vmul.f32 %v10445_v62, %v13379_v38 }
 0x2a6   : > { %v6147_v25 = vadd.f32 %v6146_v7, %v6140_v10  ;;  %v3145_v5 = vadd.f32 %v3081_v6, %v2888_v48  ;;  %v3146_v19 = vadd.f32 %v3082_v54, %v2889_v60  ;;  %v2954_v1 = vmul.f32 %v10395_v37, %v13380_v20  ;;  %v2797_v37 = vld [vmem:[%s9637_s15 + $0xe8] sm:$0xff]  ;;  %v13385_v54 = vld [vmem:[#allocation7_spill] sm:$0xff] }
 0x2a7   : > { %v2890_v16 = vmul.f32 %v2826_v34, %v2762_v35  ;;  %v2955_v33 = vmul.f32 %v10445_v62, %v13381_v40  ;;  %v5905_v2 = vadd.f32 %v5897_v21, %v5896_v29  ;;  %v2891_v10 = vmul.f32 %v2827_v15, %v2763_v50  ;;  %v2796_v34 = vld [vmem:[%s9637_s15 + $0xe0] sm:$0xff]  ;;  %v7304_v40 = vld [vmem:[%s9637_s15 + $0x2e8] sm:$0xff] }
 0x2a8   : > { %v6148_v7 = vadd.f32 %v6147_v25, %v6141_v4  ;;  %v11102_v48 = vmul.f32 %v9693_v30, %v3145_v5  ;;  %v11105_v6 = vmul.f32 %v9732_v26, %v3146_v19  ;;  %v3083_v3 = vmul.f32 %v7333_v28, %v2954_v1  ;;  %v13386_v35 = vld [vmem:[#allocation8_spill] sm:$0xff] }
 0x2a9   : > { %v3084_v38 = vmul.f32 %v7334_v27, %v2955_v33  ;;  %v11108_v60 = vmul.f32 %v13074_v44, %v3145_v5  ;;  %v11115_v4 = vmul.f32 %v9686_v45, %v3146_v19  ;;  %v2732_v29 = vmul.f32 %v10491_v52, %v13385_v54  ;;  %v7303_v1 = vld [vmem:[%s9637_s15 + $0x2e0] sm:$0xff] }
 0x2aa   : > { %13382 = vst [vmem:[#allocation60_spill] sm:$0xff] %v11105_v6  ;;  %6149 = vadd.xlane.f32.xlu0 %v6148_v7  ;;  %v5898_v62 = vmul.f32 %v11102_v48, %v11102_v48  ;;  %v2733_v15 = vmul.f32 %v10543_v17, %v13386_v35  ;;  %v5899_v25 = vmul.f32 %v11105_v6, %v11105_v6  ;;  %v13389_v7 = vld [vmem:[#allocation55_spill] sm:$0xff]  ;;  %v2798_v35 = vld [vmem:[%s9637_s15 + $0xf0] sm:$0xff] }
 0x2ab   : > { %13383 = vst [vmem:[#allocation103_spill] sm:$0xff] %v11108_v60  ;;  %13384 = vst [vmem:[#allocation41_spill] sm:$0xff] %v11115_v4  ;;  %v11123_v5 = vadd.f32 %v3083_v3, %v2890_v16  ;;  %v11125_v21 = vadd.f32 %v3084_v38, %v2891_v10  ;;  %v6142_v50 = vmul.f32 %v11108_v60, %v11108_v60  ;;  %v13390_v10 = vld [vmem:[#allocation16_spill] sm:$0xff] }
 0x2ac   : > { %v5906_v28 = vadd.f32 %v5905_v2, %v5898_v62  ;;  %v6143_v27 = vmul.f32 %v11115_v4, %v11115_v4  ;;  %v2860_v19 = vmul.f32 %v2796_v34, %v2732_v29  ;;  %v2861_v20 = vmul.f32 %v2797_v37, %v2733_v15  ;;  %v2799_v15 = vld [vmem:[%s9637_s15 + $0xf8] sm:$0xff] }
 0x2ad   : > { %v11135_v33 = vmul.f32 %v9693_v30, %v11123_v5  ;;  %v11139_v16 = vmul.f32 %v9732_v26, %v11125_v21  ;;  %v2924_v2 = vmul.f32 %v10491_v52, %v13389_v7  ;;  %v2925_v3 = vmul.f32 %v10543_v17, %v13390_v10  ;;  %v7305_v10 = vld [vmem:[%s9637_s15 + $0x2f0] sm:$0xff] }
 0x2ae   : > { %v5907_v38 = vadd.f32 %v5906_v28, %v5899_v25  ;;  %v6151_v34 = vadd.f32 %v6143_v27, %v6142_v50  ;;  %v11147_v37 = vmul.f32 %v13074_v44, %v11049_v36  ;;  %v11151_v62 = vmul.f32 %v9686_v45, %v11053_v55  ;;  %v13393_v55 = vld [vmem:[#allocation97_spill] sm:$0xff]  ;;  %v13395_v27 = vld [vmem:[#allocation67_spill] sm:$0xff] }
 0x2af   : > { %13387 = vst [vmem:[#allocation104_spill] sm:$0xff] %v11135_v33  ;;  %13388 = vst [vmem:[#allocation27_spill] sm:$0xff] %v11139_v16  ;;  %v6144_v54 = vmul.f32 %v11135_v33, %v11135_v33  ;;  %v6145_v52 = vmul.f32 %v11139_v16, %v11139_v16  ;;  %v3053_v29 = vmul.f32 %v7303_v1, %v2924_v2  ;;  %v13394_v50 = vld [vmem:[#allocation121_spill] sm:$0xff]  ;;  %v13396_v2 = vld [vmem:[#allocation116_spill] sm:$0xff] }
 0x2b0   : > { %13391 = vst [vmem:[#allocation54_spill] sm:$0xff] %v11147_v37  ;;  %13392 = vst [vmem:[#allocation29_spill] sm:$0xff] %v11151_v62  ;;  %v3054_v17 = vmul.f32 %v7304_v40, %v2925_v3  ;;  %5908 = vadd.xlane.f32.xlu1 %v5907_v38  ;;  %v6384_v36 = vmul.f32 %v11147_v37, %v11147_v37  ;;  %v6385_v25 = vmul.f32 %v11151_v62, %v11151_v62  ;;  %v7306_v38 = vld [vmem:[%s9637_s15 + $0x2f8] sm:$0xff]  ;;  %v13397_v62 = vld [vmem:[#allocation9_spill] sm:$0xff] }
 0x2b1   : > { %v2734_v28 = vmul.f32 %v13394_v50, %v13393_v55  ;;  %v2735_v7 = vmul.f32 %v10519_v57, %v13395_v27  ;;  %v6152_v16 = vadd.f32 %v6151_v34, %v6144_v54  ;;  %v3117_v1 = vadd.f32 %v3053_v29, %v2860_v19 }
 0x2b2   : > { %v3118_v40 = vadd.f32 %v3054_v17, %v2861_v20  ;;  %v2926_v3 = vmul.f32 %v13394_v50, %v13396_v2  ;;  %v6392_v37 = vadd.f32 %v6385_v25, %v6384_v36  ;;  %v2927_v60 = vmul.f32 %v10519_v57, %v13397_v62  ;;  %v2828_v20 = vld [vmem:[%s9637_s15 + $0x1e0] sm:$0xff]  ;;  %v13398_v17 = vld [vmem:[#allocation119_spill] sm:$0xff]  ;;  %v13401_v2 = vld [vmem:[#allocation10_spill] sm:$0xff] }
 0x2b3   : > { %v2862_v33 = vmul.f32 %v2798_v35, %v2734_v28  ;;  %v2863_v4 = vmul.f32 %v2799_v15, %v2735_v7  ;;  %v6153_v55 = vadd.f32 %v6152_v16, %v6145_v52  ;;  %v11174_v6 = vmul.f32 %v9693_v30, %v3117_v1  ;;  %v2829_v16 = vld [vmem:[%s9637_s15 + $0x1e8] sm:$0xff]  ;;  %v7335_v7 = vld [vmem:[%s9637_s15 + $0x3e0] sm:$0xff] }
 0x2b4   : > { %v11177_v27 = vmul.f32 %v9732_v26, %v3118_v40  ;;  %v3055_v19 = vmul.f32 %v7305_v10, %v2926_v3  ;;  %v3056_v34 = vmul.f32 %v7306_v38, %v2927_v60  ;;  %v11181_v54 = vmul.f32 %v13074_v44, %v3117_v1  ;;  %v13399_v60 = vld [vmem:[#allocation102_spill] sm:$0xff]  ;;  %v7336_v3 = vld [vmem:[%s9637_s15 + $0x3e8] sm:$0xff] }
 0x2b5   : > { %v11184_v29 = vmul.f32 %v9686_v45, %v3118_v40  ;;  %v2764_v57 = vmul.f32 %v10570_v13, %v13398_v17  ;;  %6154 = vadd.xlane.f32.xlu1 %v6153_v55  ;;  %v6386_v62 = vmul.f32 %v11174_v6, %v11174_v6  ;;  %v2765_v15 = vmul.f32 %v10609_v58, %v13399_v60  ;;  %v13403_v55 = vld [vmem:[#allocation14_spill] sm:$0xff] }
 0x2b6   : > { %v6387_v52 = vmul.f32 %v11177_v27, %v11177_v27  ;;  %v3119_v35 = vadd.f32 %v3055_v19, %v2862_v33  ;;  %v3120_v36 = vadd.f32 %v3056_v34, %v2863_v4  ;;  %v6630_v25 = vmul.f32 %v11181_v54, %v11181_v54 }
 0x2b7   : > { %v6631_v50 = vmul.f32 %v11184_v29, %v11184_v29  ;;  %v2892_v28 = vmul.f32 %v2828_v20, %v2764_v57  ;;  %v6393_v10 = vadd.f32 %v6392_v37, %v6386_v62  ;;  %v2893_v40 = vmul.f32 %v2829_v16, %v2765_v15  ;;  %v3195_v62 = vpop.xlane.xlu0 %3194 }
 0x2b8   : > { %v11201_v1 = vmul.f32 %v9693_v30, %v3119_v35  ;;  %v2956_v33 = vmul.f32 %v10570_v13, %v13401_v2  ;;  %v11207_v38 = vmul.f32 %v9732_v26, %v3120_v36  ;;  %v2957_v19 = vmul.f32 %v10609_v58, %v13403_v55  ;;  %v13412_v55 = vld [vmem:[#allocation11_spill] sm:$0xff] }
 0x2b9   : > { %v6638_v4 = vadd.f32 %v6631_v50, %v6630_v25  ;;  %v11213_v20 = vmul.f32 %v13074_v44, %v11123_v5  ;;  %v6394_v37 = vadd.f32 %v6393_v10, %v6387_v52  ;;  %v11219_v13 = vmul.f32 %v9686_v45, %v11125_v21 }
 0x2ba   : > { %13400 = vst [vmem:[#allocation62_spill] sm:$0xff] %v11201_v1  ;;  %13402 = vst [vmem:[#allocation72_spill] sm:$0xff] %v11207_v38  ;;  %v6632_v34 = vmul.f32 %v11201_v1, %v11201_v1  ;;  %v3085_v17 = vmul.f32 %v7335_v7, %v2956_v33  ;;  %v6633_v57 = vmul.f32 %v11207_v38, %v11207_v38  ;;  %v11234_v50 = vmul.f32 0.0, %v9693_v30  ;;  %v2830_v33 = vld [vmem:[%s9637_s15 + $0x1f0] sm:$0xff] }
 0x2bb   : > { %13404 = vst [vmem:[#allocation95_spill] sm:$0xff] %v11213_v20  ;;  %13405 = vst [vmem:[#allocation88_spill] sm:$0xff] %v11219_v13  ;;  %v3086_v16 = vmul.f32 %v7336_v3, %v2957_v19  ;;  %v6388_v58 = vmul.f32 %v11213_v20, %v11213_v20  ;;  %v11226_v5 = vmul.f32 %v13074_v44, %v3119_v35  ;;  %6395 = vadd.xlane.f32.xlu0 %v6394_v37  ;;  %v2831_v37 = vld [vmem:[%s9637_s15 + $0x1f8] sm:$0xff]  ;;  %v3200_v20 = vpop.xlane.xlu0 %3199 }
 0x2bc   : > { %v6639_v52 = vadd.f32 %v6638_v4, %v6632_v34  ;;  %v3149_v60 = vadd.f32 %v3085_v17, %v2892_v28  ;;  %v6389_v21 = vmul.f32 %v11219_v13, %v11219_v13  ;;  %v11231_v15 = vmul.f32 %v9686_v45, %v3120_v36  ;;  %13408 = vst [vmem:[#allocation31_spill] sm:$0xff] %v11234_v50  ;;  %v7337_v34 = vld [vmem:[%s9637_s15 + $0x3f0] sm:$0xff] }
 0x2bd   : > { %13406 = vst [vmem:[#allocation51_spill] sm:$0xff] %v11226_v5  ;;  %v3150_v25 = vadd.f32 %v3086_v16, %v2893_v40  ;;  %v11237_v7 = vmul.f32 0.0, %v9732_v26  ;;  %v6874_v35 = vmul.f32 %v11226_v5, %v11226_v5  ;;  %v6876_v3 = vmul.f32 %v11234_v50, %v11234_v50  ;;  %v13413_v16 = vld [vmem:[#allocation17_spill] sm:$0xff]  ;;  %v13416_v13 = vld [vmem:[#allocation38_spill] sm:$0xff] }
 0x2be   : > { %13407 = vst [vmem:[#allocation30_spill] sm:$0xff] %v11231_v15  ;;  %v6640_v10 = vadd.f32 %v6639_v52, %v6633_v57  ;;  %v11242_v28 = vmul.f32 %v9693_v30, %v3149_v60  ;;  %v6397_v2 = vadd.f32 %v6389_v21, %v6388_v58  ;;  %v6875_v36 = vmul.f32 %v11231_v15, %v11231_v15  ;;  %v13414_v58 = vld [vmem:[#allocation23_spill] sm:$0xff]  ;;  %v13415_v21 = vld [vmem:[#allocation21_spill] sm:$0xff] }
 0x2bf   : > { %13409 = vst [vmem:[#allocation94_spill] sm:$0xff] %v11237_v7  ;;  %v11248_v40 = vmul.f32 %v9732_v26, %v3150_v25  ;;  %v11254_v4 = vmul.f32 %v11237_v7, %v11237_v7  ;;  %v2766_v19 = vmul.f32 %v10589_v31, %v13412_v55  ;;  %v2767_v52 = vmul.f32 %v13414_v58, %v13413_v16  ;;  %v7338_v15 = vld [vmem:[%s9637_s15 + $0x3f8] sm:$0xff]  ;;  %v3444_v16 = vpop.xlane.xlu1 %3443 }
 0x2c0   : > { %13410 = vst [vmem:[#allocation84_spill] sm:$0xff] %v11242_v28  ;;  %6641 = vadd.xlane.f32.xlu0 %v6640_v10  ;;  %v6390_v17 = vmul.f32 %v11242_v28, %v11242_v28  ;;  %v6880_v57 = vadd.f32 %v6875_v36, %v6874_v35  ;;  %v2958_v50 = vmul.f32 %v10589_v31, %v13415_v21 }
 0x2c1   : > { %13411 = vst [vmem:[#allocation4_spill] sm:$0xff] %v11248_v40  ;;  %v6391_v7 = vmul.f32 %v11248_v40, %v11248_v40  ;;  %v2894_v5 = vmul.f32 %v2830_v33, %v2766_v19  ;;  %v2959_v55 = vmul.f32 %v13414_v58, %v13416_v13  ;;  %v11272_v10 = vmul.f32 %v13074_v44, %v3149_v60 }
 0x2c2   : > { %v6398_v28 = vadd.f32 %v6397_v2, %v6390_v17  ;;  %v6881_v35 = vadd.f32 %v6880_v57, %v6876_v3  ;;  %v2895_v36 = vmul.f32 %v2831_v37, %v2767_v52  ;;  %v3087_v38 = vmul.f32 %v7337_v34, %v2958_v50 }
 0x2c3   : > { %v3088_v1 = vmul.f32 %v7338_v15, %v2959_v55  ;;  %v11275_v31 = vmul.f32 %v9686_v45, %v3150_v25  ;;  %v6634_v21 = vmul.f32 %v11272_v10, %v11272_v10  ;;  %v3201_v33 = vadd.f32 1e-12, %v3195_v62 }
 0x2c4   : > { %v6399_v19 = vadd.f32 %v6398_v28, %v6391_v7  ;;  %v6882_v13 = vadd.f32 %v6881_v35, %v11254_v4  ;;  %v3151_v58 = vadd.f32 %v3087_v38, %v2894_v5  ;;  %v3202_v60 = vadd.f32 1e-12, %v3200_v20  ;;  %v3690_v5 = vpop.xlane.xlu0 %3689  ;;  %v3449_v28 = vpop.xlane.xlu1 %3448 }
 0x2c5   : > { %v3152_v40 = vadd.f32 %v3088_v1, %v2895_v36  ;;  %v6635_v2 = vmul.f32 %v11275_v31, %v11275_v31  ;;  %8010 = vrsqrt.f32 %v3201_v33  ;;  %v8100_v62 = vmov 1966171168   ;;  %v13417_v36 = vld [vmem:[#allocation35_spill] sm:$0xff] }
 0x2c6   : > { %6400 = vadd.xlane.f32.xlu1 %v6399_v19  ;;  %6883 = vadd.xlane.f32.xlu0 %v6882_v13  ;;  %v11283_v15 = vmul.f32 %v9693_v30, %v3151_v58  ;;  %v11286_v25 = vmul.f32 %v13074_v44, %v3151_v58  ;;  %8012 = vrsqrt.f32 %v3202_v60  ;;  %v3226_v50 = vunpack.c.l.s4 %v8100_v62  ;;  %v13421_v58 = vld [vmem:[#allocation50_spill] sm:$0xff]  ;;  %v13423_v62 = vld [vmem:[#allocation37_spill] sm:$0xff] }
 0x2c7   : > { %v11289_v38 = vmul.f32 %v9732_v26, %v3152_v40  ;;  %v6643_v1 = vadd.f32 %v6635_v2, %v6634_v21  ;;  %v11292_v20 = vmul.f32 %v9686_v45, %v3152_v40  ;;  %v3450_v37 = vadd.f32 1e-12, %v3444_v16  ;;  %v13422_v60 = vld [vmem:[#allocation58_spill] sm:$0xff] }
 0x2c8   : > { %v6636_v7 = vmul.f32 %v11283_v15, %v11283_v15  ;;  %v6878_v30 = vmul.f32 %v11286_v25, %v11286_v25  ;;  %v3696_v45 = vadd.f32 1e-12, %v3690_v5  ;;  %v3227_v40 = vunpack.c.0.s8 %v3226_v50 }
 0x2c9   : > { %v6879_v44 = vmul.f32 %v11292_v20, %v11292_v20  ;;  %v6637_v26 = vmul.f32 %v11289_v38, %v11289_v38  ;;  %v3451_v57 = vadd.f32 1e-12, %v3449_v28  ;;  %8014 = vrsqrt.f32 %v3450_v37  ;;  %v13426_v28 = vld [vmem:[#allocation52_spill] sm:$0xff]  ;;  %v13427_v37 = vld [vmem:[#allocation63_spill] sm:$0xff] }
 0x2ca   : > { %v6644_v34 = vadd.f32 %v6643_v1, %v6636_v7  ;;  %8016 = vrsqrt.f32 %v3696_v45  ;;  %v11305_v21 = vsub.s32 %v3227_v40, %v13417_v36  ;;  %v13418_v33 = vlaneseq  ;;  %v13424_v1 = vld [vmem:[#allocation110_spill] sm:$0xff]  ;;  %v13425_v7 = vld [vmem:[#allocation73_spill] sm:$0xff] }
 0x2cb   : > { %v6885_v17 = vadd.f32 %v6879_v44, %v6878_v30  ;;  %8018 = vrsqrt.f32 %v3451_v57 }
 0x2cc   : > { %v6645_v52 = vadd.f32 %v6644_v34, %v6637_v26  ;;  %vm11308_vm1 = vcmp.lt.s32.totalorder %v13418_v33, 512 }
 0x2cd   : > { %v6886_v55 = vadd.f32 %v6885_v17, %v6876_v3 }
 0x2ce   : > { %6646 = vadd.xlane.f32.xlu1 %v6645_v52 }
 0x2cf   : > { %v8011_v35 = vpop.eup %8010  ;;  %v6887_v19 = vadd.f32 %v6886_v55, %v11254_v4  ;;  %v13428_v4 = vld [vmem:[#allocation70_spill] sm:$0xff] }
 0x2d0   : > { %v8013_v13 = vpop.eup %8012  ;;  %v3205_v3 = vmul.f32 %v8011_v35, %v13421_v58  ;;  %v3206_v2 = vmul.f32 %v8011_v35, %v13422_v60  ;;  %v3207_v50 = vmul.f32 %v8011_v35, %v13423_v62  ;;  %v3208_v5 = vmul.f32 %v8011_v35, %v13424_v1 }
 0x2d1   : > { %v3209_v30 = vmul.f32 %v8013_v13, %v13425_v7  ;;  %v3210_v44 = vmul.f32 %v8013_v13, %v13426_v28  ;;  %v3211_v26 = vmul.f32 %v8013_v13, %v13427_v37  ;;  %v3212_v34 = vmul.f32 %v8013_v13, %v13428_v4 }
 0x2d2   : > { %6888 = vadd.xlane.f32.xlu1 %v6887_v19  ;;  %v3221_v45 = vcombine.low %v3205_v3, %v3206_v2  ;;  %v3222_v40 = vcombine.high %v3205_v3, %v3206_v2  ;;  %v3223_v17 = vcombine.low %v3207_v50, %v3208_v5  ;;  %v3224_v57 = vcombine.high %v3207_v50, %v3208_v5 }
 0x2d3   : > { %v3289_v52 = vcombine.low %v3209_v30, %v3210_v44  ;;  %v3290_v55 = vcombine.high %v3209_v30, %v3210_v44  ;;  %v3291_v36 = vcombine.low %v3211_v26, %v3212_v34  ;;  %v3292_v33 = vcombine.high %v3211_v26, %v3212_v34  ;;  %v8015_v30 = vpop.eup %8014 }
 0x2d4   : > { %v3231_v35 = vrot.slane %v3221_v45, %v11305_v21  ;;  %v3238_v58 = vrot.slane %v3222_v40, %v11305_v21  ;;  %v3245_v60 = vrot.slane %v3223_v17, %v11305_v21  ;;  %v3252_v62 = vrot.slane %v3224_v57, %v11305_v21  ;;  %v8017_v4 = vpop.eup %8016 }
 0x2d5   : > { %v3299_v13 = vrot.slane %v3289_v52, %v11305_v21  ;;  %v3306_v19 = vrot.slane %v3290_v55, %v11305_v21  ;;  %v3313_v3 = vrot.slane %v3291_v36, %v11305_v21  ;;  %v3320_v2 = vrot.slane %v3292_v33, %v11305_v21  ;;  %v11341_v57 = vpop.eup %8018 }
 0x2d6   : > { %v3253_v50 = vcombine.low %v3231_v35, %v3245_v60  ;;  %v3254_v1 = vcombine.high %v3231_v35, %v3245_v60  ;;  %v3255_v5 = vcombine.low %v3238_v58, %v3252_v62  ;;  %v3256_v7 = vcombine.high %v3238_v58, %v3252_v62 }
 0x2d7   : > { %v3321_v28 = vcombine.low %v3299_v13, %v3313_v3  ;;  %v3322_v44 = vcombine.high %v3299_v13, %v3313_v3  ;;  %v3323_v37 = vcombine.low %v3306_v19, %v3320_v2  ;;  %v3324_v26 = vcombine.high %v3306_v19, %v3320_v2 }
 0x2d8   : > { %v3263_v34 = vrot.slane %v3253_v50, %v11305_v21  ;;  %v3270_v45 = vrot.slane %v3255_v5, %v11305_v21  ;;  %v3277_v40 = vrot.slane %v3254_v1, %v11305_v21  ;;  %v3284_v17 = vrot.slane %v3256_v7, %v11305_v21  ;;  %v13429_v50 = vld [vmem:[#allocation69_spill] sm:$0xff]  ;;  %v13430_v5 = vld [vmem:[#allocation71_spill] sm:$0xff] }
 0x2d9   : > { %v3331_v52 = vrot.slane %v3321_v28, %v11305_v21  ;;  %v3338_v55 = vrot.slane %v3323_v37, %v11305_v21  ;;  %v3345_v36 = vrot.slane %v3322_v44, %v11305_v21  ;;  %v3352_v33 = vrot.slane %v3324_v26, %v11305_v21  ;;  %v13431_v28 = vld [vmem:[#allocation86_spill] sm:$0xff] }
 0x2da   : > { %v3285_v35 = vcombine.high %v3263_v34, %v3263_v34  ;;  %v3286_v58 = vcombine.high %v3270_v45, %v3270_v45  ;;  %v3287_v60 = vcombine.high %v3277_v40, %v3277_v40  ;;  %v3288_v62 = vcombine.high %v3284_v17, %v3284_v17  ;;  %3377 = vst.msk [vmem:[%s11335_s9] ss:$8 sm:$0xf] %vm11308_vm1, %v3263_v34  ;;  %v13432_v37 = vld [vmem:[#allocation106_spill] sm:$0xff] }
 0x2db   : > { %7339 = vst.msk [vmem:[%s11335_s9 + $0x40] ss:$8 sm:$0xf] %vm11308_vm1, %v3277_v40  ;;  %7342 = vst.msk [vmem:[%s11335_s9 + $0x100] ss:$8 sm:$0xf] %vm11308_vm1, %v3270_v45  ;;  %v3353_v13 = vcombine.high %v3331_v52, %v3331_v52  ;;  %v3354_v19 = vcombine.high %v3338_v55, %v3338_v55  ;;  %v3355_v3 = vcombine.high %v3345_v36, %v3345_v36 }
 0x2dc   : > { %7343 = vst.msk [vmem:[%s11335_s9 + $0x140] ss:$8 sm:$0xf] %vm11308_vm1, %v3284_v17  ;;  %v3356_v2 = vcombine.high %v3352_v33, %v3352_v33  ;;  %7346 = vst.msk [vmem:[%s11335_s9 + $0x200] ss:$8 sm:$0xf] %vm11308_vm1, %v3331_v52  ;;  %v3454_v1 = vmul.f32 %v8015_v30, %v13429_v50  ;;  %v3455_v7 = vmul.f32 %v8015_v30, %v13430_v5 }
 0x2dd   : > { %7347 = vst.msk [vmem:[%s11335_s9 + $0x240] ss:$8 sm:$0xf] %vm11308_vm1, %v3345_v36  ;;  %7350 = vst.msk [vmem:[%s11335_s9 + $0x300] ss:$8 sm:$0xf] %vm11308_vm1, %v3338_v55  ;;  %v3456_v44 = vmul.f32 %v8015_v30, %v13431_v28  ;;  %v3457_v26 = vmul.f32 %v8015_v30, %v13432_v37 }
 0x2de   : > { %7351 = vst.msk [vmem:[%s11335_s9 + $0x340] ss:$8 sm:$0xf] %vm11308_vm1, %v3352_v33  ;;  %7340 = vst.msk [vmem:[%s11335_s9 + $0x80] ss:$8 sm:$0xf] %vm11308_vm1, %v3285_v35  ;;  %v3470_v33 = vcombine.low %v3454_v1, %v3455_v7  ;;  %v3471_v35 = vcombine.high %v3454_v1, %v3455_v7 }
 0x2df   : > { %7341 = vst.msk [vmem:[%s11335_s9 + $0xc0] ss:$8 sm:$0xf] %vm11308_vm1, %v3287_v60  ;;  %7344 = vst.msk [vmem:[%s11335_s9 + $0x180] ss:$8 sm:$0xf] %vm11308_vm1, %v3286_v58  ;;  %v3472_v58 = vcombine.low %v3456_v44, %v3457_v26  ;;  %v3473_v60 = vcombine.high %v3456_v44, %v3457_v26 }
 0x2e0   : > { %7345 = vst.msk [vmem:[%s11335_s9 + $0x1c0] ss:$8 sm:$0xf] %vm11308_vm1, %v3288_v62  ;;  %7348 = vst.msk [vmem:[%s11335_s9 + $0x280] ss:$8 sm:$0xf] %vm11308_vm1, %v3353_v13 }
 0x2e1   : > { %7349 = vst.msk [vmem:[%s11335_s9 + $0x2c0] ss:$8 sm:$0xf] %vm11308_vm1, %v3355_v3  ;;  %7352 = vst.msk [vmem:[%s11335_s9 + $0x380] ss:$8 sm:$0xf] %vm11308_vm1, %v3354_v19  ;;  %v3480_v19 = vrot.slane %v3470_v33, %v11305_v21  ;;  %v3494_v5 = vrot.slane %v3472_v58, %v11305_v21  ;;  %v3501_v28 = vrot.slane %v3473_v60, %v11305_v21  ;;  %v3695_v58 = vpop.xlane.xlu1 %3694 }
 0x2e2   : > { %7353 = vst.msk [vmem:[%s11335_s9 + $0x3c0] ss:$8 sm:$0xf] %vm11308_vm1, %v3356_v2  ;;  %v13433_v34 = vld [vmem:[#allocation82_spill] sm:$0xff]  ;;  %v13434_v40 = vld [vmem:[#allocation107_spill] sm:$0xff]  ;;  %v13435_v52 = vld [vmem:[#allocation65_spill] sm:$0xff]  ;;  %v3487_v2 = vrot.slane %v3471_v35, %v11305_v21 }
 0x2e3   : > { %v3700_v45 = vmul.f32 %v8017_v4, %v13433_v34  ;;  %v3701_v17 = vmul.f32 %v8017_v4, %v13434_v40  ;;  %v3702_v55 = vmul.f32 %v8017_v4, %v13435_v52  ;;  %v13436_v36 = vld [vmem:[#allocation74_spill] sm:$0xff]  ;;  %v3502_v44 = vcombine.low %v3480_v19, %v3494_v5 }
 0x2e4   : > { %v3703_v30 = vmul.f32 %v8017_v4, %v13436_v36  ;;  %v3503_v26 = vcombine.high %v3480_v19, %v3494_v5  ;;  %v3504_v34 = vcombine.low %v3487_v2, %v3501_v28 }
 0x2e5   : > { %v3716_v62 = vcombine.low %v3700_v45, %v3701_v17  ;;  %v3717_v13 = vcombine.high %v3700_v45, %v3701_v17  ;;  %v3505_v45 = vcombine.high %v3487_v2, %v3501_v28  ;;  %v3512_v36 = vrot.slane %v3502_v44, %v11305_v21  ;;  %v3936_v28 = vpop.xlane.xlu0 %3935  ;;  %v13437_v44 = vld [vmem:[#allocation75_spill] sm:$0xff] }
 0x2e6   : > { %v3718_v3 = vcombine.low %v3702_v55, %v3703_v30  ;;  %v3719_v50 = vcombine.high %v3702_v55, %v3703_v30  ;;  %v3519_v30 = vrot.slane %v3504_v34, %v11305_v21  ;;  %v3526_v33 = vrot.slane %v3503_v26, %v11305_v21  ;;  %v13438_v34 = vld [vmem:[#allocation81_spill] sm:$0xff] }
 0x2e7   : > { %v3726_v37 = vrot.slane %v3716_v62, %v11305_v21  ;;  %v3733_v4 = vrot.slane %v3717_v13, %v11305_v21  ;;  %v3533_v35 = vrot.slane %v3505_v45, %v11305_v21  ;;  %7354 = vst.msk [vmem:[%s11335_s9 + $0x1] ss:$8 sm:$0xf] %vm11308_vm1, %v3512_v36  ;;  %v3458_v26 = vmul.f32 %v11341_v57, %v13437_v44 }
 0x2e8   : > { %v3740_v1 = vrot.slane %v3718_v3, %v11305_v21  ;;  %v3747_v7 = vrot.slane %v3719_v50, %v11305_v21  ;;  %v3534_v50 = vcombine.high %v3512_v36, %v3512_v36  ;;  %v3535_v19 = vcombine.high %v3519_v30, %v3519_v30  ;;  %7355 = vst.msk [vmem:[%s11335_s9 + $0x41] ss:$8 sm:$0xf] %vm11308_vm1, %v3526_v33 }
 0x2e9   : > { %v3536_v2 = vcombine.high %v3526_v33, %v3526_v33  ;;  %v3537_v5 = vcombine.high %v3533_v35, %v3533_v35  ;;  %7358 = vst.msk [vmem:[%s11335_s9 + $0x101] ss:$8 sm:$0xf] %vm11308_vm1, %v3519_v30  ;;  %7359 = vst.msk [vmem:[%s11335_s9 + $0x141] ss:$8 sm:$0xf] %vm11308_vm1, %v3533_v35  ;;  %v3459_v45 = vmul.f32 %v11341_v57, %v13438_v34 }
 0x2ea   : > { %v3748_v40 = vcombine.low %v3726_v37, %v3740_v1  ;;  %v3749_v17 = vcombine.high %v3726_v37, %v3740_v1  ;;  %v3750_v52 = vcombine.low %v3733_v4, %v3747_v7  ;;  %v3751_v55 = vcombine.high %v3733_v4, %v3747_v7  ;;  %7356 = vst.msk [vmem:[%s11335_s9 + $0x81] ss:$8 sm:$0xf] %vm11308_vm1, %v3534_v50 }
 0x2eb   : > { %7357 = vst.msk [vmem:[%s11335_s9 + $0xc1] ss:$8 sm:$0xf] %vm11308_vm1, %v3536_v2  ;;  %7360 = vst.msk [vmem:[%s11335_s9 + $0x181] ss:$8 sm:$0xf] %vm11308_vm1, %v3535_v19  ;;  %v3538_v33 = vcombine.low %v3458_v26, %v3459_v45  ;;  %v3539_v35 = vcombine.high %v3458_v26, %v3459_v45  ;;  %v4182_v2 = vpop.xlane.xlu0 %4181 }
 0x2ec   : > { %v3758_v60 = vrot.slane %v3748_v40, %v11305_v21  ;;  %v3765_v62 = vrot.slane %v3750_v52, %v11305_v21  ;;  %v3772_v13 = vrot.slane %v3749_v17, %v11305_v21  ;;  %v3779_v3 = vrot.slane %v3751_v55, %v11305_v21  ;;  %7361 = vst.msk [vmem:[%s11335_s9 + $0x1c1] ss:$8 sm:$0xf] %vm11308_vm1, %v3537_v5  ;;  %v13439_v40 = vld [vmem:[#allocation83_spill] sm:$0xff] }
 0x2ed   : > { %v3460_v17 = vmul.f32 %v11341_v57, %v13439_v40  ;;  %v13440_v52 = vld [vmem:[#allocation87_spill] sm:$0xff]  ;;  %v3697_v36 = vadd.f32 1e-12, %v3695_v58  ;;  %v3942_v30 = vadd.f32 1e-12, %v3936_v28 }
 0x2ee   : > { %v3780_v37 = vcombine.high %v3758_v60, %v3758_v60  ;;  %v3781_v4 = vcombine.high %v3765_v62, %v3765_v62  ;;  %v3782_v1 = vcombine.high %v3772_v13, %v3772_v13  ;;  %v3783_v7 = vcombine.high %v3779_v3, %v3779_v3  ;;  %7370 = vst.msk [vmem:[%s11335_s9 + $0x2] ss:$8 sm:$0xf] %vm11308_vm1, %v3758_v60 }
 0x2ef   : > { %7371 = vst.msk [vmem:[%s11335_s9 + $0x42] ss:$8 sm:$0xf] %vm11308_vm1, %v3772_v13  ;;  %7374 = vst.msk [vmem:[%s11335_s9 + $0x102] ss:$8 sm:$0xf] %vm11308_vm1, %v3765_v62  ;;  %v3461_v55 = vmul.f32 %v11341_v57, %v13440_v52  ;;  %v3941_v13 = vpop.xlane.xlu1 %3940  ;;  %8020 = vrsqrt.f32 %v3697_v36  ;;  %v3548_v57 = vrot.slane %v3538_v33, %v11305_v21 }
 0x2f0   : > { %7375 = vst.msk [vmem:[%s11335_s9 + $0x142] ss:$8 sm:$0xf] %vm11308_vm1, %v3779_v3  ;;  %7372 = vst.msk [vmem:[%s11335_s9 + $0x82] ss:$8 sm:$0xf] %vm11308_vm1, %v3780_v37  ;;  %v3555_v3 = vrot.slane %v3539_v35, %v11305_v21  ;;  %8022 = vrsqrt.f32 %v3942_v30  ;;  %v4428_v33 = vpop.xlane.xlu0 %4427 }
 0x2f1   : > { %7373 = vst.msk [vmem:[%s11335_s9 + $0xc2] ss:$8 sm:$0xf] %vm11308_vm1, %v3782_v1  ;;  %7376 = vst.msk [vmem:[%s11335_s9 + $0x182] ss:$8 sm:$0xf] %vm11308_vm1, %v3781_v4  ;;  %v3540_v60 = vcombine.low %v3460_v17, %v3461_v55  ;;  %v3541_v62 = vcombine.high %v3460_v17, %v3461_v55 }
 0x2f2   : > { %7377 = vst.msk [vmem:[%s11335_s9 + $0x1c2] ss:$8 sm:$0xf] %vm11308_vm1, %v3783_v7  ;;  %v4188_v4 = vadd.f32 1e-12, %v4182_v2  ;;  %v13441_v35 = vld [vmem:[#allocation6_spill] sm:$0xff] }
 0x2f3   : > { %v3562_v50 = vrot.slane %v3540_v60, %v11305_v21  ;;  %v3569_v19 = vrot.slane %v3541_v62, %v11305_v21  ;;  %v4187_v34 = vpop.xlane.xlu1 %4186  ;;  %v3943_v45 = vadd.f32 1e-12, %v3941_v13  ;;  %v13442_v62 = vld [vmem:[#allocation85_spill] sm:$0xff] }
 0x2f4   : > { %v4189_v36 = vadd.f32 1e-12, %v4187_v34  ;;  %8024 = vrsqrt.f32 %v4188_v4  ;;  %v13445_v4 = vld [vmem:[#allocation101_spill] sm:$0xff] }
 0x2f5   : > { %v3570_v5 = vcombine.low %v3548_v57, %v3562_v50  ;;  %v3571_v58 = vcombine.high %v3548_v57, %v3562_v50  ;;  %v3572_v28 = vcombine.low %v3555_v3, %v3569_v19  ;;  %v3573_v37 = vcombine.high %v3555_v3, %v3569_v19  ;;  %v13443_v57 = vld [vmem:[#allocation80_spill] sm:$0xff]  ;;  %v13444_v50 = vld [vmem:[#allocation93_spill] sm:$0xff] }
 0x2f6   : > { %8026 = vrsqrt.f32 %v3943_v45  ;;  %v13447_v34 = vld [vmem:[#allocation117_spill] sm:$0xff] }
 0x2f7   : > { %v3580_v1 = vrot.slane %v3570_v5, %v11305_v21  ;;  %v3587_v7 = vrot.slane %v3572_v28, %v11305_v21  ;;  %v3594_v44 = vrot.slane %v3571_v58, %v11305_v21  ;;  %v3601_v26 = vrot.slane %v3573_v37, %v11305_v21 }
 0x2f8   : > { %8028 = vrsqrt.f32 %v4189_v36  ;;  %v11511_v5 = vadd.f32 1e-12, %v4428_v33 }
 0x2f9   : > { %v3602_v40 = vcombine.high %v3580_v1, %v3580_v1  ;;  %v3603_v17 = vcombine.high %v3587_v7, %v3587_v7  ;;  %v3604_v52 = vcombine.high %v3594_v44, %v3594_v44  ;;  %v3605_v55 = vcombine.high %v3601_v26, %v3601_v26  ;;  %7362 = vst.msk [vmem:[%s11335_s9 + $0x201] ss:$8 sm:$0xf] %vm11308_vm1, %v3580_v1  ;;  %v8021_v30 = vpop.eup %8020 }
 0x2fa   : > { %7363 = vst.msk [vmem:[%s11335_s9 + $0x241] ss:$8 sm:$0xf] %vm11308_vm1, %v3594_v44  ;;  %7366 = vst.msk [vmem:[%s11335_s9 + $0x301] ss:$8 sm:$0xf] %vm11308_vm1, %v3587_v7  ;;  %v3704_v60 = vmul.f32 %v8021_v30, %v13441_v35  ;;  %v3705_v13 = vmul.f32 %v8021_v30, %v13442_v62  ;;  %v3706_v3 = vmul.f32 %v8021_v30, %v13443_v57  ;;  %v8023_v2 = vpop.eup %8022  ;;  %8030 = vrsqrt.f32 %v11511_v5 }
 0x2fb   : > { %7367 = vst.msk [vmem:[%s11335_s9 + $0x341] ss:$8 sm:$0xf] %vm11308_vm1, %v3601_v26  ;;  %7364 = vst.msk [vmem:[%s11335_s9 + $0x281] ss:$8 sm:$0xf] %vm11308_vm1, %v3602_v40  ;;  %v3707_v19 = vmul.f32 %v8021_v30, %v13444_v50  ;;  %v3946_v7 = vmul.f32 %v8023_v2, %v13445_v4  ;;  %v3948_v45 = vmul.f32 %v8023_v2, %v13447_v34 }
 0x2fc   : > { %7365 = vst.msk [vmem:[%s11335_s9 + $0x2c1] ss:$8 sm:$0xf] %vm11308_vm1, %v3604_v52  ;;  %7368 = vst.msk [vmem:[%s11335_s9 + $0x381] ss:$8 sm:$0xf] %vm11308_vm1, %v3603_v17  ;;  %v3784_v58 = vcombine.low %v3704_v60, %v3705_v13  ;;  %v3785_v28 = vcombine.high %v3704_v60, %v3705_v13 }
 0x2fd   : > { %7369 = vst.msk [vmem:[%s11335_s9 + $0x3c1] ss:$8 sm:$0xf] %vm11308_vm1, %v3605_v55  ;;  %v3786_v37 = vcombine.low %v3706_v3, %v3707_v19  ;;  %v3787_v1 = vcombine.high %v3706_v3, %v3707_v19  ;;  %v13446_v44 = vld [vmem:[#allocation5_spill] sm:$0xff]  ;;  %v13448_v40 = vld [vmem:[#allocation12_spill] sm:$0xff] }
 0x2fe   : > { %v3947_v26 = vmul.f32 %v8023_v2, %v13446_v44  ;;  %v3949_v17 = vmul.f32 %v8023_v2, %v13448_v40  ;;  %v3794_v52 = vrot.slane %v3784_v58, %v11305_v21  ;;  %v3801_v55 = vrot.slane %v3785_v28, %v11305_v21 }
 0x2ff   : > { %v3808_v36 = vrot.slane %v3786_v37, %v11305_v21  ;;  %v3815_v30 = vrot.slane %v3787_v1, %v11305_v21  ;;  %v8025_v37 = vpop.eup %8024 }
 0x300   : > { %v3962_v33 = vcombine.low %v3946_v7, %v3947_v26  ;;  %v3963_v35 = vcombine.high %v3946_v7, %v3947_v26  ;;  %v3964_v60 = vcombine.low %v3948_v45, %v3949_v17  ;;  %v3965_v62 = vcombine.high %v3948_v45, %v3949_v17  ;;  %v8027_v26 = vpop.eup %8026 }
 0x301   : > { %v3816_v13 = vcombine.low %v3794_v52, %v3808_v36  ;;  %v3817_v57 = vcombine.high %v3794_v52, %v3808_v36  ;;  %v3818_v3 = vcombine.low %v3801_v55, %v3815_v30  ;;  %v3819_v50 = vcombine.high %v3801_v55, %v3815_v30 }
 0x302   : > { %v3972_v19 = vrot.slane %v3962_v33, %v11305_v21  ;;  %v3979_v2 = vrot.slane %v3963_v35, %v11305_v21  ;;  %v3986_v58 = vrot.slane %v3964_v60, %v11305_v21  ;;  %v3993_v28 = vrot.slane %v3965_v62, %v11305_v21  ;;  %v11541_v33 = vpop.eup %8028 }
 0x303   : > { %v3826_v1 = vrot.slane %v3816_v13, %v11305_v21  ;;  %v3833_v4 = vrot.slane %v3818_v3, %v11305_v21  ;;  %v3840_v7 = vrot.slane %v3817_v57, %v11305_v21  ;;  %v3847_v44 = vrot.slane %v3819_v50, %v11305_v21  ;;  %v13449_v57 = vld [vmem:[#allocation53_spill] sm:$0xff]  ;;  %v13450_v50 = vld [vmem:[#allocation118_spill] sm:$0xff] }
 0x304   : > { %v3994_v34 = vcombine.low %v3972_v19, %v3986_v58  ;;  %v3995_v45 = vcombine.high %v3972_v19, %v3986_v58  ;;  %v3996_v40 = vcombine.low %v3979_v2, %v3993_v28  ;;  %v3997_v17 = vcombine.high %v3979_v2, %v3993_v28  ;;  %v13451_v2 = vld [vmem:[#allocation15_spill] sm:$0xff] }
 0x305   : > { %v3848_v52 = vcombine.high %v3826_v1, %v3826_v1  ;;  %v3849_v55 = vcombine.high %v3833_v4, %v3833_v4  ;;  %v3850_v36 = vcombine.high %v3840_v7, %v3840_v7  ;;  %v3851_v30 = vcombine.high %v3847_v44, %v3847_v44  ;;  %7378 = vst.msk [vmem:[%s11335_s9 + $0x202] ss:$8 sm:$0xf] %vm11308_vm1, %v3826_v1  ;;  %v13452_v28 = vld [vmem:[#allocation39_spill] sm:$0xff] }
 0x306   : > { %7379 = vst.msk [vmem:[%s11335_s9 + $0x242] ss:$8 sm:$0xf] %vm11308_vm1, %v3840_v7  ;;  %7382 = vst.msk [vmem:[%s11335_s9 + $0x302] ss:$8 sm:$0xf] %vm11308_vm1, %v3833_v4  ;;  %v4004_v35 = vrot.slane %v3994_v34, %v11305_v21  ;;  %v4011_v60 = vrot.slane %v3996_v40, %v11305_v21  ;;  %v4018_v62 = vrot.slane %v3995_v45, %v11305_v21 }
 0x307   : > { %7383 = vst.msk [vmem:[%s11335_s9 + $0x342] ss:$8 sm:$0xf] %vm11308_vm1, %v3847_v44  ;;  %v4025_v13 = vrot.slane %v3997_v17, %v11305_v21  ;;  %7380 = vst.msk [vmem:[%s11335_s9 + $0x282] ss:$8 sm:$0xf] %vm11308_vm1, %v3848_v52  ;;  %v4192_v3 = vmul.f32 %v8025_v37, %v13449_v57  ;;  %v4193_v19 = vmul.f32 %v8025_v37, %v13450_v50 }
 0x308   : > { %7381 = vst.msk [vmem:[%s11335_s9 + $0x2c2] ss:$8 sm:$0xf] %vm11308_vm1, %v3850_v36  ;;  %7384 = vst.msk [vmem:[%s11335_s9 + $0x382] ss:$8 sm:$0xf] %vm11308_vm1, %v3849_v55  ;;  %v4194_v58 = vmul.f32 %v8025_v37, %v13451_v2  ;;  %v4195_v1 = vmul.f32 %v8025_v37, %v13452_v28  ;;  %v4026_v4 = vcombine.high %v4004_v35, %v4004_v35  ;;  %v4674_v2 = vpop.xlane.xlu0 %4673 }
 0x309   : > { %7385 = vst.msk [vmem:[%s11335_s9 + $0x3c2] ss:$8 sm:$0xf] %vm11308_vm1, %v3851_v30  ;;  %v4027_v7 = vcombine.high %v4011_v60, %v4011_v60  ;;  %v4028_v44 = vcombine.high %v4018_v62, %v4018_v62  ;;  %v4029_v34 = vcombine.high %v4025_v13, %v4025_v13  ;;  %7386 = vst.msk [vmem:[%s11335_s9 + $0x3] ss:$8 sm:$0xf] %vm11308_vm1, %v4004_v35 }
 0x30a   : > { %7387 = vst.msk [vmem:[%s11335_s9 + $0x43] ss:$8 sm:$0xf] %vm11308_vm1, %v4018_v62  ;;  %7390 = vst.msk [vmem:[%s11335_s9 + $0x103] ss:$8 sm:$0xf] %vm11308_vm1, %v4011_v60  ;;  %v4208_v45 = vcombine.low %v4192_v3, %v4193_v19  ;;  %v4209_v40 = vcombine.high %v4192_v3, %v4193_v19  ;;  %v4210_v37 = vcombine.low %v4194_v58, %v4195_v1 }
 0x30b   : > { %7391 = vst.msk [vmem:[%s11335_s9 + $0x143] ss:$8 sm:$0xf] %vm11308_vm1, %v4025_v13  ;;  %v4211_v17 = vcombine.high %v4194_v58, %v4195_v1  ;;  %7388 = vst.msk [vmem:[%s11335_s9 + $0x83] ss:$8 sm:$0xf] %vm11308_vm1, %v4026_v4 }
 0x30c   : > { %7389 = vst.msk [vmem:[%s11335_s9 + $0xc3] ss:$8 sm:$0xf] %vm11308_vm1, %v4028_v44  ;;  %7392 = vst.msk [vmem:[%s11335_s9 + $0x183] ss:$8 sm:$0xf] %vm11308_vm1, %v4027_v7  ;;  %v4218_v57 = vrot.slane %v4208_v45, %v11305_v21  ;;  %v4225_v3 = vrot.slane %v4209_v40, %v11305_v21  ;;  %v4232_v50 = vrot.slane %v4210_v37, %v11305_v21 }
 0x30d   : > { %7393 = vst.msk [vmem:[%s11335_s9 + $0x1c3] ss:$8 sm:$0xf] %vm11308_vm1, %v4029_v34  ;;  %v13453_v52 = vld [vmem:[#allocation100_spill] sm:$0xff]  ;;  %v13455_v35 = vld [vmem:[#allocation122_spill] sm:$0xff]  ;;  %v13456_v62 = vld [vmem:[#allocation123_spill] sm:$0xff]  ;;  %v4239_v19 = vrot.slane %v4211_v17, %v11305_v21 }
 0x30e   : > { %v3950_v55 = vmul.f32 %v8027_v26, %v13453_v52  ;;  %v13454_v36 = vld [vmem:[#allocation120_spill] sm:$0xff]  ;;  %v3952_v60 = vmul.f32 %v8027_v26, %v13455_v35  ;;  %v3953_v13 = vmul.f32 %v8027_v26, %v13456_v62  ;;  %v4240_v7 = vcombine.low %v4218_v57, %v4232_v50 }
 0x30f   : > { %v3951_v30 = vmul.f32 %v8027_v26, %v13454_v36  ;;  %v4241_v44 = vcombine.high %v4218_v57, %v4232_v50  ;;  %v4242_v34 = vcombine.low %v4225_v3, %v4239_v19  ;;  %v4243_v52 = vcombine.high %v4225_v3, %v4239_v19  ;;  %v4433_v36 = vpop.xlane.xlu1 %4432 }
 0x310   : > { %v4032_v1 = vcombine.low %v3952_v60, %v3953_v13  ;;  %v4033_v4 = vcombine.high %v3952_v60, %v3953_v13  ;;  %v4250_v17 = vrot.slane %v4240_v7, %v11305_v21 }
 0x311   : > { %v4030_v58 = vcombine.low %v3950_v55, %v3951_v30  ;;  %v4031_v28 = vcombine.high %v3950_v55, %v3951_v30  ;;  %v4257_v55 = vrot.slane %v4242_v34, %v11305_v21  ;;  %v4264_v30 = vrot.slane %v4241_v44, %v11305_v21  ;;  %v13457_v34 = vld [vmem:[#allocation13_spill] sm:$0xff] }
 0x312   : > { %v4054_v40 = vrot.slane %v4032_v1, %v11305_v21  ;;  %v4061_v37 = vrot.slane %v4033_v4, %v11305_v21  ;;  %v4271_v35 = vrot.slane %v4243_v52, %v11305_v21  ;;  %v4272_v3 = vcombine.high %v4250_v17, %v4250_v17  ;;  %7402 = vst.msk [vmem:[%s11335_s9 + $0x4] ss:$8 sm:$0xf] %vm11308_vm1, %v4250_v17  ;;  %v13460_v17 = vld [vmem:[#allocation126_spill] sm:$0xff] }
 0x313   : > { %v4040_v26 = vrot.slane %v4030_v58, %v11305_v21  ;;  %v4047_v45 = vrot.slane %v4031_v28, %v11305_v21  ;;  %v4273_v50 = vcombine.high %v4257_v55, %v4257_v55  ;;  %v4274_v19 = vcombine.high %v4264_v30, %v4264_v30  ;;  %7403 = vst.msk [vmem:[%s11335_s9 + $0x44] ss:$8 sm:$0xf] %vm11308_vm1, %v4264_v30  ;;  %v4920_v28 = vpop.xlane.xlu0 %4919  ;;  %v4679_v30 = vpop.xlane.xlu1 %4678 }
 0x314   : > { %v4275_v58 = vcombine.high %v4271_v35, %v4271_v35  ;;  %7406 = vst.msk [vmem:[%s11335_s9 + $0x104] ss:$8 sm:$0xf] %vm11308_vm1, %v4257_v55  ;;  %7407 = vst.msk [vmem:[%s11335_s9 + $0x144] ss:$8 sm:$0xf] %vm11308_vm1, %v4271_v35  ;;  %v4196_v52 = vmul.f32 %v11541_v33, %v13457_v34  ;;  %v4199_v55 = vmul.f32 %v11541_v33, %v13460_v17 }
 0x315   : > { %v4062_v60 = vcombine.low %v4040_v26, %v4054_v40  ;;  %v4063_v62 = vcombine.high %v4040_v26, %v4054_v40  ;;  %v4064_v13 = vcombine.low %v4047_v45, %v4061_v37  ;;  %v4065_v57 = vcombine.high %v4047_v45, %v4061_v37  ;;  %7404 = vst.msk [vmem:[%s11335_s9 + $0x84] ss:$8 sm:$0xf] %vm11308_vm1, %v4272_v3  ;;  %v13458_v26 = vld [vmem:[#allocation124_spill] sm:$0xff]  ;;  %v13459_v40 = vld [vmem:[#allocation125_spill] sm:$0xff] }
 0x316   : > { %7405 = vst.msk [vmem:[%s11335_s9 + $0xc4] ss:$8 sm:$0xf] %vm11308_vm1, %v4274_v19  ;;  %7408 = vst.msk [vmem:[%s11335_s9 + $0x184] ss:$8 sm:$0xf] %vm11308_vm1, %v4273_v50  ;;  %v4197_v45 = vmul.f32 %v11541_v33, %v13458_v26  ;;  %v4198_v37 = vmul.f32 %v11541_v33, %v13459_v40 }
 0x317   : > { %v4072_v1 = vrot.slane %v4062_v60, %v11305_v21  ;;  %v4079_v4 = vrot.slane %v4064_v13, %v11305_v21  ;;  %v4086_v7 = vrot.slane %v4063_v62, %v11305_v21  ;;  %v4093_v44 = vrot.slane %v4065_v57, %v11305_v21  ;;  %7409 = vst.msk [vmem:[%s11335_s9 + $0x1c4] ss:$8 sm:$0xf] %vm11308_vm1, %v4275_v58  ;;  %v5166_v34 = vpop.xlane.xlu0 %5165  ;;  %v4925_v5 = vpop.xlane.xlu1 %4924 }
 0x318   : > { %v4276_v33 = vcombine.low %v4196_v52, %v4197_v45  ;;  %v4277_v57 = vcombine.high %v4196_v52, %v4197_v45  ;;  %v4278_v3 = vcombine.low %v4198_v37, %v4199_v55  ;;  %v4279_v50 = vcombine.high %v4198_v37, %v4199_v55 }
 0x319   : > { %v4094_v35 = vcombine.high %v4072_v1, %v4072_v1  ;;  %v4095_v60 = vcombine.high %v4079_v4, %v4079_v4  ;;  %v4096_v62 = vcombine.high %v4086_v7, %v4086_v7  ;;  %v4097_v13 = vcombine.high %v4093_v44, %v4093_v44  ;;  %7394 = vst.msk [vmem:[%s11335_s9 + $0x203] ss:$8 sm:$0xf] %vm11308_vm1, %v4072_v1 }
 0x31a   : > { %7395 = vst.msk [vmem:[%s11335_s9 + $0x243] ss:$8 sm:$0xf] %vm11308_vm1, %v4086_v7  ;;  %7398 = vst.msk [vmem:[%s11335_s9 + $0x303] ss:$8 sm:$0xf] %vm11308_vm1, %v4079_v4  ;;  %v4286_v1 = vrot.slane %v4276_v33, %v11305_v21  ;;  %v4293_v4 = vrot.slane %v4277_v57, %v11305_v21  ;;  %v4300_v7 = vrot.slane %v4278_v3, %v11305_v21 }
 0x31b   : > { %7399 = vst.msk [vmem:[%s11335_s9 + $0x343] ss:$8 sm:$0xf] %vm11308_vm1, %v4093_v44  ;;  %7396 = vst.msk [vmem:[%s11335_s9 + $0x283] ss:$8 sm:$0xf] %vm11308_vm1, %v4094_v35  ;;  %v4307_v44 = vrot.slane %v4279_v50, %v11305_v21  ;;  %v8031_v50 = vpop.eup %8030 }
 0x31c   : > { %7397 = vst.msk [vmem:[%s11335_s9 + $0x2c3] ss:$8 sm:$0xf] %vm11308_vm1, %v4096_v62  ;;  %7400 = vst.msk [vmem:[%s11335_s9 + $0x383] ss:$8 sm:$0xf] %vm11308_vm1, %v4095_v60  ;;  %v4308_v26 = vcombine.low %v4286_v1, %v4300_v7  ;;  %v4309_v45 = vcombine.high %v4286_v1, %v4300_v7 }
 0x31d   : > { %7401 = vst.msk [vmem:[%s11335_s9 + $0x3c3] ss:$8 sm:$0xf] %vm11308_vm1, %v4097_v13  ;;  %v4680_v19 = vadd.f32 1e-12, %v4674_v2  ;;  %v4310_v40 = vcombine.low %v4293_v4, %v4307_v44  ;;  %v4311_v37 = vcombine.high %v4293_v4, %v4307_v44  ;;  %v13462_v1 = vld [vmem:[#allocation48_spill] sm:$0xff] }
 0x31e   : > { %v4435_v58 = vadd.f32 1e-12, %v4433_v36  ;;  %v4681_v52 = vadd.f32 1e-12, %v4679_v30  ;;  %v4926_v2 = vadd.f32 1e-12, %v4920_v28  ;;  %v4318_v17 = vrot.slane %v4308_v26, %v11305_v21  ;;  %v5171_v28 = vpop.xlane.xlu1 %5170 }
 0x31f   : > { %8032 = vrsqrt.f32 %v4680_v19  ;;  %v5172_v36 = vadd.f32 1e-12, %v5166_v34  ;;  %v4325_v55 = vrot.slane %v4310_v40, %v11305_v21  ;;  %v4332_v30 = vrot.slane %v4309_v45, %v11305_v21  ;;  %v13461_v19 = vld [vmem:[#allocation68_spill] sm:$0xff]  ;;  %v13463_v7 = vld [vmem:[#allocation105_spill] sm:$0xff]  ;;  %v13464_v34 = vld [vmem:[#allocation42_spill] sm:$0xff] }
 0x320   : > { %8034 = vrsqrt.f32 %v4435_v58  ;;  %v4339_v35 = vrot.slane %v4311_v37, %v11305_v21  ;;  %v4927_v60 = vadd.f32 1e-12, %v4925_v5  ;;  %v4340_v62 = vcombine.high %v4318_v17, %v4318_v17  ;;  %7410 = vst.msk [vmem:[%s11335_s9 + $0x204] ss:$8 sm:$0xf] %vm11308_vm1, %v4318_v17  ;;  %v13465_v17 = vld [vmem:[#allocation18_spill] sm:$0xff] }
 0x321   : > { %8036 = vrsqrt.f32 %v4681_v52  ;;  %v4341_v13 = vcombine.high %v4325_v55, %v4325_v55  ;;  %v4342_v33 = vcombine.high %v4332_v30, %v4332_v30  ;;  %7411 = vst.msk [vmem:[%s11335_s9 + $0x244] ss:$8 sm:$0xf] %vm11308_vm1, %v4332_v30  ;;  %7414 = vst.msk [vmem:[%s11335_s9 + $0x304] ss:$8 sm:$0xf] %vm11308_vm1, %v4325_v55  ;;  %v4438_v58 = vmul.f32 %v8031_v50, %v13461_v19 }
 0x322   : > { %v4343_v57 = vcombine.high %v4339_v35, %v4339_v35  ;;  %7415 = vst.msk [vmem:[%s11335_s9 + $0x344] ss:$8 sm:$0xf] %vm11308_vm1, %v4339_v35  ;;  %8038 = vrsqrt.f32 %v4926_v2  ;;  %7412 = vst.msk [vmem:[%s11335_s9 + $0x284] ss:$8 sm:$0xf] %vm11308_vm1, %v4340_v62  ;;  %v4439_v4 = vmul.f32 %v8031_v50, %v13462_v1  ;;  %v4440_v44 = vmul.f32 %v8031_v50, %v13463_v7 }
 0x323   : > { %7413 = vst.msk [vmem:[%s11335_s9 + $0x2c4] ss:$8 sm:$0xf] %vm11308_vm1, %v4342_v33  ;;  %7416 = vst.msk [vmem:[%s11335_s9 + $0x384] ss:$8 sm:$0xf] %vm11308_vm1, %v4341_v13  ;;  %8040 = vrsqrt.f32 %v5172_v36  ;;  %v4441_v52 = vmul.f32 %v8031_v50, %v13464_v34 }
 0x324   : > { %7417 = vst.msk [vmem:[%s11335_s9 + $0x3c4] ss:$8 sm:$0xf] %vm11308_vm1, %v4343_v57  ;;  %v5173_v3 = vadd.f32 1e-12, %v5171_v28  ;;  %8042 = vrsqrt.f32 %v4927_v60  ;;  %v4454_v45 = vcombine.low %v4438_v58, %v4439_v4  ;;  %v4455_v40 = vcombine.high %v4438_v58, %v4439_v4  ;;  %v13466_v55 = vld [vmem:[#allocation127_spill] sm:$0xff] }
 0x325   : > { %v4456_v37 = vcombine.low %v4440_v44, %v4441_v52  ;;  %v4457_v5 = vcombine.high %v4440_v44, %v4441_v52  ;;  %v13467_v35 = vld [vmem:[#allocation59_spill] sm:$0xff]  ;;  %v13468_v62 = vld [vmem:[#allocation108_spill] sm:$0xff] }
 0x326   : > { %8044 = vrsqrt.f32 %v5173_v3  ;;  %v4464_v33 = vrot.slane %v4454_v45, %v11305_v21  ;;  %v4471_v57 = vrot.slane %v4455_v40, %v11305_v21 }
 0x327   : > { %v4478_v28 = vrot.slane %v4456_v37, %v11305_v21  ;;  %v4485_v3 = vrot.slane %v4457_v5, %v11305_v21 }
 0x329   : > { %v8033_v26 = vpop.eup %8032  ;;  %v4486_v7 = vcombine.low %v4464_v33, %v4478_v28  ;;  %v4487_v44 = vcombine.high %v4464_v33, %v4478_v28  ;;  %v4488_v34 = vcombine.low %v4471_v57, %v4485_v3  ;;  %v4489_v52 = vcombine.high %v4471_v57, %v4485_v3 }
 0x32a   : > { %v8035_v2 = vpop.eup %8034  ;;  %v4684_v36 = vmul.f32 %v8033_v26, %v13465_v17  ;;  %v4685_v30 = vmul.f32 %v8033_v26, %v13466_v55  ;;  %v4686_v60 = vmul.f32 %v8033_v26, %v13467_v35  ;;  %v4687_v13 = vmul.f32 %v8033_v26, %v13468_v62 }
 0x32b   : > { %v11708_v50 = vpop.eup %8036  ;;  %v4503_v55 = vrot.slane %v4488_v34, %v11305_v21  ;;  %v4517_v35 = vrot.slane %v4489_v52, %v11305_v21  ;;  %v13469_v52 = vld [vmem:[#allocation114_spill] sm:$0xff] }
 0x32c   : > { %v4700_v19 = vcombine.low %v4684_v36, %v4685_v30  ;;  %v4701_v58 = vcombine.high %v4684_v36, %v4685_v30  ;;  %v4702_v1 = vcombine.low %v4686_v60, %v4687_v13  ;;  %v4703_v4 = vcombine.high %v4686_v60, %v4687_v13  ;;  %v11710_v17 = vpop.eup %8038 }
 0x32d   : > { %v11716_v5 = vpop.eup %8040  ;;  %v4496_v36 = vrot.slane %v4486_v7, %v11305_v21  ;;  %v4510_v30 = vrot.slane %v4487_v44, %v11305_v21  ;;  %v4519_v3 = vcombine.high %v4503_v55, %v4503_v55  ;;  %7422 = vst.msk [vmem:[%s11335_s9 + $0x105] ss:$8 sm:$0xf] %vm11308_vm1, %v4503_v55  ;;  %7423 = vst.msk [vmem:[%s11335_s9 + $0x145] ss:$8 sm:$0xf] %vm11308_vm1, %v4517_v35 }
 0x32e   : > { %v4710_v26 = vrot.slane %v4700_v19, %v11305_v21  ;;  %v4717_v45 = vrot.slane %v4701_v58, %v11305_v21  ;;  %v4724_v40 = vrot.slane %v4702_v1, %v11305_v21  ;;  %v4731_v37 = vrot.slane %v4703_v4, %v11305_v21  ;;  %v11722_v60 = vpop.eup %8042 }
 0x32f   : > { %v4518_v28 = vcombine.high %v4496_v36, %v4496_v36  ;;  %v4520_v19 = vcombine.high %v4510_v30, %v4510_v30  ;;  %v4521_v58 = vcombine.high %v4517_v35, %v4517_v35  ;;  %7418 = vst.msk [vmem:[%s11335_s9 + $0x5] ss:$8 sm:$0xf] %vm11308_vm1, %v4496_v36  ;;  %7419 = vst.msk [vmem:[%s11335_s9 + $0x45] ss:$8 sm:$0xf] %vm11308_vm1, %v4510_v30 }
 0x330   : > { %v4732_v62 = vcombine.low %v4710_v26, %v4724_v40  ;;  %v4733_v13 = vcombine.high %v4710_v26, %v4724_v40  ;;  %v4734_v33 = vcombine.low %v4717_v45, %v4731_v37  ;;  %v4735_v57 = vcombine.high %v4717_v45, %v4731_v37  ;;  %v11736_v1 = vpop.eup %8044  ;;  %7424 = vst.msk [vmem:[%s11335_s9 + $0x185] ss:$8 sm:$0xf] %vm11308_vm1, %v4519_v3  ;;  %v13470_v45 = vld [vmem:[#allocation40_spill] sm:$0xff]  ;;  %v13471_v36 = vld [vmem:[#allocation109_spill] sm:$0xff] }
 0x331   : > { %7420 = vst.msk [vmem:[%s11335_s9 + $0x85] ss:$8 sm:$0xf] %vm11308_vm1, %v4518_v28  ;;  %7421 = vst.msk [vmem:[%s11335_s9 + $0xc5] ss:$8 sm:$0xf] %vm11308_vm1, %v4520_v19  ;;  %v4442_v26 = vmul.f32 %v8035_v2, %v13469_v52  ;;  %v4443_v40 = vmul.f32 %v8035_v2, %v13470_v45  ;;  %v4444_v37 = vmul.f32 %v8035_v2, %v10670_v22 }
 0x332   : > { %v4742_v4 = vrot.slane %v4732_v62, %v11305_v21  ;;  %v4749_v7 = vrot.slane %v4734_v33, %v11305_v21  ;;  %v4756_v44 = vrot.slane %v4733_v13, %v11305_v21  ;;  %v4763_v34 = vrot.slane %v4735_v57, %v11305_v21  ;;  %7425 = vst.msk [vmem:[%s11335_s9 + $0x1c5] ss:$8 sm:$0xf] %vm11308_vm1, %v4521_v58  ;;  %v13472_v28 = vld [vmem:[#allocation43_spill] sm:$0xff] }
 0x333   : > { %v4445_v55 = vmul.f32 %v8035_v2, %v13471_v36  ;;  %v4522_v22 = vcombine.low %v4442_v26, %v4443_v40  ;;  %v4523_v33 = vcombine.high %v4442_v26, %v4443_v40  ;;  %v4688_v3 = vmul.f32 %v11708_v50, %v13472_v28  ;;  %v13473_v19 = vld [vmem:[#allocation79_spill] sm:$0xff] }
 0x334   : > { %v4764_v30 = vcombine.high %v4742_v4, %v4742_v4  ;;  %v4765_v35 = vcombine.high %v4749_v7, %v4749_v7  ;;  %v4766_v62 = vcombine.high %v4756_v44, %v4756_v44  ;;  %v4767_v13 = vcombine.high %v4763_v34, %v4763_v34  ;;  %7434 = vst.msk [vmem:[%s11335_s9 + $0x6] ss:$8 sm:$0xf] %vm11308_vm1, %v4742_v4  ;;  %v13474_v4 = vld [vmem:[#allocation19_spill] sm:$0xff] }
 0x335   : > { %7435 = vst.msk [vmem:[%s11335_s9 + $0x46] ss:$8 sm:$0xf] %vm11308_vm1, %v4756_v44  ;;  %7438 = vst.msk [vmem:[%s11335_s9 + $0x106] ss:$8 sm:$0xf] %vm11308_vm1, %v4749_v7  ;;  %v4524_v2 = vcombine.low %v4444_v37, %v4445_v55  ;;  %v4525_v57 = vcombine.high %v4444_v37, %v4445_v55  ;;  %v4689_v58 = vmul.f32 %v11708_v50, %v13473_v19 }
 0x336   : > { %7439 = vst.msk [vmem:[%s11335_s9 + $0x146] ss:$8 sm:$0xf] %vm11308_vm1, %v4763_v34  ;;  %7436 = vst.msk [vmem:[%s11335_s9 + $0x86] ss:$8 sm:$0xf] %vm11308_vm1, %v4764_v30  ;;  %v4690_v7 = vmul.f32 %v11708_v50, %v13474_v4  ;;  %v4532_v52 = vrot.slane %v4522_v22, %v11305_v21  ;;  %v4539_v26 = vrot.slane %v4523_v33, %v11305_v21 }
 0x337   : > { %7437 = vst.msk [vmem:[%s11335_s9 + $0xc6] ss:$8 sm:$0xf] %vm11308_vm1, %v4766_v62  ;;  %7440 = vst.msk [vmem:[%s11335_s9 + $0x186] ss:$8 sm:$0xf] %vm11308_vm1, %v4765_v35  ;;  %v4546_v45 = vrot.slane %v4524_v2, %v11305_v21  ;;  %v4553_v40 = vrot.slane %v4525_v57, %v11305_v21  ;;  %v4768_v37 = vcombine.low %v4688_v3, %v4689_v58 }
 0x338   : > { %7441 = vst.msk [vmem:[%s11335_s9 + $0x1c6] ss:$8 sm:$0xf] %vm11308_vm1, %v4767_v13  ;;  %v13475_v44 = vld [vmem:[#allocation61_spill] sm:$0xff]  ;;  %v4769_v36 = vcombine.high %v4688_v3, %v4689_v58 }
 0x339   : > { %v4691_v34 = vmul.f32 %v11708_v50, %v13475_v44  ;;  %v4554_v35 = vcombine.low %v4532_v52, %v4546_v45  ;;  %v4555_v62 = vcombine.high %v4532_v52, %v4546_v45  ;;  %v4556_v13 = vcombine.low %v4539_v26, %v4553_v40  ;;  %v11802_v52 = vpop.xlane.xlu0 %5411 }
 0x33a   : > { %v4557_v28 = vcombine.high %v4539_v26, %v4553_v40  ;;  %v4778_v19 = vrot.slane %v4768_v37, %v11305_v21  ;;  %v4785_v50 = vrot.slane %v4769_v36, %v11305_v21 }
 0x33b   : > { %v4770_v55 = vcombine.low %v4690_v7, %v4691_v34  ;;  %v4771_v30 = vcombine.high %v4690_v7, %v4691_v34  ;;  %v4564_v2 = vrot.slane %v4554_v35, %v11305_v21  ;;  %v4571_v57 = vrot.slane %v4556_v13, %v11305_v21 }
 0x33c   : > { %v4578_v3 = vrot.slane %v4555_v62, %v11305_v21  ;;  %v4585_v58 = vrot.slane %v4557_v28, %v11305_v21  ;;  %v13476_v62 = vld [vmem:[#allocation36_spill] sm:$0xff] }
 0x33d   : > { %v4792_v22 = vrot.slane %v4770_v55, %v11305_v21  ;;  %v4799_v33 = vrot.slane %v4771_v30, %v11305_v21  ;;  %v4586_v26 = vcombine.high %v4564_v2, %v4564_v2  ;;  %v4587_v45 = vcombine.high %v4571_v57, %v4571_v57  ;;  %7426 = vst.msk [vmem:[%s11335_s9 + $0x205] ss:$8 sm:$0xf] %vm11308_vm1, %v4564_v2  ;;  %v13477_v28 = vld [vmem:[#allocation20_spill] sm:$0xff] }
 0x33e   : > { %v4588_v40 = vcombine.high %v4578_v3, %v4578_v3  ;;  %v4589_v37 = vcombine.high %v4585_v58, %v4585_v58  ;;  %7427 = vst.msk [vmem:[%s11335_s9 + $0x245] ss:$8 sm:$0xf] %vm11308_vm1, %v4578_v3  ;;  %7430 = vst.msk [vmem:[%s11335_s9 + $0x305] ss:$8 sm:$0xf] %vm11308_vm1, %v4571_v57  ;;  %v4930_v13 = vmul.f32 %v11710_v17, %v13476_v62 }
 0x33f   : > { %v4800_v4 = vcombine.low %v4778_v19, %v4792_v22  ;;  %v4801_v7 = vcombine.high %v4778_v19, %v4792_v22  ;;  %v4802_v44 = vcombine.low %v4785_v50, %v4799_v33  ;;  %v4803_v34 = vcombine.high %v4785_v50, %v4799_v33  ;;  %7431 = vst.msk [vmem:[%s11335_s9 + $0x345] ss:$8 sm:$0xf] %vm11308_vm1, %v4585_v58 }
 0x340   : > { %7428 = vst.msk [vmem:[%s11335_s9 + $0x285] ss:$8 sm:$0xf] %vm11308_vm1, %v4586_v26  ;;  %7429 = vst.msk [vmem:[%s11335_s9 + $0x2c5] ss:$8 sm:$0xf] %vm11308_vm1, %v4588_v40  ;;  %v4931_v19 = vmul.f32 %v11710_v17, %v13477_v28  ;;  %v4932_v50 = vmul.f32 %v11710_v17, %v10742_v39  ;;  %v4933_v22 = vmul.f32 %v11710_v17, %v10745_v32  ;;  %v11872_v26 = vpop.xlane.xlu0 %5657 }
 0x341   : > { %v4810_v36 = vrot.slane %v4800_v4, %v11305_v21  ;;  %v4817_v55 = vrot.slane %v4802_v44, %v11305_v21  ;;  %v4824_v30 = vrot.slane %v4801_v7, %v11305_v21  ;;  %v4831_v35 = vrot.slane %v4803_v34, %v11305_v21  ;;  %7432 = vst.msk [vmem:[%s11335_s9 + $0x385] ss:$8 sm:$0xf] %vm11308_vm1, %v4587_v45 }
 0x342   : > { %7433 = vst.msk [vmem:[%s11335_s9 + $0x3c5] ss:$8 sm:$0xf] %vm11308_vm1, %v4589_v37  ;;  %v4946_v39 = vcombine.low %v4930_v13, %v4931_v19  ;;  %v4947_v58 = vcombine.high %v4930_v13, %v4931_v19  ;;  %v4948_v32 = vcombine.low %v4932_v50, %v4933_v22  ;;  %v4949_v17 = vcombine.high %v4932_v50, %v4933_v22  ;;  %v11882_v50 = vpop.xlane.xlu1 %5416 }
 0x343   : > { %v4832_v33 = vcombine.high %v4810_v36, %v4810_v36  ;;  %v4833_v2 = vcombine.high %v4817_v55, %v4817_v55  ;;  %v4834_v57 = vcombine.high %v4824_v30, %v4824_v30  ;;  %v4835_v3 = vcombine.high %v4831_v35, %v4831_v35  ;;  %7442 = vst.msk [vmem:[%s11335_s9 + $0x206] ss:$8 sm:$0xf] %vm11308_vm1, %v4810_v36 }
 0x344   : > { %7443 = vst.msk [vmem:[%s11335_s9 + $0x246] ss:$8 sm:$0xf] %vm11308_vm1, %v4824_v30  ;;  %7446 = vst.msk [vmem:[%s11335_s9 + $0x306] ss:$8 sm:$0xf] %vm11308_vm1, %v4817_v55  ;;  %v5176_v4 = vmul.f32 %v11716_v5, %v10749_v24  ;;  %v5177_v7 = vmul.f32 %v11716_v5, %v10752_v46  ;;  %v5178_v44 = vmul.f32 %v11716_v5, %v10774_v11 }
 0x345   : > { %7447 = vst.msk [vmem:[%s11335_s9 + $0x346] ss:$8 sm:$0xf] %vm11308_vm1, %v4831_v35  ;;  %7444 = vst.msk [vmem:[%s11335_s9 + $0x286] ss:$8 sm:$0xf] %vm11308_vm1, %v4832_v33  ;;  %v5179_v34 = vmul.f32 %v11716_v5, %v10781_v8  ;;  %v4956_v45 = vrot.slane %v4946_v39, %v11305_v21  ;;  %v4963_v40 = vrot.slane %v4947_v58, %v11305_v21 }
 0x346   : > { %7445 = vst.msk [vmem:[%s11335_s9 + $0x2c6] ss:$8 sm:$0xf] %vm11308_vm1, %v4834_v57  ;;  %7448 = vst.msk [vmem:[%s11335_s9 + $0x386] ss:$8 sm:$0xf] %vm11308_vm1, %v4833_v2  ;;  %v4970_v37 = vrot.slane %v4948_v32, %v11305_v21  ;;  %v4977_v36 = vrot.slane %v4949_v17, %v11305_v21  ;;  %v5192_v24 = vcombine.low %v5176_v4, %v5177_v7  ;;  %v11888_v17 = vpop.xlane.xlu0 %5903 }
 0x347   : > { %7449 = vst.msk [vmem:[%s11335_s9 + $0x3c6] ss:$8 sm:$0xf] %vm11308_vm1, %v4835_v3  ;;  %v5193_v55 = vcombine.high %v5176_v4, %v5177_v7  ;;  %v5194_v30 = vcombine.low %v5178_v44, %v5179_v34  ;;  %v5195_v46 = vcombine.high %v5178_v44, %v5179_v34 }
 0x348   : > { %v4978_v35 = vcombine.low %v4956_v45, %v4970_v37  ;;  %v4979_v62 = vcombine.high %v4956_v45, %v4970_v37  ;;  %v4980_v11 = vcombine.low %v4963_v40, %v4977_v36  ;;  %v4981_v13 = vcombine.high %v4963_v40, %v4977_v36 }
 0x349   : > { %v5202_v8 = vrot.slane %v5192_v24, %v11305_v21  ;;  %v5209_v5 = vrot.slane %v5193_v55, %v11305_v21  ;;  %v5216_v28 = vrot.slane %v5194_v30, %v11305_v21  ;;  %v5223_v19 = vrot.slane %v5195_v46, %v11305_v21  ;;  %v13478_v24 = vld [vmem:[#allocation111_spill] sm:$0xff]  ;;  %v13479_v30 = vld [vmem:[#allocation45_spill] sm:$0xff] }
 0x34a   : > { %v4988_v22 = vrot.slane %v4978_v35, %v11305_v21  ;;  %v4995_v33 = vrot.slane %v4980_v11, %v11305_v21  ;;  %v5002_v2 = vrot.slane %v4979_v62, %v11305_v21  ;;  %v5009_v57 = vrot.slane %v4981_v13, %v11305_v21 }
 0x34b   : > { %v5224_v3 = vcombine.low %v5202_v8, %v5216_v28  ;;  %v5225_v39 = vcombine.high %v5202_v8, %v5216_v28  ;;  %v5226_v58 = vcombine.low %v5209_v5, %v5223_v19  ;;  %v5227_v32 = vcombine.high %v5209_v5, %v5223_v19 }
 0x34c   : > { %v5010_v4 = vcombine.high %v4988_v22, %v4988_v22  ;;  %v5011_v7 = vcombine.high %v4995_v33, %v4995_v33  ;;  %v5012_v44 = vcombine.high %v5002_v2, %v5002_v2  ;;  %v5013_v34 = vcombine.high %v5009_v57, %v5009_v57  ;;  %7450 = vst.msk [vmem:[%s11335_s9 + $0x7] ss:$8 sm:$0xf] %vm11308_vm1, %v4988_v22  ;;  %v13480_v22 = vld [vmem:[#allocation24_spill] sm:$0xff] }
 0x34d   : > { %7451 = vst.msk [vmem:[%s11335_s9 + $0x47] ss:$8 sm:$0xf] %vm11308_vm1, %v5002_v2  ;;  %7454 = vst.msk [vmem:[%s11335_s9 + $0x107] ss:$8 sm:$0xf] %vm11308_vm1, %v4995_v33  ;;  %v5234_v45 = vrot.slane %v5224_v3, %v11305_v21  ;;  %v5241_v40 = vrot.slane %v5226_v58, %v11305_v21  ;;  %v5248_v37 = vrot.slane %v5225_v39, %v11305_v21 }
 0x34e   : > { %7455 = vst.msk [vmem:[%s11335_s9 + $0x147] ss:$8 sm:$0xf] %vm11308_vm1, %v5009_v57  ;;  %v5255_v36 = vrot.slane %v5227_v32, %v11305_v21  ;;  %7452 = vst.msk [vmem:[%s11335_s9 + $0x87] ss:$8 sm:$0xf] %vm11308_vm1, %v5010_v4  ;;  %v4934_v55 = vmul.f32 %v11722_v60, %v13478_v24  ;;  %v4935_v46 = vmul.f32 %v11722_v60, %v13479_v30  ;;  %v6150_v4 = vpop.xlane.xlu0 %6149 }
 0x34f   : > { %7453 = vst.msk [vmem:[%s11335_s9 + $0xc7] ss:$8 sm:$0xf] %vm11308_vm1, %v5012_v44  ;;  %7456 = vst.msk [vmem:[%s11335_s9 + $0x187] ss:$8 sm:$0xf] %vm11308_vm1, %v5011_v7  ;;  %v4936_v35 = vmul.f32 %v11722_v60, %v10814_v59  ;;  %v4937_v62 = vmul.f32 %v11722_v60, %v10817_v43  ;;  %v5256_v11 = vcombine.high %v5234_v45, %v5234_v45  ;;  %v11938_v59 = vpop.xlane.xlu1 %5662 }
 0x350   : > { %7457 = vst.msk [vmem:[%s11335_s9 + $0x1c7] ss:$8 sm:$0xf] %vm11308_vm1, %v5013_v34  ;;  %v5257_v13 = vcombine.high %v5241_v40, %v5241_v40  ;;  %v5258_v8 = vcombine.high %v5248_v37, %v5248_v37  ;;  %v5259_v5 = vcombine.high %v5255_v36, %v5255_v36  ;;  %7466 = vst.msk [vmem:[%s11335_s9 + $0x20] ss:$8 sm:$0xf] %vm11308_vm1, %v5234_v45 }
 0x351   : > { %7467 = vst.msk [vmem:[%s11335_s9 + $0x60] ss:$8 sm:$0xf] %vm11308_vm1, %v5248_v37  ;;  %7470 = vst.msk [vmem:[%s11335_s9 + $0x120] ss:$8 sm:$0xf] %vm11308_vm1, %v5241_v40  ;;  %v5014_v43 = vcombine.low %v4934_v55, %v4935_v46  ;;  %v5015_v60 = vcombine.high %v4934_v55, %v4935_v46  ;;  %v5016_v28 = vcombine.low %v4936_v35, %v4937_v62 }
 0x352   : > { %7471 = vst.msk [vmem:[%s11335_s9 + $0x160] ss:$8 sm:$0xf] %vm11308_vm1, %v5255_v36  ;;  %v5017_v19 = vcombine.high %v4936_v35, %v4937_v62  ;;  %7468 = vst.msk [vmem:[%s11335_s9 + $0xa0] ss:$8 sm:$0xf] %vm11308_vm1, %v5256_v11  ;;  %v5180_v33 = vmul.f32 %v11736_v1, %v13480_v22 }
 0x353   : > { %7469 = vst.msk [vmem:[%s11335_s9 + $0xe0] ss:$8 sm:$0xf] %vm11308_vm1, %v5258_v8  ;;  %7472 = vst.msk [vmem:[%s11335_s9 + $0x1a0] ss:$8 sm:$0xf] %vm11308_vm1, %v5257_v13  ;;  %v5024_v7 = vrot.slane %v5014_v43, %v11305_v21  ;;  %v5031_v44 = vrot.slane %v5015_v60, %v11305_v21  ;;  %v5038_v34 = vrot.slane %v5016_v28, %v11305_v21  ;;  %v5909_v8 = vpop.xlane.xlu1 %5908 }
 0x354   : > { %7473 = vst.msk [vmem:[%s11335_s9 + $0x1e0] ss:$8 sm:$0xf] %vm11308_vm1, %v5259_v5  ;;  %v13481_v2 = vld [vmem:[#allocation112_spill] sm:$0xff]  ;;  %v13482_v3 = vld [vmem:[#allocation113_spill] sm:$0xff]  ;;  %v13483_v58 = vld [vmem:[#allocation22_spill] sm:$0xff]  ;;  %v5045_v45 = vrot.slane %v5017_v19, %v11305_v21 }
 0x355   : > { %v5181_v57 = vmul.f32 %v11736_v1, %v13481_v2  ;;  %v5182_v39 = vmul.f32 %v11736_v1, %v13482_v3  ;;  %v5183_v32 = vmul.f32 %v11736_v1, %v13483_v58  ;;  %v5046_v55 = vcombine.low %v5024_v7, %v5038_v34 }
 0x356   : > { %v5047_v30 = vcombine.high %v5024_v7, %v5038_v34  ;;  %v5048_v46 = vcombine.low %v5031_v44, %v5045_v45  ;;  %v5049_v35 = vcombine.high %v5031_v44, %v5045_v45 }
 0x357   : > { %v5260_v40 = vcombine.low %v5180_v33, %v5181_v57  ;;  %v5261_v37 = vcombine.high %v5180_v33, %v5181_v57  ;;  %v5262_v36 = vcombine.low %v5182_v39, %v5183_v32  ;;  %v5263_v24 = vcombine.high %v5182_v39, %v5183_v32  ;;  %v6396_v57 = vpop.xlane.xlu0 %6395 }
 0x358   : > { %v5056_v5 = vrot.slane %v5046_v55, %v11305_v21  ;;  %v5063_v43 = vrot.slane %v5048_v46, %v11305_v21  ;;  %v5070_v60 = vrot.slane %v5047_v30, %v11305_v21  ;;  %v5077_v28 = vrot.slane %v5049_v35, %v11305_v21 }
 0x359   : > { %v5270_v62 = vrot.slane %v5260_v40, %v11305_v21  ;;  %v5277_v1 = vrot.slane %v5261_v37, %v11305_v21  ;;  %v5284_v11 = vrot.slane %v5262_v36, %v11305_v21  ;;  %v5291_v13 = vrot.slane %v5263_v24, %v11305_v21 }
 0x35a   : > { %v5078_v3 = vcombine.high %v5056_v5, %v5056_v5  ;;  %v5079_v39 = vcombine.high %v5063_v43, %v5063_v43  ;;  %v5080_v58 = vcombine.high %v5070_v60, %v5070_v60  ;;  %v5081_v32 = vcombine.high %v5077_v28, %v5077_v28  ;;  %7458 = vst.msk [vmem:[%s11335_s9 + $0x207] ss:$8 sm:$0xf] %vm11308_vm1, %v5056_v5 }
 0x35b   : > { %v5292_v19 = vcombine.low %v5270_v62, %v5284_v11  ;;  %v5293_v22 = vcombine.high %v5270_v62, %v5284_v11  ;;  %v5294_v33 = vcombine.low %v5277_v1, %v5291_v13  ;;  %v5295_v2 = vcombine.high %v5277_v1, %v5291_v13  ;;  %7459 = vst.msk [vmem:[%s11335_s9 + $0x247] ss:$8 sm:$0xf] %vm11308_vm1, %v5070_v60  ;;  %v6642_v62 = vpop.xlane.xlu0 %6641 }
 0x35c   : > { %7462 = vst.msk [vmem:[%s11335_s9 + $0x307] ss:$8 sm:$0xf] %vm11308_vm1, %v5063_v43  ;;  %7463 = vst.msk [vmem:[%s11335_s9 + $0x347] ss:$8 sm:$0xf] %vm11308_vm1, %v5077_v28 }
 0x35d   : > { %v5302_v7 = vrot.slane %v5292_v19, %v11305_v21  ;;  %v5309_v44 = vrot.slane %v5294_v33, %v11305_v21  ;;  %v5316_v34 = vrot.slane %v5293_v22, %v11305_v21  ;;  %v5323_v45 = vrot.slane %v5295_v2, %v11305_v21  ;;  %7460 = vst.msk [vmem:[%s11335_s9 + $0x287] ss:$8 sm:$0xf] %vm11308_vm1, %v5078_v3  ;;  %v13484_v19 = vld [vmem:[#allocation26_spill] sm:$0xff]  ;;  %v13485_v22 = vld [vmem:[#allocation25_spill] sm:$0xff] }
 0x35e   : > { %7461 = vst.msk [vmem:[%s11335_s9 + $0x2c7] ss:$8 sm:$0xf] %vm11308_vm1, %v5080_v58  ;;  %7464 = vst.msk [vmem:[%s11335_s9 + $0x387] ss:$8 sm:$0xf] %vm11308_vm1, %v5079_v39 }
 0x35f   : > { %7465 = vst.msk [vmem:[%s11335_s9 + $0x3c7] ss:$8 sm:$0xf] %vm11308_vm1, %v5081_v32  ;;  %v5418_v40 = vadd.f32 1e-12, %v11802_v52  ;;  %v5324_v24 = vcombine.high %v5302_v7, %v5302_v7  ;;  %v5325_v55 = vcombine.high %v5309_v44, %v5309_v44  ;;  %v5326_v30 = vcombine.high %v5316_v34, %v5316_v34  ;;  %v6155_v52 = vpop.xlane.xlu1 %6154  ;;  %v6884_v43 = vpop.xlane.xlu0 %6883 }
 0x360   : > { %v5664_v37 = vadd.f32 1e-12, %v11872_v26  ;;  %v5419_v36 = vadd.f32 1e-12, %v11882_v50  ;;  %v5327_v46 = vcombine.high %v5323_v45, %v5323_v45  ;;  %v5665_v26 = vadd.f32 1e-12, %v11938_v59 }
 0x361   : > { %7474 = vst.msk [vmem:[%s11335_s9 + $0x220] ss:$8 sm:$0xf] %vm11308_vm1, %v5302_v7  ;;  %7475 = vst.msk [vmem:[%s11335_s9 + $0x260] ss:$8 sm:$0xf] %vm11308_vm1, %v5316_v34  ;;  %8046 = vrsqrt.f32 %v5418_v40 }
 0x362   : > { %7478 = vst.msk [vmem:[%s11335_s9 + $0x320] ss:$8 sm:$0xf] %vm11308_vm1, %v5309_v44  ;;  %7479 = vst.msk [vmem:[%s11335_s9 + $0x360] ss:$8 sm:$0xf] %vm11308_vm1, %v5323_v45  ;;  %8048 = vrsqrt.f32 %v5664_v37 }
 0x363   : > { %v5910_v50 = vadd.f32 1e-12, %v11888_v17  ;;  %7476 = vst.msk [vmem:[%s11335_s9 + $0x2a0] ss:$8 sm:$0xf] %vm11308_vm1, %v5324_v24  ;;  %8050 = vrsqrt.f32 %v5419_v36  ;;  %v6401_v13 = vpop.xlane.xlu1 %6400  ;;  %v13486_v7 = vld [vmem:[#allocation44_spill] sm:$0xff] }
 0x364   : > { %7477 = vst.msk [vmem:[%s11335_s9 + $0x2e0] ss:$8 sm:$0xf] %vm11308_vm1, %v5326_v30  ;;  %7480 = vst.msk [vmem:[%s11335_s9 + $0x3a0] ss:$8 sm:$0xf] %vm11308_vm1, %v5325_v55  ;;  %8052 = vrsqrt.f32 %v5665_v26 }
 0x365   : > { %7481 = vst.msk [vmem:[%s11335_s9 + $0x3e0] ss:$8 sm:$0xf] %vm11308_vm1, %v5327_v46  ;;  %v6156_v35 = vadd.f32 1e-12, %v6150_v4  ;;  %8054 = vrsqrt.f32 %v5910_v50 }
 0x366   : > { %v5911_v1 = vadd.f32 1e-12, %v5909_v8  ;;  %v6157_v59 = vadd.f32 1e-12, %v6155_v52  ;;  %v6402_v17 = vadd.f32 1e-12, %v6396_v57 }
 0x367   : > { %8056 = vrsqrt.f32 %v6156_v35  ;;  %v6648_v11 = vadd.f32 1e-12, %v6642_v62  ;;  %v6403_v5 = vadd.f32 1e-12, %v6401_v13  ;;  %v12029_v28 = vadd.f32 1e-12, %v6884_v43 }
 0x368   : > { %8058 = vrsqrt.f32 %v5911_v1 }
 0x369   : > { %8060 = vrsqrt.f32 %v6157_v59 }
 0x36a   : > { %8062 = vrsqrt.f32 %v6402_v17 }
 0x36b   : > { %8064 = vrsqrt.f32 %v6648_v11  ;;  %v8047_v60 = vpop.eup %8046 }
 0x36c   : > { %8066 = vrsqrt.f32 %v6403_v5  ;;  %v8049_v4 = vpop.eup %8048  ;;  %v5422_v8 = vmul.f32 %v8047_v60, %v13484_v19  ;;  %v5423_v33 = vmul.f32 %v8047_v60, %v13485_v22  ;;  %v5424_v2 = vmul.f32 %v8047_v60, %v10886_v63 }
 0x36d   : > { %v5425_v57 = vmul.f32 %v8047_v60, %v10889_v49  ;;  %v12035_v3 = vpop.eup %8050  ;;  %v5668_v39 = vmul.f32 %v8049_v4, %v10893_v47  ;;  %v5669_v58 = vmul.f32 %v8049_v4, %v10896_v9  ;;  %v5670_v32 = vmul.f32 %v8049_v4, %v10918_v56 }
 0x36e   : > { %v5671_v44 = vmul.f32 %v8049_v4, %v13486_v7  ;;  %v12041_v34 = vpop.eup %8052  ;;  %v5438_v45 = vcombine.low %v5422_v8, %v5423_v33  ;;  %v5439_v40 = vcombine.high %v5422_v8, %v5423_v33  ;;  %8068 = vrsqrt.f32 %v12029_v28 }
 0x36f   : > { %v5440_v37 = vcombine.low %v5424_v2, %v5425_v57  ;;  %v5441_v36 = vcombine.high %v5424_v2, %v5425_v57  ;;  %v12043_v24 = vpop.eup %8054  ;;  %v5684_v63 = vcombine.low %v5668_v39, %v5669_v58  ;;  %v5685_v49 = vcombine.high %v5668_v39, %v5669_v58 }
 0x370   : > { %v5686_v55 = vcombine.low %v5670_v32, %v5671_v44  ;;  %v5687_v30 = vcombine.high %v5670_v32, %v5671_v44  ;;  %v5448_v47 = vrot.slane %v5438_v45, %v11305_v21  ;;  %v5455_v9 = vrot.slane %v5439_v40, %v11305_v21 }
 0x371   : > { %v12045_v46 = vpop.eup %8056  ;;  %v5462_v56 = vrot.slane %v5440_v37, %v11305_v21  ;;  %v5469_v52 = vrot.slane %v5441_v36, %v11305_v21  ;;  %v5694_v50 = vrot.slane %v5684_v63, %v11305_v21  ;;  %v5701_v35 = vrot.slane %v5685_v49, %v11305_v21 }
 0x372   : > { %v12051_v26 = vpop.eup %8058  ;;  %v5708_v62 = vrot.slane %v5686_v55, %v11305_v21  ;;  %v5715_v1 = vrot.slane %v5687_v30, %v11305_v21 }
 0x373   : > { %v12057_v59 = vpop.eup %8060  ;;  %v5470_v17 = vcombine.low %v5448_v47, %v5462_v56  ;;  %v5471_v11 = vcombine.high %v5448_v47, %v5462_v56  ;;  %v5472_v13 = vcombine.low %v5455_v9, %v5469_v52  ;;  %v5473_v5 = vcombine.high %v5455_v9, %v5469_v52  ;;  %v13487_v9 = vld [vmem:[#allocation47_spill] sm:$0xff]  ;;  %v13488_v52 = vld [vmem:[#allocation66_spill] sm:$0xff] }
 0x374   : > { %v12059_v43 = vpop.eup %8062  ;;  %v5716_v60 = vcombine.low %v5694_v50, %v5708_v62  ;;  %v5717_v4 = vcombine.high %v5694_v50, %v5708_v62  ;;  %v5718_v19 = vcombine.low %v5701_v35, %v5715_v1  ;;  %v5719_v8 = vcombine.high %v5701_v35, %v5715_v1  ;;  %v13489_v1 = vld [vmem:[#allocation46_spill] sm:$0xff] }
 0x375   : > { %v12061_v22 = vpop.eup %8064  ;;  %v5480_v33 = vrot.slane %v5470_v17, %v11305_v21  ;;  %v5487_v2 = vrot.slane %v5472_v13, %v11305_v21  ;;  %v5494_v57 = vrot.slane %v5471_v11, %v11305_v21  ;;  %v5501_v39 = vrot.slane %v5473_v5, %v11305_v21  ;;  %v13490_v11 = vld [vmem:[#allocation64_spill] sm:$0xff]  ;;  %v13491_v13 = vld [vmem:[#allocation115_spill] sm:$0xff] }
 0x376   : > { %v12067_v58 = vpop.eup %8066  ;;  %v5726_v32 = vrot.slane %v5716_v60, %v11305_v21  ;;  %v5733_v7 = vrot.slane %v5718_v19, %v11305_v21  ;;  %v5740_v44 = vrot.slane %v5717_v4, %v11305_v21  ;;  %v5747_v45 = vrot.slane %v5719_v8, %v11305_v21 }
 0x377   : > { %v5502_v40 = vcombine.high %v5480_v33, %v5480_v33  ;;  %v5503_v37 = vcombine.high %v5487_v2, %v5487_v2  ;;  %v5504_v36 = vcombine.high %v5494_v57, %v5494_v57  ;;  %v5505_v63 = vcombine.high %v5501_v39, %v5501_v39  ;;  %7482 = vst.msk [vmem:[%s11335_s9 + $0x21] ss:$8 sm:$0xf] %vm11308_vm1, %v5480_v33 }
 0x378   : > { %7483 = vst.msk [vmem:[%s11335_s9 + $0x61] ss:$8 sm:$0xf] %vm11308_vm1, %v5494_v57  ;;  %7486 = vst.msk [vmem:[%s11335_s9 + $0x121] ss:$8 sm:$0xf] %vm11308_vm1, %v5487_v2  ;;  %v5748_v49 = vcombine.high %v5726_v32, %v5726_v32  ;;  %v5749_v55 = vcombine.high %v5733_v7, %v5733_v7  ;;  %v5750_v30 = vcombine.high %v5740_v44, %v5740_v44 }
 0x379   : > { %7487 = vst.msk [vmem:[%s11335_s9 + $0x161] ss:$8 sm:$0xf] %vm11308_vm1, %v5501_v39  ;;  %v5751_v47 = vcombine.high %v5747_v45, %v5747_v45  ;;  %7498 = vst.msk [vmem:[%s11335_s9 + $0x22] ss:$8 sm:$0xf] %vm11308_vm1, %v5726_v32  ;;  %v5426_v56 = vmul.f32 %v12035_v3, %v13487_v9  ;;  %v5427_v50 = vmul.f32 %v12035_v3, %v13488_v52 }
 0x37a   : > { %7499 = vst.msk [vmem:[%s11335_s9 + $0x62] ss:$8 sm:$0xf] %vm11308_vm1, %v5740_v44  ;;  %7502 = vst.msk [vmem:[%s11335_s9 + $0x122] ss:$8 sm:$0xf] %vm11308_vm1, %v5733_v7  ;;  %v5428_v35 = vmul.f32 %v12035_v3, %v10958_v23  ;;  %v5429_v62 = vmul.f32 %v12035_v3, %v10961_v12  ;;  %v5672_v17 = vmul.f32 %v12041_v34, %v13489_v1 }
 0x37b   : > { %7503 = vst.msk [vmem:[%s11335_s9 + $0x162] ss:$8 sm:$0xf] %vm11308_vm1, %v5747_v45  ;;  %7484 = vst.msk [vmem:[%s11335_s9 + $0xa1] ss:$8 sm:$0xf] %vm11308_vm1, %v5502_v40  ;;  %v5673_v23 = vmul.f32 %v12041_v34, %v13490_v11  ;;  %v5674_v12 = vmul.f32 %v12041_v34, %v13491_v13  ;;  %v5506_v60 = vcombine.low %v5426_v56, %v5427_v50 }
 0x37c   : > { %7485 = vst.msk [vmem:[%s11335_s9 + $0xe1] ss:$8 sm:$0xf] %vm11308_vm1, %v5504_v36  ;;  %7488 = vst.msk [vmem:[%s11335_s9 + $0x1a1] ss:$8 sm:$0xf] %vm11308_vm1, %v5503_v37  ;;  %v5507_v4 = vcombine.high %v5426_v56, %v5427_v50  ;;  %v5508_v19 = vcombine.low %v5428_v35, %v5429_v62  ;;  %v5509_v8 = vcombine.high %v5428_v35, %v5429_v62 }
 0x37d   : > { %7489 = vst.msk [vmem:[%s11335_s9 + $0x1e1] ss:$8 sm:$0xf] %vm11308_vm1, %v5505_v63  ;;  %7500 = vst.msk [vmem:[%s11335_s9 + $0xa2] ss:$8 sm:$0xf] %vm11308_vm1, %v5748_v49  ;;  %v5752_v33 = vcombine.low %v5672_v17, %v5673_v23  ;;  %v5753_v2 = vcombine.high %v5672_v17, %v5673_v23  ;;  %v5516_v32 = vrot.slane %v5506_v60, %v11305_v21 }
 0x37e   : > { %7501 = vst.msk [vmem:[%s11335_s9 + $0xe2] ss:$8 sm:$0xf] %vm11308_vm1, %v5750_v30  ;;  %7504 = vst.msk [vmem:[%s11335_s9 + $0x1a2] ss:$8 sm:$0xf] %vm11308_vm1, %v5749_v55  ;;  %v5523_v7 = vrot.slane %v5507_v4, %v11305_v21  ;;  %v5530_v44 = vrot.slane %v5508_v19, %v11305_v21  ;;  %v5537_v45 = vrot.slane %v5509_v8, %v11305_v21 }
 0x37f   : > { %7505 = vst.msk [vmem:[%s11335_s9 + $0x1e2] ss:$8 sm:$0xf] %vm11308_vm1, %v5751_v47  ;;  %v13492_v3 = vld [vmem:[#allocation57_spill] sm:$0xff]  ;;  %v5762_v40 = vrot.slane %v5752_v33, %v11305_v21 }
 0x380   : > { %v5675_v5 = vmul.f32 %v12041_v34, %v13492_v3  ;;  %v5769_v34 = vrot.slane %v5753_v2, %v11305_v21  ;;  %v5538_v63 = vcombine.low %v5516_v32, %v5530_v44  ;;  %v5539_v49 = vcombine.high %v5516_v32, %v5530_v44  ;;  %v13493_v2 = vld [vmem:[#allocation49_spill] sm:$0xff] }
 0x381   : > { %v5540_v55 = vcombine.low %v5523_v7, %v5537_v45  ;;  %v5541_v30 = vcombine.high %v5523_v7, %v5537_v45  ;;  %v5916_v7 = vmul.f32 %v12043_v24, %v11030_v0  ;;  %v5917_v44 = vmul.f32 %v12043_v24, %v11033_v61 }
 0x382   : > { %v5754_v57 = vcombine.low %v5674_v12, %v5675_v5  ;;  %v5755_v39 = vcombine.high %v5674_v12, %v5675_v5  ;;  %v5548_v50 = vrot.slane %v5538_v63, %v11305_v21  ;;  %v5562_v62 = vrot.slane %v5539_v49, %v11305_v21 }
 0x383   : > { %v5555_v35 = vrot.slane %v5540_v55, %v11305_v21  ;;  %v5569_v1 = vrot.slane %v5541_v30, %v11305_v21  ;;  %v6160_v45 = vmul.f32 %v12045_v46, %v11037_v42  ;;  %v6161_v0 = vmul.f32 %v12045_v46, %v11040_v53 }
 0x384   : > { %v5776_v37 = vrot.slane %v5754_v57, %v11305_v21  ;;  %v5783_v36 = vrot.slane %v5755_v39, %v11305_v21  ;;  %v5570_v12 = vcombine.high %v5548_v50, %v5548_v50  ;;  %v5572_v5 = vcombine.high %v5562_v62, %v5562_v62  ;;  %7490 = vst.msk [vmem:[%s11335_s9 + $0x221] ss:$8 sm:$0xf] %vm11308_vm1, %v5548_v50  ;;  %v13494_v39 = vld [vmem:[#allocation77_spill] sm:$0xff] }
 0x385   : > { %v5571_v3 = vcombine.high %v5555_v35, %v5555_v35  ;;  %v5573_v60 = vcombine.high %v5569_v1, %v5569_v1  ;;  %7491 = vst.msk [vmem:[%s11335_s9 + $0x261] ss:$8 sm:$0xf] %vm11308_vm1, %v5562_v62  ;;  %7494 = vst.msk [vmem:[%s11335_s9 + $0x321] ss:$8 sm:$0xf] %vm11308_vm1, %v5555_v35  ;;  %v5914_v57 = vmul.f32 %v12043_v24, %v13493_v2 }
 0x386   : > { %v5784_v47 = vcombine.low %v5762_v40, %v5776_v37  ;;  %v5785_v9 = vcombine.high %v5762_v40, %v5776_v37  ;;  %v5786_v56 = vcombine.low %v5769_v34, %v5783_v36  ;;  %v5787_v52 = vcombine.high %v5769_v34, %v5783_v36  ;;  %7495 = vst.msk [vmem:[%s11335_s9 + $0x361] ss:$8 sm:$0xf] %vm11308_vm1, %v5569_v1 }
 0x387   : > { %7492 = vst.msk [vmem:[%s11335_s9 + $0x2a1] ss:$8 sm:$0xf] %vm11308_vm1, %v5570_v12  ;;  %7493 = vst.msk [vmem:[%s11335_s9 + $0x2e1] ss:$8 sm:$0xf] %vm11308_vm1, %v5572_v5  ;;  %v5915_v32 = vmul.f32 %v12043_v24, %v13494_v39  ;;  %v6162_v61 = vmul.f32 %v12045_v46, %v11062_v18  ;;  %v6163_v24 = vmul.f32 %v12045_v46, %v11069_v51 }
 0x388   : > { %v5794_v17 = vrot.slane %v5784_v47, %v11305_v21  ;;  %v5801_v11 = vrot.slane %v5786_v56, %v11305_v21  ;;  %v5808_v23 = vrot.slane %v5785_v9, %v11305_v21  ;;  %v5815_v13 = vrot.slane %v5787_v52, %v11305_v21  ;;  %7496 = vst.msk [vmem:[%s11335_s9 + $0x3a1] ss:$8 sm:$0xf] %vm11308_vm1, %v5571_v3 }
 0x389   : > { %7497 = vst.msk [vmem:[%s11335_s9 + $0x3e1] ss:$8 sm:$0xf] %vm11308_vm1, %v5573_v60  ;;  %v5930_v40 = vcombine.low %v5914_v57, %v5915_v32  ;;  %v5931_v34 = vcombine.high %v5914_v57, %v5915_v32  ;;  %v5932_v37 = vcombine.low %v5916_v7, %v5917_v44  ;;  %v5933_v36 = vcombine.high %v5916_v7, %v5917_v44 }
 0x38a   : > { %v5816_v4 = vcombine.high %v5794_v17, %v5794_v17  ;;  %v5817_v19 = vcombine.high %v5801_v11, %v5801_v11  ;;  %v5818_v8 = vcombine.high %v5808_v23, %v5808_v23  ;;  %v5819_v33 = vcombine.high %v5815_v13, %v5815_v13  ;;  %7506 = vst.msk [vmem:[%s11335_s9 + $0x222] ss:$8 sm:$0xf] %vm11308_vm1, %v5794_v17 }
 0x38b   : > { %7507 = vst.msk [vmem:[%s11335_s9 + $0x262] ss:$8 sm:$0xf] %vm11308_vm1, %v5808_v23  ;;  %7510 = vst.msk [vmem:[%s11335_s9 + $0x322] ss:$8 sm:$0xf] %vm11308_vm1, %v5801_v11  ;;  %v6176_v63 = vcombine.low %v6160_v45, %v6161_v0  ;;  %v6177_v49 = vcombine.high %v6160_v45, %v6161_v0  ;;  %v6178_v55 = vcombine.low %v6162_v61, %v6163_v24 }
 0x38c   : > { %7511 = vst.msk [vmem:[%s11335_s9 + $0x362] ss:$8 sm:$0xf] %vm11308_vm1, %v5815_v13  ;;  %7508 = vst.msk [vmem:[%s11335_s9 + $0x2a2] ss:$8 sm:$0xf] %vm11308_vm1, %v5816_v4  ;;  %v6179_v30 = vcombine.high %v6162_v61, %v6163_v24  ;;  %v5940_v47 = vrot.slane %v5930_v40, %v11305_v21  ;;  %v5947_v42 = vrot.slane %v5931_v34, %v11305_v21 }
 0x38d   : > { %7509 = vst.msk [vmem:[%s11335_s9 + $0x2e2] ss:$8 sm:$0xf] %vm11308_vm1, %v5818_v8  ;;  %7512 = vst.msk [vmem:[%s11335_s9 + $0x3a2] ss:$8 sm:$0xf] %vm11308_vm1, %v5817_v19  ;;  %v5954_v53 = vrot.slane %v5932_v37, %v11305_v21  ;;  %v5961_v9 = vrot.slane %v5933_v36, %v11305_v21  ;;  %v6186_v18 = vrot.slane %v6176_v63, %v11305_v21 }
 0x38e   : > { %7513 = vst.msk [vmem:[%s11335_s9 + $0x3e2] ss:$8 sm:$0xf] %vm11308_vm1, %v5819_v33  ;;  %v6193_v51 = vrot.slane %v6177_v49, %v11305_v21  ;;  %v6200_v46 = vrot.slane %v6178_v55, %v11305_v21  ;;  %v6207_v56 = vrot.slane %v6179_v30, %v11305_v21  ;;  %v5918_v0 = vmul.f32 %v12051_v26, %v11075_v14  ;;  %v13495_v40 = vld [vmem:[#allocation60_spill] sm:$0xff]  ;;  %v13496_v14 = vld [vmem:[#allocation103_spill] sm:$0xff]  ;;  %v13497_v37 = vld [vmem:[#allocation41_spill] sm:$0xff] }
 0x38f   : > { %v5962_v52 = vcombine.low %v5940_v47, %v5954_v53  ;;  %v5963_v50 = vcombine.high %v5940_v47, %v5954_v53  ;;  %v5964_v35 = vcombine.low %v5947_v42, %v5961_v9  ;;  %v5965_v62 = vcombine.high %v5947_v42, %v5961_v9  ;;  %v13498_v36 = vld [vmem:[#allocation104_spill] sm:$0xff]  ;;  %v13499_v63 = vld [vmem:[#allocation27_spill] sm:$0xff] }
 0x390   : > { %v6208_v1 = vcombine.low %v6186_v18, %v6200_v46  ;;  %v6209_v17 = vcombine.high %v6186_v18, %v6200_v46  ;;  %v6210_v11 = vcombine.low %v6193_v51, %v6207_v56  ;;  %v6211_v23 = vcombine.high %v6193_v51, %v6207_v56 }
 0x391   : > { %v5972_v13 = vrot.slane %v5962_v52, %v11305_v21  ;;  %v5979_v12 = vrot.slane %v5964_v35, %v11305_v21  ;;  %v5986_v3 = vrot.slane %v5963_v50, %v11305_v21  ;;  %v5993_v5 = vrot.slane %v5965_v62, %v11305_v21 }
 0x392   : > { %v6218_v60 = vrot.slane %v6208_v1, %v11305_v21  ;;  %v6225_v4 = vrot.slane %v6210_v11, %v11305_v21  ;;  %v6232_v19 = vrot.slane %v6209_v17, %v11305_v21  ;;  %v6239_v8 = vrot.slane %v6211_v23, %v11305_v21 }
 0x393   : > { %v5994_v33 = vcombine.high %v5972_v13, %v5972_v13  ;;  %v5995_v2 = vcombine.high %v5979_v12, %v5979_v12  ;;  %v5996_v57 = vcombine.high %v5986_v3, %v5986_v3  ;;  %v5997_v39 = vcombine.high %v5993_v5, %v5993_v5  ;;  %7514 = vst.msk [vmem:[%s11335_s9 + $0x23] ss:$8 sm:$0xf] %vm11308_vm1, %v5972_v13 }
 0x394   : > { %7515 = vst.msk [vmem:[%s11335_s9 + $0x63] ss:$8 sm:$0xf] %vm11308_vm1, %v5986_v3  ;;  %7518 = vst.msk [vmem:[%s11335_s9 + $0x123] ss:$8 sm:$0xf] %vm11308_vm1, %v5979_v12  ;;  %v6240_v32 = vcombine.high %v6218_v60, %v6218_v60  ;;  %v6241_v7 = vcombine.high %v6225_v4, %v6225_v4  ;;  %v6242_v44 = vcombine.high %v6232_v19, %v6232_v19 }
 0x395   : > { %7519 = vst.msk [vmem:[%s11335_s9 + $0x163] ss:$8 sm:$0xf] %vm11308_vm1, %v5993_v5  ;;  %v6243_v45 = vcombine.high %v6239_v8, %v6239_v8  ;;  %7530 = vst.msk [vmem:[%s11335_s9 + $0x24] ss:$8 sm:$0xf] %vm11308_vm1, %v6218_v60  ;;  %v5919_v61 = vmul.f32 %v12051_v26, %v11081_v41  ;;  %v5920_v24 = vmul.f32 %v12051_v26, %v11102_v48 }
 0x396   : > { %7531 = vst.msk [vmem:[%s11335_s9 + $0x64] ss:$8 sm:$0xf] %vm11308_vm1, %v6232_v19  ;;  %7534 = vst.msk [vmem:[%s11335_s9 + $0x124] ss:$8 sm:$0xf] %vm11308_vm1, %v6225_v4  ;;  %v5921_v34 = vmul.f32 %v12051_v26, %v13495_v40  ;;  %v6164_v41 = vmul.f32 %v12057_v59, %v13496_v14  ;;  %v6165_v48 = vmul.f32 %v12057_v59, %v13497_v37 }
 0x397   : > { %7535 = vst.msk [vmem:[%s11335_s9 + $0x164] ss:$8 sm:$0xf] %vm11308_vm1, %v6239_v8  ;;  %7516 = vst.msk [vmem:[%s11335_s9 + $0xa3] ss:$8 sm:$0xf] %vm11308_vm1, %v5994_v33  ;;  %v6166_v26 = vmul.f32 %v12057_v59, %v13498_v36  ;;  %v6167_v49 = vmul.f32 %v12057_v59, %v13499_v63  ;;  %v5998_v55 = vcombine.low %v5918_v0, %v5919_v61 }
 0x398   : > { %7517 = vst.msk [vmem:[%s11335_s9 + $0xe3] ss:$8 sm:$0xf] %vm11308_vm1, %v5996_v57  ;;  %7520 = vst.msk [vmem:[%s11335_s9 + $0x1a3] ss:$8 sm:$0xf] %vm11308_vm1, %v5995_v2  ;;  %v5999_v30 = vcombine.high %v5918_v0, %v5919_v61  ;;  %v6000_v47 = vcombine.low %v5920_v24, %v5921_v34  ;;  %v6001_v42 = vcombine.high %v5920_v24, %v5921_v34 }
 0x399   : > { %7521 = vst.msk [vmem:[%s11335_s9 + $0x1e3] ss:$8 sm:$0xf] %vm11308_vm1, %v5997_v39  ;;  %7532 = vst.msk [vmem:[%s11335_s9 + $0xa4] ss:$8 sm:$0xf] %vm11308_vm1, %v6240_v32  ;;  %v6244_v53 = vcombine.low %v6164_v41, %v6165_v48  ;;  %v6245_v9 = vcombine.high %v6164_v41, %v6165_v48  ;;  %v6246_v18 = vcombine.low %v6166_v26, %v6167_v49 }
 0x39a   : > { %7533 = vst.msk [vmem:[%s11335_s9 + $0xe4] ss:$8 sm:$0xf] %vm11308_vm1, %v6242_v44  ;;  %7536 = vst.msk [vmem:[%s11335_s9 + $0x1a4] ss:$8 sm:$0xf] %vm11308_vm1, %v6241_v7  ;;  %v6247_v51 = vcombine.high %v6166_v26, %v6167_v49  ;;  %v6008_v46 = vrot.slane %v5998_v55, %v11305_v21  ;;  %v6015_v56 = vrot.slane %v5999_v30, %v11305_v21 }
 0x39b   : > { %7537 = vst.msk [vmem:[%s11335_s9 + $0x1e4] ss:$8 sm:$0xf] %vm11308_vm1, %v6243_v45  ;;  %v6022_v52 = vrot.slane %v6000_v47, %v11305_v21  ;;  %v6029_v50 = vrot.slane %v6001_v42, %v11305_v21  ;;  %v6254_v35 = vrot.slane %v6244_v53, %v11305_v21  ;;  %v6261_v59 = vrot.slane %v6245_v9, %v11305_v21  ;;  %v13500_v14 = vld [vmem:[#allocation54_spill] sm:$0xff]  ;;  %v13501_v37 = vld [vmem:[#allocation29_spill] sm:$0xff] }
 0x39c   : > { %v6268_v62 = vrot.slane %v6246_v18, %v11305_v21  ;;  %v6275_v1 = vrot.slane %v6247_v51, %v11305_v21  ;;  %v6406_v41 = vmul.f32 %v12059_v43, %v13500_v14  ;;  %v6407_v48 = vmul.f32 %v12059_v43, %v13501_v37  ;;  %v13502_v49 = vld [vmem:[#allocation62_spill] sm:$0xff] }
 0x39d   : > { %v6030_v17 = vcombine.low %v6008_v46, %v6022_v52  ;;  %v6031_v11 = vcombine.high %v6008_v46, %v6022_v52  ;;  %v6032_v23 = vcombine.low %v6015_v56, %v6029_v50  ;;  %v6033_v13 = vcombine.high %v6015_v56, %v6029_v50 }
 0x39e   : > { %v6276_v12 = vcombine.low %v6254_v35, %v6268_v62  ;;  %v6277_v3 = vcombine.high %v6254_v35, %v6268_v62  ;;  %v6278_v5 = vcombine.low %v6261_v59, %v6275_v1  ;;  %v6279_v60 = vcombine.high %v6261_v59, %v6275_v1 }
 0x39f   : > { %v6040_v4 = vrot.slane %v6030_v17, %v11305_v21  ;;  %v6047_v19 = vrot.slane %v6032_v23, %v11305_v21  ;;  %v6054_v8 = vrot.slane %v6031_v11, %v11305_v21  ;;  %v6061_v33 = vrot.slane %v6033_v13, %v11305_v21 }
 0x3a0   : > { %v6286_v2 = vrot.slane %v6276_v12, %v11305_v21  ;;  %v6293_v57 = vrot.slane %v6278_v5, %v11305_v21  ;;  %v6300_v39 = vrot.slane %v6277_v3, %v11305_v21  ;;  %v6307_v32 = vrot.slane %v6279_v60, %v11305_v21 }
 0x3a1   : > { %v6062_v7 = vcombine.high %v6040_v4, %v6040_v4  ;;  %v6063_v44 = vcombine.high %v6047_v19, %v6047_v19  ;;  %v6064_v45 = vcombine.high %v6054_v8, %v6054_v8  ;;  %v6065_v0 = vcombine.high %v6061_v33, %v6061_v33  ;;  %7522 = vst.msk [vmem:[%s11335_s9 + $0x223] ss:$8 sm:$0xf] %vm11308_vm1, %v6040_v4 }
 0x3a2   : > { %7523 = vst.msk [vmem:[%s11335_s9 + $0x263] ss:$8 sm:$0xf] %vm11308_vm1, %v6054_v8  ;;  %7526 = vst.msk [vmem:[%s11335_s9 + $0x323] ss:$8 sm:$0xf] %vm11308_vm1, %v6047_v19  ;;  %v6308_v61 = vcombine.high %v6286_v2, %v6286_v2  ;;  %v6309_v24 = vcombine.high %v6293_v57, %v6293_v57  ;;  %v6310_v40 = vcombine.high %v6300_v39, %v6300_v39 }
 0x3a3   : > { %7527 = vst.msk [vmem:[%s11335_s9 + $0x363] ss:$8 sm:$0xf] %vm11308_vm1, %v6061_v33  ;;  %v6311_v34 = vcombine.high %v6307_v32, %v6307_v32  ;;  %7538 = vst.msk [vmem:[%s11335_s9 + $0x224] ss:$8 sm:$0xf] %vm11308_vm1, %v6286_v2  ;;  %v6408_v36 = vmul.f32 %v12059_v43, %v11174_v6  ;;  %v6409_v26 = vmul.f32 %v12059_v43, %v11177_v27 }
 0x3a4   : > { %7539 = vst.msk [vmem:[%s11335_s9 + $0x264] ss:$8 sm:$0xf] %vm11308_vm1, %v6300_v39  ;;  %7542 = vst.msk [vmem:[%s11335_s9 + $0x324] ss:$8 sm:$0xf] %vm11308_vm1, %v6293_v57  ;;  %v6652_v63 = vmul.f32 %v12061_v22, %v11181_v54  ;;  %v6653_v6 = vmul.f32 %v12061_v22, %v11184_v29  ;;  %v6654_v27 = vmul.f32 %v12061_v22, %v13502_v49 }
 0x3a5   : > { %7543 = vst.msk [vmem:[%s11335_s9 + $0x364] ss:$8 sm:$0xf] %vm11308_vm1, %v6307_v32  ;;  %7524 = vst.msk [vmem:[%s11335_s9 + $0x2a3] ss:$8 sm:$0xf] %vm11308_vm1, %v6062_v7  ;;  %v6422_v30 = vcombine.low %v6406_v41, %v6407_v48  ;;  %v6423_v47 = vcombine.high %v6406_v41, %v6407_v48  ;;  %v6424_v42 = vcombine.low %v6408_v36, %v6409_v26 }
 0x3a6   : > { %7525 = vst.msk [vmem:[%s11335_s9 + $0x2e3] ss:$8 sm:$0xf] %vm11308_vm1, %v6064_v45  ;;  %7528 = vst.msk [vmem:[%s11335_s9 + $0x3a3] ss:$8 sm:$0xf] %vm11308_vm1, %v6063_v44  ;;  %v6425_v53 = vcombine.high %v6408_v36, %v6409_v26  ;;  %v6668_v9 = vcombine.low %v6652_v63, %v6653_v6  ;;  %v6669_v18 = vcombine.high %v6652_v63, %v6653_v6  ;;  %v6647_v45 = vpop.xlane.xlu1 %6646 }
 0x3a7   : > { %7529 = vst.msk [vmem:[%s11335_s9 + $0x3e3] ss:$8 sm:$0xf] %vm11308_vm1, %v6065_v0  ;;  %7540 = vst.msk [vmem:[%s11335_s9 + $0x2a4] ss:$8 sm:$0xf] %vm11308_vm1, %v6308_v61  ;;  %v6432_v56 = vrot.slane %v6422_v30, %v11305_v21  ;;  %v6439_v54 = vrot.slane %v6423_v47, %v11305_v21  ;;  %v6446_v29 = vrot.slane %v6424_v42, %v11305_v21 }
 0x3a8   : > { %7541 = vst.msk [vmem:[%s11335_s9 + $0x2e4] ss:$8 sm:$0xf] %vm11308_vm1, %v6310_v40  ;;  %7544 = vst.msk [vmem:[%s11335_s9 + $0x3a4] ss:$8 sm:$0xf] %vm11308_vm1, %v6309_v24  ;;  %v6453_v52 = vrot.slane %v6425_v53, %v11305_v21  ;;  %v6678_v50 = vrot.slane %v6668_v9, %v11305_v21 }
 0x3a9   : > { %7545 = vst.msk [vmem:[%s11335_s9 + $0x3e4] ss:$8 sm:$0xf] %vm11308_vm1, %v6311_v34  ;;  %v13503_v43 = vld [vmem:[#allocation72_spill] sm:$0xff]  ;;  %v6454_v62 = vcombine.low %v6432_v56, %v6446_v29  ;;  %v6455_v1 = vcombine.high %v6432_v56, %v6446_v29  ;;  %v13504_v34 = vld [vmem:[#allocation95_spill] sm:$0xff] }
 0x3aa   : > { %v6655_v55 = vmul.f32 %v12061_v22, %v13503_v43  ;;  %v6685_v22 = vrot.slane %v6669_v18, %v11305_v21  ;;  %v6456_v17 = vcombine.low %v6439_v54, %v6453_v52  ;;  %v6457_v11 = vcombine.high %v6439_v54, %v6453_v52  ;;  %v13505_v41 = vld [vmem:[#allocation88_spill] sm:$0xff]  ;;  %v6889_v53 = vpop.xlane.xlu1 %6888 }
 0x3ab   : > { %v6464_v5 = vrot.slane %v6454_v62, %v11305_v21  ;;  %v6478_v4 = vrot.slane %v6455_v1, %v11305_v21  ;;  %v6410_v14 = vmul.f32 %v12067_v58, %v13504_v34  ;;  %v6411_v37 = vmul.f32 %v12067_v58, %v13505_v41  ;;  %v13506_v48 = vld [vmem:[#allocation84_spill] sm:$0xff]  ;;  %v8069_v62 = vpop.eup %8068  ;;  %v13508_v1 = vld [vmem:[#allocation51_spill] sm:$0xff] }
 0x3ac   : > { %v6670_v51 = vcombine.low %v6654_v27, %v6655_v55  ;;  %v6671_v46 = vcombine.high %v6654_v27, %v6655_v55  ;;  %v6471_v60 = vrot.slane %v6456_v17, %v11305_v21  ;;  %v6485_v19 = vrot.slane %v6457_v11, %v11305_v21  ;;  %v13507_v26 = vld [vmem:[#allocation4_spill] sm:$0xff]  ;;  %v13509_v11 = vld [vmem:[#allocation30_spill] sm:$0xff] }
 0x3ad   : > { %v6486_v39 = vcombine.high %v6464_v5, %v6464_v5  ;;  %v6488_v7 = vcombine.high %v6478_v4, %v6478_v4  ;;  %7546 = vst.msk [vmem:[%s11335_s9 + $0x25] ss:$8 sm:$0xf] %vm11308_vm1, %v6464_v5  ;;  %7547 = vst.msk [vmem:[%s11335_s9 + $0x65] ss:$8 sm:$0xf] %vm11308_vm1, %v6478_v4  ;;  %v6412_v36 = vmul.f32 %v12067_v58, %v13506_v48 }
 0x3ae   : > { %v6692_v35 = vrot.slane %v6670_v51, %v11305_v21  ;;  %v6699_v59 = vrot.slane %v6671_v46, %v11305_v21  ;;  %v6487_v32 = vcombine.high %v6471_v60, %v6471_v60  ;;  %v6489_v44 = vcombine.high %v6485_v19, %v6485_v19  ;;  %7550 = vst.msk [vmem:[%s11335_s9 + $0x125] ss:$8 sm:$0xf] %vm11308_vm1, %v6471_v60 }
 0x3af   : > { %7551 = vst.msk [vmem:[%s11335_s9 + $0x165] ss:$8 sm:$0xf] %vm11308_vm1, %v6485_v19  ;;  %7548 = vst.msk [vmem:[%s11335_s9 + $0xa5] ss:$8 sm:$0xf] %vm11308_vm1, %v6486_v39  ;;  %v6413_v63 = vmul.f32 %v12067_v58, %v13507_v26  ;;  %v6490_v49 = vcombine.low %v6410_v14, %v6411_v37  ;;  %v6491_v27 = vcombine.high %v6410_v14, %v6411_v37 }
 0x3b0   : > { %v6700_v23 = vcombine.low %v6678_v50, %v6692_v35  ;;  %v6701_v13 = vcombine.high %v6678_v50, %v6692_v35  ;;  %v6702_v12 = vcombine.low %v6685_v22, %v6699_v59  ;;  %v6703_v3 = vcombine.high %v6685_v22, %v6699_v59  ;;  %7549 = vst.msk [vmem:[%s11335_s9 + $0xe5] ss:$8 sm:$0xf] %vm11308_vm1, %v6488_v7 }
 0x3b1   : > { %7552 = vst.msk [vmem:[%s11335_s9 + $0x1a5] ss:$8 sm:$0xf] %vm11308_vm1, %v6487_v32  ;;  %7553 = vst.msk [vmem:[%s11335_s9 + $0x1e5] ss:$8 sm:$0xf] %vm11308_vm1, %v6489_v44  ;;  %v6492_v43 = vcombine.low %v6412_v36, %v6413_v63  ;;  %v6493_v55 = vcombine.high %v6412_v36, %v6413_v63  ;;  %v6500_v58 = vrot.slane %v6490_v49, %v11305_v21 }
 0x3b2   : > { %v6710_v8 = vrot.slane %v6700_v23, %v11305_v21  ;;  %v6717_v33 = vrot.slane %v6702_v12, %v11305_v21  ;;  %v6724_v2 = vrot.slane %v6701_v13, %v11305_v21  ;;  %v6731_v57 = vrot.slane %v6703_v3, %v11305_v21  ;;  %v13510_v13 = vld [vmem:[#allocation31_spill] sm:$0xff]  ;;  %v13511_v3 = vld [vmem:[#allocation94_spill] sm:$0xff] }
 0x3b3   : > { %v6649_v6 = vadd.f32 1e-12, %v6647_v45  ;;  %v6507_v30 = vrot.slane %v6491_v27, %v11305_v21  ;;  %v6514_v47 = vrot.slane %v6492_v43, %v11305_v21  ;;  %v6521_v42 = vrot.slane %v6493_v55, %v11305_v21 }
 0x3b4   : > { %v6732_v0 = vcombine.high %v6710_v8, %v6710_v8  ;;  %v6733_v61 = vcombine.high %v6717_v33, %v6717_v33  ;;  %v6734_v24 = vcombine.high %v6724_v2, %v6724_v2  ;;  %v6735_v40 = vcombine.high %v6731_v57, %v6731_v57  ;;  %7562 = vst.msk [vmem:[%s11335_s9 + $0x26] ss:$8 sm:$0xf] %vm11308_vm1, %v6710_v8 }
 0x3b5   : > { %7563 = vst.msk [vmem:[%s11335_s9 + $0x66] ss:$8 sm:$0xf] %vm11308_vm1, %v6724_v2  ;;  %7566 = vst.msk [vmem:[%s11335_s9 + $0x126] ss:$8 sm:$0xf] %vm11308_vm1, %v6717_v33  ;;  %8070 = vrsqrt.f32 %v6649_v6  ;;  %v6522_v9 = vcombine.low %v6500_v58, %v6514_v47  ;;  %v6523_v28 = vcombine.high %v6500_v58, %v6514_v47  ;;  %v6524_v18 = vcombine.low %v6507_v30, %v6521_v42 }
 0x3b6   : > { %7567 = vst.msk [vmem:[%s11335_s9 + $0x166] ss:$8 sm:$0xf] %vm11308_vm1, %v6731_v57  ;;  %7564 = vst.msk [vmem:[%s11335_s9 + $0xa6] ss:$8 sm:$0xf] %vm11308_vm1, %v6732_v0  ;;  %v6525_v51 = vcombine.high %v6507_v30, %v6521_v42  ;;  %v6894_v17 = vmul.f32 %v8069_v62, %v13508_v1  ;;  %v6895_v23 = vmul.f32 %v8069_v62, %v13509_v11 }
 0x3b7   : > { %7565 = vst.msk [vmem:[%s11335_s9 + $0xe6] ss:$8 sm:$0xf] %vm11308_vm1, %v6734_v24  ;;  %7568 = vst.msk [vmem:[%s11335_s9 + $0x1a6] ss:$8 sm:$0xf] %vm11308_vm1, %v6733_v61  ;;  %v6532_v56 = vrot.slane %v6522_v9, %v11305_v21  ;;  %v6539_v54 = vrot.slane %v6524_v18, %v11305_v21  ;;  %v6546_v29 = vrot.slane %v6523_v28, %v11305_v21 }
 0x3b8   : > { %7569 = vst.msk [vmem:[%s11335_s9 + $0x1e6] ss:$8 sm:$0xf] %vm11308_vm1, %v6735_v40  ;;  %v6891_v46 = vadd.f32 1e-12, %v6889_v53  ;;  %v6553_v52 = vrot.slane %v6525_v51, %v11305_v21  ;;  %v6896_v12 = vmul.f32 %v8069_v62, %v13510_v13  ;;  %v6897_v5 = vmul.f32 %v8069_v62, %v13511_v3 }
 0x3b9   : > { %v6554_v50 = vcombine.high %v6532_v56, %v6532_v56  ;;  %v6555_v22 = vcombine.high %v6539_v54, %v6539_v54  ;;  %v6556_v35 = vcombine.high %v6546_v29, %v6546_v29  ;;  %7554 = vst.msk [vmem:[%s11335_s9 + $0x225] ss:$8 sm:$0xf] %vm11308_vm1, %v6532_v56  ;;  %7555 = vst.msk [vmem:[%s11335_s9 + $0x265] ss:$8 sm:$0xf] %vm11308_vm1, %v6546_v29 }
 0x3ba   : > { %v6557_v59 = vcombine.high %v6553_v52, %v6553_v52  ;;  %7558 = vst.msk [vmem:[%s11335_s9 + $0x325] ss:$8 sm:$0xf] %vm11308_vm1, %v6539_v54  ;;  %7559 = vst.msk [vmem:[%s11335_s9 + $0x365] ss:$8 sm:$0xf] %vm11308_vm1, %v6553_v52  ;;  %8072 = vrsqrt.f32 %v6891_v46  ;;  %v6910_v4 = vcombine.low %v6894_v17, %v6895_v23  ;;  %v6911_v19 = vcombine.high %v6894_v17, %v6895_v23 }
 0x3bb   : > { %7556 = vst.msk [vmem:[%s11335_s9 + $0x2a5] ss:$8 sm:$0xf] %vm11308_vm1, %v6554_v50  ;;  %7557 = vst.msk [vmem:[%s11335_s9 + $0x2e5] ss:$8 sm:$0xf] %vm11308_vm1, %v6556_v35  ;;  %v6912_v8 = vcombine.low %v6896_v12, %v6897_v5  ;;  %v6913_v33 = vcombine.high %v6896_v12, %v6897_v5 }
 0x3bc   : > { %7560 = vst.msk [vmem:[%s11335_s9 + $0x3a5] ss:$8 sm:$0xf] %vm11308_vm1, %v6555_v22  ;;  %7561 = vst.msk [vmem:[%s11335_s9 + $0x3e5] ss:$8 sm:$0xf] %vm11308_vm1, %v6557_v59  ;;  %v6920_v7 = vrot.slane %v6910_v4, %v11305_v21  ;;  %v6927_v44 = vrot.slane %v6911_v19, %v11305_v21 }
 0x3bd   : > { %v6934_v45 = vrot.slane %v6912_v8, %v11305_v21  ;;  %v6941_v0 = vrot.slane %v6913_v33, %v11305_v21 }
 0x3bf   : > { %v8071_v60 = vpop.eup %8070  ;;  %v6942_v14 = vcombine.low %v6920_v7, %v6934_v45  ;;  %v6944_v41 = vcombine.low %v6927_v44, %v6941_v0 }
 0x3c0   : > { %v6656_v2 = vmul.f32 %v8071_v60, %v11272_v10  ;;  %v6657_v57 = vmul.f32 %v8071_v60, %v11275_v31  ;;  %v6658_v39 = vmul.f32 %v8071_v60, %v11283_v15  ;;  %v6659_v32 = vmul.f32 %v8071_v60, %v11289_v38 }
 0x3c1   : > { %v6943_v10 = vcombine.high %v6920_v7, %v6934_v45  ;;  %v6945_v31 = vcombine.high %v6927_v44, %v6941_v0  ;;  %v6952_v36 = vrot.slane %v6942_v14, %v11305_v21  ;;  %v6959_v26 = vrot.slane %v6944_v41, %v11305_v21 }
 0x3c2   : > { %v6736_v61 = vcombine.low %v6656_v2, %v6657_v57  ;;  %v6737_v24 = vcombine.high %v6656_v2, %v6657_v57  ;;  %v6738_v40 = vcombine.low %v6658_v39, %v6659_v32  ;;  %v6739_v34 = vcombine.high %v6658_v39, %v6659_v32 }
 0x3c3   : > { %v6966_v63 = vrot.slane %v6943_v10, %v11305_v21  ;;  %v6973_v6 = vrot.slane %v6945_v31, %v11305_v21  ;;  %v6974_v30 = vcombine.high %v6952_v36, %v6952_v36  ;;  %v6975_v47 = vcombine.high %v6959_v26, %v6959_v26  ;;  %7578 = vst.msk [vmem:[%s11335_s9 + $0x27] ss:$8 sm:$0xf] %vm11308_vm1, %v6952_v36 }
 0x3c4   : > { %v6746_v15 = vrot.slane %v6736_v61, %v11305_v21  ;;  %v6753_v38 = vrot.slane %v6737_v24, %v11305_v21  ;;  %v6760_v37 = vrot.slane %v6738_v40, %v11305_v21  ;;  %v6767_v48 = vrot.slane %v6739_v34, %v11305_v21  ;;  %v8073_v49 = vpop.eup %8072  ;;  %7582 = vst.msk [vmem:[%s11335_s9 + $0x127] ss:$8 sm:$0xf] %vm11308_vm1, %v6959_v26 }
 0x3c5   : > { %v6976_v42 = vcombine.high %v6966_v63, %v6966_v63  ;;  %v6977_v53 = vcombine.high %v6973_v6, %v6973_v6  ;;  %7579 = vst.msk [vmem:[%s11335_s9 + $0x67] ss:$8 sm:$0xf] %vm11308_vm1, %v6966_v63  ;;  %7583 = vst.msk [vmem:[%s11335_s9 + $0x167] ss:$8 sm:$0xf] %vm11308_vm1, %v6973_v6  ;;  %v6898_v46 = vmul.f32 %v8073_v49, %v11286_v25 }
 0x3c6   : > { %v6768_v27 = vcombine.low %v6746_v15, %v6760_v37  ;;  %v6769_v43 = vcombine.high %v6746_v15, %v6760_v37  ;;  %v6770_v55 = vcombine.low %v6753_v38, %v6767_v48  ;;  %v6771_v58 = vcombine.high %v6753_v38, %v6767_v48  ;;  %7580 = vst.msk [vmem:[%s11335_s9 + $0xa7] ss:$8 sm:$0xf] %vm11308_vm1, %v6974_v30 }
 0x3c7   : > { %7581 = vst.msk [vmem:[%s11335_s9 + $0xe7] ss:$8 sm:$0xf] %vm11308_vm1, %v6976_v42  ;;  %7584 = vst.msk [vmem:[%s11335_s9 + $0x1a7] ss:$8 sm:$0xf] %vm11308_vm1, %v6975_v47  ;;  %v6899_v56 = vmul.f32 %v8073_v49, %v11292_v20  ;;  %v6900_v54 = vmul.f32 %v8073_v49, %v13510_v13  ;;  %v6901_v29 = vmul.f32 %v8073_v49, %v13511_v3 }
 0x3c8   : > { %v6778_v9 = vrot.slane %v6768_v27, %v11305_v21  ;;  %v6785_v28 = vrot.slane %v6770_v55, %v11305_v21  ;;  %v6792_v18 = vrot.slane %v6769_v43, %v11305_v21  ;;  %v6799_v51 = vrot.slane %v6771_v58, %v11305_v21  ;;  %7585 = vst.msk [vmem:[%s11335_s9 + $0x1e7] ss:$8 sm:$0xf] %vm11308_vm1, %v6977_v53 }
 0x3c9   : > { %v6978_v25 = vcombine.low %v6898_v46, %v6899_v56  ;;  %v6979_v20 = vcombine.high %v6898_v46, %v6899_v56  ;;  %v6980_v59 = vcombine.low %v6900_v54, %v6901_v29  ;;  %v6981_v62 = vcombine.high %v6900_v54, %v6901_v29 }
 0x3ca   : > { %v6800_v52 = vcombine.high %v6778_v9, %v6778_v9  ;;  %v6801_v50 = vcombine.high %v6785_v28, %v6785_v28  ;;  %v6802_v22 = vcombine.high %v6792_v18, %v6792_v18  ;;  %v6803_v35 = vcombine.high %v6799_v51, %v6799_v51  ;;  %7570 = vst.msk [vmem:[%s11335_s9 + $0x226] ss:$8 sm:$0xf] %vm11308_vm1, %v6778_v9 }
 0x3cb   : > { %7571 = vst.msk [vmem:[%s11335_s9 + $0x266] ss:$8 sm:$0xf] %vm11308_vm1, %v6792_v18  ;;  %7574 = vst.msk [vmem:[%s11335_s9 + $0x326] ss:$8 sm:$0xf] %vm11308_vm1, %v6785_v28  ;;  %v6988_v1 = vrot.slane %v6978_v25, %v11305_v21  ;;  %v6995_v17 = vrot.slane %v6979_v20, %v11305_v21  ;;  %v7002_v11 = vrot.slane %v6980_v59, %v11305_v21 }
 0x3cc   : > { %7575 = vst.msk [vmem:[%s11335_s9 + $0x366] ss:$8 sm:$0xf] %vm11308_vm1, %v6799_v51  ;;  %7572 = vst.msk [vmem:[%s11335_s9 + $0x2a6] ss:$8 sm:$0xf] %vm11308_vm1, %v6800_v52  ;;  %v7009_v23 = vrot.slane %v6981_v62, %v11305_v21 }
 0x3cd   : > { %7573 = vst.msk [vmem:[%s11335_s9 + $0x2e6] ss:$8 sm:$0xf] %vm11308_vm1, %v6802_v22  ;;  %7576 = vst.msk [vmem:[%s11335_s9 + $0x3a6] ss:$8 sm:$0xf] %vm11308_vm1, %v6801_v50  ;;  %v7010_v13 = vcombine.low %v6988_v1, %v7002_v11  ;;  %v7011_v12 = vcombine.high %v6988_v1, %v7002_v11 }
 0x3ce   : > { %7577 = vst.msk [vmem:[%s11335_s9 + $0x3e6] ss:$8 sm:$0xf] %vm11308_vm1, %v6803_v35  ;;  %v7012_v3 = vcombine.low %v6995_v17, %v7009_v23  ;;  %v7013_v5 = vcombine.high %v6995_v17, %v7009_v23 }
 0x3cf   : > { %v7020_v60 = vrot.slane %v7010_v13, %v11305_v21  ;;  %v7034_v19 = vrot.slane %v7011_v12, %v11305_v21 }
 0x3d0   : > { %v7027_v4 = vrot.slane %v7012_v3, %v11305_v21  ;;  %v7041_v8 = vrot.slane %v7013_v5, %v11305_v21 }
 0x3d1   : > { %v7042_v33 = vcombine.high %v7020_v60, %v7020_v60  ;;  %v7044_v57 = vcombine.high %v7034_v19, %v7034_v19  ;;  %7586 = vst.msk [vmem:[%s11335_s9 + $0x227] ss:$8 sm:$0xf] %vm11308_vm1, %v7020_v60  ;;  %7587 = vst.msk [vmem:[%s11335_s9 + $0x267] ss:$8 sm:$0xf] %vm11308_vm1, %v7034_v19 }
 0x3d2   : > { %v7043_v2 = vcombine.high %v7027_v4, %v7027_v4  ;;  %v7045_v39 = vcombine.high %v7041_v8, %v7041_v8  ;;  %7590 = vst.msk [vmem:[%s11335_s9 + $0x327] ss:$8 sm:$0xf] %vm11308_vm1, %v7027_v4  ;;  %7591 = vst.msk [vmem:[%s11335_s9 + $0x367] ss:$8 sm:$0xf] %vm11308_vm1, %v7041_v8 }
 0x3d3   : > { %7588 = vst.msk [vmem:[%s11335_s9 + $0x2a7] ss:$8 sm:$0xf] %vm11308_vm1, %v7042_v33  ;;  %7589 = vst.msk [vmem:[%s11335_s9 + $0x2e7] ss:$8 sm:$0xf] %vm11308_vm1, %v7044_v57 }
 0x3d4   : > { %7592 = vst.msk [vmem:[%s11335_s9 + $0x3a7] ss:$8 sm:$0xf] %vm11308_vm1, %v7043_v2  ;;  %7593 = vst.msk [vmem:[%s11335_s9 + $0x3e7] ss:$8 sm:$0xf] %vm11308_vm1, %v7045_v39 }
 0x3d5 PF: > { %p11_p9 = scmp.ge.s32.totalorder %s8143_s19, 4   ;;  %s13512_s15 = smov %s8093_s16 }
 0x3d6   : > { %s13513_s16 = smov %s8152_s22  ;;  %s13514_s17 = smov %s8143_s19 }
 0x3d7   :  { %13 = sbr.rel (!%p11_p9) target bundleno = 2 (0x2), region = 397 }

// kernel: reverse.7
= control target key start
LH: loop header
LB: loop body
LE: loop exit
PB: predicated region body
PF: predicated region fallthrough
CT: control target
= control target key end

     0   :  { %v2_v0 = vlaneseq  ;;  %s1698_s0 = inlined_call_operand.vmem [shape: f32[32,16,256], index: 0, kind: input, shape index: {}]   ;;  %s1699_s1 = inlined_call_operand.vmem [shape: f32[32,16,256], index: 1, kind: output, shape index: {}]  }
   0x2   :  { %v1388_v1 = vsub.s32 127, %v2_v0 }
   0x4   :  { %4 = vset.pattern.permute.xlu0 %v1388_v1 }
   0x5   :  { %s1391_s6 = smov 0   ;;  %s1393_s7 = smov 0  }
   0x6   :  { %s1395_s8 = smov 0  }
   0x7 LB: > { %s1191_s9 = sadd.s32 4294967295, %s1376_s8   ;;  %s22_s10 = sadd.s32 1, %s1372_s7  ;;  %s1376_s8 = sphi %s1395_s8, %s10_s8   ;;  %s1372_s7 = sphi %s1393_s7, %s1701_s7   ;;  %s1368_s6 = sphi %s1391_s6, %s1700_s6  }
   0x8   : > { %p23_p0 = scmp.ge.s32.totalorder %s22_s10, 2  ;;  %p1193_p1 = scmp.ge.s32.totalorder %s1376_s8, 2 }
   0x9   : > { %s45_s11 = sand.u32 (!%p1193_p1), 1, %s1376_s8   ;;  %s48_s12 = ssub.s32 (!%p1193_p1), 1, %s1372_s7 }
   0xa   : > { %s1703_s10 = smov (%p23_p0, %s22_s10), 0  ;;  %43 = sbr.rel (%p1193_p1) target bundleno = 46 (0x2e), region = 16 }
   0xb   : > { %s1194_s13 = sshll.u32 (!%p1193_p1), %s45_s11, 9  ;;  %s1195_s14 = sshll.u32 (!%p1193_p1), %s48_s12, 3 }
   0xc   : > { %s1416_s17 = scalar_lea.vmem (!%p1193_p1), %s1698_s0, %s1195_s14  ;;  %s1421_s18 = scalar_lea.vmem (!%p1193_p1), [#allocation0], %s1194_s13 }
   0xd   : > { %v210_v2 = vld [vmem:[%s1416_s17] sm:$0xff] (!%p1193_p1)  ;;  %v212_v3 = vld [vmem:[%s1416_s17 + $0x10] sm:$0xff] (!%p1193_p1) }
   0xe   : > { %v214_v4 = vld [vmem:[%s1416_s17 + $0x20] sm:$0xff] (!%p1193_p1)  ;;  %211 = vst [vmem:[%s1421_s18] sm:$0xff] (!%p1193_p1), %v210_v2  ;;  %213 = vst [vmem:[%s1421_s18 + $0x8] sm:$0xff] (!%p1193_p1), %v212_v3  ;;  %v216_v5 = vld [vmem:[%s1416_s17 + $0x30] sm:$0xff] (!%p1193_p1) }
   0xf   : > { %215 = vst [vmem:[%s1421_s18 + $0x10] sm:$0xff] (!%p1193_p1), %v214_v4  ;;  %v218_v6 = vld [vmem:[%s1416_s17 + $0x40] sm:$0xff] (!%p1193_p1)  ;;  %v220_v7 = vld [vmem:[%s1416_s17 + $0x50] sm:$0xff] (!%p1193_p1)  ;;  %217 = vst [vmem:[%s1421_s18 + $0x18] sm:$0xff] (!%p1193_p1), %v216_v5 }
  0x10   : > { %219 = vst [vmem:[%s1421_s18 + $0x20] sm:$0xff] (!%p1193_p1), %v218_v6  ;;  %221 = vst [vmem:[%s1421_s18 + $0x28] sm:$0xff] (!%p1193_p1), %v220_v7  ;;  %v222_v8 = vld [vmem:[%s1416_s17 + $0x60] sm:$0xff] (!%p1193_p1)  ;;  %v224_v9 = vld [vmem:[%s1416_s17 + $0x70] sm:$0xff] (!%p1193_p1) }
  0x11   : > { %v226_v10 = vld [vmem:[%s1416_s17 + $0x80] sm:$0xff]  ;;  %223 = vst [vmem:[%s1421_s18 + $0x30] sm:$0xff] %v222_v8  ;;  %225 = vst [vmem:[%s1421_s18 + $0x38] sm:$0xff] %v224_v9  ;;  %v228_v11 = vld [vmem:[%s1416_s17 + $0x90] sm:$0xff] }
  0x12   : > { %227 = vst [vmem:[%s1421_s18 + $0x40] sm:$0xff] %v226_v10  ;;  %v230_v12 = vld [vmem:[%s1416_s17 + $0xa0] sm:$0xff]  ;;  %v232_v13 = vld [vmem:[%s1416_s17 + $0xb0] sm:$0xff]  ;;  %229 = vst [vmem:[%s1421_s18 + $0x48] sm:$0xff] %v228_v11 }
  0x13   : > { %231 = vst [vmem:[%s1421_s18 + $0x50] sm:$0xff] %v230_v12  ;;  %233 = vst [vmem:[%s1421_s18 + $0x58] sm:$0xff] %v232_v13  ;;  %v234_v14 = vld [vmem:[%s1416_s17 + $0xc0] sm:$0xff]  ;;  %v236_v15 = vld [vmem:[%s1416_s17 + $0xd0] sm:$0xff] }
  0x14   : > { %v238_v16 = vld [vmem:[%s1416_s17 + $0xe0] sm:$0xff]  ;;  %235 = vst [vmem:[%s1421_s18 + $0x60] sm:$0xff] %v234_v14  ;;  %237 = vst [vmem:[%s1421_s18 + $0x68] sm:$0xff] %v236_v15  ;;  %v240_v17 = vld [vmem:[%s1416_s17 + $0xf0] sm:$0xff] }
  0x15   : > { %239 = vst [vmem:[%s1421_s18 + $0x70] sm:$0xff] %v238_v16  ;;  %v242_v18 = vld [vmem:[%s1416_s17 + $0x100] sm:$0xff]  ;;  %v244_v19 = vld [vmem:[%s1416_s17 + $0x110] sm:$0xff]  ;;  %241 = vst [vmem:[%s1421_s18 + $0x78] sm:$0xff] %v240_v17 }
  0x16   : > { %243 = vst [vmem:[%s1421_s18 + $0x80] sm:$0xff] %v242_v18  ;;  %245 = vst [vmem:[%s1421_s18 + $0x88] sm:$0xff] %v244_v19  ;;  %v246_v20 = vld [vmem:[%s1416_s17 + $0x120] sm:$0xff]  ;;  %v248_v21 = vld [vmem:[%s1416_s17 + $0x130] sm:$0xff] }
  0x17   : > { %v250_v22 = vld [vmem:[%s1416_s17 + $0x140] sm:$0xff]  ;;  %247 = vst [vmem:[%s1421_s18 + $0x90] sm:$0xff] %v246_v20  ;;  %249 = vst [vmem:[%s1421_s18 + $0x98] sm:$0xff] %v248_v21  ;;  %v252_v23 = vld [vmem:[%s1416_s17 + $0x150] sm:$0xff] }
  0x18   : > { %251 = vst [vmem:[%s1421_s18 + $0xa0] sm:$0xff] %v250_v22  ;;  %v254_v24 = vld [vmem:[%s1416_s17 + $0x160] sm:$0xff]  ;;  %v256_v25 = vld [vmem:[%s1416_s17 + $0x170] sm:$0xff]  ;;  %253 = vst [vmem:[%s1421_s18 + $0xa8] sm:$0xff] %v252_v23 }
  0x19   : > { %255 = vst [vmem:[%s1421_s18 + $0xb0] sm:$0xff] %v254_v24  ;;  %257 = vst [vmem:[%s1421_s18 + $0xb8] sm:$0xff] %v256_v25  ;;  %v258_v26 = vld [vmem:[%s1416_s17 + $0x180] sm:$0xff]  ;;  %v260_v27 = vld [vmem:[%s1416_s17 + $0x190] sm:$0xff] }
  0x1a   : > { %v262_v28 = vld [vmem:[%s1416_s17 + $0x1a0] sm:$0xff]  ;;  %259 = vst [vmem:[%s1421_s18 + $0xc0] sm:$0xff] %v258_v26  ;;  %261 = vst [vmem:[%s1421_s18 + $0xc8] sm:$0xff] %v260_v27  ;;  %v264_v29 = vld [vmem:[%s1416_s17 + $0x1b0] sm:$0xff] }
  0x1b   : > { %263 = vst [vmem:[%s1421_s18 + $0xd0] sm:$0xff] %v262_v28  ;;  %v266_v30 = vld [vmem:[%s1416_s17 + $0x1c0] sm:$0xff]  ;;  %v268_v31 = vld [vmem:[%s1416_s17 + $0x1d0] sm:$0xff]  ;;  %265 = vst [vmem:[%s1421_s18 + $0xd8] sm:$0xff] %v264_v29 }
  0x1c   : > { %267 = vst [vmem:[%s1421_s18 + $0xe0] sm:$0xff] %v266_v30  ;;  %269 = vst [vmem:[%s1421_s18 + $0xe8] sm:$0xff] %v268_v31  ;;  %v270_v32 = vld [vmem:[%s1416_s17 + $0x1e0] sm:$0xff]  ;;  %v272_v33 = vld [vmem:[%s1416_s17 + $0x1f0] sm:$0xff] }
  0x1d   : > { %v274_v34 = vld [vmem:[%s1416_s17 + $0x200] sm:$0xff]  ;;  %271 = vst [vmem:[%s1421_s18 + $0xf0] sm:$0xff] %v270_v32  ;;  %273 = vst [vmem:[%s1421_s18 + $0xf8] sm:$0xff] %v272_v33  ;;  %v276_v35 = vld [vmem:[%s1416_s17 + $0x210] sm:$0xff] }
  0x1e   : > { %275 = vst [vmem:[%s1421_s18 + $0x100] sm:$0xff] %v274_v34  ;;  %v278_v36 = vld [vmem:[%s1416_s17 + $0x220] sm:$0xff]  ;;  %v280_v37 = vld [vmem:[%s1416_s17 + $0x230] sm:$0xff]  ;;  %277 = vst [vmem:[%s1421_s18 + $0x108] sm:$0xff] %v276_v35 }
  0x1f   : > { %279 = vst [vmem:[%s1421_s18 + $0x110] sm:$0xff] %v278_v36  ;;  %281 = vst [vmem:[%s1421_s18 + $0x118] sm:$0xff] %v280_v37  ;;  %v282_v38 = vld [vmem:[%s1416_s17 + $0x240] sm:$0xff]  ;;  %v284_v39 = vld [vmem:[%s1416_s17 + $0x250] sm:$0xff] }
  0x20   : > { %v286_v40 = vld [vmem:[%s1416_s17 + $0x260] sm:$0xff]  ;;  %283 = vst [vmem:[%s1421_s18 + $0x120] sm:$0xff] %v282_v38  ;;  %285 = vst [vmem:[%s1421_s18 + $0x128] sm:$0xff] %v284_v39  ;;  %v288_v41 = vld [vmem:[%s1416_s17 + $0x270] sm:$0xff] }
  0x21   : > { %287 = vst [vmem:[%s1421_s18 + $0x130] sm:$0xff] %v286_v40  ;;  %v290_v42 = vld [vmem:[%s1416_s17 + $0x280] sm:$0xff]  ;;  %v292_v43 = vld [vmem:[%s1416_s17 + $0x290] sm:$0xff]  ;;  %289 = vst [vmem:[%s1421_s18 + $0x138] sm:$0xff] %v288_v41 }
  0x22   : > { %291 = vst [vmem:[%s1421_s18 + $0x140] sm:$0xff] %v290_v42  ;;  %293 = vst [vmem:[%s1421_s18 + $0x148] sm:$0xff] %v292_v43  ;;  %v294_v44 = vld [vmem:[%s1416_s17 + $0x2a0] sm:$0xff]  ;;  %v296_v45 = vld [vmem:[%s1416_s17 + $0x2b0] sm:$0xff] }
  0x23   : > { %v298_v46 = vld [vmem:[%s1416_s17 + $0x2c0] sm:$0xff]  ;;  %295 = vst [vmem:[%s1421_s18 + $0x150] sm:$0xff] %v294_v44  ;;  %297 = vst [vmem:[%s1421_s18 + $0x158] sm:$0xff] %v296_v45  ;;  %v300_v47 = vld [vmem:[%s1416_s17 + $0x2d0] sm:$0xff] }
  0x24   : > { %299 = vst [vmem:[%s1421_s18 + $0x160] sm:$0xff] %v298_v46  ;;  %v302_v48 = vld [vmem:[%s1416_s17 + $0x2e0] sm:$0xff]  ;;  %v304_v49 = vld [vmem:[%s1416_s17 + $0x2f0] sm:$0xff]  ;;  %301 = vst [vmem:[%s1421_s18 + $0x168] sm:$0xff] %v300_v47 }
  0x25   : > { %303 = vst [vmem:[%s1421_s18 + $0x170] sm:$0xff] %v302_v48  ;;  %305 = vst [vmem:[%s1421_s18 + $0x178] sm:$0xff] %v304_v49  ;;  %v306_v50 = vld [vmem:[%s1416_s17 + $0x300] sm:$0xff]  ;;  %v308_v51 = vld [vmem:[%s1416_s17 + $0x310] sm:$0xff] }
  0x26   : > { %v310_v52 = vld [vmem:[%s1416_s17 + $0x320] sm:$0xff]  ;;  %307 = vst [vmem:[%s1421_s18 + $0x180] sm:$0xff] %v306_v50  ;;  %309 = vst [vmem:[%s1421_s18 + $0x188] sm:$0xff] %v308_v51  ;;  %v312_v53 = vld [vmem:[%s1416_s17 + $0x330] sm:$0xff] }
  0x27   : > { %311 = vst [vmem:[%s1421_s18 + $0x190] sm:$0xff] %v310_v52  ;;  %v314_v54 = vld [vmem:[%s1416_s17 + $0x340] sm:$0xff]  ;;  %v316_v55 = vld [vmem:[%s1416_s17 + $0x350] sm:$0xff]  ;;  %313 = vst [vmem:[%s1421_s18 + $0x198] sm:$0xff] %v312_v53 }
  0x28   : > { %315 = vst [vmem:[%s1421_s18 + $0x1a0] sm:$0xff] %v314_v54  ;;  %317 = vst [vmem:[%s1421_s18 + $0x1a8] sm:$0xff] %v316_v55  ;;  %v318_v56 = vld [vmem:[%s1416_s17 + $0x360] sm:$0xff]  ;;  %v320_v57 = vld [vmem:[%s1416_s17 + $0x370] sm:$0xff] }
  0x29   : > { %v322_v58 = vld [vmem:[%s1416_s17 + $0x380] sm:$0xff]  ;;  %319 = vst [vmem:[%s1421_s18 + $0x1b0] sm:$0xff] %v318_v56  ;;  %321 = vst [vmem:[%s1421_s18 + $0x1b8] sm:$0xff] %v320_v57  ;;  %v324_v59 = vld [vmem:[%s1416_s17 + $0x390] sm:$0xff] }
  0x2a   : > { %323 = vst [vmem:[%s1421_s18 + $0x1c0] sm:$0xff] %v322_v58  ;;  %v326_v60 = vld [vmem:[%s1416_s17 + $0x3a0] sm:$0xff]  ;;  %v328_v61 = vld [vmem:[%s1416_s17 + $0x3b0] sm:$0xff]  ;;  %325 = vst [vmem:[%s1421_s18 + $0x1c8] sm:$0xff] %v324_v59 }
  0x2b   : > { %327 = vst [vmem:[%s1421_s18 + $0x1d0] sm:$0xff] %v326_v60  ;;  %329 = vst [vmem:[%s1421_s18 + $0x1d8] sm:$0xff] %v328_v61  ;;  %v330_v62 = vld [vmem:[%s1416_s17 + $0x3c0] sm:$0xff]  ;;  %v332_v63 = vld [vmem:[%s1416_s17 + $0x3d0] sm:$0xff] }
  0x2c   : > { %v334_v0 = vld [vmem:[%s1416_s17 + $0x3e0] sm:$0xff]  ;;  %331 = vst [vmem:[%s1421_s18 + $0x1e0] sm:$0xff] %v330_v62  ;;  %333 = vst [vmem:[%s1421_s18 + $0x1e8] sm:$0xff] %v332_v63  ;;  %v336_v2 = vld [vmem:[%s1416_s17 + $0x3f0] sm:$0xff] }
  0x2d   : > { %335 = vst [vmem:[%s1421_s18 + $0x1f0] sm:$0xff] %v334_v0  ;;  %337 = vst [vmem:[%s1421_s18 + $0x1f8] sm:$0xff] %v336_v2 }
  0x2e PF: > { %p1196_p2 = scmp.ge.s32.totalorder %s1376_s8, 1  ;;  %p342_p3 = scmp.lt.s32.totalorder %s1376_s8, 3 }
  0x30   : > { %p343_p4 = pnand %p1196_p2, %p342_p3 }
  0x31   : > { %1353 = vset.pattern.permute.xlu1 (!%p343_p4), %v1388_v1  ;;  %s349_s19 = sand.u32 (!%p343_p4), 1, %s1191_s9   ;;  %s1326_s22 = sshll.u32 (!%p343_p4), %s1368_s6, 3 }
  0x32   : > { %346 = sbr.rel (%p343_p4) target bundleno = 306 (0x132), region = 54  ;;  %s1197_s20 = sshll.u32 (!%p343_p4), %s349_s19, 9 }
  0x33   : > { %s1553_s21 = scalar_lea.vmem (!%p343_p4), [#allocation0], %s1197_s20  ;;  %s1623_s25 = scalar_lea.vmem (!%p343_p4), %s1699_s1, %s1326_s22 }
  0x34   : > { %v1201_v3 = vld [vmem:[%s1553_s21 + $0x10] sm:$0xff] (!%p343_p4)  ;;  %v365_v4 = vld [vmem:[%s1553_s21] sm:$0xff] (!%p343_p4)  ;;  %v1203_v5 = vld [vmem:[%s1553_s21 + $0x18] sm:$0xff] (!%p343_p4) }
  0x35   : > { %378 = vperm.xlu1 (!%p343_p4), %1353, %v1201_v3   ;;  %366 = vperm.xlu0 (!%p343_p4), %4, %v365_v4   ;;  %v1199_v6 = vld [vmem:[%s1553_s21 + $0x8] sm:$0xff] (!%p343_p4)  ;;  %v1205_v8 = vld [vmem:[%s1553_s21 + $0x20] sm:$0xff] (!%p343_p4)  ;;  %v1211_v9 = vld [vmem:[%s1553_s21 + $0x38] sm:$0xff] (!%p343_p4) }
  0x36   : > { %v1207_v7 = vld [vmem:[%s1553_s21 + $0x28] sm:$0xff] (!%p343_p4)  ;;  %v1209_v10 = vld [vmem:[%s1553_s21 + $0x30] sm:$0xff] (!%p343_p4)  ;;  %v1213_v12 = vld [vmem:[%s1553_s21 + $0x40] sm:$0xff] (!%p343_p4) }
  0x37   : > { %v1215_v11 = vld [vmem:[%s1553_s21 + $0x48] sm:$0xff] (!%p343_p4)  ;;  %v1219_v13 = vld [vmem:[%s1553_s21 + $0x58] sm:$0xff] (!%p343_p4)  ;;  %v1217_v14 = vld [vmem:[%s1553_s21 + $0x50] sm:$0xff] (!%p343_p4) }
  0x38   : > { %v1223_v15 = vld [vmem:[%s1553_s21 + $0x68] sm:$0xff] (!%p343_p4)  ;;  %v1221_v16 = vld [vmem:[%s1553_s21 + $0x60] sm:$0xff] (!%p343_p4)  ;;  %v1227_v17 = vld [vmem:[%s1553_s21 + $0x78] sm:$0xff] (!%p343_p4) }
  0x39   : > { %384 = vperm.xlu1 %1353, %v1203_v5   ;;  %372 = vperm.xlu0 %4, %v1199_v6   ;;  %v1225_v18 = vld [vmem:[%s1553_s21 + $0x70] sm:$0xff]  ;;  %v1231_v19 = vld [vmem:[%s1553_s21 + $0x88] sm:$0xff]  ;;  %v1229_v20 = vld [vmem:[%s1553_s21 + $0x80] sm:$0xff] }
  0x3a   : > { %v1235_v21 = vld [vmem:[%s1553_s21 + $0x98] sm:$0xff]  ;;  %v1233_v22 = vld [vmem:[%s1553_s21 + $0x90] sm:$0xff]  ;;  %v1239_v23 = vld [vmem:[%s1553_s21 + $0xa8] sm:$0xff] }
  0x3b   : > { %v1237_v24 = vld [vmem:[%s1553_s21 + $0xa0] sm:$0xff]  ;;  %v1243_v25 = vld [vmem:[%s1553_s21 + $0xb8] sm:$0xff]  ;;  %v1241_v26 = vld [vmem:[%s1553_s21 + $0xb0] sm:$0xff] }
  0x3c   : > { %v1247_v27 = vld [vmem:[%s1553_s21 + $0xc8] sm:$0xff]  ;;  %v1245_v28 = vld [vmem:[%s1553_s21 + $0xc0] sm:$0xff]  ;;  %v1251_v29 = vld [vmem:[%s1553_s21 + $0xd8] sm:$0xff] }
  0x3d   : > { %396 = vperm.xlu1 %1353, %v1207_v7   ;;  %390 = vperm.xlu0 %4, %v1205_v8   ;;  %v1249_v30 = vld [vmem:[%s1553_s21 + $0xd0] sm:$0xff]  ;;  %v1255_v31 = vld [vmem:[%s1553_s21 + $0xe8] sm:$0xff]  ;;  %v1253_v32 = vld [vmem:[%s1553_s21 + $0xe0] sm:$0xff] }
  0x3e   : > { %v1259_v33 = vld [vmem:[%s1553_s21 + $0xf8] sm:$0xff]  ;;  %v1257_v34 = vld [vmem:[%s1553_s21 + $0xf0] sm:$0xff]  ;;  %v1263_v35 = vld [vmem:[%s1553_s21 + $0x108] sm:$0xff] }
  0x3f   : > { %v1261_v36 = vld [vmem:[%s1553_s21 + $0x100] sm:$0xff]  ;;  %v1267_v37 = vld [vmem:[%s1553_s21 + $0x118] sm:$0xff]  ;;  %v1265_v38 = vld [vmem:[%s1553_s21 + $0x110] sm:$0xff] }
  0x40   : > { %v1271_v39 = vld [vmem:[%s1553_s21 + $0x128] sm:$0xff]  ;;  %v1269_v40 = vld [vmem:[%s1553_s21 + $0x120] sm:$0xff]  ;;  %v1275_v41 = vld [vmem:[%s1553_s21 + $0x138] sm:$0xff] }
  0x41   : > { %408 = vperm.xlu1 %1353, %v1211_v9   ;;  %402 = vperm.xlu0 %4, %v1209_v10   ;;  %v1273_v42 = vld [vmem:[%s1553_s21 + $0x130] sm:$0xff]  ;;  %v1279_v43 = vld [vmem:[%s1553_s21 + $0x148] sm:$0xff]  ;;  %v1277_v44 = vld [vmem:[%s1553_s21 + $0x140] sm:$0xff] }
  0x42   : > { %v1283_v45 = vld [vmem:[%s1553_s21 + $0x158] sm:$0xff]  ;;  %v1281_v46 = vld [vmem:[%s1553_s21 + $0x150] sm:$0xff]  ;;  %v1287_v47 = vld [vmem:[%s1553_s21 + $0x168] sm:$0xff] }
  0x43   : > { %v1285_v48 = vld [vmem:[%s1553_s21 + $0x160] sm:$0xff]  ;;  %v1291_v49 = vld [vmem:[%s1553_s21 + $0x178] sm:$0xff]  ;;  %v1289_v50 = vld [vmem:[%s1553_s21 + $0x170] sm:$0xff] }
  0x44   : > { %v1295_v51 = vld [vmem:[%s1553_s21 + $0x188] sm:$0xff]  ;;  %v1293_v52 = vld [vmem:[%s1553_s21 + $0x180] sm:$0xff]  ;;  %v1299_v53 = vld [vmem:[%s1553_s21 + $0x198] sm:$0xff] }
  0x45   : > { %420 = vperm.xlu1 %1353, %v1215_v11   ;;  %414 = vperm.xlu0 %4, %v1213_v12   ;;  %v1297_v54 = vld [vmem:[%s1553_s21 + $0x190] sm:$0xff]  ;;  %v1303_v55 = vld [vmem:[%s1553_s21 + $0x1a8] sm:$0xff]  ;;  %v1301_v56 = vld [vmem:[%s1553_s21 + $0x1a0] sm:$0xff] }
  0x46   : > { %v1307_v57 = vld [vmem:[%s1553_s21 + $0x1b8] sm:$0xff]  ;;  %v1305_v58 = vld [vmem:[%s1553_s21 + $0x1b0] sm:$0xff]  ;;  %v1311_v59 = vld [vmem:[%s1553_s21 + $0x1c8] sm:$0xff] }
  0x47   : > { %v1309_v60 = vld [vmem:[%s1553_s21 + $0x1c0] sm:$0xff]  ;;  %v1315_v61 = vld [vmem:[%s1553_s21 + $0x1d8] sm:$0xff]  ;;  %v1313_v62 = vld [vmem:[%s1553_s21 + $0x1d0] sm:$0xff] }
  0x48   : > { %v1319_v63 = vld [vmem:[%s1553_s21 + $0x1e8] sm:$0xff]  ;;  %v1317_v0 = vld [vmem:[%s1553_s21 + $0x1e0] sm:$0xff]  ;;  %v1323_v2 = vld [vmem:[%s1553_s21 + $0x1f8] sm:$0xff] }
  0x49   : > { %432 = vperm.xlu1 %1353, %v1219_v13   ;;  %426 = vperm.xlu0 %4, %v1217_v14   ;;  %v1321_v3 = vld [vmem:[%s1553_s21 + $0x1f0] sm:$0xff] }
  0x4d   : > { %444 = vperm.xlu1 %1353, %v1223_v15   ;;  %438 = vperm.xlu0 %4, %v1221_v16  }
  0x51   : > { %456 = vperm.xlu1 %1353, %v1227_v17   ;;  %450 = vperm.xlu0 %4, %v1225_v18  }
  0x55   : > { %468 = vperm.xlu1 %1353, %v1231_v19   ;;  %462 = vperm.xlu0 %4, %v1229_v20  }
  0x59   : > { %480 = vperm.xlu1 %1353, %v1235_v21   ;;  %474 = vperm.xlu0 %4, %v1233_v22  }
  0x5d   : > { %492 = vperm.xlu1 %1353, %v1239_v23   ;;  %486 = vperm.xlu0 %4, %v1237_v24  }
  0x61   : > { %504 = vperm.xlu1 %1353, %v1243_v25   ;;  %498 = vperm.xlu0 %4, %v1241_v26  }
  0x65   : > { %516 = vperm.xlu1 %1353, %v1247_v27   ;;  %510 = vperm.xlu0 %4, %v1245_v28  }
  0x69   : > { %528 = vperm.xlu1 %1353, %v1251_v29   ;;  %522 = vperm.xlu0 %4, %v1249_v30  }
  0x6d   : > { %540 = vperm.xlu1 %1353, %v1255_v31   ;;  %534 = vperm.xlu0 %4, %v1253_v32  }
  0x71   : > { %552 = vperm.xlu1 %1353, %v1259_v33   ;;  %546 = vperm.xlu0 %4, %v1257_v34  }
  0x75   : > { %564 = vperm.xlu1 %1353, %v1263_v35   ;;  %558 = vperm.xlu0 %4, %v1261_v36  }
  0x79   : > { %576 = vperm.xlu1 %1353, %v1267_v37   ;;  %570 = vperm.xlu0 %4, %v1265_v38  }
  0x7d   : > { %588 = vperm.xlu1 %1353, %v1271_v39   ;;  %582 = vperm.xlu0 %4, %v1269_v40  }
  0x81   : > { %600 = vperm.xlu1 %1353, %v1275_v41   ;;  %594 = vperm.xlu0 %4, %v1273_v42  }
  0x85   : > { %612 = vperm.xlu1 %1353, %v1279_v43   ;;  %606 = vperm.xlu0 %4, %v1277_v44  }
  0x89   : > { %624 = vperm.xlu1 %1353, %v1283_v45   ;;  %618 = vperm.xlu0 %4, %v1281_v46  }
  0x8d   : > { %636 = vperm.xlu1 %1353, %v1287_v47   ;;  %630 = vperm.xlu0 %4, %v1285_v48  }
  0x91   : > { %648 = vperm.xlu1 %1353, %v1291_v49   ;;  %642 = vperm.xlu0 %4, %v1289_v50  }
  0x95   : > { %660 = vperm.xlu1 %1353, %v1295_v51   ;;  %654 = vperm.xlu0 %4, %v1293_v52  }
  0x99   : > { %672 = vperm.xlu1 %1353, %v1299_v53   ;;  %666 = vperm.xlu0 %4, %v1297_v54  }
  0x9d   : > { %684 = vperm.xlu1 %1353, %v1303_v55   ;;  %678 = vperm.xlu0 %4, %v1301_v56  }
  0xa1   : > { %696 = vperm.xlu1 %1353, %v1307_v57   ;;  %690 = vperm.xlu0 %4, %v1305_v58  }
  0xa5   : > { %708 = vperm.xlu1 %1353, %v1311_v59   ;;  %702 = vperm.xlu0 %4, %v1309_v60  }
  0xa9   : > { %720 = vperm.xlu1 %1353, %v1315_v61   ;;  %714 = vperm.xlu0 %4, %v1313_v62  }
  0xad   : > { %732 = vperm.xlu1 %1353, %v1319_v63   ;;  %726 = vperm.xlu0 %4, %v1317_v0  }
  0xb1   : > { %744 = vperm.xlu1 %1353, %v1323_v2   ;;  %738 = vperm.xlu0 %4, %v1321_v3  }
  0xb4   : > { %v379_v4 = vpop.permute.xlu1 %378  ;;  %v367_v5 = vpop.permute.xlu0 %366 }
  0xb5   : > { %917 = vst [vmem:[%s1623_s25 + $0x20] sm:$0xff] %v379_v4  ;;  %913 = vst [vmem:[%s1623_s25] sm:$0xff] %v367_v5 }
  0xb8   : > { %v385_v6 = vpop.permute.xlu1 %384  ;;  %v373_v7 = vpop.permute.xlu0 %372 }
  0xb9   : > { %919 = vst [vmem:[%s1623_s25 + $0x30] sm:$0xff] %v385_v6  ;;  %915 = vst [vmem:[%s1623_s25 + $0x10] sm:$0xff] %v373_v7 }
  0xbc   : > { %v397_v8 = vpop.permute.xlu1 %396  ;;  %v391_v9 = vpop.permute.xlu0 %390 }
  0xbd   : > { %923 = vst [vmem:[%s1623_s25 + $0x50] sm:$0xff] %v397_v8  ;;  %921 = vst [vmem:[%s1623_s25 + $0x40] sm:$0xff] %v391_v9 }
  0xc0   : > { %v409_v10 = vpop.permute.xlu1 %408  ;;  %v403_v11 = vpop.permute.xlu0 %402 }
  0xc1   : > { %927 = vst [vmem:[%s1623_s25 + $0x70] sm:$0xff] %v409_v10  ;;  %925 = vst [vmem:[%s1623_s25 + $0x60] sm:$0xff] %v403_v11 }
  0xc4   : > { %v421_v12 = vpop.permute.xlu1 %420  ;;  %v415_v13 = vpop.permute.xlu0 %414 }
  0xc5   : > { %931 = vst [vmem:[%s1623_s25 + $0x90] sm:$0xff] %v421_v12  ;;  %929 = vst [vmem:[%s1623_s25 + $0x80] sm:$0xff] %v415_v13 }
  0xc8   : > { %v433_v14 = vpop.permute.xlu1 %432  ;;  %v427_v15 = vpop.permute.xlu0 %426 }
  0xc9   : > { %935 = vst [vmem:[%s1623_s25 + $0xb0] sm:$0xff] %v433_v14  ;;  %933 = vst [vmem:[%s1623_s25 + $0xa0] sm:$0xff] %v427_v15 }
  0xcc   : > { %v445_v16 = vpop.permute.xlu1 %444  ;;  %v439_v17 = vpop.permute.xlu0 %438 }
  0xcd   : > { %939 = vst [vmem:[%s1623_s25 + $0xd0] sm:$0xff] %v445_v16  ;;  %937 = vst [vmem:[%s1623_s25 + $0xc0] sm:$0xff] %v439_v17 }
  0xd0   : > { %v457_v18 = vpop.permute.xlu1 %456  ;;  %v451_v19 = vpop.permute.xlu0 %450 }
  0xd1   : > { %943 = vst [vmem:[%s1623_s25 + $0xf0] sm:$0xff] %v457_v18  ;;  %941 = vst [vmem:[%s1623_s25 + $0xe0] sm:$0xff] %v451_v19 }
  0xd4   : > { %v469_v20 = vpop.permute.xlu1 %468  ;;  %v463_v21 = vpop.permute.xlu0 %462 }
  0xd5   : > { %947 = vst [vmem:[%s1623_s25 + $0x110] sm:$0xff] %v469_v20  ;;  %945 = vst [vmem:[%s1623_s25 + $0x100] sm:$0xff] %v463_v21 }
  0xd8   : > { %v481_v22 = vpop.permute.xlu1 %480  ;;  %v475_v23 = vpop.permute.xlu0 %474 }
  0xd9   : > { %951 = vst [vmem:[%s1623_s25 + $0x130] sm:$0xff] %v481_v22  ;;  %949 = vst [vmem:[%s1623_s25 + $0x120] sm:$0xff] %v475_v23 }
  0xdc   : > { %v493_v24 = vpop.permute.xlu1 %492  ;;  %v487_v25 = vpop.permute.xlu0 %486 }
  0xdd   : > { %955 = vst [vmem:[%s1623_s25 + $0x150] sm:$0xff] %v493_v24  ;;  %953 = vst [vmem:[%s1623_s25 + $0x140] sm:$0xff] %v487_v25 }
  0xe0   : > { %v505_v26 = vpop.permute.xlu1 %504  ;;  %v499_v27 = vpop.permute.xlu0 %498 }
  0xe1   : > { %959 = vst [vmem:[%s1623_s25 + $0x170] sm:$0xff] %v505_v26  ;;  %957 = vst [vmem:[%s1623_s25 + $0x160] sm:$0xff] %v499_v27 }
  0xe4   : > { %v517_v28 = vpop.permute.xlu1 %516  ;;  %v511_v29 = vpop.permute.xlu0 %510 }
  0xe5   : > { %963 = vst [vmem:[%s1623_s25 + $0x190] sm:$0xff] %v517_v28  ;;  %961 = vst [vmem:[%s1623_s25 + $0x180] sm:$0xff] %v511_v29 }
  0xe8   : > { %v529_v30 = vpop.permute.xlu1 %528  ;;  %v523_v31 = vpop.permute.xlu0 %522 }
  0xe9   : > { %967 = vst [vmem:[%s1623_s25 + $0x1b0] sm:$0xff] %v529_v30  ;;  %965 = vst [vmem:[%s1623_s25 + $0x1a0] sm:$0xff] %v523_v31 }
  0xec   : > { %v541_v32 = vpop.permute.xlu1 %540  ;;  %v535_v33 = vpop.permute.xlu0 %534 }
  0xed   : > { %971 = vst [vmem:[%s1623_s25 + $0x1d0] sm:$0xff] %v541_v32  ;;  %969 = vst [vmem:[%s1623_s25 + $0x1c0] sm:$0xff] %v535_v33 }
  0xf0   : > { %v553_v34 = vpop.permute.xlu1 %552  ;;  %v547_v35 = vpop.permute.xlu0 %546 }
  0xf1   : > { %975 = vst [vmem:[%s1623_s25 + $0x1f0] sm:$0xff] %v553_v34  ;;  %973 = vst [vmem:[%s1623_s25 + $0x1e0] sm:$0xff] %v547_v35 }
  0xf4   : > { %v565_v36 = vpop.permute.xlu1 %564  ;;  %v559_v37 = vpop.permute.xlu0 %558 }
  0xf5   : > { %979 = vst [vmem:[%s1623_s25 + $0x210] sm:$0xff] %v565_v36  ;;  %977 = vst [vmem:[%s1623_s25 + $0x200] sm:$0xff] %v559_v37 }
  0xf8   : > { %v577_v38 = vpop.permute.xlu1 %576  ;;  %v571_v39 = vpop.permute.xlu0 %570 }
  0xf9   : > { %983 = vst [vmem:[%s1623_s25 + $0x230] sm:$0xff] %v577_v38  ;;  %981 = vst [vmem:[%s1623_s25 + $0x220] sm:$0xff] %v571_v39 }
  0xfc   : > { %v589_v40 = vpop.permute.xlu1 %588  ;;  %v583_v41 = vpop.permute.xlu0 %582 }
  0xfd   : > { %987 = vst [vmem:[%s1623_s25 + $0x250] sm:$0xff] %v589_v40  ;;  %985 = vst [vmem:[%s1623_s25 + $0x240] sm:$0xff] %v583_v41 }
 0x100   : > { %v601_v42 = vpop.permute.xlu1 %600  ;;  %v595_v43 = vpop.permute.xlu0 %594 }
 0x101   : > { %991 = vst [vmem:[%s1623_s25 + $0x270] sm:$0xff] %v601_v42  ;;  %989 = vst [vmem:[%s1623_s25 + $0x260] sm:$0xff] %v595_v43 }
 0x104   : > { %v613_v44 = vpop.permute.xlu1 %612  ;;  %v607_v45 = vpop.permute.xlu0 %606 }
 0x105   : > { %995 = vst [vmem:[%s1623_s25 + $0x290] sm:$0xff] %v613_v44  ;;  %993 = vst [vmem:[%s1623_s25 + $0x280] sm:$0xff] %v607_v45 }
 0x108   : > { %v625_v46 = vpop.permute.xlu1 %624  ;;  %v619_v47 = vpop.permute.xlu0 %618 }
 0x109   : > { %999 = vst [vmem:[%s1623_s25 + $0x2b0] sm:$0xff] %v625_v46  ;;  %997 = vst [vmem:[%s1623_s25 + $0x2a0] sm:$0xff] %v619_v47 }
 0x10c   : > { %v637_v48 = vpop.permute.xlu1 %636  ;;  %v631_v49 = vpop.permute.xlu0 %630 }
 0x10d   : > { %1003 = vst [vmem:[%s1623_s25 + $0x2d0] sm:$0xff] %v637_v48  ;;  %1001 = vst [vmem:[%s1623_s25 + $0x2c0] sm:$0xff] %v631_v49 }
 0x110   : > { %v649_v50 = vpop.permute.xlu1 %648  ;;  %v643_v51 = vpop.permute.xlu0 %642 }
 0x111   : > { %1007 = vst [vmem:[%s1623_s25 + $0x2f0] sm:$0xff] %v649_v50  ;;  %1005 = vst [vmem:[%s1623_s25 + $0x2e0] sm:$0xff] %v643_v51 }
 0x114   : > { %v661_v52 = vpop.permute.xlu1 %660  ;;  %v655_v53 = vpop.permute.xlu0 %654 }
 0x115   : > { %1011 = vst [vmem:[%s1623_s25 + $0x310] sm:$0xff] %v661_v52  ;;  %1009 = vst [vmem:[%s1623_s25 + $0x300] sm:$0xff] %v655_v53 }
 0x118   : > { %v673_v54 = vpop.permute.xlu1 %672  ;;  %v667_v55 = vpop.permute.xlu0 %666 }
 0x119   : > { %1015 = vst [vmem:[%s1623_s25 + $0x330] sm:$0xff] %v673_v54  ;;  %1013 = vst [vmem:[%s1623_s25 + $0x320] sm:$0xff] %v667_v55 }
 0x11c   : > { %v685_v56 = vpop.permute.xlu1 %684  ;;  %v679_v57 = vpop.permute.xlu0 %678 }
 0x11d   : > { %1019 = vst [vmem:[%s1623_s25 + $0x350] sm:$0xff] %v685_v56  ;;  %1017 = vst [vmem:[%s1623_s25 + $0x340] sm:$0xff] %v679_v57 }
 0x120   : > { %v697_v58 = vpop.permute.xlu1 %696  ;;  %v691_v59 = vpop.permute.xlu0 %690 }
 0x121   : > { %1023 = vst [vmem:[%s1623_s25 + $0x370] sm:$0xff] %v697_v58  ;;  %1021 = vst [vmem:[%s1623_s25 + $0x360] sm:$0xff] %v691_v59 }
 0x124   : > { %v709_v60 = vpop.permute.xlu1 %708  ;;  %v703_v61 = vpop.permute.xlu0 %702 }
 0x125   : > { %1027 = vst [vmem:[%s1623_s25 + $0x390] sm:$0xff] %v709_v60  ;;  %1025 = vst [vmem:[%s1623_s25 + $0x380] sm:$0xff] %v703_v61 }
 0x128   : > { %v721_v62 = vpop.permute.xlu1 %720  ;;  %v715_v63 = vpop.permute.xlu0 %714 }
 0x129   : > { %1031 = vst [vmem:[%s1623_s25 + $0x3b0] sm:$0xff] %v721_v62  ;;  %1029 = vst [vmem:[%s1623_s25 + $0x3a0] sm:$0xff] %v715_v63 }
 0x12c   : > { %v733_v0 = vpop.permute.xlu1 %732  ;;  %v727_v2 = vpop.permute.xlu0 %726 }
 0x12d   : > { %1035 = vst [vmem:[%s1623_s25 + $0x3d0] sm:$0xff] %v733_v0  ;;  %1033 = vst [vmem:[%s1623_s25 + $0x3c0] sm:$0xff] %v727_v2 }
 0x130   : > { %v745_v3 = vpop.permute.xlu1 %744  ;;  %v739_v4 = vpop.permute.xlu0 %738 }
 0x131   : > { %1039 = vst [vmem:[%s1623_s25 + $0x3f0] sm:$0xff] %v745_v3  ;;  %1037 = vst [vmem:[%s1623_s25 + $0x3e0] sm:$0xff] %v739_v4 }
 0x132 PF: > { %s10_s8 = sadd.s32 1, %s1376_s8   ;;  %s1700_s6 = smov %s1372_s7 }
 0x133   : > { %p7_p5 = scmp.ge.s32.totalorder %s10_s8, 4   ;;  %s1701_s7 = smov %s1703_s10 }
 0x135   :  { %9 = sbr.rel (!%p7_p5) target bundleno = 7 (0x7), region = 244 }

// kernel: forward.5
= control target key start
LH: loop header
LB: loop body
LE: loop exit
PB: predicated region body
PF: predicated region fallthrough
CT: control target
= control target key end

     0   :  { %10 = vsyncpa [#allocation5], 0  ;;  %s2137_s0 = inlined_call_operand.vmem [shape: f32[32,16], index: 0, kind: input, shape index: {}]   ;;  %s2138_s1 = inlined_call_operand.vmem [shape: f32[16,2], index: 1, kind: input, shape index: {}]   ;;  %s2139_s2 = inlined_call_operand.vmem [shape: f32[1,2], index: 2, kind: input, shape index: {}]   ;;  %s2140_s3 = inlined_call_operand.vmem [shape: f32[32,4096], index: 3, kind: input, shape index: {}]   ;;  %s2141_s4 = inlined_call_operand.vmem [shape: f32[32,4096], index: 4, kind: input, shape index: {}]   ;;  %s2142_s5 = inlined_call_operand.hbm [shape: f32[32,4096], index: 5, kind: output, shape index: {}]  }
   0x1   :  { %12 = vsyncpa [#allocation5 + $0x1], 0  ;;  %s1427_s18 = smov 0   ;;  %s1429_s19 = smov 0  }
   0x2   :  { %s1431_s20 = smov 0   ;;  %s1433_s21 = smov 0  }
   0x3 LB: > { %s1216_s22 = sadd.s32 4294967295, %s1389_s21   ;;  %s1217_s23 = sadd.s32 4294967294, %s1389_s21   ;;  %s1389_s21 = sphi %s1433_s21, %s2166_s21   ;;  %s1385_s20 = sphi %s1431_s20, %s2165_s20   ;;  %s1381_s19 = sphi %s1429_s19, %s2164_s19   ;;  %s1377_s18 = sphi %s1427_s18, %s2163_s18  }
   0x4   : > { %s1450_s24 = sadd.s32 1, %s1389_s21   ;;  %s88_s25 = sadd.s32 1, %s1385_s20 }
   0x5   : > { %s85_s26 = ssub.s32 %s1389_s21, %s1450_s24  ;;  %p95_p0 = scmp.ne.s32.totalorder %s1385_s20, %s1381_s19 }
   0x6   : > { %p86_p1 = scmp.eq.s32.totalorder %s85_s26, 0  ;;  %p96_p2 = scmp.eq.s32.totalorder %s1389_s21, 0 }
   0x7   : > { %p151_p3 = scmp.eq.s32.totalorder %s1216_s22, 1  ;;  %p156_p4 = scmp.ne.s32.totalorder %s1381_s19, %s1377_s18 }
   0x8   : > { %s1463_s27 = scalar_select %p86_p1, %s1385_s20, %s88_s25  }
   0x9   : > { %p1465_p5 = por %p96_p2, %p95_p0  ;;  %p1469_p6 = por %p151_p3, %p95_p0 }
   0xa   : > { %p157_p7 = scmp.eq.s32.totalorder %s1217_s23, 1  ;;  %p1219_p9 = scmp.ge.s32.totalorder %s1389_s21, 2 }
   0xc   : > { %p1473_p8 = por %p157_p7, %p156_p4  ;;  %182 = sbr.rel (%p1219_p9) target bundleno = 91 (0x5b), region = 28 }
  0x13   : > { %185 = sbr.rel (!%p1465_p5) target bundleno = 55 (0x37), region = 32  ;;  %s187_s6 = sand.u32 (%p1465_p5), 1, %s1385_s20  }
  0x14   : > { %s1240_s7 = sshll.u32 (%p1465_p5), %s1389_s21, 7  ;;  %s1220_s8 = sshll.u32 (%p1465_p5), %s187_s6, 9 }
  0x15   : > { %s1487_s11 = scalar_lea.vmem (%p1465_p5), %s2140_s3, %s1240_s7  ;;  %s1492_s12 = scalar_lea.vmem (%p1465_p5), [#allocation2], %s1220_s8 }
  0x16   : > { %v205_v0 = vld [vmem:[%s1487_s11] sm:$0xff] (%p1465_p5)  ;;  %v207_v1 = vld [vmem:[%s1487_s11 + $0x8] sm:$0xff] (%p1465_p5)  ;;  %v209_v2 = vld [vmem:[%s1487_s11 + $0x10] sm:$0xff] (%p1465_p5) }
  0x17   : > { %206 = vst [vmem:[%s1492_s12] sm:$0xff] (%p1465_p5), %v205_v0  ;;  %208 = vst [vmem:[%s1492_s12 + $0x8] sm:$0xff] (%p1465_p5), %v207_v1  ;;  %v211_v3 = vld [vmem:[%s1487_s11 + $0x18] sm:$0xff] (%p1465_p5)  ;;  %v213_v4 = vld [vmem:[%s1487_s11 + $0x20] sm:$0xff] (%p1465_p5) }
  0x18   : > { %210 = vst [vmem:[%s1492_s12 + $0x10] sm:$0xff] (%p1465_p5), %v209_v2  ;;  %v215_v5 = vld [vmem:[%s1487_s11 + $0x28] sm:$0xff] (%p1465_p5)  ;;  %212 = vst [vmem:[%s1492_s12 + $0x18] sm:$0xff] (%p1465_p5), %v211_v3  ;;  %v217_v6 = vld [vmem:[%s1487_s11 + $0x30] sm:$0xff] (%p1465_p5) }
  0x19   : > { %214 = vst [vmem:[%s1492_s12 + $0x20] sm:$0xff] (%p1465_p5), %v213_v4  ;;  %216 = vst [vmem:[%s1492_s12 + $0x28] sm:$0xff] (%p1465_p5), %v215_v5  ;;  %v219_v7 = vld [vmem:[%s1487_s11 + $0x38] sm:$0xff] (%p1465_p5)  ;;  %v221_v8 = vld [vmem:[%s1487_s11 + $0x40] sm:$0xff] (%p1465_p5) }
  0x1a   : > { %218 = vst [vmem:[%s1492_s12 + $0x30] sm:$0xff] %v217_v6  ;;  %220 = vst [vmem:[%s1492_s12 + $0x38] sm:$0xff] %v219_v7  ;;  %v223_v9 = vld [vmem:[%s1487_s11 + $0x48] sm:$0xff]  ;;  %v225_v10 = vld [vmem:[%s1487_s11 + $0x50] sm:$0xff] }
  0x1b   : > { %222 = vst [vmem:[%s1492_s12 + $0x40] sm:$0xff] %v221_v8  ;;  %v227_v11 = vld [vmem:[%s1487_s11 + $0x58] sm:$0xff]  ;;  %224 = vst [vmem:[%s1492_s12 + $0x48] sm:$0xff] %v223_v9  ;;  %v229_v12 = vld [vmem:[%s1487_s11 + $0x60] sm:$0xff] }
  0x1c   : > { %226 = vst [vmem:[%s1492_s12 + $0x50] sm:$0xff] %v225_v10  ;;  %228 = vst [vmem:[%s1492_s12 + $0x58] sm:$0xff] %v227_v11  ;;  %v231_v13 = vld [vmem:[%s1487_s11 + $0x68] sm:$0xff]  ;;  %v233_v14 = vld [vmem:[%s1487_s11 + $0x70] sm:$0xff] }
  0x1d   : > { %230 = vst [vmem:[%s1492_s12 + $0x60] sm:$0xff] %v229_v12  ;;  %232 = vst [vmem:[%s1492_s12 + $0x68] sm:$0xff] %v231_v13  ;;  %v235_v15 = vld [vmem:[%s1487_s11 + $0x78] sm:$0xff]  ;;  %v237_v16 = vld [vmem:[%s1487_s11 + $0x100] sm:$0xff] }
  0x1e   : > { %234 = vst [vmem:[%s1492_s12 + $0x70] sm:$0xff] %v233_v14  ;;  %v239_v17 = vld [vmem:[%s1487_s11 + $0x108] sm:$0xff]  ;;  %236 = vst [vmem:[%s1492_s12 + $0x78] sm:$0xff] %v235_v15  ;;  %v241_v18 = vld [vmem:[%s1487_s11 + $0x110] sm:$0xff] }
  0x1f   : > { %238 = vst [vmem:[%s1492_s12 + $0x80] sm:$0xff] %v237_v16  ;;  %240 = vst [vmem:[%s1492_s12 + $0x88] sm:$0xff] %v239_v17  ;;  %v243_v19 = vld [vmem:[%s1487_s11 + $0x118] sm:$0xff]  ;;  %v245_v20 = vld [vmem:[%s1487_s11 + $0x120] sm:$0xff] }
  0x20   : > { %242 = vst [vmem:[%s1492_s12 + $0x90] sm:$0xff] %v241_v18  ;;  %244 = vst [vmem:[%s1492_s12 + $0x98] sm:$0xff] %v243_v19  ;;  %v247_v21 = vld [vmem:[%s1487_s11 + $0x128] sm:$0xff]  ;;  %v249_v22 = vld [vmem:[%s1487_s11 + $0x130] sm:$0xff] }
  0x21   : > { %246 = vst [vmem:[%s1492_s12 + $0xa0] sm:$0xff] %v245_v20  ;;  %v251_v23 = vld [vmem:[%s1487_s11 + $0x138] sm:$0xff]  ;;  %248 = vst [vmem:[%s1492_s12 + $0xa8] sm:$0xff] %v247_v21  ;;  %v253_v24 = vld [vmem:[%s1487_s11 + $0x140] sm:$0xff] }
  0x22   : > { %250 = vst [vmem:[%s1492_s12 + $0xb0] sm:$0xff] %v249_v22  ;;  %252 = vst [vmem:[%s1492_s12 + $0xb8] sm:$0xff] %v251_v23  ;;  %v255_v25 = vld [vmem:[%s1487_s11 + $0x148] sm:$0xff]  ;;  %v257_v26 = vld [vmem:[%s1487_s11 + $0x150] sm:$0xff] }
  0x23   : > { %254 = vst [vmem:[%s1492_s12 + $0xc0] sm:$0xff] %v253_v24  ;;  %256 = vst [vmem:[%s1492_s12 + $0xc8] sm:$0xff] %v255_v25  ;;  %v259_v27 = vld [vmem:[%s1487_s11 + $0x158] sm:$0xff]  ;;  %v261_v28 = vld [vmem:[%s1487_s11 + $0x160] sm:$0xff] }
  0x24   : > { %258 = vst [vmem:[%s1492_s12 + $0xd0] sm:$0xff] %v257_v26  ;;  %v263_v29 = vld [vmem:[%s1487_s11 + $0x168] sm:$0xff]  ;;  %260 = vst [vmem:[%s1492_s12 + $0xd8] sm:$0xff] %v259_v27  ;;  %v265_v30 = vld [vmem:[%s1487_s11 + $0x170] sm:$0xff] }
  0x25   : > { %262 = vst [vmem:[%s1492_s12 + $0xe0] sm:$0xff] %v261_v28  ;;  %264 = vst [vmem:[%s1492_s12 + $0xe8] sm:$0xff] %v263_v29  ;;  %v267_v31 = vld [vmem:[%s1487_s11 + $0x178] sm:$0xff]  ;;  %v269_v32 = vld [vmem:[%s1487_s11 + $0x200] sm:$0xff] }
  0x26   : > { %266 = vst [vmem:[%s1492_s12 + $0xf0] sm:$0xff] %v265_v30  ;;  %268 = vst [vmem:[%s1492_s12 + $0xf8] sm:$0xff] %v267_v31  ;;  %v271_v33 = vld [vmem:[%s1487_s11 + $0x208] sm:$0xff]  ;;  %v273_v34 = vld [vmem:[%s1487_s11 + $0x210] sm:$0xff] }
  0x27   : > { %270 = vst [vmem:[%s1492_s12 + $0x100] sm:$0xff] %v269_v32  ;;  %v275_v35 = vld [vmem:[%s1487_s11 + $0x218] sm:$0xff]  ;;  %272 = vst [vmem:[%s1492_s12 + $0x108] sm:$0xff] %v271_v33  ;;  %v277_v36 = vld [vmem:[%s1487_s11 + $0x220] sm:$0xff] }
  0x28   : > { %274 = vst [vmem:[%s1492_s12 + $0x110] sm:$0xff] %v273_v34  ;;  %276 = vst [vmem:[%s1492_s12 + $0x118] sm:$0xff] %v275_v35  ;;  %v279_v37 = vld [vmem:[%s1487_s11 + $0x228] sm:$0xff]  ;;  %v281_v38 = vld [vmem:[%s1487_s11 + $0x230] sm:$0xff] }
  0x29   : > { %278 = vst [vmem:[%s1492_s12 + $0x120] sm:$0xff] %v277_v36  ;;  %280 = vst [vmem:[%s1492_s12 + $0x128] sm:$0xff] %v279_v37  ;;  %v283_v39 = vld [vmem:[%s1487_s11 + $0x238] sm:$0xff]  ;;  %v285_v40 = vld [vmem:[%s1487_s11 + $0x240] sm:$0xff] }
  0x2a   : > { %282 = vst [vmem:[%s1492_s12 + $0x130] sm:$0xff] %v281_v38  ;;  %v287_v41 = vld [vmem:[%s1487_s11 + $0x248] sm:$0xff]  ;;  %284 = vst [vmem:[%s1492_s12 + $0x138] sm:$0xff] %v283_v39  ;;  %v289_v42 = vld [vmem:[%s1487_s11 + $0x250] sm:$0xff] }
  0x2b   : > { %286 = vst [vmem:[%s1492_s12 + $0x140] sm:$0xff] %v285_v40  ;;  %288 = vst [vmem:[%s1492_s12 + $0x148] sm:$0xff] %v287_v41  ;;  %v291_v43 = vld [vmem:[%s1487_s11 + $0x258] sm:$0xff]  ;;  %v293_v44 = vld [vmem:[%s1487_s11 + $0x260] sm:$0xff] }
  0x2c   : > { %290 = vst [vmem:[%s1492_s12 + $0x150] sm:$0xff] %v289_v42  ;;  %292 = vst [vmem:[%s1492_s12 + $0x158] sm:$0xff] %v291_v43  ;;  %v295_v45 = vld [vmem:[%s1487_s11 + $0x268] sm:$0xff]  ;;  %v297_v46 = vld [vmem:[%s1487_s11 + $0x270] sm:$0xff] }
  0x2d   : > { %294 = vst [vmem:[%s1492_s12 + $0x160] sm:$0xff] %v293_v44  ;;  %v299_v47 = vld [vmem:[%s1487_s11 + $0x278] sm:$0xff]  ;;  %296 = vst [vmem:[%s1492_s12 + $0x168] sm:$0xff] %v295_v45  ;;  %v301_v48 = vld [vmem:[%s1487_s11 + $0x300] sm:$0xff] }
  0x2e   : > { %298 = vst [vmem:[%s1492_s12 + $0x170] sm:$0xff] %v297_v46  ;;  %300 = vst [vmem:[%s1492_s12 + $0x178] sm:$0xff] %v299_v47  ;;  %v303_v49 = vld [vmem:[%s1487_s11 + $0x308] sm:$0xff]  ;;  %v305_v50 = vld [vmem:[%s1487_s11 + $0x310] sm:$0xff] }
  0x2f   : > { %302 = vst [vmem:[%s1492_s12 + $0x180] sm:$0xff] %v301_v48  ;;  %304 = vst [vmem:[%s1492_s12 + $0x188] sm:$0xff] %v303_v49  ;;  %v307_v51 = vld [vmem:[%s1487_s11 + $0x318] sm:$0xff]  ;;  %v309_v52 = vld [vmem:[%s1487_s11 + $0x320] sm:$0xff] }
  0x30   : > { %306 = vst [vmem:[%s1492_s12 + $0x190] sm:$0xff] %v305_v50  ;;  %v311_v53 = vld [vmem:[%s1487_s11 + $0x328] sm:$0xff]  ;;  %308 = vst [vmem:[%s1492_s12 + $0x198] sm:$0xff] %v307_v51  ;;  %v313_v54 = vld [vmem:[%s1487_s11 + $0x330] sm:$0xff] }
  0x31   : > { %310 = vst [vmem:[%s1492_s12 + $0x1a0] sm:$0xff] %v309_v52  ;;  %312 = vst [vmem:[%s1492_s12 + $0x1a8] sm:$0xff] %v311_v53  ;;  %v315_v55 = vld [vmem:[%s1487_s11 + $0x338] sm:$0xff]  ;;  %v317_v56 = vld [vmem:[%s1487_s11 + $0x340] sm:$0xff] }
  0x32   : > { %314 = vst [vmem:[%s1492_s12 + $0x1b0] sm:$0xff] %v313_v54  ;;  %316 = vst [vmem:[%s1492_s12 + $0x1b8] sm:$0xff] %v315_v55  ;;  %v319_v57 = vld [vmem:[%s1487_s11 + $0x348] sm:$0xff]  ;;  %v321_v58 = vld [vmem:[%s1487_s11 + $0x350] sm:$0xff] }
  0x33   : > { %318 = vst [vmem:[%s1492_s12 + $0x1c0] sm:$0xff] %v317_v56  ;;  %v323_v59 = vld [vmem:[%s1487_s11 + $0x358] sm:$0xff]  ;;  %320 = vst [vmem:[%s1492_s12 + $0x1c8] sm:$0xff] %v319_v57  ;;  %v325_v60 = vld [vmem:[%s1487_s11 + $0x360] sm:$0xff] }
  0x34   : > { %322 = vst [vmem:[%s1492_s12 + $0x1d0] sm:$0xff] %v321_v58  ;;  %324 = vst [vmem:[%s1492_s12 + $0x1d8] sm:$0xff] %v323_v59  ;;  %v327_v61 = vld [vmem:[%s1487_s11 + $0x368] sm:$0xff]  ;;  %v329_v62 = vld [vmem:[%s1487_s11 + $0x370] sm:$0xff] }
  0x35   : > { %326 = vst [vmem:[%s1492_s12 + $0x1e0] sm:$0xff] %v325_v60  ;;  %328 = vst [vmem:[%s1492_s12 + $0x1e8] sm:$0xff] %v327_v61  ;;  %v331_v63 = vld [vmem:[%s1487_s11 + $0x378] sm:$0xff] }
  0x36   : > { %330 = vst [vmem:[%s1492_s12 + $0x1f0] sm:$0xff] %v329_v62  ;;  %332 = vst [vmem:[%s1492_s12 + $0x1f8] sm:$0xff] %v331_v63 }
  0x37 PF: > { %338 = sbr.rel (!%p1465_p5) target bundleno = 91 (0x5b), region = 55  ;;  %s340_s13 = sand.u32 (%p1465_p5), 1, %s1385_s20  }
  0x38   : > { %s1241_s14 = sshll.u32 (%p1465_p5), %s1389_s21, 7  ;;  %s1223_s15 = sshll.u32 (%p1465_p5), %s340_s13, 9 }
  0x39   : > { %s1626_s23 = scalar_lea.vmem (%p1465_p5), %s2141_s4, %s1241_s14  ;;  %s1631_s25 = scalar_lea.vmem (%p1465_p5), [#allocation3], %s1223_s15 }
  0x3a   : > { %v358_v0 = vld [vmem:[%s1626_s23] sm:$0xff] (%p1465_p5)  ;;  %v360_v1 = vld [vmem:[%s1626_s23 + $0x8] sm:$0xff] (%p1465_p5)  ;;  %v362_v2 = vld [vmem:[%s1626_s23 + $0x10] sm:$0xff] (%p1465_p5) }
  0x3b   : > { %359 = vst [vmem:[%s1631_s25] sm:$0xff] (%p1465_p5), %v358_v0  ;;  %361 = vst [vmem:[%s1631_s25 + $0x8] sm:$0xff] (%p1465_p5), %v360_v1  ;;  %v364_v3 = vld [vmem:[%s1626_s23 + $0x18] sm:$0xff] (%p1465_p5)  ;;  %v366_v4 = vld [vmem:[%s1626_s23 + $0x20] sm:$0xff] (%p1465_p5) }
  0x3c   : > { %363 = vst [vmem:[%s1631_s25 + $0x10] sm:$0xff] (%p1465_p5), %v362_v2  ;;  %v368_v5 = vld [vmem:[%s1626_s23 + $0x28] sm:$0xff] (%p1465_p5)  ;;  %365 = vst [vmem:[%s1631_s25 + $0x18] sm:$0xff] (%p1465_p5), %v364_v3  ;;  %v370_v6 = vld [vmem:[%s1626_s23 + $0x30] sm:$0xff] (%p1465_p5) }
  0x3d   : > { %367 = vst [vmem:[%s1631_s25 + $0x20] sm:$0xff] (%p1465_p5), %v366_v4  ;;  %369 = vst [vmem:[%s1631_s25 + $0x28] sm:$0xff] (%p1465_p5), %v368_v5  ;;  %v372_v7 = vld [vmem:[%s1626_s23 + $0x38] sm:$0xff] (%p1465_p5)  ;;  %v374_v8 = vld [vmem:[%s1626_s23 + $0x40] sm:$0xff] (%p1465_p5) }
  0x3e   : > { %371 = vst [vmem:[%s1631_s25 + $0x30] sm:$0xff] %v370_v6  ;;  %373 = vst [vmem:[%s1631_s25 + $0x38] sm:$0xff] %v372_v7  ;;  %v376_v9 = vld [vmem:[%s1626_s23 + $0x48] sm:$0xff]  ;;  %v378_v10 = vld [vmem:[%s1626_s23 + $0x50] sm:$0xff] }
  0x3f   : > { %375 = vst [vmem:[%s1631_s25 + $0x40] sm:$0xff] %v374_v8  ;;  %v380_v11 = vld [vmem:[%s1626_s23 + $0x58] sm:$0xff]  ;;  %377 = vst [vmem:[%s1631_s25 + $0x48] sm:$0xff] %v376_v9  ;;  %v382_v12 = vld [vmem:[%s1626_s23 + $0x60] sm:$0xff] }
  0x40   : > { %379 = vst [vmem:[%s1631_s25 + $0x50] sm:$0xff] %v378_v10  ;;  %381 = vst [vmem:[%s1631_s25 + $0x58] sm:$0xff] %v380_v11  ;;  %v384_v13 = vld [vmem:[%s1626_s23 + $0x68] sm:$0xff]  ;;  %v386_v14 = vld [vmem:[%s1626_s23 + $0x70] sm:$0xff] }
  0x41   : > { %383 = vst [vmem:[%s1631_s25 + $0x60] sm:$0xff] %v382_v12  ;;  %385 = vst [vmem:[%s1631_s25 + $0x68] sm:$0xff] %v384_v13  ;;  %v388_v15 = vld [vmem:[%s1626_s23 + $0x78] sm:$0xff]  ;;  %v390_v16 = vld [vmem:[%s1626_s23 + $0x100] sm:$0xff] }
  0x42   : > { %387 = vst [vmem:[%s1631_s25 + $0x70] sm:$0xff] %v386_v14  ;;  %v392_v17 = vld [vmem:[%s1626_s23 + $0x108] sm:$0xff]  ;;  %389 = vst [vmem:[%s1631_s25 + $0x78] sm:$0xff] %v388_v15  ;;  %v394_v18 = vld [vmem:[%s1626_s23 + $0x110] sm:$0xff] }
  0x43   : > { %391 = vst [vmem:[%s1631_s25 + $0x80] sm:$0xff] %v390_v16  ;;  %393 = vst [vmem:[%s1631_s25 + $0x88] sm:$0xff] %v392_v17  ;;  %v396_v19 = vld [vmem:[%s1626_s23 + $0x118] sm:$0xff]  ;;  %v398_v20 = vld [vmem:[%s1626_s23 + $0x120] sm:$0xff] }
  0x44   : > { %395 = vst [vmem:[%s1631_s25 + $0x90] sm:$0xff] %v394_v18  ;;  %397 = vst [vmem:[%s1631_s25 + $0x98] sm:$0xff] %v396_v19  ;;  %v400_v21 = vld [vmem:[%s1626_s23 + $0x128] sm:$0xff]  ;;  %v402_v22 = vld [vmem:[%s1626_s23 + $0x130] sm:$0xff] }
  0x45   : > { %399 = vst [vmem:[%s1631_s25 + $0xa0] sm:$0xff] %v398_v20  ;;  %v404_v23 = vld [vmem:[%s1626_s23 + $0x138] sm:$0xff]  ;;  %401 = vst [vmem:[%s1631_s25 + $0xa8] sm:$0xff] %v400_v21  ;;  %v406_v24 = vld [vmem:[%s1626_s23 + $0x140] sm:$0xff] }
  0x46   : > { %403 = vst [vmem:[%s1631_s25 + $0xb0] sm:$0xff] %v402_v22  ;;  %405 = vst [vmem:[%s1631_s25 + $0xb8] sm:$0xff] %v404_v23  ;;  %v408_v25 = vld [vmem:[%s1626_s23 + $0x148] sm:$0xff]  ;;  %v410_v26 = vld [vmem:[%s1626_s23 + $0x150] sm:$0xff] }
  0x47   : > { %407 = vst [vmem:[%s1631_s25 + $0xc0] sm:$0xff] %v406_v24  ;;  %409 = vst [vmem:[%s1631_s25 + $0xc8] sm:$0xff] %v408_v25  ;;  %v412_v27 = vld [vmem:[%s1626_s23 + $0x158] sm:$0xff]  ;;  %v414_v28 = vld [vmem:[%s1626_s23 + $0x160] sm:$0xff] }
  0x48   : > { %411 = vst [vmem:[%s1631_s25 + $0xd0] sm:$0xff] %v410_v26  ;;  %v416_v29 = vld [vmem:[%s1626_s23 + $0x168] sm:$0xff]  ;;  %413 = vst [vmem:[%s1631_s25 + $0xd8] sm:$0xff] %v412_v27  ;;  %v418_v30 = vld [vmem:[%s1626_s23 + $0x170] sm:$0xff] }
  0x49   : > { %415 = vst [vmem:[%s1631_s25 + $0xe0] sm:$0xff] %v414_v28  ;;  %417 = vst [vmem:[%s1631_s25 + $0xe8] sm:$0xff] %v416_v29  ;;  %v420_v31 = vld [vmem:[%s1626_s23 + $0x178] sm:$0xff]  ;;  %v422_v32 = vld [vmem:[%s1626_s23 + $0x200] sm:$0xff] }
  0x4a   : > { %419 = vst [vmem:[%s1631_s25 + $0xf0] sm:$0xff] %v418_v30  ;;  %421 = vst [vmem:[%s1631_s25 + $0xf8] sm:$0xff] %v420_v31  ;;  %v424_v33 = vld [vmem:[%s1626_s23 + $0x208] sm:$0xff]  ;;  %v426_v34 = vld [vmem:[%s1626_s23 + $0x210] sm:$0xff] }
  0x4b   : > { %423 = vst [vmem:[%s1631_s25 + $0x100] sm:$0xff] %v422_v32  ;;  %v428_v35 = vld [vmem:[%s1626_s23 + $0x218] sm:$0xff]  ;;  %425 = vst [vmem:[%s1631_s25 + $0x108] sm:$0xff] %v424_v33  ;;  %v430_v36 = vld [vmem:[%s1626_s23 + $0x220] sm:$0xff] }
  0x4c   : > { %427 = vst [vmem:[%s1631_s25 + $0x110] sm:$0xff] %v426_v34  ;;  %429 = vst [vmem:[%s1631_s25 + $0x118] sm:$0xff] %v428_v35  ;;  %v432_v37 = vld [vmem:[%s1626_s23 + $0x228] sm:$0xff]  ;;  %v434_v38 = vld [vmem:[%s1626_s23 + $0x230] sm:$0xff] }
  0x4d   : > { %431 = vst [vmem:[%s1631_s25 + $0x120] sm:$0xff] %v430_v36  ;;  %433 = vst [vmem:[%s1631_s25 + $0x128] sm:$0xff] %v432_v37  ;;  %v436_v39 = vld [vmem:[%s1626_s23 + $0x238] sm:$0xff]  ;;  %v438_v40 = vld [vmem:[%s1626_s23 + $0x240] sm:$0xff] }
  0x4e   : > { %435 = vst [vmem:[%s1631_s25 + $0x130] sm:$0xff] %v434_v38  ;;  %v440_v41 = vld [vmem:[%s1626_s23 + $0x248] sm:$0xff]  ;;  %437 = vst [vmem:[%s1631_s25 + $0x138] sm:$0xff] %v436_v39  ;;  %v442_v42 = vld [vmem:[%s1626_s23 + $0x250] sm:$0xff] }
  0x4f   : > { %439 = vst [vmem:[%s1631_s25 + $0x140] sm:$0xff] %v438_v40  ;;  %441 = vst [vmem:[%s1631_s25 + $0x148] sm:$0xff] %v440_v41  ;;  %v444_v43 = vld [vmem:[%s1626_s23 + $0x258] sm:$0xff]  ;;  %v446_v44 = vld [vmem:[%s1626_s23 + $0x260] sm:$0xff] }
  0x50   : > { %443 = vst [vmem:[%s1631_s25 + $0x150] sm:$0xff] %v442_v42  ;;  %445 = vst [vmem:[%s1631_s25 + $0x158] sm:$0xff] %v444_v43  ;;  %v448_v45 = vld [vmem:[%s1626_s23 + $0x268] sm:$0xff]  ;;  %v450_v46 = vld [vmem:[%s1626_s23 + $0x270] sm:$0xff] }
  0x51   : > { %447 = vst [vmem:[%s1631_s25 + $0x160] sm:$0xff] %v446_v44  ;;  %v452_v47 = vld [vmem:[%s1626_s23 + $0x278] sm:$0xff]  ;;  %449 = vst [vmem:[%s1631_s25 + $0x168] sm:$0xff] %v448_v45  ;;  %v454_v48 = vld [vmem:[%s1626_s23 + $0x300] sm:$0xff] }
  0x52   : > { %451 = vst [vmem:[%s1631_s25 + $0x170] sm:$0xff] %v450_v46  ;;  %453 = vst [vmem:[%s1631_s25 + $0x178] sm:$0xff] %v452_v47  ;;  %v456_v49 = vld [vmem:[%s1626_s23 + $0x308] sm:$0xff]  ;;  %v458_v50 = vld [vmem:[%s1626_s23 + $0x310] sm:$0xff] }
  0x53   : > { %455 = vst [vmem:[%s1631_s25 + $0x180] sm:$0xff] %v454_v48  ;;  %457 = vst [vmem:[%s1631_s25 + $0x188] sm:$0xff] %v456_v49  ;;  %v460_v51 = vld [vmem:[%s1626_s23 + $0x318] sm:$0xff]  ;;  %v462_v52 = vld [vmem:[%s1626_s23 + $0x320] sm:$0xff] }
  0x54   : > { %459 = vst [vmem:[%s1631_s25 + $0x190] sm:$0xff] %v458_v50  ;;  %v464_v53 = vld [vmem:[%s1626_s23 + $0x328] sm:$0xff]  ;;  %461 = vst [vmem:[%s1631_s25 + $0x198] sm:$0xff] %v460_v51  ;;  %v466_v54 = vld [vmem:[%s1626_s23 + $0x330] sm:$0xff] }
  0x55   : > { %463 = vst [vmem:[%s1631_s25 + $0x1a0] sm:$0xff] %v462_v52  ;;  %465 = vst [vmem:[%s1631_s25 + $0x1a8] sm:$0xff] %v464_v53  ;;  %v468_v55 = vld [vmem:[%s1626_s23 + $0x338] sm:$0xff]  ;;  %v470_v56 = vld [vmem:[%s1626_s23 + $0x340] sm:$0xff] }
  0x56   : > { %467 = vst [vmem:[%s1631_s25 + $0x1b0] sm:$0xff] %v466_v54  ;;  %469 = vst [vmem:[%s1631_s25 + $0x1b8] sm:$0xff] %v468_v55  ;;  %v472_v57 = vld [vmem:[%s1626_s23 + $0x348] sm:$0xff]  ;;  %v474_v58 = vld [vmem:[%s1626_s23 + $0x350] sm:$0xff] }
  0x57   : > { %471 = vst [vmem:[%s1631_s25 + $0x1c0] sm:$0xff] %v470_v56  ;;  %v476_v59 = vld [vmem:[%s1626_s23 + $0x358] sm:$0xff]  ;;  %473 = vst [vmem:[%s1631_s25 + $0x1c8] sm:$0xff] %v472_v57  ;;  %v478_v60 = vld [vmem:[%s1626_s23 + $0x360] sm:$0xff] }
  0x58   : > { %475 = vst [vmem:[%s1631_s25 + $0x1d0] sm:$0xff] %v474_v58  ;;  %477 = vst [vmem:[%s1631_s25 + $0x1d8] sm:$0xff] %v476_v59  ;;  %v480_v61 = vld [vmem:[%s1626_s23 + $0x368] sm:$0xff]  ;;  %v482_v62 = vld [vmem:[%s1626_s23 + $0x370] sm:$0xff] }
  0x59   : > { %479 = vst [vmem:[%s1631_s25 + $0x1e0] sm:$0xff] %v478_v60  ;;  %481 = vst [vmem:[%s1631_s25 + $0x1e8] sm:$0xff] %v480_v61  ;;  %v484_v63 = vld [vmem:[%s1626_s23 + $0x378] sm:$0xff] }
  0x5a   : > { %483 = vst [vmem:[%s1631_s25 + $0x1f0] sm:$0xff] %v482_v62  ;;  %485 = vst [vmem:[%s1631_s25 + $0x1f8] sm:$0xff] %v484_v63 }
  0x5b PF: > { %p1226_p10 = scmp.ge.s32.totalorder %s1389_s21, 1  ;;  %p490_p11 = scmp.lt.s32.totalorder %s1389_s21, 3 }
  0x5d   : > { %p491_p12 = pnand %p1226_p10, %p490_p11 }
  0x5f   : > { %494 = sbr.rel (%p491_p12) target bundleno = 674 (0x2a2), region = 78 }
  0x66   : > { %v542_v0 = vld [vmem:[%s2138_s1] sm:$0xff]  ;;  %v543_v1 = vld [vmem:[%s2138_s1 + $0x8] sm:$0xff]  ;;  %vm551_vm0 = vcmask 130048   ;;  %v540_v4 = vld [vmem:[%s2137_s0 + $0x10] sm:$0xff]  ;;  %s1391_s23 = smov 1   ;;  %v1392_v16 = vmov 1  }
  0x67   : > { %v538_v2 = vld [vmem:[%s2137_s0] sm:$0xff]  ;;  %v1259_v3 = vpack.c.bf16 %v543_v1, %v542_v0  ;;  %1256 = vmatprep.mubr.msk.f32.mxu1 %vm551_vm0, %v540_v4  ;;  %v539_v5 = vld [vmem:[%s2137_s0 + $0x8] sm:$0xff]  ;;  %v541_v6 = vld [vmem:[%s2137_s0 + $0x18] sm:$0xff]  ;;  %1310 = vset.pattern.permute.xlu0 %v1392_v16  ;;  %s497_s25 = sand.u32 1, %s1381_s19   ;;  %s1242_s8 = sshll.u32 %s1216_s22, 11 }
  0x68   : > { %1253 = vmatprep.mubr.msk.f32.mxu0 %vm551_vm0, %v538_v2  ;;  %v1230_v7 = vld [vmem:[%s2139_s2] ss:$0 sm:$0xff]  ;;  %1309 = vset.pattern.permute.xlu1 %v1392_v16  ;;  %s1784_s26 = sshll.u32 %s497_s25, 9  ;;  %s2073_s11 = scalar_lea.hbm %s2142_s5, %s1242_s8 }
  0x69   : > { %1260 = vmatprep.subr.bf16.mxu0 %v1259_v3  ;;  %1263 = vmatprep.subr.bf16.mxu1 %v1259_v3  ;;  %s1787_s28 = scalar_lea.vmem [#allocation2], %s1784_s26  ;;  %s1874_s6 = scalar_lea.vmem [#allocation3], %s1784_s26 }
  0x6a   : > { %1262 = vmatpush3.bf16.msra.mxu0 %v1259_v3  ;;  %1264 = vmatpush3.bf16.msra.mxu1 %v1259_v3  ;;  %v705_v45 = vld [vmem:[%s1787_s28 + $0x80] sm:$0xff]  ;;  %v706_v46 = vld [vmem:[%s1787_s28 + $0x88] sm:$0xff]  ;;  %v707_v47 = vld [vmem:[%s1787_s28 + $0x90] sm:$0xff]  ;;  %s1900_s7 = scalar_lea.vmem [#allocation4], %s1784_s26  ;;  %s2095_s12 = scalar_lea.sflag [#allocation5], %s497_s25 }
  0x6b   : > { %v708_v48 = vld [vmem:[%s1787_s28 + $0x98] sm:$0xff]  ;;  %v737_v49 = vld [vmem:[%s1787_s28 + $0x180] sm:$0xff]  ;;  %v710_v51 = vld [vmem:[%s1787_s28 + $0xa8] sm:$0xff]  ;;  %s1131_s9 = sshll.u32 %s1900_s7, 4  ;;  %s1393_s14 = smov [#allocation4]   ;;  %s2079_s9 = int_to_ptr.vmem [resolvable:$true] %s1131_s9 }
  0x6c   : > { %v709_v50 = vld [vmem:[%s1787_s28 + $0xa0] sm:$0xff]  ;;  %v711_v52 = vld [vmem:[%s1787_s28 + $0xb0] sm:$0xff]  ;;  %v712_v53 = vld [vmem:[%s1787_s28 + $0xb8] sm:$0xff]  ;;  %s1327_s13 = scalar_lea.vmem %s2079_s9, 8192  ;;  %s1331_s15 = sshll.u32 %s1393_s14, 4  ;;  %s1332_s15 = int_to_ptr.vmem [resolvable:$false] %s1331_s15 }
  0x6d   : > { %1254 = vmatmul.mubr.msk.f32.vlgmr.msra.gmra.mrb[0].mxu0 %vm551_vm0, %v539_v5  ;;  %1257 = vmatmul.mubr.msk.f32.vlgmr.msra.gmra.mrb[0].mxu1 %vm551_vm0, %v541_v6  ;;  %v738_v54 = vld [vmem:[%s1787_s28 + $0x188] sm:$0xff]  ;;  %v739_v55 = vld [vmem:[%s1787_s28 + $0x190] sm:$0xff]  ;;  %v740_v56 = vld [vmem:[%s1787_s28 + $0x198] sm:$0xff]  ;;  %p1328_p13 = scmp.ne.s32.totalorder %s2079_s9, %s1327_s13  ;;  %s1333_s16 = scalar_lea.vmem %s1332_s15, 16384 }
  0x6e   : > { %v713_v57 = vld [vmem:[%s1787_s28 + $0xc0] sm:$0xff]  ;;  %v714_v58 = vld [vmem:[%s1787_s28 + $0xc8] sm:$0xff]  ;;  %v715_v59 = vld [vmem:[%s1787_s28 + $0xd0] sm:$0xff]  ;;  %p1334_p2 = scmp.lt.s32.totalorder %s2079_s9, %s1332_s15  ;;  %p1335_p3 = scmp.lt.s32.totalorder %s1333_s16, %s1327_s13 }
  0x6f   : > { %v716_v60 = vld [vmem:[%s1787_s28 + $0xd8] sm:$0xff]  ;;  %v717_v61 = vld [vmem:[%s1787_s28 + $0xe0] sm:$0xff]  ;;  %v718_v62 = vld [vmem:[%s1787_s28 + $0xe8] sm:$0xff]  ;;  %p1329_p0 = pnand %p1328_p13, %p1469_p6 }
  0x70   : > { %v719_v63 = vld [vmem:[%s1787_s28 + $0xf0] sm:$0xff]  ;;  %v720_v0 = vld [vmem:[%s1787_s28 + $0xf8] sm:$0xff]  ;;  %v689_v3 = vld [vmem:[%s1787_s28] sm:$0xff]  ;;  %p1336_p4 = por %p1335_p3, %p1334_p2 }
  0x71   : > { %v690_v4 = vld [vmem:[%s1787_s28 + $0x8] sm:$0xff]  ;;  %v691_v5 = vld [vmem:[%s1787_s28 + $0x10] sm:$0xff]  ;;  %v692_v6 = vld [vmem:[%s1787_s28 + $0x18] sm:$0xff]  ;;  %p1330_p1 = pneg %p1329_p0 }
  0x72   : > { %v694_v16 = vld [vmem:[%s1787_s28 + $0x28] sm:$0xff] }
  0x73   : > { %p1337_p5 = pnand %p1336_p4, %p1330_p1 }
 0x140   : > { %v1255_v8 = vpop.f32.mrb[0].mxu0  ;;  %v1258_v9 = vpop.f32.mrb[0].mxu1 }
 0x141   : > { %v630_v10 = vpop.f32.mrb[1].mxu0  ;;  %v640_v11 = vpop.f32.mrb[1].mxu1  ;;  %v636_v14 = vadd.f32 %v1255_v8, %v1230_v7  ;;  %v646_v15 = vadd.f32 %v1258_v9, %v1230_v7 }
 0x142   : > { %v631_v12 = vadd.f32 %v1230_v7, %v630_v10  ;;  %v641_v13 = vadd.f32 %v1230_v7, %v640_v11 }
 0x144   : > { %657 = vrot.lane.b32.xlu1 %v641_v13, %s1391_s23  ;;  %653 = vrot.lane.b32.xlu0 %v631_v12, %s1391_s23 }
 0x148   : > { %659 = vrot.lane.b32.xlu1 %v646_v15, %s1391_s23  ;;  %655 = vrot.lane.b32.xlu0 %v636_v14, %s1391_s23 }
 0x1b6   : > { %v658_v17 = vpop.permute.xlu1 %657  ;;  %v654_v18 = vpop.permute.xlu0 %653 }
 0x1b7   : > { %v667_v19 = vsub.f32 %v641_v13, %v658_v17  ;;  %v665_v20 = vsub.f32 %v631_v12, %v654_v18  ;;  %v695_v17 = vld [vmem:[%s1787_s28 + $0x30] sm:$0xff]  ;;  %v696_v18 = vld [vmem:[%s1787_s28 + $0x38] sm:$0xff] }
 0x1b9   : > { %v673_v21 = vmul.f32 1.442695, %v667_v19  ;;  %v669_v22 = vmul.f32 1.442695, %v665_v20 }
 0x1ba   : > { %v660_v23 = vpop.permute.xlu1 %659  ;;  %v656_v24 = vpop.permute.xlu0 %655 }
 0x1bb   : > { %v668_v25 = vsub.f32 %v646_v15, %v660_v23  ;;  %v666_v26 = vsub.f32 %v636_v14, %v656_v24  ;;  %1311 = vpow2.f32 %v673_v21  ;;  %v693_v15 = vld [vmem:[%s1787_s28 + $0x20] sm:$0xff]  ;;  %v698_v24 = vld [vmem:[%s1787_s28 + $0x48] sm:$0xff] }
 0x1bc   : > { %1313 = vpow2.f32 %v669_v22  ;;  %v697_v23 = vld [vmem:[%s1787_s28 + $0x40] sm:$0xff] }
 0x1bd   : > { %v675_v27 = vmul.f32 1.442695, %v668_v25  ;;  %v671_v28 = vmul.f32 1.442695, %v666_v26  ;;  %v699_v25 = vld [vmem:[%s1787_s28 + $0x50] sm:$0xff] }
 0x1bf   : > { %1315 = vpow2.f32 %v675_v27 }
 0x1c0   : > { %1317 = vpow2.f32 %v671_v28 }
 0x1c5   : > { %v1312_v29 = vpop.eup %1311 }
 0x1c6   : > { %v1314_v30 = vpop.eup %1313  ;;  %v679_v36 = vadd.f32 1.0, %v1312_v29 }
 0x1c7   : > { %v677_v35 = vadd.f32 1.0, %v1314_v30 }
 0x1c9   : > { %v1316_v31 = vpop.eup %1315 }
 0x1ca   : > { %v1318_v32 = vpop.eup %1317  ;;  %v680_v33 = vadd.f32 1.0, %v1316_v31  ;;  %v700_v31 = vld [vmem:[%s1787_s28 + $0x58] sm:$0xff] }
 0x1cb   : > { %v678_v34 = vadd.f32 1.0, %v1318_v32  ;;  %v701_v32 = vld [vmem:[%s1787_s28 + $0x60] sm:$0xff] }
 0x1cc   : > { %1319 = vrcp.f32 %v680_v33  ;;  %v702_v33 = vld [vmem:[%s1787_s28 + $0x68] sm:$0xff] }
 0x1cd   : > { %1321 = vrcp.f32 %v678_v34 }
 0x1ce   : > { %1323 = vrcp.f32 %v677_v35 }
 0x1cf   : > { %1325 = vrcp.f32 %v679_v36 }
 0x1d6   : > { %v1320_v37 = vpop.eup %1319 }
 0x1d7   : > { %v1322_v38 = vpop.eup %1321  ;;  %770 = vperm.xlu0 %1310, %v1320_v37   ;;  %v904_v43 = vsub.f32 1.0, %v1320_v37 }
 0x1d8   : > { %760 = vperm.xlu1 %1309, %v1322_v38   ;;  %v1324_v39 = vpop.eup %1323  ;;  %v902_v41 = vsub.f32 1.0, %v1322_v38 }
 0x1d9   : > { %v1326_v40 = vpop.eup %1325  ;;  %v901_v42 = vsub.f32 1.0, %v1324_v39 }
 0x1da   : > { %v903_v44 = vsub.f32 1.0, %v1326_v40 }
 0x1db   : > { %755 = vperm.xlu0 %1310, %v1324_v39   ;;  %v703_v39 = vld [vmem:[%s1787_s28 + $0x70] sm:$0xff] }
 0x1dc   : > { %765 = vperm.xlu1 %1309, %v1326_v40   ;;  %v704_v40 = vld [vmem:[%s1787_s28 + $0x78] sm:$0xff] }
 0x1df   : > { %912 = vperm.xlu0 %1310, %v902_v41   ;;  %v837_v41 = vld [vmem:[%s1874_s6] sm:$0xff] }
 0x1e0   : > { %907 = vperm.xlu1 %1309, %v901_v42  }
 0x1e3   : > { %922 = vperm.xlu0 %1310, %v904_v43  }
 0x1e4   : > { %917 = vperm.xlu1 %1309, %v903_v44  }
 0x256   : > { %v1809_v1 = vpop.permute.xlu0 %770 }
 0x257   : > { %2149 = vst [vmem:[#allocation7_spill] sm:$0xff] %v1809_v1  ;;  %v761_v2 = vpop.permute.xlu1 %760  ;;  %v1816_v7 = vmul.f32 %v1809_v1, %v737_v49  ;;  %v1819_v8 = vmul.f32 %v1809_v1, %v738_v54  ;;  %v1822_v9 = vmul.f32 %v1809_v1, %v739_v55  ;;  %v1825_v10 = vmul.f32 %v1809_v1, %v740_v56  ;;  %v842_v54 = vld [vmem:[%s1874_s6 + $0x28] sm:$0xff]  ;;  %v843_v55 = vld [vmem:[%s1874_s6 + $0x30] sm:$0xff] }
 0x258   : > { %v1827_v11 = vmul.f32 %v761_v2, %v705_v45  ;;  %v1829_v12 = vmul.f32 %v761_v2, %v706_v46  ;;  %v1831_v13 = vmul.f32 %v761_v2, %v707_v47  ;;  %v1833_v14 = vmul.f32 %v761_v2, %v708_v48  ;;  %v838_v46 = vld [vmem:[%s1874_s6 + $0x8] sm:$0xff]  ;;  %v839_v47 = vld [vmem:[%s1874_s6 + $0x10] sm:$0xff]  ;;  %v840_v48 = vld [vmem:[%s1874_s6 + $0x18] sm:$0xff] }
 0x259   : > { %2150 = vst [vmem:[#allocation8_spill] sm:$0xff] %v1816_v7  ;;  %2151 = vst [vmem:[#allocation9_spill] sm:$0xff] %v1819_v8  ;;  %v1839_v19 = vmul.f32 %v761_v2, %v709_v50  ;;  %v1841_v20 = vmul.f32 %v761_v2, %v710_v51  ;;  %v1843_v21 = vmul.f32 %v761_v2, %v711_v52 }
 0x25a   : > { %2152 = vst [vmem:[#allocation10_spill] sm:$0xff] %v1822_v9  ;;  %2153 = vst [vmem:[#allocation11_spill] sm:$0xff] %v1825_v10  ;;  %v1845_v22 = vmul.f32 %v761_v2, %v712_v53  ;;  %v1850_v26 = vmul.f32 %v761_v2, %v713_v57  ;;  %v1852_v27 = vmul.f32 %v761_v2, %v714_v58  ;;  %v756_v30 = vpop.permute.xlu0 %755  ;;  %v841_v53 = vld [vmem:[%s1874_s6 + $0x20] sm:$0xff] }
 0x25b   : > { %v1854_v28 = vmul.f32 %v761_v2, %v715_v59  ;;  %v1856_v29 = vmul.f32 %v761_v2, %v716_v60  ;;  %v1861_v34 = vmul.f32 %v761_v2, %v717_v61  ;;  %v1863_v35 = vmul.f32 %v761_v2, %v718_v62  ;;  %v1869_v38 = vpop.permute.xlu1 %765  ;;  %v844_v60 = vld [vmem:[%s1874_s6 + $0x38] sm:$0xff]  ;;  %v845_v61 = vld [vmem:[%s1874_s6 + $0x40] sm:$0xff]  ;;  %v846_v62 = vld [vmem:[%s1874_s6 + $0x48] sm:$0xff] }
 0x25c   : > { %v1865_v36 = vmul.f32 %v761_v2, %v719_v63  ;;  %v1867_v37 = vmul.f32 %v761_v2, %v720_v0  ;;  %2155 = vst [vmem:[#allocation13_spill] sm:$0xff] %v1869_v38  ;;  %v773_v42 = vmul.f32 %v756_v30, %v689_v3  ;;  %v774_v43 = vmul.f32 %v756_v30, %v690_v4 }
 0x25d   : > { %v775_v44 = vmul.f32 %v756_v30, %v691_v5  ;;  %v776_v45 = vmul.f32 %v756_v30, %v692_v6  ;;  %v777_v49 = vmul.f32 %v756_v30, %v693_v15  ;;  %v778_v50 = vmul.f32 %v756_v30, %v694_v16  ;;  %v847_v5 = vld [vmem:[%s1874_s6 + $0x50] sm:$0xff]  ;;  %v848_v6 = vld [vmem:[%s1874_s6 + $0x58] sm:$0xff]  ;;  %v849_v15 = vld [vmem:[%s1874_s6 + $0x60] sm:$0xff] }
 0x25e   : > { %2154 = vst [vmem:[#allocation12_spill] sm:$0xff] %v1867_v37  ;;  %v779_v51 = vmul.f32 %v756_v30, %v695_v17  ;;  %v780_v52 = vmul.f32 %v756_v30, %v696_v18  ;;  %v781_v56 = vmul.f32 %v756_v30, %v697_v23  ;;  %v782_v57 = vmul.f32 %v756_v30, %v698_v24  ;;  %v850_v16 = vld [vmem:[%s1874_s6 + $0x68] sm:$0xff]  ;;  %v851_v17 = vld [vmem:[%s1874_s6 + $0x70] sm:$0xff]  ;;  %v852_v18 = vld [vmem:[%s1874_s6 + $0x78] sm:$0xff] }
 0x25f   : > { %v783_v58 = vmul.f32 %v756_v30, %v699_v25  ;;  %v784_v59 = vmul.f32 %v756_v30, %v700_v31  ;;  %v785_v63 = vmul.f32 %v756_v30, %v701_v32  ;;  %v786_v0 = vmul.f32 %v756_v30, %v702_v33  ;;  %v908_v4 = vpop.permute.xlu1 %907  ;;  %v856_v37 = vld [vmem:[%s1874_s6 + $0x98] sm:$0xff] }
 0x260   : > { %v787_v2 = vmul.f32 %v756_v30, %v703_v39  ;;  %v788_v3 = vmul.f32 %v756_v30, %v704_v40  ;;  %v925_v23 = vmul.f32 %v908_v4, %v837_v41  ;;  %v926_v24 = vmul.f32 %v908_v4, %v838_v46  ;;  %v853_v46 = vld [vmem:[%s1874_s6 + $0x80] sm:$0xff] }
 0x261   : > { %v927_v10 = vmul.f32 %v908_v4, %v839_v47  ;;  %v928_v25 = vmul.f32 %v908_v4, %v840_v48  ;;  %v929_v31 = vmul.f32 %v908_v4, %v841_v53  ;;  %v930_v9 = vmul.f32 %v908_v4, %v842_v54 }
 0x262   : > { %v931_v8 = vmul.f32 %v908_v4, %v843_v55  ;;  %v932_v32 = vmul.f32 %v908_v4, %v844_v60  ;;  %v933_v30 = vmul.f32 %v908_v4, %v845_v61  ;;  %v934_v33 = vmul.f32 %v908_v4, %v846_v62  ;;  %v854_v55 = vld [vmem:[%s1874_s6 + $0x88] sm:$0xff]  ;;  %v855_v60 = vld [vmem:[%s1874_s6 + $0x90] sm:$0xff] }
 0x263   : > { %v935_v39 = vmul.f32 %v908_v4, %v847_v5  ;;  %v936_v40 = vmul.f32 %v908_v4, %v848_v6  ;;  %v937_v7 = vmul.f32 %v908_v4, %v849_v15  ;;  %v938_v1 = vmul.f32 %v908_v4, %v850_v16  ;;  %v913_v15 = vpop.permute.xlu0 %912  ;;  %v857_v16 = vld [vmem:[%s1874_s6 + $0xa0] sm:$0xff] }
 0x264   : > { %v939_v38 = vmul.f32 %v908_v4, %v851_v17  ;;  %v940_v41 = vmul.f32 %v908_v4, %v852_v18  ;;  %v989_v47 = vadd.f32 %v925_v23, %v773_v42  ;;  %v990_v48 = vadd.f32 %v926_v24, %v774_v43  ;;  %v858_v4 = vld [vmem:[%s1874_s6 + $0xa8] sm:$0xff]  ;;  %v859_v17 = vld [vmem:[%s1874_s6 + $0xb0] sm:$0xff] }
 0x265   : > { %v991_v53 = vadd.f32 %v927_v10, %v775_v44  ;;  %v992_v54 = vadd.f32 %v928_v25, %v776_v45  ;;  %v993_v61 = vadd.f32 %v929_v31, %v777_v49  ;;  %v994_v62 = vadd.f32 %v930_v9, %v778_v50  ;;  %v861_v9 = vld [vmem:[%s1874_s6 + $0xc0] sm:$0xff]  ;;  %v862_v44 = vld [vmem:[%s1874_s6 + $0xc8] sm:$0xff] }
 0x266   : > { %v995_v5 = vadd.f32 %v931_v8, %v779_v51  ;;  %v996_v6 = vadd.f32 %v932_v32, %v780_v52  ;;  %v997_v18 = vadd.f32 %v933_v30, %v781_v56  ;;  %v998_v42 = vadd.f32 %v934_v33, %v782_v57  ;;  %1053 = vst [vmem:[%s1900_s7] sm:$0xff] %v989_v47  ;;  %v860_v8 = vld [vmem:[%s1874_s6 + $0xb8] sm:$0xff]  ;;  %v863_v52 = vld [vmem:[%s1874_s6 + $0xd0] sm:$0xff]  ;;  %v865_v57 = vld [vmem:[%s1874_s6 + $0xe0] sm:$0xff] }
 0x267   : > { %v999_v43 = vadd.f32 %v935_v39, %v783_v58  ;;  %v1000_v10 = vadd.f32 %v936_v40, %v784_v59  ;;  %1054 = vst [vmem:[%s1900_s7 + $0x8] sm:$0xff] %v990_v48  ;;  %1055 = vst [vmem:[%s1900_s7 + $0x10] sm:$0xff] %v991_v53  ;;  %v1001_v45 = vadd.f32 %v937_v7, %v785_v63  ;;  %v864_v56 = vld [vmem:[%s1874_s6 + $0xd8] sm:$0xff]  ;;  %v866_v7 = vld [vmem:[%s1874_s6 + $0xe8] sm:$0xff] }
 0x268   : > { %1056 = vst [vmem:[%s1900_s7 + $0x18] sm:$0xff] %v992_v54  ;;  %v1002_v49 = vadd.f32 %v938_v1, %v786_v0  ;;  %v1003_v50 = vadd.f32 %v939_v38, %v787_v2  ;;  %v1004_v51 = vadd.f32 %v940_v41, %v788_v3  ;;  %1057 = vst [vmem:[%s1900_s7 + $0x20] sm:$0xff] %v993_v61  ;;  %v867_v1 = vld [vmem:[%s1874_s6 + $0xf0] sm:$0xff]  ;;  %v868_v58 = vld [vmem:[%s1874_s6 + $0xf8] sm:$0xff] }
 0x269   : > { %1058 = vst [vmem:[%s1900_s7 + $0x28] sm:$0xff] %v994_v62  ;;  %1059 = vst [vmem:[%s1900_s7 + $0x30] sm:$0xff] %v995_v5  ;;  %v941_v38 = vmul.f32 %v913_v15, %v853_v46  ;;  %v942_v59 = vmul.f32 %v913_v15, %v854_v55  ;;  %v943_v63 = vmul.f32 %v913_v15, %v855_v60  ;;  %v721_v41 = vld [vmem:[%s1787_s28 + $0x100] sm:$0xff]  ;;  %v722_v46 = vld [vmem:[%s1787_s28 + $0x108] sm:$0xff] }
 0x26a   : > { %1060 = vst [vmem:[%s1900_s7 + $0x38] sm:$0xff] %v996_v6  ;;  %1061 = vst [vmem:[%s1900_s7 + $0x40] sm:$0xff] %v997_v18  ;;  %v944_v0 = vmul.f32 %v913_v15, %v856_v37  ;;  %v945_v2 = vmul.f32 %v913_v15, %v857_v16  ;;  %v946_v3 = vmul.f32 %v913_v15, %v858_v4  ;;  %v723_v47 = vld [vmem:[%s1787_s28 + $0x110] sm:$0xff]  ;;  %v724_v48 = vld [vmem:[%s1787_s28 + $0x118] sm:$0xff] }
 0x26b   : > { %1062 = vst [vmem:[%s1900_s7 + $0x48] sm:$0xff] %v998_v42  ;;  %1063 = vst [vmem:[%s1900_s7 + $0x50] sm:$0xff] %v999_v43  ;;  %v947_v23 = vmul.f32 %v913_v15, %v859_v17  ;;  %v948_v24 = vmul.f32 %v913_v15, %v860_v8  ;;  %v949_v25 = vmul.f32 %v913_v15, %v861_v9  ;;  %v725_v61 = vld [vmem:[%s1787_s28 + $0x120] sm:$0xff]  ;;  %v726_v62 = vld [vmem:[%s1787_s28 + $0x128] sm:$0xff] }
 0x26c   : > { %1064 = vst [vmem:[%s1900_s7 + $0x58] sm:$0xff] %v1000_v10  ;;  %1065 = vst [vmem:[%s1900_s7 + $0x60] sm:$0xff] %v1001_v45  ;;  %v950_v31 = vmul.f32 %v913_v15, %v862_v44  ;;  %v951_v32 = vmul.f32 %v913_v15, %v863_v52  ;;  %v952_v30 = vmul.f32 %v913_v15, %v864_v56  ;;  %v727_v5 = vld [vmem:[%s1787_s28 + $0x130] sm:$0xff]  ;;  %v728_v6 = vld [vmem:[%s1787_s28 + $0x138] sm:$0xff]  ;;  %v918_v52 = vpop.permute.xlu1 %917 }
 0x26d   : > { %1066 = vst [vmem:[%s1900_s7 + $0x68] sm:$0xff] %v1002_v49  ;;  %1067 = vst [vmem:[%s1900_s7 + $0x70] sm:$0xff] %v1003_v50  ;;  %v953_v37 = vmul.f32 %v913_v15, %v865_v57  ;;  %v954_v33 = vmul.f32 %v913_v15, %v866_v7  ;;  %v955_v39 = vmul.f32 %v913_v15, %v867_v1  ;;  %v730_v16 = vld [vmem:[%s1787_s28 + $0x148] sm:$0xff]  ;;  %v731_v4 = vld [vmem:[%s1787_s28 + $0x150] sm:$0xff] }
 0x26e   : > { %1068 = vst [vmem:[%s1900_s7 + $0x78] sm:$0xff] %v1004_v51  ;;  %v956_v40 = vmul.f32 %v913_v15, %v868_v58  ;;  %v1005_v53 = vadd.f32 %v941_v38, %v1827_v11  ;;  %v1006_v54 = vadd.f32 %v942_v59, %v1829_v12  ;;  %v1007_v55 = vadd.f32 %v943_v63, %v1831_v13  ;;  %v2156_v42 = vld [vmem:[#allocation12_spill] sm:$0xff]  ;;  %v735_v10 = vld [vmem:[%s1787_s28 + $0x170] sm:$0xff]  ;;  %v736_v8 = vld [vmem:[%s1787_s28 + $0x178] sm:$0xff] }
 0x26f   : > { %v1008_v60 = vadd.f32 %v944_v0, %v1833_v14  ;;  %v1009_v15 = vadd.f32 %v945_v2, %v1839_v19  ;;  %v1010_v11 = vadd.f32 %v946_v3, %v1841_v20  ;;  %v1011_v12 = vadd.f32 %v947_v23, %v1843_v21  ;;  %v729_v14 = vld [vmem:[%s1787_s28 + $0x140] sm:$0xff]  ;;  %v732_v21 = vld [vmem:[%s1787_s28 + $0x158] sm:$0xff]  ;;  %v870_v49 = vld [vmem:[%s1874_s6 + $0x108] sm:$0xff] }
 0x270   : > { %v1012_v13 = vadd.f32 %v948_v24, %v1845_v22  ;;  %v1013_v17 = vadd.f32 %v949_v25, %v1850_v26  ;;  %v1014_v18 = vadd.f32 %v950_v31, %v1852_v27  ;;  %v1015_v19 = vadd.f32 %v951_v32, %v1854_v28  ;;  %1069 = vst [vmem:[%s1900_s7 + $0x80] sm:$0xff] %v1005_v53  ;;  %v733_v22 = vld [vmem:[%s1787_s28 + $0x160] sm:$0xff]  ;;  %v734_v26 = vld [vmem:[%s1787_s28 + $0x168] sm:$0xff]  ;;  %v871_v50 = vld [vmem:[%s1874_s6 + $0x110] sm:$0xff] }
 0x271   : > { %v1016_v20 = vadd.f32 %v952_v30, %v1856_v29  ;;  %1070 = vst [vmem:[%s1900_s7 + $0x88] sm:$0xff] %v1006_v54  ;;  %1071 = vst [vmem:[%s1900_s7 + $0x90] sm:$0xff] %v1007_v55  ;;  %v1017_v27 = vadd.f32 %v953_v37, %v1861_v34  ;;  %v1018_v28 = vadd.f32 %v954_v33, %v1863_v35  ;;  %v869_v34 = vld [vmem:[%s1874_s6 + $0x100] sm:$0xff]  ;;  %v2157_v35 = vld [vmem:[#allocation13_spill] sm:$0xff] }
 0x272   : > { %1072 = vst [vmem:[%s1900_s7 + $0x98] sm:$0xff] %v1008_v60  ;;  %v1019_v29 = vadd.f32 %v955_v39, %v1865_v36  ;;  %v1020_v43 = vadd.f32 %v956_v40, %v2156_v42  ;;  %1073 = vst [vmem:[%s1900_s7 + $0xa0] sm:$0xff] %v1009_v15  ;;  %v805_v36 = vmul.f32 %v2157_v35, %v721_v41  ;;  %v872_v51 = vld [vmem:[%s1874_s6 + $0x118] sm:$0xff]  ;;  %v873_v58 = vld [vmem:[%s1874_s6 + $0x120] sm:$0xff] }
 0x273   : > { %1074 = vst [vmem:[%s1900_s7 + $0xa8] sm:$0xff] %v1010_v11  ;;  %1075 = vst [vmem:[%s1900_s7 + $0xb0] sm:$0xff] %v1011_v12  ;;  %v806_v9 = vmul.f32 %v2157_v35, %v722_v46  ;;  %v807_v44 = vmul.f32 %v2157_v35, %v723_v47  ;;  %v808_v45 = vmul.f32 %v2157_v35, %v724_v48  ;;  %v874_v38 = vld [vmem:[%s1874_s6 + $0x128] sm:$0xff]  ;;  %v875_v59 = vld [vmem:[%s1874_s6 + $0x130] sm:$0xff] }
 0x274   : > { %1076 = vst [vmem:[%s1900_s7 + $0xb8] sm:$0xff] %v1012_v13  ;;  %1077 = vst [vmem:[%s1900_s7 + $0xc0] sm:$0xff] %v1013_v17  ;;  %v809_v56 = vmul.f32 %v2157_v35, %v725_v61  ;;  %v810_v57 = vmul.f32 %v2157_v35, %v726_v62  ;;  %v811_v7 = vmul.f32 %v2157_v35, %v727_v5  ;;  %v876_v23 = vld [vmem:[%s1874_s6 + $0x138] sm:$0xff]  ;;  %v877_v24 = vld [vmem:[%s1874_s6 + $0x140] sm:$0xff] }
 0x275   : > { %1078 = vst [vmem:[%s1900_s7 + $0xc8] sm:$0xff] %v1014_v18  ;;  %1079 = vst [vmem:[%s1900_s7 + $0xd0] sm:$0xff] %v1015_v19  ;;  %v812_v1 = vmul.f32 %v2157_v35, %v728_v6  ;;  %v813_v63 = vmul.f32 %v2157_v35, %v729_v14  ;;  %v814_v0 = vmul.f32 %v2157_v35, %v730_v16  ;;  %v878_v25 = vld [vmem:[%s1874_s6 + $0x148] sm:$0xff]  ;;  %v879_v33 = vld [vmem:[%s1874_s6 + $0x150] sm:$0xff] }
 0x276   : > { %1080 = vst [vmem:[%s1900_s7 + $0xd8] sm:$0xff] %v1016_v20  ;;  %1081 = vst [vmem:[%s1900_s7 + $0xe0] sm:$0xff] %v1017_v27  ;;  %v815_v2 = vmul.f32 %v2157_v35, %v731_v4  ;;  %v816_v3 = vmul.f32 %v2157_v35, %v732_v21  ;;  %v817_v31 = vmul.f32 %v2157_v35, %v733_v22  ;;  %v880_v39 = vld [vmem:[%s1874_s6 + $0x158] sm:$0xff]  ;;  %v881_v40 = vld [vmem:[%s1874_s6 + $0x160] sm:$0xff] }
 0x277   : > { %1082 = vst [vmem:[%s1900_s7 + $0xe8] sm:$0xff] %v1018_v28  ;;  %1083 = vst [vmem:[%s1900_s7 + $0xf0] sm:$0xff] %v1019_v29  ;;  %v818_v32 = vmul.f32 %v2157_v35, %v734_v26  ;;  %v819_v30 = vmul.f32 %v2157_v35, %v735_v10  ;;  %v820_v37 = vmul.f32 %v2157_v35, %v736_v8  ;;  %v882_v41 = vld [vmem:[%s1874_s6 + $0x168] sm:$0xff]  ;;  %v883_v46 = vld [vmem:[%s1874_s6 + $0x170] sm:$0xff] }
 0x278   : > { %1084 = vst [vmem:[%s1900_s7 + $0xf8] sm:$0xff] %v1020_v43  ;;  %v884_v47 = vld [vmem:[%s1874_s6 + $0x178] sm:$0xff]  ;;  %v957_v48 = vmul.f32 %v918_v52, %v869_v34  ;;  %v958_v53 = vmul.f32 %v918_v52, %v870_v49  ;;  %v959_v54 = vmul.f32 %v918_v52, %v871_v50  ;;  %v960_v55 = vmul.f32 %v918_v52, %v872_v51  ;;  %v741_v17 = vld [vmem:[%s1787_s28 + $0x1a0] sm:$0xff]  ;;  %v742_v18 = vld [vmem:[%s1787_s28 + $0x1a8] sm:$0xff] }
 0x279   : > { %v961_v60 = vmul.f32 %v918_v52, %v873_v58  ;;  %v962_v61 = vmul.f32 %v918_v52, %v874_v38  ;;  %v963_v62 = vmul.f32 %v918_v52, %v875_v59  ;;  %v964_v5 = vmul.f32 %v918_v52, %v876_v23  ;;  %v743_v19 = vld [vmem:[%s1787_s28 + $0x1b0] sm:$0xff]  ;;  %v744_v20 = vld [vmem:[%s1787_s28 + $0x1b8] sm:$0xff]  ;;  %v745_v28 = vld [vmem:[%s1787_s28 + $0x1c0] sm:$0xff] }
 0x27a   : > { %v965_v6 = vmul.f32 %v918_v52, %v877_v24  ;;  %v966_v15 = vmul.f32 %v918_v52, %v878_v25  ;;  %v967_v11 = vmul.f32 %v918_v52, %v879_v33  ;;  %v968_v12 = vmul.f32 %v918_v52, %v880_v39  ;;  %v746_v29 = vld [vmem:[%s1787_s28 + $0x1c8] sm:$0xff]  ;;  %v747_v42 = vld [vmem:[%s1787_s28 + $0x1d0] sm:$0xff]  ;;  %v748_v35 = vld [vmem:[%s1787_s28 + $0x1d8] sm:$0xff] }
 0x27b   : > { %v969_v13 = vmul.f32 %v918_v52, %v881_v40  ;;  %v970_v14 = vmul.f32 %v918_v52, %v882_v41  ;;  %v971_v16 = vmul.f32 %v918_v52, %v883_v46  ;;  %v972_v4 = vmul.f32 %v918_v52, %v884_v47  ;;  %v749_v49 = vld [vmem:[%s1787_s28 + $0x1e0] sm:$0xff]  ;;  %v751_v51 = vld [vmem:[%s1787_s28 + $0x1f0] sm:$0xff]  ;;  %v752_v52 = vld [vmem:[%s1787_s28 + $0x1f8] sm:$0xff] }
 0x27c   : > { %v1021_v21 = vadd.f32 %v957_v48, %v805_v36  ;;  %v1022_v22 = vadd.f32 %v958_v53, %v806_v9  ;;  %v1023_v26 = vadd.f32 %v959_v54, %v807_v44  ;;  %v1024_v27 = vadd.f32 %v960_v55, %v808_v45  ;;  %v750_v36 = vld [vmem:[%s1787_s28 + $0x1e8] sm:$0xff]  ;;  %v887_v59 = vld [vmem:[%s1874_s6 + $0x190] sm:$0xff]  ;;  %v892_v41 = vld [vmem:[%s1874_s6 + $0x1b8] sm:$0xff] }
 0x27d   : > { %v1025_v43 = vadd.f32 %v961_v60, %v809_v56  ;;  %v1026_v10 = vadd.f32 %v962_v61, %v810_v57  ;;  %v1027_v8 = vadd.f32 %v963_v62, %v811_v7  ;;  %v1028_v34 = vadd.f32 %v964_v5, %v812_v1  ;;  %v885_v56 = vld [vmem:[%s1874_s6 + $0x180] sm:$0xff]  ;;  %v886_v38 = vld [vmem:[%s1874_s6 + $0x188] sm:$0xff]  ;;  %v895_v60 = vld [vmem:[%s1874_s6 + $0x1d0] sm:$0xff] }
 0x27e   : > { %v1029_v9 = vadd.f32 %v965_v6, %v813_v63  ;;  %v1030_v44 = vadd.f32 %v966_v15, %v814_v0  ;;  %v1031_v45 = vadd.f32 %v967_v11, %v815_v2  ;;  %v1032_v50 = vadd.f32 %v968_v12, %v816_v3  ;;  %1085 = vst [vmem:[%s1900_s7 + $0x100] sm:$0xff] %v1021_v21  ;;  %v888_v63 = vld [vmem:[%s1874_s6 + $0x198] sm:$0xff]  ;;  %v923_v0 = vpop.permute.xlu0 %922  ;;  %v2158_v2 = vld [vmem:[#allocation7_spill] sm:$0xff]  ;;  %v894_v47 = vld [vmem:[%s1874_s6 + $0x1c8] sm:$0xff] }
 0x27f   : > { %1086 = vst [vmem:[%s1900_s7 + $0x108] sm:$0xff] %v1022_v22  ;;  %1087 = vst [vmem:[%s1900_s7 + $0x110] sm:$0xff] %v1023_v26  ;;  %v1033_v57 = vadd.f32 %v969_v13, %v817_v31  ;;  %v1034_v7 = vadd.f32 %v970_v14, %v818_v32  ;;  %v1035_v1 = vadd.f32 %v971_v16, %v819_v30  ;;  %v889_v31 = vld [vmem:[%s1874_s6 + $0x1a0] sm:$0xff]  ;;  %v890_v32 = vld [vmem:[%s1874_s6 + $0x1a8] sm:$0xff] }
 0x280   : > { %1088 = vst [vmem:[%s1900_s7 + $0x118] sm:$0xff] %v1024_v27  ;;  %v1036_v58 = vadd.f32 %v972_v4, %v820_v37  ;;  %1089 = vst [vmem:[%s1900_s7 + $0x120] sm:$0xff] %v1025_v43  ;;  %v825_v3 = vmul.f32 %v2158_v2, %v741_v17  ;;  %v826_v23 = vmul.f32 %v2158_v2, %v742_v18  ;;  %v891_v30 = vld [vmem:[%s1874_s6 + $0x1b0] sm:$0xff]  ;;  %v893_v46 = vld [vmem:[%s1874_s6 + $0x1c0] sm:$0xff] }
 0x281   : > { %1090 = vst [vmem:[%s1900_s7 + $0x128] sm:$0xff] %v1026_v10  ;;  %1091 = vst [vmem:[%s1900_s7 + $0x130] sm:$0xff] %v1027_v8  ;;  %v827_v24 = vmul.f32 %v2158_v2, %v743_v19  ;;  %v828_v25 = vmul.f32 %v2158_v2, %v744_v20  ;;  %v829_v37 = vmul.f32 %v2158_v2, %v745_v28  ;;  %v896_v61 = vld [vmem:[%s1874_s6 + $0x1d8] sm:$0xff]  ;;  %v897_v62 = vld [vmem:[%s1874_s6 + $0x1e0] sm:$0xff] }
 0x282   : > { %1092 = vst [vmem:[%s1900_s7 + $0x138] sm:$0xff] %v1028_v34  ;;  %1093 = vst [vmem:[%s1900_s7 + $0x140] sm:$0xff] %v1029_v9  ;;  %v830_v33 = vmul.f32 %v2158_v2, %v746_v29  ;;  %v831_v39 = vmul.f32 %v2158_v2, %v747_v42  ;;  %v832_v40 = vmul.f32 %v2158_v2, %v748_v35  ;;  %v898_v5 = vld [vmem:[%s1874_s6 + $0x1e8] sm:$0xff]  ;;  %v899_v6 = vld [vmem:[%s1874_s6 + $0x1f0] sm:$0xff] }
 0x283   : > { %1094 = vst [vmem:[%s1900_s7 + $0x148] sm:$0xff] %v1030_v44  ;;  %1095 = vst [vmem:[%s1900_s7 + $0x150] sm:$0xff] %v1031_v45  ;;  %v833_v48 = vmul.f32 %v2158_v2, %v749_v49  ;;  %v834_v53 = vmul.f32 %v2158_v2, %v750_v36  ;;  %v835_v54 = vmul.f32 %v2158_v2, %v751_v51  ;;  %v900_v15 = vld [vmem:[%s1874_s6 + $0x1f8] sm:$0xff]  ;;  %v2159_v42 = vld [vmem:[#allocation8_spill] sm:$0xff] }
 0x284   : > { %1096 = vst [vmem:[%s1900_s7 + $0x158] sm:$0xff] %v1032_v50  ;;  %1097 = vst [vmem:[%s1900_s7 + $0x160] sm:$0xff] %v1033_v57  ;;  %v836_v55 = vmul.f32 %v2158_v2, %v752_v52  ;;  %v973_v11 = vmul.f32 %v923_v0, %v885_v56  ;;  %v974_v12 = vmul.f32 %v923_v0, %v886_v38  ;;  %v2160_v10 = vld [vmem:[#allocation9_spill] sm:$0xff]  ;;  %v2161_v34 = vld [vmem:[#allocation10_spill] sm:$0xff] }
 0x285   : > { %1098 = vst [vmem:[%s1900_s7 + $0x168] sm:$0xff] %v1034_v7  ;;  %1099 = vst [vmem:[%s1900_s7 + $0x170] sm:$0xff] %v1035_v1  ;;  %v975_v13 = vmul.f32 %v923_v0, %v887_v59  ;;  %v976_v14 = vmul.f32 %v923_v0, %v888_v63  ;;  %v977_v16 = vmul.f32 %v923_v0, %v889_v31  ;;  %v2162_v49 = vld [vmem:[#allocation11_spill] sm:$0xff] }
 0x286   : > { %1100 = vst [vmem:[%s1900_s7 + $0x178] sm:$0xff] %v1036_v58  ;;  %v978_v4 = vmul.f32 %v923_v0, %v890_v32  ;;  %v979_v17 = vmul.f32 %v923_v0, %v891_v30  ;;  %v980_v18 = vmul.f32 %v923_v0, %v892_v41  ;;  %v981_v19 = vmul.f32 %v923_v0, %v893_v46 }
 0x287   : > { %v982_v20 = vmul.f32 %v923_v0, %v894_v47  ;;  %v983_v21 = vmul.f32 %v923_v0, %v895_v60  ;;  %v984_v22 = vmul.f32 %v923_v0, %v896_v61  ;;  %v985_v26 = vmul.f32 %v923_v0, %v897_v62 }
 0x288   : > { %v986_v27 = vmul.f32 %v923_v0, %v898_v5  ;;  %v987_v28 = vmul.f32 %v923_v0, %v899_v6  ;;  %v988_v29 = vmul.f32 %v923_v0, %v900_v15  ;;  %v1037_v43 = vadd.f32 %v973_v11, %v2159_v42 }
 0x289   : > { %v1038_v8 = vadd.f32 %v974_v12, %v2160_v10  ;;  %v1039_v35 = vadd.f32 %v975_v13, %v2161_v34  ;;  %v1040_v36 = vadd.f32 %v976_v14, %v2162_v49  ;;  %v1041_v9 = vadd.f32 %v977_v16, %v825_v3 }
 0x28a   : > { %v1042_v44 = vadd.f32 %v978_v4, %v826_v23  ;;  %v1043_v45 = vadd.f32 %v979_v17, %v827_v24  ;;  %v1044_v50 = vadd.f32 %v980_v18, %v828_v25  ;;  %v1045_v51 = vadd.f32 %v981_v19, %v829_v37  ;;  %1101 = vst [vmem:[%s1900_s7 + $0x180] sm:$0xff] %v1037_v43 }
 0x28b   : > { %v1046_v52 = vadd.f32 %v982_v20, %v830_v33  ;;  %v1047_v56 = vadd.f32 %v983_v21, %v831_v39  ;;  %v1048_v57 = vadd.f32 %v984_v22, %v832_v40  ;;  %1102 = vst [vmem:[%s1900_s7 + $0x188] sm:$0xff] %v1038_v8  ;;  %1103 = vst [vmem:[%s1900_s7 + $0x190] sm:$0xff] %v1039_v35 }
 0x28c   : > { %1104 = vst [vmem:[%s1900_s7 + $0x198] sm:$0xff] %v1040_v36  ;;  %v1049_v7 = vadd.f32 %v985_v26, %v833_v48  ;;  %v1050_v1 = vadd.f32 %v986_v27, %v834_v53  ;;  %v1051_v58 = vadd.f32 %v987_v28, %v835_v54  ;;  %v1052_v38 = vadd.f32 %v988_v29, %v836_v55 }
 0x28d   : > { %1105 = vst [vmem:[%s1900_s7 + $0x1a0] sm:$0xff] %v1041_v9  ;;  %1106 = vst [vmem:[%s1900_s7 + $0x1a8] sm:$0xff] %v1042_v44 }
 0x28e   : > { %1107 = vst [vmem:[%s1900_s7 + $0x1b0] sm:$0xff] %v1043_v45  ;;  %1108 = vst [vmem:[%s1900_s7 + $0x1b8] sm:$0xff] %v1044_v50 }
 0x28f   : > { %1109 = vst [vmem:[%s1900_s7 + $0x1c0] sm:$0xff] %v1045_v51  ;;  %1110 = vst [vmem:[%s1900_s7 + $0x1c8] sm:$0xff] %v1046_v52 }
 0x290   : > { %1111 = vst [vmem:[%s1900_s7 + $0x1d0] sm:$0xff] %v1047_v56  ;;  %1112 = vst [vmem:[%s1900_s7 + $0x1d8] sm:$0xff] %v1048_v57 }
 0x291   : > { %1113 = vst [vmem:[%s1900_s7 + $0x1e0] sm:$0xff] %v1049_v7  ;;  %1114 = vst [vmem:[%s1900_s7 + $0x1e8] sm:$0xff] %v1050_v1 }
 0x292   : > { %1115 = vst [vmem:[%s1900_s7 + $0x1f0] sm:$0xff] %v1051_v58  ;;  %1116 = vst [vmem:[%s1900_s7 + $0x1f8] sm:$0xff] %v1052_v38 }
 0x293   : > { %1340 = shalt.err (!%p1337_p5)
}
 0x294   : > { %s1341_s17 = scalar_lea.hbm %s2073_s11, 8192  ;;  %s1345_s26 = scalar_lea.hbm %s2142_s5, 16384 }
 0x295   : > { %p1342_p7 = scmp.ne.s32.totalorder %s2073_s11, %s1341_s17  ;;  %p1346_p12 = scmp.lt.u32.totalorder %s2073_s11, %s2142_s5 }
 0x296   : > { %p1347_p13 = scmp.lt.u32.totalorder %s1345_s26, %s1341_s17  ;;  %p1349_p1 = scmp.lt.u32.totalorder %s1341_s17, %s2073_s11 }
 0x297   : > { %p1343_p10 = pnand %p1342_p7, %p1469_p6 }
 0x298   : > { %p1348_p0 = por %p1347_p13, %p1346_p12 }
 0x299   : > { %p1344_p11 = pneg %p1343_p10 }
 0x29a   : > { %p1350_p2 = por %p1349_p1, %p1348_p0 }
 0x29c   : > { %p1351_p3 = pnand %p1350_p2, %p1344_p11 }
 0x29e   : > { %1354 = shalt.err (!%p1351_p3)
}
 0x29f   : > { %s1394_s7 = smov 2048   ;;  %s1395_s8 = smov 4096  }
 0x2a0   : > { %s1396_s22 = smov 128  }
 0x2a1   : > { %1265 = dma.vmem_to_hbm [thread:$0]  (%p1469_p6), %s2079_s9, 8192, %s2073_s11, %s2095_s12, %s1394_s7, %s1395_s8, %s1396_s22  }
 0x2a2 PF: > { %s1146_s10 = sand.u32 1, %s1377_s18   ;;  %p1268_p4 = pnand %p1219_p9, %p1473_p8 }
 0x2a3   : > { %s1147_s13 = scalar_lea.sflag [#allocation5], %s1146_s10 }
 0x2a4   : > { %1372 = dma.done.wait (!%p1268_p4), %s1147_s13, 8192  }
 0x2a5   : > { %1374 = vsyncadd (!%p1268_p4), %s1147_s13, 4294959104  ;;  %p15_p5 = scmp.ge.s32.totalorder %s1450_s24, 4   ;;  %s2163_s18 = smov %s1381_s19 }
 0x2a6   : > { %s2164_s19 = smov %s1385_s20  ;;  %s2165_s20 = smov %s1463_s27 }
 0x2a7   : > { %s2166_s21 = smov %s1450_s24  ;;  %17 = sbr.rel (!%p15_p5) target bundleno = 3 (0x3), region = 134 }
 0x2ae   :  { %1152 = vsyncpa [#allocation5], 1 }
 0x2af   :  { %1154 = vsyncpa [#allocation5 + $0x1], 1 }

</bundles_post_ra>
